<compile_context>
chip_gen: v5e
topology: v5e:2x2
jax: 0.10.0
libtpu: 0.0.40
codegen_flags: <defaults>
</compile_context>

<pallas_src>
import jax
import jax.numpy as jnp
from jax.experimental import pallas as pl
from jax.experimental.pallas import tpu as pltpu

EPS = 1e-6


def atthead_kernel(p_ref, x_ref, w1_ref, b1_ref, waf_ref, baf_ref, o_ref):
    # x_ref block: (Bb, C, F, T) — native NCHW layout, Bb batch elements.
    Bb, C, F, T = x_ref.shape
    K2 = waf_ref.shape[1]
    K = K2 // 2

    p = p_ref[0]                 # scalar read from SMEM (scalar path)
    inv_p = 1.0 / p

    # GeMFreq: clamp(min=eps).pow(p) -> mean over F -> pow(1/p)
    x = jnp.maximum(x_ref[...].astype(jnp.float32), EPS)     # (Bb, C, F, T)
    xp = jnp.exp(p * jnp.log(x))                              # x ** p   (x > 0)
    g = jnp.mean(xp, axis=2)                                  # (Bb, C, T)
    g = jnp.exp(inv_p * jnp.log(g))                           # ** (1/p) (g > 0)

    # Small in-VMEM transpose of the pooled slab, flatten rows for the MXU.
    gt = jnp.transpose(g, (0, 2, 1)).reshape(Bb * T, C)       # (Bb*T, C)

    # dense_layers: Linear(C -> A) + ReLU (dropouts = identity in eval).
    h = jnp.dot(gt, w1_ref[...], preferred_element_type=jnp.float32)
    h = jnp.maximum(h + b1_ref[...], 0.0)                     # (Bb*T, A)

    # attention + fix_scale fused: one (A, 2K) matmul, then split.
    af = jnp.dot(h, waf_ref[...], preferred_element_type=jnp.float32)
    af = (af + baf_ref[...]).reshape(Bb, T, K2)               # (Bb, T, 2K)
    att = jnp.tanh(af[:, :, :K])                              # (Bb, T, K)
    fs = af[:, :, K:]                                         # (Bb, T, K)

    # softmax over time, fused with the weighted sum:
    #   logits = sum_t fs * softmax(att) = sum_t(fs * e) / sum_t(e)
    m = jnp.max(att, axis=1, keepdims=True)                   # (Bb, 1, K)
    e = jnp.exp(att - m)                                      # (Bb, T, K)
    num = jnp.sum(fs * e, axis=1)                             # (Bb, K)
    den = jnp.sum(e, axis=1)                                  # (Bb, K)
    o_ref[...] = (num / den).astype(o_ref.dtype)              # single tiny divide


def att_head_forward(x_nchw, params, *, block_b=None):
    """x_nchw: (B, C, F, T) backbone feature map (NCHW). Returns logits (B, K)."""
    p, w1, b1, wa, ba, wf, bf = params
    B, C, F, T = x_nchw.shape
    A = w1.shape[1]
    K = wa.shape[1]

    if block_b is None:
        block_b = 8 if (B >= 8 and B % 8 == 0) else B
    assert B % block_b == 0, "B must be divisible by block_b"
    # (8,128) rule on the 2-D output block (block_b, K): sublane dim must be a
    # multiple of 8 or equal to the full batch dim.
    assert block_b == B or block_b % 8 == 0, "block_b must be 8-aligned or == B"

    # Fuse the two 1x1 convs (attention, fix_scale) into one weight/bias.
    waf = jnp.concatenate([wa, wf], axis=1)                   # (A, 2K)
    baf = jnp.concatenate([ba, bf], axis=0).reshape(1, 2 * K)
    b1_2 = b1.reshape(1, A)
    p_s = p.astype(jnp.float32)                               # (1,) -> SMEM

    grid_spec = pltpu.PrefetchScalarGridSpec(
        num_scalar_prefetch=0,
        grid=(B // block_b,),
        in_specs=[
            pl.BlockSpec(memory_space=pltpu.MemorySpace.SMEM),          # p
            pl.BlockSpec((block_b, C, F, T), lambda b: (b, 0, 0, 0)),   # x (NCHW)
            pl.BlockSpec((C, A), lambda b: (0, 0)),                     # w1
            pl.BlockSpec((1, A), lambda b: (0, 0)),                     # b1
            pl.BlockSpec((A, 2 * K), lambda b: (0, 0)),                 # waf
            pl.BlockSpec((1, 2 * K), lambda b: (0, 0)),                 # baf
        ],
        out_specs=pl.BlockSpec((block_b, K), lambda b: (b, 0)),
    )

    return pl.pallas_call(
        atthead_kernel,
        out_shape=jax.ShapeDtypeStruct((B, K), jnp.float32),
        grid_spec=grid_spec,
        compiler_params=pltpu.CompilerParams(
            dimension_semantics=("parallel",),
            vmem_limit_bytes=32 * 1024 * 1024,
        ),
    )(p_s, x_nchw, w1, b1_2, waf, baf)


def att_head_reference(x_nchw, params):
    """Pure-JAX reference mirroring the PyTorch forward (eval mode)."""
    p, w1, b1, wa, ba, wf, bf = params
    p = p[0]
    xp = jnp.maximum(x_nchw, EPS) ** p                    # (B, C, F, T)
    g = jnp.mean(xp, axis=2) ** (1.0 / p)                 # (B, C, T)
    g = jnp.transpose(g, (0, 2, 1))                       # (B, T, C)
    h = jnp.maximum(g @ w1 + b1, 0.0)                     # (B, T, A)
    att = jnp.tanh(h @ wa + ba)                           # (B, T, K)
    fs = h @ wf + bf                                      # (B, T, K)
    sm = jax.nn.softmax(att, axis=1)                      # softmax over time
    return jnp.sum(fs * sm, axis=1)                       # (B, K)


def make_params(key, in_chans, attn_length, num_classes, p_init=3.0):
    k1, k2, k3, k4, k5, k6 = jax.random.split(key, 6)
    scale = 0.05
    p = jnp.ones((1,), jnp.float32) * p_init
    w1 = jax.random.normal(k1, (in_chans, attn_length), jnp.float32) * scale
    b1 = jax.random.normal(k2, (attn_length,), jnp.float32) * scale
    wa = jax.random.normal(k3, (attn_length, num_classes), jnp.float32) * scale
    ba = jax.random.normal(k4, (num_classes,), jnp.float32) * scale
    wf = jax.random.normal(k5, (attn_length, num_classes), jnp.float32) * scale
    bf = jax.random.normal(k6, (num_classes,), jnp.float32) * scale
    return (p, w1, b1, wa, ba, wf, bf)


if __name__ == "__main__":
    # Small synthetic shapes: B=16 batches, C=32 backbone channels,
    # F=8 freq bins, T=16 time frames, attn_length=64, num_classes=8.
    # block_b=8 -> 2 grid steps, output block (8, K) is (8,128)-rule clean.
    B, C, F, T = 16, 32, 8, 16
    ATTN_LEN, NUM_CLASSES = 64, 8

    key = jax.random.PRNGKey(0)
    kx, kp = jax.random.split(key)
    # Backbone output stand-in (NCHW feature map), positive-ish activations.
    x = jax.random.uniform(kx, (B, C, F, T), jnp.float32, minval=0.0, maxval=1.0)
    params = make_params(kp, C, ATTN_LEN, NUM_CLASSES)

    logits = att_head_forward(x, params, block_b=8)
    logits = jax.block_until_ready(logits)

    ref = att_head_reference(x, params)
    assert logits.shape == (B, NUM_CLASSES)
    max_err = jnp.max(jnp.abs(logits - ref))
    assert jnp.allclose(logits, ref, atol=1e-4, rtol=1e-4), (
        f"mismatch: max abs err {max_err}")

    print("KERNEL_OK")
</pallas_src>

<mosaic_0001>
module attributes {stable_mosaic.version = 11 : i64} {
  func.func @atthead_kernel(%arg0: i32, %arg1: memref<1xf32, #tpu.memory_space<smem>>, %arg2: memref<8x32x8x16xf32, #tpu.memory_space<vmem>>, %arg3: memref<32x64xf32, #tpu.memory_space<vmem>>, %arg4: memref<1x64xf32, #tpu.memory_space<vmem>>, %arg5: memref<64x16xf32, #tpu.memory_space<vmem>>, %arg6: memref<1x16xf32, #tpu.memory_space<vmem>>, %arg7: memref<8x8xf32, #tpu.memory_space<vmem>>) attributes {dimension_semantics = [#tpu.dimension_semantics<parallel>], iteration_bounds = array<i64: 2>, scalar_prefetch = 0 : i64, scratch_operands = 0 : i64, tpu.core_type = #tpu.core_type<tc>, window_params = [{transform_indices = @transform_0, window_bounds = array<i64: 1>}, {transform_indices = @transform_1, window_bounds = array<i64: 8, 32, 8, 16>}, {pipeline_mode = #tpu.pipeline_mode<synchronous>, transform_indices = @transform_2, window_bounds = array<i64: 32, 64>}, {pipeline_mode = #tpu.pipeline_mode<synchronous>, transform_indices = @transform_3, window_bounds = array<i64: 1, 64>}, {pipeline_mode = #tpu.pipeline_mode<synchronous>, transform_indices = @transform_4, window_bounds = array<i64: 64, 16>}, {pipeline_mode = #tpu.pipeline_mode<synchronous>, transform_indices = @transform_5, window_bounds = array<i64: 1, 16>}, {transform_indices = @transform_6, window_bounds = array<i64: 8, 8>}]} {
    %c0 = arith.constant 0 : index
    %0 = memref.load %arg1[%c0] : memref<1xf32, #tpu.memory_space<smem>>
    %cst = arith.constant 1.000000e+00 : f32
    %1 = arith.divf %cst, %0 : f32
    %c0_0 = arith.constant 0 : index
    %c0_1 = arith.constant 0 : index
    %c0_2 = arith.constant 0 : index
    %c0_3 = arith.constant 0 : index
    %2 = vector.load %arg2[%c0_0, %c0_1, %c0_2, %c0_3] : memref<8x32x8x16xf32, #tpu.memory_space<vmem>>, vector<8x32x8x16xf32>
    %cst_4 = arith.constant 9.99999997E-7 : f32
    %3 = vector.broadcast %cst_4 : f32 to vector<8x32x8x16xf32>
    %4 = arith.maximumf %2, %3 : vector<8x32x8x16xf32>
    %5 = math.log %4 : vector<8x32x8x16xf32>
    %6 = vector.broadcast %0 : f32 to vector<8x32x8x16xf32>
    %7 = arith.mulf %6, %5 : vector<8x32x8x16xf32>
    %8 = math.exp %7 : vector<8x32x8x16xf32>
    %cst_5 = arith.constant dense<0.000000e+00> : vector<8x32x16xf32>
    %9 = vector.multi_reduction <add>, %8, %cst_5 [2] : vector<8x32x8x16xf32> to vector<8x32x16xf32>
    %cst_6 = arith.constant 8.000000e+00 : f32
    %10 = vector.broadcast %cst_6 : f32 to vector<8x32x16xf32>
    %11 = arith.divf %9, %10 : vector<8x32x16xf32>
    %12 = math.log %11 : vector<8x32x16xf32>
    %13 = vector.broadcast %1 : f32 to vector<8x32x16xf32>
    %14 = arith.mulf %13, %12 : vector<8x32x16xf32>
    %15 = math.exp %14 : vector<8x32x16xf32>
    %16 = tpu.transpose %15, [0, 2, 1] : vector<8x32x16xf32> -> vector<8x16x32xf32>
    %17 = vector.shape_cast %16 : vector<8x16x32xf32> to vector<128x32xf32>
    %c0_7 = arith.constant 0 : index
    %c0_8 = arith.constant 0 : index
    %18 = vector.load %arg3[%c0_7, %c0_8] : memref<32x64xf32, #tpu.memory_space<vmem>>, vector<32x64xf32>
    %cst_9 = arith.constant dense<0.000000e+00> : vector<128x64xf32>
    %19 = tpu.matmul %17, %18, %cst_9 {dimension_numbers = #tpu.dot_dimension_numbers<[1], [0], [0], [1], [0, 0, 1, 1], [], []>} : vector<128x32xf32>, vector<32x64xf32>, vector<128x64xf32> -> vector<128x64xf32>
    %c0_10 = arith.constant 0 : index
    %c0_11 = arith.constant 0 : index
    %20 = vector.load %arg4[%c0_10, %c0_11] : memref<1x64xf32, #tpu.memory_space<vmem>>, vector<1x64xf32>
    %21 = vector.broadcast %20 : vector<1x64xf32> to vector<128x64xf32>
    %22 = arith.addf %19, %21 : vector<128x64xf32>
    %cst_12 = arith.constant 0.000000e+00 : f32
    %23 = vector.broadcast %cst_12 : f32 to vector<128x64xf32>
    %24 = arith.maximumf %22, %23 : vector<128x64xf32>
    %c0_13 = arith.constant 0 : index
    %c0_14 = arith.constant 0 : index
    %25 = vector.load %arg5[%c0_13, %c0_14] : memref<64x16xf32, #tpu.memory_space<vmem>>, vector<64x16xf32>
    %cst_15 = arith.constant dense<0.000000e+00> : vector<128x16xf32>
    %26 = tpu.matmul %24, %25, %cst_15 {dimension_numbers = #tpu.dot_dimension_numbers<[1], [0], [0], [1], [0, 0, 1, 1], [], []>} : vector<128x64xf32>, vector<64x16xf32>, vector<128x16xf32> -> vector<128x16xf32>
    %c0_16 = arith.constant 0 : index
    %c0_17 = arith.constant 0 : index
    %27 = vector.load %arg6[%c0_16, %c0_17] : memref<1x16xf32, #tpu.memory_space<vmem>>, vector<1x16xf32>
    %28 = vector.broadcast %27 : vector<1x16xf32> to vector<128x16xf32>
    %29 = arith.addf %26, %28 : vector<128x16xf32>
    %30 = vector.shape_cast %29 : vector<128x16xf32> to vector<8x16x16xf32>
    %31 = vector.extract_strided_slice %30 {offsets = [0, 0, 0], sizes = [8, 16, 8], strides = [1, 1, 1]} : vector<8x16x16xf32> to vector<8x16x8xf32>
    %32 = math.tanh %31 : vector<8x16x8xf32>
    %33 = vector.extract_strided_slice %30 {offsets = [0, 0, 8], sizes = [8, 16, 8], strides = [1, 1, 1]} : vector<8x16x16xf32> to vector<8x16x8xf32>
    %cst_18 = arith.constant dense<0xFF800000> : vector<8x8xf32>
    %34 = vector.multi_reduction <maximumf>, %32, %cst_18 [1] : vector<8x16x8xf32> to vector<8x8xf32>
    %35 = vector.shape_cast %34 : vector<8x8xf32> to vector<8x1x8xf32>
    %36 = vector.broadcast %35 : vector<8x1x8xf32> to vector<8x16x8xf32>
    %37 = arith.subf %32, %36 : vector<8x16x8xf32>
    %38 = math.exp %37 : vector<8x16x8xf32>
    %39 = arith.mulf %33, %38 : vector<8x16x8xf32>
    %cst_19 = arith.constant dense<0.000000e+00> : vector<8x8xf32>
    %40 = vector.multi_reduction <add>, %39, %cst_19 [1] : vector<8x16x8xf32> to vector<8x8xf32>
    %cst_20 = arith.constant dense<0.000000e+00> : vector<8x8xf32>
    %41 = vector.multi_reduction <add>, %38, %cst_20 [1] : vector<8x16x8xf32> to vector<8x8xf32>
    %42 = arith.divf %40, %41 : vector<8x8xf32>
    %c0_21 = arith.constant 0 : index
    %c0_22 = arith.constant 0 : index
    %43 = vector.load %arg7[%c0_21, %c0_22] : memref<8x8xf32, #tpu.memory_space<vmem>>, vector<8x8xf32>
    tpu.vector_store %arg7[%c0_21, %c0_22], %42 {strides = array<i32>} : memref<8x8xf32, #tpu.memory_space<vmem>>, vector<8x8xf32>,
    return
  }
  func.func @transform_0(%arg0: i32) -> i32 {
    %c0_i32 = arith.constant 0 : i32
    %c0_i32_0 = arith.constant 0 : i32
    return %c0_i32 : i32
  }
  func.func @transform_1(%arg0: i32) -> (i32, i32, i32, i32) {
    %c0_i32 = arith.constant 0 : i32
    %c0_i32_0 = arith.constant 0 : i32
    %c0_i32_1 = arith.constant 0 : i32
    %c0_i32_2 = arith.constant 0 : i32
    return %arg0, %c0_i32, %c0_i32_0, %c0_i32_1 : i32, i32, i32, i32
  }
  func.func @transform_2(%arg0: i32) -> (i32, i32) {
    %c0_i32 = arith.constant 0 : i32
    %c0_i32_0 = arith.constant 0 : i32
    %c0_i32_1 = arith.constant 0 : i32
    return %c0_i32, %c0_i32_0 : i32, i32
  }
  func.func @transform_3(%arg0: i32) -> (i32, i32) {
    %c0_i32 = arith.constant 0 : i32
    %c0_i32_0 = arith.constant 0 : i32
    %c0_i32_1 = arith.constant 0 : i32
    return %c0_i32, %c0_i32_0 : i32, i32
  }
  func.func @transform_4(%arg0: i32) -> (i32, i32) {
    %c0_i32 = arith.constant 0 : i32
    %c0_i32_0 = arith.constant 0 : i32
    %c0_i32_1 = arith.constant 0 : i32
    return %c0_i32, %c0_i32_0 : i32, i32
  }
  func.func @transform_5(%arg0: i32) -> (i32, i32) {
    %c0_i32 = arith.constant 0 : i32
    %c0_i32_0 = arith.constant 0 : i32
    %c0_i32_1 = arith.constant 0 : i32
    return %c0_i32, %c0_i32_0 : i32, i32
  }
  func.func @transform_6(%arg0: i32) -> (i32, i32) {
    %c0_i32 = arith.constant 0 : i32
    %c0_i32_0 = arith.constant 0 : i32
    return %arg0, %c0_i32 : i32, i32
  }
}

</mosaic_0001>

<bundles_post_ra>
// kernel: tpu_custom_call.1
= control target key start
LH: loop header
LB: loop body
LE: loop exit
PB: predicated region body
PF: predicated region fallthrough
CT: control target
= control target key end

     0   :  { %s9288_s23 = smov 0   ;;  %s11337_s0 = inlined_call_operand.<no memory space> [shape: f32[1], index: 0, kind: input, shape index: {}]   ;;  %s11338_s1 = inlined_call_operand.vmem [shape: f32[16,32,8,16], index: 1, kind: input, shape index: {}]   ;;  %s11339_s2 = inlined_call_operand.vmem [shape: f32[32,64], index: 2, kind: input, shape index: {}]   ;;  %s11340_s3 = inlined_call_operand.vmem [shape: f32[1,64], index: 3, kind: input, shape index: {}]   ;;  %s11341_s4 = inlined_call_operand.vmem [shape: f32[64,16], index: 4, kind: input, shape index: {}]   ;;  %s11342_s5 = inlined_call_operand.vmem [shape: f32[1,16], index: 5, kind: input, shape index: {}]   ;;  %s11343_s6 = inlined_call_operand.vmem [shape: f32[16,8], index: 6, kind: output, shape index: {}]  }
   0x1   :  { %11 = sst [smem:[#allocation2]] %s11337_s0 }
   0x2 LB: > { %s9294_s24 = sadd.s32 4294967295, %s9245_s23   ;;  %p7039_p0 = scmp.ge.s32.totalorder %s9245_s23, 1  ;;  %s9245_s23 = sphi %s9288_s23, %s17_s23  }
   0x3   : > { %p215_p1 = scmp.lt.s32.totalorder %s9245_s23, 3 }
   0x5   : > { %p216_p2 = pnand %p7039_p0, %p215_p1 }
   0x6   : > { %s256_s25 = sld [smem:[#allocation2]] (!%p216_p2)  ;;  %s7040_s26 = sshll.u32 (!%p216_p2), %s9294_s24, 3 }
   0x7   : > { %219 = sbr.rel (%p216_p2) target bundleno = 2098 (0x832), region = 44  ;;  %p246_p3 = scmp.lt.s32.totalorder (!%p216_p2), %s7040_s26, 15 }
   0x8   : > { %s9248_s12 = smov (!%p216_p2), 8   ;;  %s9249_s13 = smov (!%p216_p2), 120  }
   0x9   : > { %p252_p4 = scmp.lt.s32.totalorder (!%p216_p2), %s9294_s24, 1 }
   0xc   : > { %s11363_s26 = smov (!%p246_p3, %s7040_s26), 15  ;;  %v9299_v0 = vstv %s256_s25  ;;  %v9247_v35 = vmov 8.0   ;;  %vm2066_vm4 = vcmask 130048   ;;  %vm5659_vm6 = vcmask 1041409   ;;  %s11365_s24 = smov (!%p252_p4, %s9294_s24), 1 }
   0xd   : > { %s7078_s0 = sshll.u32 %s11363_s26, 8  ;;  %7107 = vrcp.f32 %v9299_v0  ;;  %vm263_vm0 = vweird.f32 %v9299_v0  ;;  %v267_v21 = vand.u32 2147483647, %v9299_v0  ;;  %v269_v23 = vand.u32 2147483648, %v9299_v0  ;;  %s7043_s14 = sshll.u32 %s11365_s24, 3 }
   0xe   : > { %s9304_s29 = scalar_lea.vmem %s11338_s1, %s7078_s0  ;;  %vm5661_vm7 = vcmask 1042434   ;;  %vm5663_vm8 = vcmask 1043459   ;;  %vm5665_vm9 = vcmask 1044484   ;;  %vm5667_vm10 = vcmask 1045509   ;;  %s255_s17 = scalar_lea.vmem %s11343_s6, %s7043_s14 }
   0xf   : > { %v337_v1 = vld [vmem:[%s9304_s29 + $0x200] sm:$0xff]  ;;  %v338_v2 = vld [vmem:[%s9304_s29 + $0x208] sm:$0xff]  ;;  %v339_v3 = vld [vmem:[%s9304_s29 + $0x210] sm:$0xff]  ;;  %vm9322_vm2 = vcmp.eq.f32.partialorder %v267_v21, 8.507059e+37  ;;  %v270_v38 = vor.u32 1.1754944e-38, %v269_v23  ;;  %vm5669_vm11 = vcmask 1046534  }
  0x10   : > { %v340_v4 = vld [vmem:[%s9304_s29 + $0x218] sm:$0xff]  ;;  %v341_v5 = vld [vmem:[%s9304_s29 + $0x220] sm:$0xff]  ;;  %v342_v6 = vld [vmem:[%s9304_s29 + $0x228] sm:$0xff]  ;;  %v593_v7 = vmax.f32 %v337_v1, 1e-06  ;;  %vm5671_vm12 = vcmask 1047559  }
  0x11   : > { %v343_v8 = vld [vmem:[%s9304_s29 + $0x230] sm:$0xff]  ;;  %v344_v9 = vld [vmem:[%s9304_s29 + $0x238] sm:$0xff]  ;;  %v594_v10 = vmax.f32 %v338_v2, 1e-06  ;;  %v595_v11 = vmax.f32 %v339_v3, 1e-06 }
  0x12   : > { %v596_v12 = vmax.f32 %v340_v4, 1e-06  ;;  %v597_v13 = vmax.f32 %v341_v5, 1e-06  ;;  %7109 = vlog2.f32 %v593_v7  ;;  %v598_v14 = vmax.f32 %v342_v6, 1e-06 }
  0x13   : > { %7111 = vlog2.f32 %v594_v10  ;;  %v599_v15 = vmax.f32 %v343_v8, 1e-06  ;;  %v305_v16 = vld [vmem:[%s9304_s29 + $0x100] sm:$0xff]  ;;  %v7108_v17 = vpop.eup %7107  ;;  %v600_v18 = vmax.f32 %v344_v9, 1e-06  ;;  %v306_v19 = vld [vmem:[%s9304_s29 + $0x108] sm:$0xff] }
  0x14   : > { %7113 = vlog2.f32 %v595_v11  ;;  %v259_v20 = vmul.f32 %v7108_v17, %v9299_v0  ;;  %v307_v22 = vld [vmem:[%s9304_s29 + $0x110] sm:$0xff]  ;;  %v561_v24 = vmax.f32 %v305_v16, 1e-06  ;;  %vm264_vm1 = vweird.f32 %v7108_v17  ;;  %v308_v58 = vld [vmem:[%s9304_s29 + $0x118] sm:$0xff]  ;;  %v309_v63 = vld [vmem:[%s9304_s29 + $0x120] sm:$0xff] }
  0x15   : > { %7115 = vlog2.f32 %v596_v12  ;;  %v562_v27 = vmax.f32 %v306_v19, 1e-06  ;;  %v563_v30 = vmax.f32 %v307_v22, 1e-06  ;;  %vm9328_vm3 = vmor %vm263_vm0, %vm264_vm1  ;;  %v310_v6 = vld [vmem:[%s9304_s29 + $0x128] sm:$0xff]  ;;  %v311_v10 = vld [vmem:[%s9304_s29 + $0x130] sm:$0xff] }
  0x16   : > { %7117 = vlog2.f32 %v597_v13  ;;  %v260_v26 = vsub.f32 1.0, %v259_v20  ;;  %v9349_v11 = vld [vmem:[%s9304_s29 + $0x138] sm:$0xff]  ;;  %v564_v12 = vmax.f32 %v308_v58, 1e-06  ;;  %v567_v21 = vmax.f32 %v311_v10, 1e-06 }
  0x17   : > { %7119 = vlog2.f32 %v598_v14  ;;  %v568_v22 = vmax.f32 %v9349_v11, 1e-06  ;;  %vm6186_vm13 = vcmask 261120   ;;  %vm6328_vm14 = vcmask 523264  }
  0x18   : > { %v7110_v25 = vpop.eup %7109  ;;  %7121 = vlog2.f32 %v599_v15  ;;  %v261_v32 = vmul.f32 %v7108_v17, %v260_v26  ;;  %vm6458_vm15 = vcmask 64512   ;;  %vm6659_vm0 = vcmask 130112  }
  0x19   : > { %v7112_v28 = vpop.eup %7111  ;;  %v914_v29 = vmul.f32 0.6931472, %v7110_v25  ;;  %7123 = vlog2.f32 %v600_v18  ;;  %v566_v18 = vmax.f32 %v310_v6, 1e-06 }
  0x1a   : > { %v7114_v31 = vpop.eup %7113  ;;  %v916_v34 = vmul.f32 0.6931472, %v7112_v28  ;;  %7125 = vrcp.f32 %v9247_v35  ;;  %v262_v42 = vadd.f32 %v7108_v17, %v261_v32 }
  0x1b   : > { %v7116_v36 = vpop.eup %7115  ;;  %v918_v39 = vmul.f32 0.6931472, %v7114_v31  ;;  %v1362_v40 = vmul.f32 %v914_v29, %v9299_v0  ;;  %7127 = vlog2.f32 %v561_v24 }
  0x1c   : > { %v7118_v41 = vpop.eup %7117  ;;  %v920_v43 = vmul.f32 0.6931472, %v7116_v36  ;;  %v1363_v44 = vmul.f32 %v916_v34, %v9299_v0  ;;  %7129 = vlog2.f32 %v562_v27  ;;  %v266_v50 = vsel %vm9328_vm3, %v7108_v17, %v262_v42 }
  0x1d   : > { %v7120_v45 = vpop.eup %7119  ;;  %v922_v46 = vmul.f32 0.6931472, %v7118_v41  ;;  %v1364_v47 = vmul.f32 %v918_v39, %v9299_v0  ;;  %v1682_v48 = vmul.f32 1.442695, %v1362_v40  ;;  %7131 = vlog2.f32 %v563_v30 }
  0x1e   : > { %v7122_v49 = vpop.eup %7121  ;;  %v924_v51 = vmul.f32 0.6931472, %v7120_v45  ;;  %v1365_v52 = vmul.f32 %v920_v43, %v9299_v0  ;;  %v1684_v53 = vmul.f32 1.442695, %v1363_v44  ;;  %v271_v55 = vsel %vm9322_vm2, %v270_v38, %v266_v50 }
  0x1f   : > { %v7124_v54 = vpop.eup %7123  ;;  %v926_v56 = vmul.f32 0.6931472, %v7122_v49  ;;  %v1366_v57 = vmul.f32 %v922_v46, %v9299_v0  ;;  %7133 = vpow2.f32 %v1682_v48  ;;  %7091 = vpush %v271_v55  ;;  %v1686_v62 = vmul.f32 1.442695, %v1364_v47 }
  0x20   : > { %v7126_v59 = vpop.eup %7125  ;;  %v928_v60 = vmul.f32 0.6931472, %v7124_v54  ;;  %v1367_v61 = vmul.f32 %v924_v51, %v9299_v0  ;;  %7135 = vpow2.f32 %v1684_v53  ;;  %v1688_v3 = vmul.f32 1.442695, %v1365_v52 }
  0x21   : > { %v7128_v1 = vpop.eup %7127  ;;  %v1368_v2 = vmul.f32 %v926_v56, %v9299_v0  ;;  %v1690_v4 = vmul.f32 1.442695, %v1366_v57  ;;  %v3860_v5 = vmul.f32 8.0, %v7126_v59  ;;  %7137 = vpow2.f32 %v1686_v62 }
  0x22   : > { %v7130_v7 = vpop.eup %7129  ;;  %v1369_v8 = vmul.f32 %v928_v60, %v9299_v0  ;;  %v1692_v9 = vmul.f32 1.442695, %v1367_v61  ;;  %7139 = vpow2.f32 %v1688_v3  ;;  %v565_v17 = vmax.f32 %v309_v63, 1e-06 }
  0x23   : > { %v7132_v13 = vpop.eup %7131  ;;  %v1694_v14 = vmul.f32 1.442695, %v1368_v2  ;;  %v3861_v15 = vsub.f32 1.0, %v3860_v5  ;;  %7141 = vpow2.f32 %v1690_v4  ;;  %vm3864_vm5 = vweird.f32 %v7126_v59 }
  0x24   : > { %v1696_v16 = vmul.f32 1.442695, %v1369_v8  ;;  %7143 = vpow2.f32 %v1692_v9  ;;  %v9353_v25 = vmul.f32 0.6931472, %v7128_v1  ;;  %v9356_v31 = vmul.f32 0.6931472, %v7130_v7 }
  0x25   : > { %v7134_v19 = vpop.eup %7133  ;;  %v3862_v20 = vmul.f32 %v7126_v59, %v3861_v15  ;;  %7145 = vpow2.f32 %v1694_v14  ;;  %v9358_v32 = vmul.f32 0.6931472, %v7132_v13 }
  0x26   : > { %v7136_v23 = vpop.eup %7135  ;;  %v2515_v24 = vsel %vm2066_vm4, %v7134_v19, 0.0  ;;  %7147 = vpow2.f32 %v1696_v16 }
  0x27   : > { %v2516_v26 = vrot.slane %v2515_v24, 4  ;;  %v2522_v27 = vsel %vm2066_vm4, %v7136_v23, 0.0  ;;  %v3863_v28 = vadd.f32 %v7126_v59, %v3862_v20  ;;  %v7138_v29 = vpop.eup %7137  ;;  %7149 = vlog2.f32 %v564_v12 }
  0x28   : > { %v2523_v30 = vrot.slane %v2522_v27, 4  ;;  %v7140_v33 = vpop.eup %7139  ;;  %v2529_v35 = vsel %vm2066_vm4, %v7138_v29, 0.0  ;;  %7151 = vlog2.f32 %v565_v17 }
  0x29   : > { %v2517_v34 = vadd.f32 %v2516_v26, %v2515_v24  ;;  %v9361_v36 = vsel %vm3864_vm5, %v7126_v59, %v3863_v28  ;;  %v7142_v37 = vpop.eup %7141  ;;  %v2530_v39 = vrot.slane %v2529_v35, 4  ;;  %v2536_v40 = vsel %vm2066_vm4, %v7140_v33, 0.0 }
  0x2a   : > { %v2524_v38 = vadd.f32 %v2523_v30, %v2522_v27  ;;  %7153 = vlog2.f32 %v566_v18  ;;  %v7144_v41 = vpop.eup %7143  ;;  %v2537_v43 = vrot.slane %v2536_v40, 4  ;;  %v2543_v44 = vsel %vm2066_vm4, %v7142_v37, 0.0 }
  0x2b   : > { %v2518_v42 = vrot.slane %v2517_v34, 2  ;;  %7155 = vlog2.f32 %v567_v21  ;;  %v7146_v45 = vpop.eup %7145  ;;  %v2531_v47 = vadd.f32 %v2530_v39, %v2529_v35  ;;  %v2544_v48 = vrot.slane %v2543_v44, 4 }
  0x2c   : > { %v2525_v46 = vrot.slane %v2524_v38, 2  ;;  %v2550_v49 = vsel %vm2066_vm4, %v7144_v41, 0.0  ;;  %v7148_v50 = vpop.eup %7147  ;;  %v2538_v52 = vadd.f32 %v2537_v43, %v2536_v40  ;;  %v2557_v54 = vsel %vm2066_vm4, %v7146_v45, 0.0 }
  0x2d   : > { %v2519_v51 = vadd.f32 %v2518_v42, %v2517_v34  ;;  %v2551_v53 = vrot.slane %v2550_v49, 4  ;;  %v7150_v55 = vpop.eup %7149  ;;  %v2532_v57 = vrot.slane %v2531_v47, 2  ;;  %v2545_v58 = vadd.f32 %v2544_v48, %v2543_v44 }
  0x2e   : > { %v2526_v56 = vadd.f32 %v2525_v46, %v2524_v38  ;;  %v2558_v59 = vrot.slane %v2557_v54, 4  ;;  %v7152_v60 = vpop.eup %7151  ;;  %v2539_v62 = vrot.slane %v2538_v52, 2  ;;  %v2564_v1 = vsel %vm2066_vm4, %v7148_v50, 0.0 }
  0x2f   : > { %v2520_v61 = vrot.slane %v2519_v51, 1  ;;  %v2552_v63 = vadd.f32 %v2551_v53, %v2550_v49  ;;  %v2533_v4 = vadd.f32 %v2532_v57, %v2531_v47  ;;  %v2546_v5 = vrot.slane %v2545_v58, 2 }
  0x30   : > { %v7154_v2 = vpop.eup %7153  ;;  %v2527_v3 = vrot.slane %v2526_v56, 1  ;;  %v2559_v6 = vadd.f32 %v2558_v59, %v2557_v54  ;;  %v2540_v9 = vadd.f32 %v2539_v62, %v2538_v52  ;;  %v2565_v12 = vrot.slane %v2564_v1, 4 }
  0x31   : > { %v7156_v7 = vpop.eup %7155  ;;  %v2521_v8 = vadd.f32 %v2520_v61, %v2519_v51  ;;  %v2553_v10 = vrot.slane %v2552_v63, 2  ;;  %v2534_v14 = vrot.slane %v2533_v4, 1  ;;  %v2547_v15 = vadd.f32 %v2546_v5, %v2545_v58  ;;  %v273_v61 = vld [vmem:[%s9304_s29] sm:$0xff]  ;;  %v275_v5 = vld [vmem:[%s9304_s29 + $0x10] sm:$0xff] }
  0x32   : > { %v2528_v13 = vadd.f32 %v2527_v3, %v2526_v56  ;;  %v2560_v16 = vrot.slane %v2559_v6, 2  ;;  %v2541_v17 = vrot.slane %v2540_v9, 1  ;;  %v2566_v19 = vadd.f32 %v2565_v12, %v2564_v1 }
  0x33   : > { %v2554_v18 = vadd.f32 %v2553_v10, %v2552_v63  ;;  %v3930_v20 = vmul.f32 %v9361_v36, %v2521_v8  ;;  %v2535_v21 = vadd.f32 %v2534_v14, %v2533_v4  ;;  %v2548_v23 = vrot.slane %v2547_v15, 1  ;;  %v274_v63 = vld [vmem:[%s9304_s29 + $0x8] sm:$0xff] }
  0x34   : > { %v2561_v24 = vadd.f32 %v2560_v16, %v2559_v6  ;;  %v3931_v26 = vmul.f32 %v9361_v36, %v2528_v13  ;;  %v2542_v27 = vadd.f32 %v2541_v17, %v2540_v9  ;;  %v2567_v29 = vrot.slane %v2566_v19, 2  ;;  %v9392_v6 = vld [vmem:[%s9304_s29 + $0x18] sm:$0xff] }
  0x35   : > { %v2555_v28 = vrot.slane %v2554_v18, 1  ;;  %v1330_v30 = vmul.f32 %v9353_v25, %v9299_v0  ;;  %v2549_v33 = vadd.f32 %v2548_v23, %v2547_v15  ;;  %v3932_v35 = vmul.f32 %v9361_v36, %v2535_v21 }
  0x36   : > { %v2562_v34 = vrot.slane %v2561_v24, 1  ;;  %v1331_v37 = vmul.f32 %v9356_v31, %v9299_v0  ;;  %v2568_v39 = vadd.f32 %v2567_v29, %v2566_v19  ;;  %v3933_v40 = vmul.f32 %v9361_v36, %v2542_v27 }
  0x37   : > { %v2556_v38 = vadd.f32 %v2555_v28, %v2554_v18  ;;  %7157 = vlog2.f32 %v3930_v20  ;;  %v3934_v42 = vmul.f32 %v9361_v36, %v2549_v33  ;;  %v856_v43 = vmul.f32 0.6931472, %v7150_v55 }
  0x38   : > { %v2563_v41 = vadd.f32 %v2562_v34, %v2561_v24  ;;  %7159 = vlog2.f32 %v3931_v26  ;;  %v2569_v44 = vrot.slane %v2568_v39, 1  ;;  %v858_v45 = vmul.f32 0.6931472, %v7152_v60 }
  0x39   : > { %v3935_v25 = vmul.f32 %v9361_v36, %v2556_v38  ;;  %7161 = vlog2.f32 %v3932_v35  ;;  %v860_v47 = vmul.f32 0.6931472, %v7154_v2  ;;  %v862_v31 = vmul.f32 0.6931472, %v7156_v7 }
  0x3a   : > { %v3936_v46 = vmul.f32 %v9361_v36, %v2563_v41  ;;  %7163 = vlog2.f32 %v3933_v40  ;;  %v2570_v48 = vadd.f32 %v2569_v44, %v2568_v39  ;;  %v1332_v49 = vmul.f32 %v9358_v32, %v9299_v0 }
  0x3b   : > { %7165 = vlog2.f32 %v3934_v42  ;;  %v1333_v50 = vmul.f32 %v856_v43, %v9299_v0  ;;  %v1618_v51 = vmul.f32 1.442695, %v1330_v30  ;;  %v1334_v54 = vmul.f32 %v858_v45, %v9299_v0 }
  0x3c   : > { %7167 = vlog2.f32 %v3935_v25  ;;  %v3937_v53 = vmul.f32 %v9361_v36, %v2570_v48  ;;  %v1620_v55 = vmul.f32 1.442695, %v1331_v37  ;;  %v1335_v57 = vmul.f32 %v860_v47, %v9299_v0 }
  0x3d   : > { %v7158_v52 = vpop.eup %7157  ;;  %7169 = vlog2.f32 %v568_v22  ;;  %v1336_v32 = vmul.f32 %v862_v31, %v9299_v0  ;;  %v1622_v60 = vmul.f32 1.442695, %v1332_v49  ;;  %v1624_v22 = vmul.f32 1.442695, %v1333_v50 }
  0x3e   : > { %v7160_v56 = vpop.eup %7159  ;;  %7171 = vlog2.f32 %v3936_v46  ;;  %v1626_v62 = vmul.f32 1.442695, %v1334_v54  ;;  %v1628_v2 = vmul.f32 1.442695, %v1335_v57  ;;  %v529_v7 = vmax.f32 %v273_v61, 1e-06 }
  0x3f   : > { %v7162_v58 = vpop.eup %7161  ;;  %7173 = vlog2.f32 %v3937_v53  ;;  %v1630_v3 = vmul.f32 1.442695, %v1336_v32  ;;  %v9394_v9 = vmul.f32 0.6931472, %v7158_v52  ;;  %v530_v12 = vmax.f32 %v274_v63, 1e-06 }
  0x40   : > { %v7164_v59 = vpop.eup %7163  ;;  %7175 = vpow2.f32 %v1618_v51  ;;  %v9396_v14 = vmul.f32 0.6931472, %v7160_v56  ;;  %v9398_v15 = vmul.f32 0.6931472, %v7162_v58  ;;  %v531_v26 = vmax.f32 %v275_v5, 1e-06 }
  0x41   : > { %v7166_v11 = vpop.eup %7165  ;;  %7177 = vpow2.f32 %v1620_v55  ;;  %v9400_v16 = vmul.f32 0.6931472, %v7164_v59  ;;  %v532_v33 = vmax.f32 %v9392_v6, 1e-06 }
  0x42   : > { %v7168_v1 = vpop.eup %7167  ;;  %7179 = vpow2.f32 %v1622_v60  ;;  %v9402_v18 = vmul.f32 0.6931472, %v7166_v11 }
  0x43   : > { %v7170_v4 = vpop.eup %7169  ;;  %7181 = vpow2.f32 %v1624_v22  ;;  %v9404_v19 = vmul.f32 0.6931472, %v7168_v1 }
  0x44   : > { %v7172_v8 = vpop.eup %7171  ;;  %v864_v10 = vmul.f32 0.6931472, %v7170_v4  ;;  %7183 = vpow2.f32 %v1626_v62 }
  0x45   : > { %v7174_v13 = vpop.eup %7173  ;;  %7185 = vpow2.f32 %v1628_v2  ;;  %v4263_v23 = vmul.f32 0.6931472, %v7172_v8 }
  0x46   : > { %v7176_v17 = vpop.eup %7175  ;;  %v1337_v20 = vmul.f32 %v864_v10, %v9299_v0  ;;  %7187 = vpow2.f32 %v1630_v3  ;;  %v4265_v35 = vmul.f32 0.6931472, %v7174_v13 }
  0x47   : > { %v7178_v21 = vpop.eup %7177  ;;  %v2291_v24 = vsel %vm2066_vm4, %v7176_v17, 0.0  ;;  %7189 = vlog2.f32 %v529_v7 }
  0x48   : > { %v7180_v27 = vpop.eup %7179  ;;  %v1632_v28 = vmul.f32 1.442695, %v1337_v20  ;;  %v2292_v29 = vrot.slane %v2291_v24, 4  ;;  %v2298_v30 = vsel %vm2066_vm4, %v7178_v21, 0.0 }
  0x49   : > { %v7182_v34 = vpop.eup %7181  ;;  %v2299_v37 = vrot.slane %v2298_v30, 4  ;;  %v2305_v38 = vsel %vm2066_vm4, %v7180_v27, 0.0 }
  0x4a   : > { %v7184_v39 = vpop.eup %7183  ;;  %7191 = vpow2.f32 %v1632_v28  ;;  %v2293_v40 = vadd.f32 %v2292_v29, %v2291_v24  ;;  %v2306_v41 = vrot.slane %v2305_v38, 4  ;;  %v2312_v42 = vsel %vm2066_vm4, %v7182_v34, 0.0 }
  0x4b   : > { %v7186_v43 = vpop.eup %7185  ;;  %v2300_v44 = vadd.f32 %v2299_v37, %v2298_v30  ;;  %v2313_v25 = vrot.slane %v2312_v42, 4  ;;  %v2319_v45 = vsel %vm2066_vm4, %v7184_v39, 0.0  ;;  %7193 = vlog2.f32 %v530_v12  ;;  %v9439_v39 = vld [vmem:[%s9304_s29 + $0x20] sm:$0xff] }
  0x4c   : > { %v7188_v46 = vpop.eup %7187  ;;  %v2294_v47 = vrot.slane %v2293_v40, 2  ;;  %v2307_v31 = vadd.f32 %v2306_v41, %v2305_v38  ;;  %v2320_v48 = vrot.slane %v2319_v45, 4  ;;  %v2326_v49 = vsel %vm2066_vm4, %v7186_v43, 0.0 }
  0x4d   : > { %v2301_v50 = vrot.slane %v2300_v44, 2  ;;  %v2314_v51 = vadd.f32 %v2313_v25, %v2312_v42  ;;  %v2327_v52 = vrot.slane %v2326_v49, 4  ;;  %v2333_v53 = vsel %vm2066_vm4, %v7188_v46, 0.0  ;;  %v9415_v32 = vpop.eup %7189 }
  0x4e   : > { %v2295_v54 = vadd.f32 %v2294_v47, %v2293_v40  ;;  %v2308_v55 = vrot.slane %v2307_v31, 2  ;;  %v2321_v56 = vadd.f32 %v2320_v48, %v2319_v45  ;;  %v2334_v57 = vrot.slane %v2333_v53, 4 }
  0x4f   : > { %v2302_v58 = vadd.f32 %v2301_v50, %v2300_v44  ;;  %v2315_v59 = vrot.slane %v2314_v51, 2  ;;  %v2328_v60 = vadd.f32 %v2327_v52, %v2326_v49  ;;  %7195 = vlog2.f32 %v531_v26 }
  0x50   : > { %v7192_v61 = vpop.eup %7191  ;;  %v2296_v11 = vrot.slane %v2295_v54, 1  ;;  %v2309_v22 = vadd.f32 %v2308_v55, %v2307_v31  ;;  %v2322_v62 = vrot.slane %v2321_v56, 2  ;;  %7197 = vlog2.f32 %v532_v33  ;;  %s7092_s30 = spop %7091 }
  0x51   : > { %v9417_v63 = vpop.eup %7193  ;;  %v2303_v1 = vrot.slane %v2302_v58, 1  ;;  %v2316_v2 = vadd.f32 %v2315_v59, %v2314_v51  ;;  %v2329_v3 = vrot.slane %v2328_v60, 2  ;;  %v2335_v4 = vadd.f32 %v2334_v57, %v2333_v53 }
  0x52   : > { %v9419_v5 = vstv %s7092_s30  ;;  %v2297_v6 = vadd.f32 %v2296_v11, %v2295_v54  ;;  %v2310_v7 = vrot.slane %v2309_v22, 1  ;;  %v2340_v8 = vsel %vm2066_vm4, %v7192_v61, 0.0  ;;  %v278_v61 = vld [vmem:[%s9304_s29 + $0x28] sm:$0xff] }
  0x53   : > { %v4699_v10 = vmul.f32 %v9419_v5, %v9394_v9  ;;  %v4700_v12 = vmul.f32 %v9419_v5, %v9396_v14  ;;  %v4701_v13 = vmul.f32 %v9419_v5, %v9398_v15  ;;  %v4702_v17 = vmul.f32 %v9419_v5, %v9400_v16 }
  0x54   : > { %v4703_v20 = vmul.f32 %v9419_v5, %v9402_v18  ;;  %v4704_v21 = vmul.f32 %v9419_v5, %v9404_v19  ;;  %v4705_v24 = vmul.f32 %v9419_v5, %v4263_v23  ;;  %v2323_v26 = vadd.f32 %v2322_v62, %v2321_v56 }
  0x55   : > { %v7196_v9 = vpop.eup %7195  ;;  %v4706_v27 = vmul.f32 %v9419_v5, %v4265_v35  ;;  %v5019_v14 = vmul.f32 1.442695, %v4699_v10  ;;  %v5021_v28 = vmul.f32 1.442695, %v4700_v12  ;;  %v5023_v29 = vmul.f32 1.442695, %v4701_v13 }
  0x56   : > { %v9436_v15 = vpop.eup %7197  ;;  %v5025_v16 = vmul.f32 1.442695, %v4702_v17  ;;  %v5027_v30 = vmul.f32 1.442695, %v4703_v20  ;;  %v5029_v18 = vmul.f32 1.442695, %v4704_v21  ;;  %v2304_v33 = vadd.f32 %v2303_v1, %v2302_v58 }
  0x57   : > { %7199 = vpow2.f32 %v5019_v14  ;;  %v5031_v19 = vmul.f32 1.442695, %v4705_v24  ;;  %v2311_v23 = vadd.f32 %v2310_v7, %v2309_v22  ;;  %v2317_v34 = vrot.slane %v2316_v2, 1  ;;  %v279_v7 = vld [vmem:[%s9304_s29 + $0x30] sm:$0xff]  ;;  %v280_v21 = vld [vmem:[%s9304_s29 + $0x38] sm:$0xff] }
  0x58   : > { %7201 = vpow2.f32 %v5021_v28  ;;  %v2324_v35 = vrot.slane %v2323_v26, 1  ;;  %v2330_v37 = vadd.f32 %v2329_v3, %v2328_v60  ;;  %v2336_v38 = vrot.slane %v2335_v4, 2 }
  0x59   : > { %7203 = vpow2.f32 %v5023_v29  ;;  %v5033_v40 = vmul.f32 1.442695, %v4706_v27  ;;  %v2318_v41 = vadd.f32 %v2317_v34, %v2316_v2  ;;  %v2341_v42 = vrot.slane %v2340_v8, 4 }
  0x5a   : > { %7205 = vpow2.f32 %v5025_v16  ;;  %v2325_v43 = vadd.f32 %v2324_v35, %v2323_v26  ;;  %v2331_v44 = vrot.slane %v2330_v37, 1  ;;  %v2337_v25 = vadd.f32 %v2336_v38, %v2335_v4 }
  0x5b   : > { %7207 = vpow2.f32 %v5027_v30  ;;  %v2342_v45 = vadd.f32 %v2341_v42, %v2340_v8  ;;  %v3898_v46 = vmul.f32 %v9361_v36, %v2297_v6  ;;  %v533_v47 = vmax.f32 %v9439_v39, 1e-06 }
  0x5c   : > { %7209 = vpow2.f32 %v5029_v18  ;;  %v2332_v31 = vadd.f32 %v2331_v44, %v2330_v37  ;;  %v2338_v48 = vrot.slane %v2337_v25, 1  ;;  %v3899_v49 = vmul.f32 %v9361_v36, %v2304_v33 }
  0x5d   : > { %v7200_v50 = vpop.eup %7199  ;;  %7211 = vpow2.f32 %v5031_v19  ;;  %v2343_v51 = vrot.slane %v2342_v45, 2  ;;  %v3900_v52 = vmul.f32 %v9361_v36, %v2311_v23  ;;  %v786_v53 = vmul.f32 0.6931472, %v9415_v32 }
  0x5e   : > { %v7202_v54 = vpop.eup %7201  ;;  %7213 = vpow2.f32 %v5033_v40  ;;  %v2339_v55 = vadd.f32 %v2338_v48, %v2337_v25  ;;  %v3901_v56 = vmul.f32 %v9361_v36, %v2318_v41  ;;  %v3902_v57 = vmul.f32 %v9361_v36, %v2325_v43 }
  0x5f   : > { %v7204_v58 = vpop.eup %7203  ;;  %v5722_v59 = vsel %vm5659_vm6, %v7202_v54, %v7200_v50  ;;  %v2344_v60 = vadd.f32 %v2343_v51, %v2342_v45  ;;  %7215 = vlog2.f32 %v3898_v46  ;;  %v788_v11 = vmul.f32 0.6931472, %v9417_v63 }
  0x60   : > { %v7206_v22 = vpop.eup %7205  ;;  %v5723_v62 = vsel %vm5661_vm7, %v7204_v58, %v5722_v59  ;;  %v3903_v32 = vmul.f32 %v9361_v36, %v2332_v31  ;;  %7217 = vlog2.f32 %v3899_v49  ;;  %v790_v1 = vmul.f32 0.6931472, %v7196_v9 }
  0x61   : > { %v7208_v2 = vpop.eup %7207  ;;  %v5724_v3 = vsel %vm5663_vm8, %v7206_v22, %v5723_v62  ;;  %v2345_v4 = vrot.slane %v2344_v60, 1  ;;  %v3904_v6 = vmul.f32 %v9361_v36, %v2339_v55  ;;  %7219 = vlog2.f32 %v3900_v52 }
  0x62   : > { %v7210_v8 = vpop.eup %7209  ;;  %v5725_v10 = vsel %vm5665_vm9, %v7208_v2, %v5724_v3  ;;  %7221 = vlog2.f32 %v3901_v56  ;;  %v534_v63 = vmax.f32 %v278_v61, 1e-06  ;;  %v792_v12 = vmul.f32 0.6931472, %v9436_v15 }
  0x63   : > { %v7212_v13 = vpop.eup %7211  ;;  %v5726_v17 = vsel %vm5667_vm10, %v7210_v8, %v5725_v10  ;;  %v2346_v20 = vadd.f32 %v2345_v4, %v2344_v60  ;;  %7223 = vlog2.f32 %v3902_v57  ;;  %v1298_v24 = vmul.f32 %v786_v53, %v9299_v0 }
  0x64   : > { %v7214_v26 = vpop.eup %7213  ;;  %v5727_v9 = vsel %vm5669_vm11, %v7212_v13, %v5726_v17  ;;  %7225 = vlog2.f32 %v3903_v32  ;;  %v535_v27 = vmax.f32 %v279_v7, 1e-06  ;;  %v1299_v14 = vmul.f32 %v788_v11, %v9299_v0 }
  0x65   : > { %v7216_v28 = vpop.eup %7215  ;;  %v5728_v29 = vsel %vm5671_vm12, %v7214_v26, %v5727_v9  ;;  %v3905_v15 = vmul.f32 %v9361_v36, %v2346_v20  ;;  %7227 = vlog2.f32 %v3904_v6  ;;  %v1300_v16 = vmul.f32 %v790_v1, %v9299_v0 }
  0x66   : > { %v7218_v30 = vpop.eup %7217  ;;  %5986 = vxpose.xlu2.b32.start [1/4] (short) (narrow) %v5728_v29, 16  ;;  %v4187_v18 = vmul.f32 0.6931472, %v7216_v28  ;;  %v536_v33 = vmax.f32 %v280_v21, 1e-06  ;;  %7229 = vlog2.f32 %v533_v47  ;;  %v1301_v34 = vmul.f32 %v792_v12, %v9299_v0 }
  0x67   : > { %v7220_v19 = vpop.eup %7219  ;;  %v4189_v23 = vmul.f32 0.6931472, %v7218_v30  ;;  %7231 = vlog2.f32 %v3905_v15  ;;  %v1554_v35 = vmul.f32 1.442695, %v1298_v24  ;;  %v1556_v40 = vmul.f32 1.442695, %v1299_v14 }
  0x68   : > { %v7222_v37 = vpop.eup %7221  ;;  %v4191_v38 = vmul.f32 0.6931472, %v7220_v19  ;;  %v4667_v39 = vmul.f32 %v9419_v5, %v4187_v18  ;;  %7233 = vlog2.f32 %v534_v63  ;;  %v1558_v44 = vmul.f32 1.442695, %v1300_v16 }
  0x69   : > { %v7224_v41 = vpop.eup %7223  ;;  %v4193_v42 = vmul.f32 0.6931472, %v7222_v37  ;;  %v4668_v43 = vmul.f32 %v9419_v5, %v4189_v23  ;;  %7235 = vlog2.f32 %v535_v27  ;;  %v1560_v63 = vmul.f32 1.442695, %v1301_v34  ;;  %v345_v37 = vld [vmem:[%s9304_s29 + $0x240] sm:$0xff] }
  0x6a   : > { %v7226_v25 = vpop.eup %7225  ;;  %v4195_v45 = vmul.f32 0.6931472, %v7224_v41  ;;  %v4669_v46 = vmul.f32 %v9419_v5, %v4191_v38  ;;  %v4955_v47 = vmul.f32 1.442695, %v4667_v39  ;;  %7237 = vlog2.f32 %v536_v33 }
  0x6b   : > { %v7228_v31 = vpop.eup %7227  ;;  %v4197_v48 = vmul.f32 0.6931472, %v7226_v25  ;;  %v4670_v49 = vmul.f32 %v9419_v5, %v4193_v42  ;;  %v4957_v50 = vmul.f32 1.442695, %v4668_v43  ;;  %7239 = vpow2.f32 %v1554_v35  ;;  %v346_v43 = vld [vmem:[%s9304_s29 + $0x248] sm:$0xff] }
  0x6c   : > { %v7230_v51 = vpop.eup %7229  ;;  %v4199_v52 = vmul.f32 0.6931472, %v7228_v31  ;;  %v4671_v53 = vmul.f32 %v9419_v5, %v4195_v45  ;;  %7241 = vpow2.f32 %v4955_v47  ;;  %v4959_v54 = vmul.f32 1.442695, %v4669_v46 }
  0x6d   : > { %v7232_v55 = vpop.eup %7231  ;;  %v4672_v56 = vmul.f32 %v9419_v5, %v4197_v48  ;;  %7243 = vpow2.f32 %v4957_v50  ;;  %v4961_v57 = vmul.f32 1.442695, %v4670_v49  ;;  %v794_v58 = vmul.f32 0.6931472, %v7230_v51  ;;  %v347_v49 = vld [vmem:[%s9304_s29 + $0x250] sm:$0xff] }
  0x6e   : > { %v7234_v59 = vpop.eup %7233  ;;  %v4201_v60 = vmul.f32 0.6931472, %v7232_v55  ;;  %v4673_v61 = vmul.f32 %v9419_v5, %v4199_v52  ;;  %7245 = vpow2.f32 %v4959_v54  ;;  %v4963_v11 = vmul.f32 1.442695, %v4671_v53 }
  0x6f   : > { %v7236_v22 = vpop.eup %7235  ;;  %7247 = vpow2.f32 %v4961_v57  ;;  %v4965_v62 = vmul.f32 1.442695, %v4672_v56  ;;  %v796_v32 = vmul.f32 0.6931472, %v7234_v59  ;;  %v1302_v1 = vmul.f32 %v794_v58, %v9299_v0 }
  0x70   : > { %v7238_v2 = vpop.eup %7237  ;;  %v4674_v3 = vmul.f32 %v9419_v5, %v4201_v60  ;;  %7249 = vpow2.f32 %v4963_v11  ;;  %v4967_v4 = vmul.f32 1.442695, %v4673_v61  ;;  %v798_v6 = vmul.f32 0.6931472, %v7236_v22 }
  0x71   : > { %v7240_v7 = vpop.eup %7239  ;;  %7251 = vpow2.f32 %v4965_v62  ;;  %v800_v8 = vmul.f32 0.6931472, %v7238_v2  ;;  %v1303_v10 = vmul.f32 %v796_v32, %v9299_v0  ;;  %v1562_v26 = vmul.f32 1.442695, %v1302_v1 }
  0x72   : > { %v7242_v12 = vpop.eup %7241  ;;  %7253 = vpow2.f32 %v4967_v4  ;;  %v4969_v13 = vmul.f32 1.442695, %v4674_v3  ;;  %v1304_v17 = vmul.f32 %v798_v6, %v9299_v0  ;;  %v2067_v20 = vsel %vm2066_vm4, %v7240_v7, 0.0 }
  0x73   : > { %v7244_v21 = vpop.eup %7243  ;;  %v1305_v24 = vmul.f32 %v800_v8, %v9299_v0  ;;  %7255 = vpow2.f32 %v1556_v40  ;;  %v2068_v9 = vrot.slane %v2067_v20, 4  ;;  %v1564_v28 = vmul.f32 1.442695, %v1303_v10 }
  0x74   : > { %v7246_v27 = vpop.eup %7245  ;;  %7257 = vpow2.f32 %v4969_v13  ;;  %v5694_v14 = vsel %vm5659_vm6, %v7244_v21, %v7242_v12  ;;  %v1566_v16 = vmul.f32 1.442695, %v1304_v17  ;;  %v601_v45 = vmax.f32 %v345_v37, 1e-06 }
  0x75   : > { %v7248_v29 = vpop.eup %7247  ;;  %v5695_v15 = vsel %vm5661_vm7, %v7246_v27, %v5694_v14  ;;  %7259 = vpow2.f32 %v1558_v44  ;;  %v2069_v30 = vadd.f32 %v2068_v9, %v2067_v20  ;;  %v1568_v19 = vmul.f32 1.442695, %v1305_v24 }
  0x76   : > { %v7250_v18 = vpop.eup %7249  ;;  %v5696_v33 = vsel %vm5663_vm8, %v7248_v29, %v5695_v15  ;;  %7261 = vpow2.f32 %v1560_v63  ;;  %v602_v52 = vmax.f32 %v346_v43, 1e-06  ;;  %v603_v61 = vmax.f32 %v347_v49, 1e-06  ;;  %v348_v49 = vld [vmem:[%s9304_s29 + $0x258] sm:$0xff] }
  0x77   : > { %v7252_v23 = vpop.eup %7251  ;;  %v5697_v34 = vsel %vm5665_vm9, %v7250_v18, %v5696_v33  ;;  %7263 = vpow2.f32 %v1562_v26  ;;  %v2070_v35 = vrot.slane %v2069_v30, 2 }
  0x78   : > { %v7254_v38 = vpop.eup %7253  ;;  %v5698_v39 = vsel %vm5667_vm10, %v7252_v23, %v5697_v34  ;;  %7265 = vpow2.f32 %v1564_v28 }
  0x79   : > { %v7256_v40 = vpop.eup %7255  ;;  %v5699_v41 = vsel %vm5669_vm11, %v7254_v38, %v5698_v39  ;;  %7267 = vpow2.f32 %v1566_v16  ;;  %v2071_v42 = vadd.f32 %v2070_v35, %v2069_v30 }
  0x7a   : > { %v7258_v44 = vpop.eup %7257  ;;  %7269 = vpow2.f32 %v1568_v19  ;;  %v2074_v25 = vsel %vm2066_vm4, %v7256_v40, 0.0 }
  0x7b   : > { %v7260_v46 = vpop.eup %7259  ;;  %v5700_v47 = vsel %vm5671_vm12, %v7258_v44, %v5699_v41  ;;  %v2072_v31 = vrot.slane %v2071_v42, 1  ;;  %v2075_v48 = vrot.slane %v2074_v25, 4  ;;  %7271 = vlog2.f32 %v601_v45 }
  0x7c   : > { %v7262_v50 = vpop.eup %7261  ;;  %5954 = vxpose.xlu1.b32.start [1/4] (short) (narrow) %v5700_v47, 16  ;;  %v2081_v51 = vsel %vm2066_vm4, %v7260_v46, 0.0 }
  0x7d   : > { %v7264_v53 = vpop.eup %7263  ;;  %v2073_v54 = vadd.f32 %v2072_v31, %v2071_v42  ;;  %v2076_v55 = vadd.f32 %v2075_v48, %v2074_v25  ;;  %v2082_v56 = vrot.slane %v2081_v51, 4  ;;  %v2088_v57 = vsel %vm2066_vm4, %v7262_v50, 0.0 }
  0x7e   : > { %v7266_v58 = vpop.eup %7265  ;;  %v2089_v59 = vrot.slane %v2088_v57, 4  ;;  %v2095_v60 = vsel %vm2066_vm4, %v7264_v53, 0.0 }
  0x7f   : > { %v7268_v11 = vpop.eup %7267  ;;  %v2077_v22 = vrot.slane %v2076_v55, 2  ;;  %v2083_v62 = vadd.f32 %v2082_v56, %v2081_v51  ;;  %v2096_v32 = vrot.slane %v2095_v60, 4  ;;  %v2102_v1 = vsel %vm2066_vm4, %v7266_v58, 0.0  ;;  %v349_v56 = vld [vmem:[%s9304_s29 + $0x260] sm:$0xff] }
  0x80   : > { %v7270_v2 = vpop.eup %7269  ;;  %v2090_v3 = vadd.f32 %v2089_v59, %v2088_v57  ;;  %v2103_v4 = vrot.slane %v2102_v1, 4  ;;  %v2109_v6 = vsel %vm2066_vm4, %v7268_v11, 0.0  ;;  %v3866_v7 = vmul.f32 %v9361_v36, %v2073_v54  ;;  %v350_v59 = vld [vmem:[%s9304_s29 + $0x268] sm:$0xff]  ;;  %v351_v11 = vld [vmem:[%s9304_s29 + $0x270] sm:$0xff] }
  0x81   : > { %v2078_v8 = vadd.f32 %v2077_v22, %v2076_v55  ;;  %v2084_v10 = vrot.slane %v2083_v62, 2  ;;  %v2097_v63 = vadd.f32 %v2096_v32, %v2095_v60  ;;  %v2110_v12 = vrot.slane %v2109_v6, 4  ;;  %v7272_v27 = vpop.eup %7271 }
  0x82   : > { %v2091_v13 = vrot.slane %v2090_v3, 2  ;;  %v2104_v17 = vadd.f32 %v2103_v4, %v2102_v1  ;;  %v2116_v20 = vsel %vm2066_vm4, %v7270_v2, 0.0  ;;  %7273 = vlog2.f32 %v3866_v7 }
  0x83   : > { %v2079_v21 = vrot.slane %v2078_v8, 1  ;;  %v2085_v24 = vadd.f32 %v2084_v10, %v2083_v62  ;;  %v2098_v26 = vrot.slane %v2097_v63, 2  ;;  %v2111_v9 = vadd.f32 %v2110_v12, %v2109_v6  ;;  %v352_v62 = vld [vmem:[%s9304_s29 + $0x278] sm:$0xff] }
  0x84   : > { %v2092_v14 = vadd.f32 %v2091_v13, %v2090_v3  ;;  %v2105_v28 = vrot.slane %v2104_v17, 2  ;;  %v2117_v29 = vrot.slane %v2116_v20, 4  ;;  %7275 = vlog2.f32 %v602_v52 }
  0x85   : > { %v2080_v15 = vadd.f32 %v2079_v21, %v2078_v8  ;;  %v2086_v16 = vrot.slane %v2085_v24, 1  ;;  %v2099_v30 = vadd.f32 %v2098_v26, %v2097_v63  ;;  %v2112_v18 = vrot.slane %v2111_v9, 2 }
  0x86   : > { %v2093_v33 = vrot.slane %v2092_v14, 1  ;;  %v2106_v19 = vadd.f32 %v2105_v28, %v2104_v17  ;;  %v2118_v23 = vadd.f32 %v2117_v29, %v2116_v20  ;;  %7277 = vlog2.f32 %v603_v61 }
  0x87   : > { %v2087_v34 = vadd.f32 %v2086_v16, %v2085_v24  ;;  %v2100_v35 = vrot.slane %v2099_v30, 1  ;;  %v2113_v37 = vadd.f32 %v2112_v18, %v2111_v9  ;;  %v3867_v38 = vmul.f32 %v9361_v36, %v2080_v15 }
  0x88   : > { %v7274_v39 = vpop.eup %7273  ;;  %v2094_v40 = vadd.f32 %v2093_v33, %v2092_v14  ;;  %v2107_v41 = vrot.slane %v2106_v19, 1  ;;  %v2119_v42 = vrot.slane %v2118_v23, 2  ;;  %v604_v60 = vmax.f32 %v348_v49, 1e-06 }
  0x89   : > { %v2101_v43 = vadd.f32 %v2100_v35, %v2099_v30  ;;  %v2114_v44 = vrot.slane %v2113_v37, 1  ;;  %v3868_v25 = vmul.f32 %v9361_v36, %v2087_v34  ;;  %v4123_v45 = vmul.f32 0.6931472, %v7274_v39 }
  0x8a   : > { %v7276_v46 = vpop.eup %7275  ;;  %v2108_v47 = vadd.f32 %v2107_v41, %v2106_v19  ;;  %v2120_v31 = vadd.f32 %v2119_v42, %v2118_v23  ;;  %v3869_v48 = vmul.f32 %v9361_v36, %v2094_v40  ;;  %7279 = vlog2.f32 %v3867_v38 }
  0x8b   : > { %v2115_v50 = vadd.f32 %v2114_v44, %v2113_v37  ;;  %v3870_v51 = vmul.f32 %v9361_v36, %v2101_v43  ;;  %7281 = vlog2.f32 %v3868_v25  ;;  %v4635_v52 = vmul.f32 %v9419_v5, %v4123_v45 }
  0x8c   : > { %v7278_v53 = vpop.eup %7277  ;;  %v2121_v54 = vrot.slane %v2120_v31, 1  ;;  %v3871_v55 = vmul.f32 %v9361_v36, %v2108_v47  ;;  %7283 = vlog2.f32 %v3869_v48  ;;  %v930_v22 = vmul.f32 0.6931472, %v7272_v27 }
  0x8d   : > { %v3872_v57 = vmul.f32 %v9361_v36, %v2115_v50  ;;  %7285 = vlog2.f32 %v3870_v51  ;;  %v4891_v58 = vmul.f32 1.442695, %v4635_v52  ;;  %v605_v32 = vmax.f32 %v349_v56, 1e-06 }
  0x8e   : > { %v2122_v61 = vadd.f32 %v2121_v54, %v2120_v31  ;;  %7287 = vlog2.f32 %v3871_v55  ;;  %v932_v1 = vmul.f32 0.6931472, %v7276_v46  ;;  %v606_v4 = vmax.f32 %v350_v59, 1e-06 }
  0x8f   : > { %7289 = vlog2.f32 %v3872_v57  ;;  %v934_v6 = vmul.f32 0.6931472, %v7278_v53  ;;  %v607_v10 = vmax.f32 %v351_v11, 1e-06  ;;  %v608_v13 = vmax.f32 %v352_v62, 1e-06 }
  0x90   : > { %v7280_v2 = vpop.eup %7279  ;;  %v3873_v3 = vmul.f32 %v9361_v36, %v2122_v61  ;;  %7291 = vpow2.f32 %v4891_v58  ;;  %v1370_v17 = vmul.f32 %v930_v22, %v9299_v0  ;;  %v1371_v26 = vmul.f32 %v932_v1, %v9299_v0 }
  0x91   : > { %v7282_v7 = vpop.eup %7281  ;;  %v4125_v8 = vmul.f32 0.6931472, %v7280_v2  ;;  %7293 = vlog2.f32 %v604_v60  ;;  %v1372_v28 = vmul.f32 %v934_v6, %v9299_v0 }
  0x92   : > { %v7284_v63 = vpop.eup %7283  ;;  %v4127_v12 = vmul.f32 0.6931472, %v7282_v7  ;;  %7295 = vlog2.f32 %v3873_v3  ;;  %v1698_v38 = vmul.f32 1.442695, %v1370_v17  ;;  %v1700_v45 = vmul.f32 1.442695, %v1371_v26 }
  0x93   : > { %v7286_v20 = vpop.eup %7285  ;;  %v4129_v21 = vmul.f32 0.6931472, %v7284_v63  ;;  %v4636_v24 = vmul.f32 %v9419_v5, %v4125_v8  ;;  %7297 = vlog2.f32 %v605_v32  ;;  %v1702_v52 = vmul.f32 1.442695, %v1372_v28  ;;  %v315_v17 = vld [vmem:[%s9304_s29 + $0x150] sm:$0xff] }
  0x94   : > { %v7288_v9 = vpop.eup %7287  ;;  %v4131_v27 = vmul.f32 0.6931472, %v7286_v20  ;;  %v4637_v14 = vmul.f32 %v9419_v5, %v4127_v12  ;;  %7299 = vlog2.f32 %v606_v4  ;;  %v313_v4 = vld [vmem:[%s9304_s29 + $0x140] sm:$0xff] }
  0x95   : > { %v7290_v29 = vpop.eup %7289  ;;  %v4133_v15 = vmul.f32 0.6931472, %v7288_v9  ;;  %v4638_v16 = vmul.f32 %v9419_v5, %v4129_v21  ;;  %v4893_v30 = vmul.f32 1.442695, %v4636_v24  ;;  %7301 = vlog2.f32 %v607_v10  ;;  %v314_v10 = vld [vmem:[%s9304_s29 + $0x148] sm:$0xff]  ;;  %v316_v24 = vld [vmem:[%s9304_s29 + $0x158] sm:$0xff] }
  0x96   : > { %v7292_v18 = vpop.eup %7291  ;;  %v4135_v33 = vmul.f32 0.6931472, %v7290_v29  ;;  %v4639_v19 = vmul.f32 %v9419_v5, %v4131_v27  ;;  %v4895_v23 = vmul.f32 1.442695, %v4637_v14  ;;  %7303 = vlog2.f32 %v608_v13 }
  0x97   : > { %v7294_v34 = vpop.eup %7293  ;;  %v4640_v35 = vmul.f32 %v9419_v5, %v4133_v15  ;;  %7305 = vpow2.f32 %v4893_v30  ;;  %v4897_v37 = vmul.f32 1.442695, %v4638_v16  ;;  %v569_v26 = vmax.f32 %v313_v4, 1e-06  ;;  %v9538_v15 = vld [vmem:[%s9304_s29 + $0x160] sm:$0xff] }
  0x98   : > { %v7296_v39 = vpop.eup %7295  ;;  %v4641_v40 = vmul.f32 %v9419_v5, %v4135_v33  ;;  %7307 = vpow2.f32 %v4895_v23  ;;  %v4899_v41 = vmul.f32 1.442695, %v4639_v19  ;;  %v936_v42 = vmul.f32 0.6931472, %v7294_v34 }
  0x99   : > { %v7298_v43 = vpop.eup %7297  ;;  %v4137_v44 = vmul.f32 0.6931472, %v7296_v39  ;;  %7309 = vpow2.f32 %v4897_v37  ;;  %v4901_v25 = vmul.f32 1.442695, %v4640_v35  ;;  %v570_v14 = vmax.f32 %v314_v10, 1e-06 }
  0x9a   : > { %v7300_v46 = vpop.eup %7299  ;;  %7311 = vpow2.f32 %v4899_v41  ;;  %v4903_v47 = vmul.f32 1.442695, %v4641_v40  ;;  %v938_v31 = vmul.f32 0.6931472, %v7298_v43  ;;  %v1373_v48 = vmul.f32 %v936_v42, %v9299_v0 }
  0x9b   : > { %v7302_v49 = vpop.eup %7301  ;;  %v4642_v50 = vmul.f32 %v9419_v5, %v4137_v44  ;;  %7313 = vpow2.f32 %v4901_v25  ;;  %v940_v51 = vmul.f32 0.6931472, %v7300_v46  ;;  %v571_v16 = vmax.f32 %v315_v17, 1e-06 }
  0x9c   : > { %v7304_v53 = vpop.eup %7303  ;;  %7315 = vpow2.f32 %v4903_v47  ;;  %v942_v54 = vmul.f32 0.6931472, %v7302_v49  ;;  %v1374_v55 = vmul.f32 %v938_v31, %v9299_v0  ;;  %v1704_v56 = vmul.f32 1.442695, %v1373_v48 }
  0x9d   : > { %v7306_v57 = vpop.eup %7305  ;;  %v4905_v58 = vmul.f32 1.442695, %v4642_v50  ;;  %v944_v59 = vmul.f32 0.6931472, %v7304_v53  ;;  %v1375_v60 = vmul.f32 %v940_v51, %v9299_v0  ;;  %7317 = vpow2.f32 %v1698_v38 }
  0x9e   : > { %v7308_v61 = vpop.eup %7307  ;;  %v5660_v11 = vsel %vm5659_vm6, %v7306_v57, %v7292_v18  ;;  %v1376_v22 = vmul.f32 %v942_v54, %v9299_v0  ;;  %7319 = vpow2.f32 %v1700_v45  ;;  %v1706_v62 = vmul.f32 1.442695, %v1374_v55 }
  0x9f   : > { %v7310_v32 = vpop.eup %7309  ;;  %7321 = vpow2.f32 %v4905_v58  ;;  %v5662_v1 = vsel %vm5661_vm7, %v7308_v61, %v5660_v11  ;;  %v1377_v2 = vmul.f32 %v944_v59, %v9299_v0  ;;  %v1708_v3 = vmul.f32 1.442695, %v1375_v60 }
  0xa0   : > { %v7312_v6 = vpop.eup %7311  ;;  %v5664_v7 = vsel %vm5663_vm8, %v7310_v32, %v5662_v1  ;;  %7323 = vpow2.f32 %v1702_v52  ;;  %v1710_v8 = vmul.f32 1.442695, %v1376_v22  ;;  %v572_v19 = vmax.f32 %v316_v24, 1e-06 }
  0xa1   : > { %v7314_v63 = vpop.eup %7313  ;;  %v5666_v12 = vsel %vm5665_vm9, %v7312_v6, %v5664_v7  ;;  %7325 = vpow2.f32 %v1704_v56  ;;  %v1712_v13 = vmul.f32 1.442695, %v1377_v2  ;;  %v573_v40 = vmax.f32 %v9538_v15, 1e-06 }
  0xa2   : > { %v7316_v20 = vpop.eup %7315  ;;  %v5668_v21 = vsel %vm5667_vm10, %v7314_v63, %v5666_v12  ;;  %7327 = vpow2.f32 %v1706_v62 }
  0xa3   : > { %v7318_v9 = vpop.eup %7317  ;;  %v5670_v27 = vsel %vm5669_vm11, %v7316_v20, %v5668_v21  ;;  %7329 = vpow2.f32 %v1708_v3 }
  0xa4   : > { %v7320_v28 = vpop.eup %7319  ;;  %7331 = vpow2.f32 %v1710_v8  ;;  %v2571_v29 = vsel %vm2066_vm4, %v7318_v9, 0.0 }
  0xa5   : > { %v7322_v30 = vpop.eup %7321  ;;  %7333 = vpow2.f32 %v1712_v13  ;;  %v2572_v18 = vrot.slane %v2571_v29, 4  ;;  %v2578_v33 = vsel %vm2066_vm4, %v7320_v28, 0.0 }
  0xa6   : > { %v7324_v23 = vpop.eup %7323  ;;  %v5672_v34 = vsel %vm5671_vm12, %v7322_v30, %v5670_v27  ;;  %v2579_v35 = vrot.slane %v2578_v33, 4  ;;  %7335 = vlog2.f32 %v569_v26 }
  0xa7   : > { %v7326_v37 = vpop.eup %7325  ;;  %5922 = vxpose.xlu0.b32.start [1/4] (short) (narrow) %v5672_v34, 16  ;;  %v2573_v38 = vadd.f32 %v2572_v18, %v2571_v29  ;;  %v2585_v39 = vsel %vm2066_vm4, %v7324_v23, 0.0  ;;  %7337 = vlog2.f32 %v570_v14 }
  0xa8   : > { %v7328_v41 = vpop.eup %7327  ;;  %v2580_v42 = vadd.f32 %v2579_v35, %v2578_v33  ;;  %v2586_v43 = vrot.slane %v2585_v39, 4  ;;  %v2592_v44 = vsel %vm2066_vm4, %v7326_v37, 0.0  ;;  %7339 = vlog2.f32 %v571_v16  ;;  %v318_v37 = vld [vmem:[%s9304_s29 + $0x168] sm:$0xff] }
  0xa9   : > { %v7330_v25 = vpop.eup %7329  ;;  %v2574_v45 = vrot.slane %v2573_v38, 2  ;;  %v2593_v46 = vrot.slane %v2592_v44, 4  ;;  %v2599_v47 = vsel %vm2066_vm4, %v7328_v41, 0.0  ;;  %7341 = vlog2.f32 %v572_v19 }
  0xaa   : > { %v7332_v31 = vpop.eup %7331  ;;  %v2581_v48 = vrot.slane %v2580_v42, 2  ;;  %v2587_v49 = vadd.f32 %v2586_v43, %v2585_v39  ;;  %v2600_v50 = vrot.slane %v2599_v47, 4  ;;  %v2606_v51 = vsel %vm2066_vm4, %v7330_v25, 0.0 }
  0xab   : > { %v7334_v52 = vpop.eup %7333  ;;  %v2575_v53 = vadd.f32 %v2574_v45, %v2573_v38  ;;  %v2594_v54 = vadd.f32 %v2593_v46, %v2592_v44  ;;  %v2607_v55 = vrot.slane %v2606_v51, 4  ;;  %v2613_v56 = vsel %vm2066_vm4, %v7332_v31, 0.0 }
  0xac   : > { %v7336_v57 = vpop.eup %7335  ;;  %v2582_v58 = vadd.f32 %v2581_v48, %v2580_v42  ;;  %v2588_v59 = vrot.slane %v2587_v49, 2  ;;  %v2601_v60 = vadd.f32 %v2600_v50, %v2599_v47  ;;  %v2614_v61 = vrot.slane %v2613_v56, 4  ;;  %v319_v47 = vld [vmem:[%s9304_s29 + $0x170] sm:$0xff] }
  0xad   : > { %v7338_v11 = vpop.eup %7337  ;;  %v2576_v22 = vrot.slane %v2575_v53, 1  ;;  %v2595_v62 = vrot.slane %v2594_v54, 2  ;;  %v2608_v32 = vadd.f32 %v2607_v55, %v2606_v51  ;;  %v2620_v1 = vsel %vm2066_vm4, %v7334_v52, 0.0 }
  0xae   : > { %v7340_v2 = vpop.eup %7339  ;;  %v2583_v3 = vrot.slane %v2582_v58, 1  ;;  %v2589_v4 = vadd.f32 %v2588_v59, %v2587_v49  ;;  %v2602_v6 = vrot.slane %v2601_v60, 2  ;;  %v2615_v7 = vadd.f32 %v2614_v61, %v2613_v56  ;;  %v320_v49 = vld [vmem:[%s9304_s29 + $0x178] sm:$0xff] }
  0xaf   : > { %v7342_v8 = vpop.eup %7341  ;;  %v2577_v10 = vadd.f32 %v2576_v22, %v2575_v53  ;;  %v2596_v63 = vadd.f32 %v2595_v62, %v2594_v54  ;;  %v2609_v12 = vrot.slane %v2608_v32, 2  ;;  %v2621_v13 = vrot.slane %v2620_v1, 4 }
  0xb0   : > { %v2584_v17 = vadd.f32 %v2583_v3, %v2582_v58  ;;  %v2590_v20 = vrot.slane %v2589_v4, 1  ;;  %v2603_v21 = vadd.f32 %v2602_v6, %v2601_v60  ;;  %v2616_v24 = vrot.slane %v2615_v7, 2 }
  0xb1   : > { %v2597_v26 = vrot.slane %v2596_v63, 1  ;;  %v2610_v9 = vadd.f32 %v2609_v12, %v2608_v32  ;;  %v2622_v27 = vadd.f32 %v2621_v13, %v2620_v1  ;;  %v3938_v14 = vmul.f32 %v9361_v36, %v2577_v10 }
  0xb2   : > { %v2591_v28 = vadd.f32 %v2590_v20, %v2589_v4  ;;  %v2604_v29 = vrot.slane %v2603_v21, 1  ;;  %v2617_v16 = vadd.f32 %v2616_v24, %v2615_v7  ;;  %v3939_v30 = vmul.f32 %v9361_v36, %v2584_v17 }
  0xb3   : > { %v2598_v18 = vadd.f32 %v2597_v26, %v2596_v63  ;;  %v2611_v33 = vrot.slane %v2610_v9, 1  ;;  %v2623_v19 = vrot.slane %v2622_v27, 2  ;;  %7343 = vlog2.f32 %v3938_v14 }
  0xb4   : > { %v2605_v23 = vadd.f32 %v2604_v29, %v2603_v21  ;;  %v2618_v34 = vrot.slane %v2617_v16, 1  ;;  %v3940_v35 = vmul.f32 %v9361_v36, %v2591_v28  ;;  %7345 = vlog2.f32 %v3939_v30 }
  0xb5   : > { %v2612_v38 = vadd.f32 %v2611_v33, %v2610_v9  ;;  %v2624_v39 = vadd.f32 %v2623_v19, %v2622_v27  ;;  %v3941_v41 = vmul.f32 %v9361_v36, %v2598_v18  ;;  %v866_v42 = vmul.f32 0.6931472, %v7336_v57 }
  0xb6   : > { %v2619_v43 = vadd.f32 %v2618_v34, %v2617_v16  ;;  %v3942_v44 = vmul.f32 %v9361_v36, %v2605_v23  ;;  %7347 = vlog2.f32 %v3940_v35  ;;  %v868_v25 = vmul.f32 0.6931472, %v7338_v11 }
  0xb7   : > { %v2625_v45 = vrot.slane %v2624_v39, 1  ;;  %v3943_v46 = vmul.f32 %v9361_v36, %v2612_v38  ;;  %7349 = vlog2.f32 %v3941_v41  ;;  %v574_v31 = vmax.f32 %v318_v37, 1e-06 }
  0xb8   : > { %v3944_v48 = vmul.f32 %v9361_v36, %v2619_v43  ;;  %7351 = vlog2.f32 %v3942_v44  ;;  %v870_v50 = vmul.f32 0.6931472, %v7340_v2  ;;  %v872_v51 = vmul.f32 0.6931472, %v7342_v8 }
  0xb9   : > { %v7344_v52 = vpop.eup %7343  ;;  %v2626_v53 = vadd.f32 %v2625_v45, %v2624_v39  ;;  %7353 = vlog2.f32 %v3943_v46  ;;  %v1338_v54 = vmul.f32 %v866_v42, %v9299_v0  ;;  %v575_v57 = vmax.f32 %v319_v47, 1e-06 }
  0xba   : > { %v7346_v55 = vpop.eup %7345  ;;  %v4267_v56 = vmul.f32 0.6931472, %v7344_v52  ;;  %7355 = vlog2.f32 %v3944_v48  ;;  %v1339_v58 = vmul.f32 %v868_v25, %v9299_v0  ;;  %v576_v61 = vmax.f32 %v320_v49, 1e-06 }
  0xbb   : > { %v3945_v59 = vmul.f32 %v9361_v36, %v2626_v53  ;;  %v4269_v60 = vmul.f32 0.6931472, %v7346_v55  ;;  %7357 = vlog2.f32 %v573_v40  ;;  %v1340_v62 = vmul.f32 %v870_v50, %v9299_v0 }
  0xbc   : > { %v7348_v11 = vpop.eup %7347  ;;  %v4707_v22 = vmul.f32 %v9419_v5, %v4267_v56  ;;  %7359 = vlog2.f32 %v574_v31  ;;  %v1341_v32 = vmul.f32 %v872_v51, %v9299_v0  ;;  %v1634_v4 = vmul.f32 1.442695, %v1338_v54 }
  0xbd   : > { %v7350_v1 = vpop.eup %7349  ;;  %v4271_v2 = vmul.f32 0.6931472, %v7348_v11  ;;  %7361 = vlog2.f32 %v3945_v59  ;;  %v4708_v3 = vmul.f32 %v9419_v5, %v4269_v60  ;;  %v1636_v15 = vmul.f32 1.442695, %v1339_v58  ;;  %v281_v59 = vld [vmem:[%s9304_s29 + $0x40] sm:$0xff] }
  0xbe   : > { %v7352_v6 = vpop.eup %7351  ;;  %v4273_v7 = vmul.f32 0.6931472, %v7350_v1  ;;  %v5035_v8 = vmul.f32 1.442695, %v4707_v22  ;;  %7363 = vlog2.f32 %v575_v57  ;;  %v1638_v21 = vmul.f32 1.442695, %v1340_v62 }
  0xbf   : > { %v7354_v40 = vpop.eup %7353  ;;  %v4275_v10 = vmul.f32 0.6931472, %v7352_v6  ;;  %v4709_v63 = vmul.f32 %v9419_v5, %v4271_v2  ;;  %v5037_v12 = vmul.f32 1.442695, %v4708_v3  ;;  %7365 = vlog2.f32 %v576_v61  ;;  %v282_v22 = vld [vmem:[%s9304_s29 + $0x48] sm:$0xff]  ;;  %v283_v2 = vld [vmem:[%s9304_s29 + $0x50] sm:$0xff] }
  0xc0   : > { %v7356_v13 = vpop.eup %7355  ;;  %v4277_v17 = vmul.f32 0.6931472, %v7354_v40  ;;  %v4710_v20 = vmul.f32 %v9419_v5, %v4273_v7  ;;  %7367 = vpow2.f32 %v5035_v8  ;;  %v1640_v47 = vmul.f32 1.442695, %v1341_v32  ;;  %v9589_v40 = vld [vmem:[%s9304_s29 + $0x58] sm:$0xff] }
  0xc1   : > { %v7358_v24 = vpop.eup %7357  ;;  %v4279_v26 = vmul.f32 0.6931472, %v7356_v13  ;;  %v4711_v9 = vmul.f32 %v9419_v5, %v4275_v10  ;;  %7369 = vpow2.f32 %v5037_v12  ;;  %v5039_v27 = vmul.f32 1.442695, %v4709_v63 }
  0xc2   : > { %v7360_v14 = vpop.eup %7359  ;;  %v4712_v28 = vmul.f32 %v9419_v5, %v4277_v17  ;;  %v5041_v29 = vmul.f32 1.442695, %v4710_v20  ;;  %v874_v16 = vmul.f32 0.6931472, %v7358_v24  ;;  %7371 = vpow2.f32 %v1634_v4 }
  0xc3   : > { %v7362_v30 = vpop.eup %7361  ;;  %v4713_v18 = vmul.f32 %v9419_v5, %v4279_v26  ;;  %7373 = vpow2.f32 %v5039_v27  ;;  %v5043_v33 = vmul.f32 1.442695, %v4711_v9  ;;  %v876_v19 = vmul.f32 0.6931472, %v7360_v14 }
  0xc4   : > { %v7364_v23 = vpop.eup %7363  ;;  %v4281_v34 = vmul.f32 0.6931472, %v7362_v30  ;;  %7375 = vpow2.f32 %v5041_v29  ;;  %v5045_v35 = vmul.f32 1.442695, %v4712_v28  ;;  %v1342_v37 = vmul.f32 %v874_v16, %v9299_v0 }
  0xc5   : > { %v7366_v38 = vpop.eup %7365  ;;  %7377 = vpow2.f32 %v5043_v33  ;;  %v5047_v39 = vmul.f32 1.442695, %v4713_v18  ;;  %v878_v41 = vmul.f32 0.6931472, %v7364_v23  ;;  %v1343_v42 = vmul.f32 %v876_v19, %v9299_v0 }
  0xc6   : > { %v7368_v43 = vpop.eup %7367  ;;  %v4714_v44 = vmul.f32 %v9419_v5, %v4281_v34  ;;  %7379 = vpow2.f32 %v5045_v35  ;;  %v880_v25 = vmul.f32 0.6931472, %v7366_v38  ;;  %v1642_v31 = vmul.f32 1.442695, %v1342_v37 }
  0xc7   : > { %v7370_v45 = vpop.eup %7369  ;;  %7381 = vpow2.f32 %v5047_v39  ;;  %v1344_v46 = vmul.f32 %v878_v41, %v9299_v0  ;;  %v1644_v53 = vmul.f32 1.442695, %v1343_v42  ;;  %v537_v6 = vmax.f32 %v281_v59, 1e-06 }
  0xc8   : > { %v7372_v48 = vpop.eup %7371  ;;  %v5049_v49 = vmul.f32 1.442695, %v4714_v44  ;;  %v5729_v50 = vsel %vm5659_vm6, %v7370_v45, %v7368_v43  ;;  %v1345_v51 = vmul.f32 %v880_v25, %v9299_v0  ;;  %7383 = vpow2.f32 %v1636_v15 }
  0xc9   : > { %v7374_v52 = vpop.eup %7373  ;;  %7385 = vpow2.f32 %v1638_v21  ;;  %v2347_v54 = vsel %vm2066_vm4, %v7372_v48, 0.0  ;;  %v1646_v57 = vmul.f32 1.442695, %v1344_v46  ;;  %v538_v10 = vmax.f32 %v282_v22, 1e-06 }
  0xca   : > { %v7376_v55 = vpop.eup %7375  ;;  %7387 = vpow2.f32 %v5049_v49  ;;  %v5730_v56 = vsel %vm5661_vm7, %v7374_v52, %v5729_v50  ;;  %v2348_v58 = vrot.slane %v2347_v54, 4  ;;  %v1648_v11 = vmul.f32 1.442695, %v1345_v51 }
  0xcb   : > { %v7378_v60 = vpop.eup %7377  ;;  %v5731_v61 = vsel %vm5663_vm8, %v7376_v55, %v5730_v56  ;;  %7389 = vpow2.f32 %v1640_v47  ;;  %v539_v13 = vmax.f32 %v283_v2, 1e-06  ;;  %v540_v14 = vmax.f32 %v9589_v40, 1e-06 }
  0xcc   : > { %v7380_v62 = vpop.eup %7379  ;;  %v5732_v32 = vsel %vm5665_vm9, %v7378_v60, %v5731_v61  ;;  %7391 = vpow2.f32 %v1642_v31  ;;  %v2349_v1 = vadd.f32 %v2348_v58, %v2347_v54 }
  0xcd   : > { %v7382_v3 = vpop.eup %7381  ;;  %v5733_v4 = vsel %vm5667_vm10, %v7380_v62, %v5732_v32  ;;  %7393 = vpow2.f32 %v1644_v53 }
  0xce   : > { %v7384_v7 = vpop.eup %7383  ;;  %v5734_v8 = vsel %vm5669_vm11, %v7382_v3, %v5733_v4  ;;  %7395 = vpow2.f32 %v1646_v57  ;;  %v2350_v15 = vrot.slane %v2349_v1, 2 }
  0xcf   : > { %v7386_v63 = vpop.eup %7385  ;;  %7397 = vpow2.f32 %v1648_v11  ;;  %v2354_v12 = vsel %vm2066_vm4, %v7384_v7, 0.0 }
  0xd0   : > { %v7388_v17 = vpop.eup %7387  ;;  %v2351_v20 = vadd.f32 %v2350_v15, %v2349_v1  ;;  %v2355_v21 = vrot.slane %v2354_v12, 4  ;;  %v2361_v24 = vsel %vm2066_vm4, %v7386_v63, 0.0  ;;  %7399 = vlog2.f32 %v537_v6 }
  0xd1   : > { %v7390_v26 = vpop.eup %7389  ;;  %v5735_v9 = vsel %vm5671_vm12, %v7388_v17, %v5734_v8  ;;  %v2362_v27 = vrot.slane %v2361_v24, 4  ;;  %7401 = vlog2.f32 %v538_v10 }
  0xd2   : > { %v7392_v28 = vpop.eup %7391  ;;  %5987 = vxpose.xlu2.b32.cont [2/4] (short) (narrow) %v5735_v9, 16  ;;  %v2352_v29 = vrot.slane %v2351_v20, 1  ;;  %v2356_v16 = vadd.f32 %v2355_v21, %v2354_v12  ;;  %v2368_v30 = vsel %vm2066_vm4, %v7390_v26, 0.0  ;;  %7403 = vlog2.f32 %v539_v13 }
  0xd3   : > { %v7394_v18 = vpop.eup %7393  ;;  %v2363_v33 = vadd.f32 %v2362_v27, %v2361_v24  ;;  %v2369_v19 = vrot.slane %v2368_v30, 4  ;;  %v2375_v23 = vsel %vm2066_vm4, %v7392_v28, 0.0  ;;  %v285_v24 = vld [vmem:[%s9304_s29 + $0x60] sm:$0xff] }
  0xd4   : > { %v7396_v34 = vpop.eup %7395  ;;  %v2353_v35 = vadd.f32 %v2352_v29, %v2351_v20  ;;  %v2357_v37 = vrot.slane %v2356_v16, 2  ;;  %v2376_v38 = vrot.slane %v2375_v23, 4  ;;  %v2382_v39 = vsel %vm2066_vm4, %v7394_v18, 0.0  ;;  %v287_v18 = vld [vmem:[%s9304_s29 + $0x70] sm:$0xff] }
  0xd5   : > { %v7398_v41 = vpop.eup %7397  ;;  %v2364_v42 = vrot.slane %v2363_v33, 2  ;;  %v2370_v43 = vadd.f32 %v2369_v19, %v2368_v30  ;;  %v2383_v44 = vrot.slane %v2382_v39, 4  ;;  %v2389_v25 = vsel %vm2066_vm4, %v7396_v34, 0.0  ;;  %v286_v30 = vld [vmem:[%s9304_s29 + $0x68] sm:$0xff] }
  0xd6   : > { %v2358_v45 = vadd.f32 %v2357_v37, %v2356_v16  ;;  %v2377_v46 = vadd.f32 %v2376_v38, %v2375_v23  ;;  %v2390_v47 = vrot.slane %v2389_v25, 4  ;;  %v2396_v31 = vsel %vm2066_vm4, %v7398_v41, 0.0  ;;  %v7400_v48 = vpop.eup %7399  ;;  %v288_v37 = vld [vmem:[%s9304_s29 + $0x78] sm:$0xff] }
  0xd7   : > { %v2365_v49 = vadd.f32 %v2364_v42, %v2363_v33  ;;  %v2371_v50 = vrot.slane %v2370_v43, 2  ;;  %v2384_v51 = vadd.f32 %v2383_v44, %v2382_v39  ;;  %v2397_v52 = vrot.slane %v2396_v31, 4  ;;  %v7402_v53 = vpop.eup %7401 }
  0xd8   : > { %v2359_v54 = vrot.slane %v2358_v45, 1  ;;  %v2378_v55 = vrot.slane %v2377_v46, 2  ;;  %v2391_v56 = vadd.f32 %v2390_v47, %v2389_v25  ;;  %v3906_v57 = vmul.f32 %v9361_v36, %v2353_v35  ;;  %v7404_v58 = vpop.eup %7403 }
  0xd9   : > { %v2366_v59 = vrot.slane %v2365_v49, 1  ;;  %v2372_v60 = vadd.f32 %v2371_v50, %v2370_v43  ;;  %v2385_v61 = vrot.slane %v2384_v51, 2  ;;  %v2398_v11 = vadd.f32 %v2397_v52, %v2396_v31 }
  0xda   : > { %v2360_v22 = vadd.f32 %v2359_v54, %v2358_v45  ;;  %v2379_v62 = vadd.f32 %v2378_v55, %v2377_v46  ;;  %v2392_v32 = vrot.slane %v2391_v56, 2  ;;  %7405 = vlog2.f32 %v3906_v57 }
  0xdb   : > { %v2367_v1 = vadd.f32 %v2366_v59, %v2365_v49  ;;  %v2373_v2 = vrot.slane %v2372_v60, 1  ;;  %v2386_v3 = vadd.f32 %v2385_v61, %v2384_v51  ;;  %v2399_v4 = vrot.slane %v2398_v11, 2 }
  0xdc   : > { %v2380_v6 = vrot.slane %v2379_v62, 1  ;;  %v2393_v7 = vadd.f32 %v2392_v32, %v2391_v56  ;;  %v3907_v8 = vmul.f32 %v9361_v36, %v2360_v22  ;;  %7407 = vlog2.f32 %v540_v14 }
  0xdd   : > { %v2374_v15 = vadd.f32 %v2373_v2, %v2372_v60  ;;  %v2387_v40 = vrot.slane %v2386_v3, 1  ;;  %v2400_v10 = vadd.f32 %v2399_v4, %v2398_v11  ;;  %v3908_v63 = vmul.f32 %v9361_v36, %v2367_v1 }
  0xde   : > { %v2381_v12 = vadd.f32 %v2380_v6, %v2379_v62  ;;  %v2394_v13 = vrot.slane %v2393_v7, 1  ;;  %7409 = vlog2.f32 %v3907_v8  ;;  %v802_v14 = vmul.f32 0.6931472, %v7400_v48 }
  0xdf   : > { %v2388_v17 = vadd.f32 %v2387_v40, %v2386_v3  ;;  %v2401_v20 = vrot.slane %v2400_v10, 1  ;;  %v3909_v21 = vmul.f32 %v9361_v36, %v2374_v15  ;;  %7411 = vlog2.f32 %v3908_v63 }
  0xe0   : > { %v7406_v26 = vpop.eup %7405  ;;  %v2395_v9 = vadd.f32 %v2394_v13, %v2393_v7  ;;  %v3910_v27 = vmul.f32 %v9361_v36, %v2381_v12  ;;  %v541_v23 = vmax.f32 %v285_v24, 1e-06  ;;  %v804_v38 = vmul.f32 0.6931472, %v7402_v53 }
  0xe1   : > { %v2402_v28 = vadd.f32 %v2401_v20, %v2400_v10  ;;  %v3911_v29 = vmul.f32 %v9361_v36, %v2388_v17  ;;  %v4203_v16 = vmul.f32 0.6931472, %v7406_v26  ;;  %7413 = vlog2.f32 %v3909_v21 }
  0xe2   : > { %v7408_v33 = vpop.eup %7407  ;;  %v3912_v19 = vmul.f32 %v9361_v36, %v2395_v9  ;;  %7415 = vlog2.f32 %v3910_v27  ;;  %v542_v41 = vmax.f32 %v286_v30, 1e-06  ;;  %v543_v42 = vmax.f32 %v287_v18, 1e-06 }
  0xe3   : > { %v3913_v34 = vmul.f32 %v9361_v36, %v2402_v28  ;;  %7417 = vlog2.f32 %v3911_v29  ;;  %v4675_v35 = vmul.f32 %v9419_v5, %v4203_v16  ;;  %v806_v43 = vmul.f32 0.6931472, %v7404_v58 }
  0xe4   : > { %v7410_v39 = vpop.eup %7409  ;;  %7419 = vlog2.f32 %v3912_v19  ;;  %v1306_v46 = vmul.f32 %v802_v14, %v9299_v0  ;;  %v544_v31 = vmax.f32 %v288_v37, 1e-06  ;;  %v808_v50 = vmul.f32 0.6931472, %v7408_v33 }
  0xe5   : > { %v7412_v44 = vpop.eup %7411  ;;  %v4205_v25 = vmul.f32 0.6931472, %v7410_v39  ;;  %7421 = vlog2.f32 %v3913_v34  ;;  %v4971_v45 = vmul.f32 1.442695, %v4675_v35  ;;  %v1307_v51 = vmul.f32 %v804_v38, %v9299_v0 }
  0xe6   : > { %v4207_v47 = vmul.f32 0.6931472, %v7412_v44  ;;  %7423 = vlog2.f32 %v541_v23  ;;  %v1308_v55 = vmul.f32 %v806_v43, %v9299_v0  ;;  %v1570_v59 = vmul.f32 1.442695, %v1306_v46  ;;  %v353_v44 = vld [vmem:[%s9304_s29 + $0x280] sm:$0xff] }
  0xe7   : > { %v7414_v48 = vpop.eup %7413  ;;  %v4676_v49 = vmul.f32 %v9419_v5, %v4205_v25  ;;  %7425 = vpow2.f32 %v4971_v45  ;;  %v1309_v2 = vmul.f32 %v808_v50, %v9299_v0  ;;  %v1572_v17 = vmul.f32 1.442695, %v1307_v51 }
  0xe8   : > { %v7416_v52 = vpop.eup %7415  ;;  %v4209_v53 = vmul.f32 0.6931472, %v7414_v48  ;;  %v4677_v54 = vmul.f32 %v9419_v5, %v4207_v47  ;;  %7427 = vlog2.f32 %v542_v41  ;;  %v1574_v28 = vmul.f32 1.442695, %v1308_v55 }
  0xe9   : > { %v7418_v56 = vpop.eup %7417  ;;  %v4211_v57 = vmul.f32 0.6931472, %v7416_v52  ;;  %v4973_v58 = vmul.f32 1.442695, %v4676_v49  ;;  %7429 = vlog2.f32 %v543_v42  ;;  %v1576_v18 = vmul.f32 1.442695, %v1309_v2 }
  0xea   : > { %v7420_v60 = vpop.eup %7419  ;;  %v4213_v61 = vmul.f32 0.6931472, %v7418_v56  ;;  %v4678_v11 = vmul.f32 %v9419_v5, %v4209_v53  ;;  %v4975_v22 = vmul.f32 1.442695, %v4677_v54  ;;  %7431 = vlog2.f32 %v544_v31  ;;  %v354_v31 = vld [vmem:[%s9304_s29 + $0x288] sm:$0xff]  ;;  %v355_v53 = vld [vmem:[%s9304_s29 + $0x290] sm:$0xff] }
  0xeb   : > { %v7422_v62 = vpop.eup %7421  ;;  %v4215_v32 = vmul.f32 0.6931472, %v7420_v60  ;;  %v4679_v1 = vmul.f32 %v9419_v5, %v4211_v57  ;;  %7433 = vpow2.f32 %v4973_v58  ;;  %v609_v54 = vmax.f32 %v353_v44, 1e-06 }
  0xec   : > { %v7424_v3 = vpop.eup %7423  ;;  %v4217_v4 = vmul.f32 0.6931472, %v7422_v62  ;;  %v4680_v6 = vmul.f32 %v9419_v5, %v4213_v61  ;;  %7435 = vpow2.f32 %v4975_v22  ;;  %v4977_v7 = vmul.f32 1.442695, %v4678_v11  ;;  %v356_v61 = vld [vmem:[%s9304_s29 + $0x298] sm:$0xff] }
  0xed   : > { %v7426_v8 = vpop.eup %7425  ;;  %v4681_v15 = vmul.f32 %v9419_v5, %v4215_v32  ;;  %v4979_v40 = vmul.f32 1.442695, %v4679_v1  ;;  %v810_v10 = vmul.f32 0.6931472, %v7424_v3  ;;  %7437 = vpow2.f32 %v1570_v59 }
  0xee   : > { %v7428_v63 = vpop.eup %7427  ;;  %v4682_v12 = vmul.f32 %v9419_v5, %v4217_v4  ;;  %7439 = vpow2.f32 %v4977_v7  ;;  %v4981_v13 = vmul.f32 1.442695, %v4680_v6  ;;  %v610_v57 = vmax.f32 %v354_v31, 1e-06 }
  0xef   : > { %v7430_v20 = vpop.eup %7429  ;;  %7441 = vpow2.f32 %v4979_v40  ;;  %v4983_v21 = vmul.f32 1.442695, %v4681_v15  ;;  %v812_v24 = vmul.f32 0.6931472, %v7428_v63  ;;  %v1310_v26 = vmul.f32 %v810_v10, %v9299_v0 }
  0xf0   : > { %v7432_v9 = vpop.eup %7431  ;;  %7443 = vpow2.f32 %v4981_v13  ;;  %v4985_v27 = vmul.f32 1.442695, %v4682_v12  ;;  %v814_v14 = vmul.f32 0.6931472, %v7430_v20  ;;  %v611_v62 = vmax.f32 %v355_v53, 1e-06 }
  0xf1   : > { %v7434_v29 = vpop.eup %7433  ;;  %7445 = vpow2.f32 %v4983_v21  ;;  %v816_v16 = vmul.f32 0.6931472, %v7432_v9  ;;  %v1311_v30 = vmul.f32 %v812_v24, %v9299_v0  ;;  %v1578_v34 = vmul.f32 1.442695, %v1310_v26 }
  0xf2   : > { %v7436_v33 = vpop.eup %7435  ;;  %7447 = vpow2.f32 %v4985_v27  ;;  %v5701_v19 = vsel %vm5659_vm6, %v7434_v29, %v7426_v8  ;;  %v1312_v23 = vmul.f32 %v814_v14, %v9299_v0  ;;  %v612_v8 = vmax.f32 %v356_v61, 1e-06 }
  0xf3   : > { %v7438_v35 = vpop.eup %7437  ;;  %v5702_v37 = vsel %vm5661_vm7, %v7436_v33, %v5701_v19  ;;  %v1313_v38 = vmul.f32 %v816_v16, %v9299_v0  ;;  %7449 = vpow2.f32 %v1572_v17  ;;  %v1580_v39 = vmul.f32 1.442695, %v1311_v30 }
  0xf4   : > { %v7440_v41 = vpop.eup %7439  ;;  %7451 = vpow2.f32 %v1574_v28  ;;  %v1582_v42 = vmul.f32 1.442695, %v1312_v23  ;;  %v2123_v43 = vsel %vm2066_vm4, %v7438_v35, 0.0 }
  0xf5   : > { %v7442_v25 = vpop.eup %7441  ;;  %v5703_v45 = vsel %vm5663_vm8, %v7440_v41, %v5702_v37  ;;  %7453 = vpow2.f32 %v1576_v18  ;;  %v1584_v46 = vmul.f32 1.442695, %v1313_v38  ;;  %v2124_v47 = vrot.slane %v2123_v43, 4 }
  0xf6   : > { %v7444_v48 = vpop.eup %7443  ;;  %v5704_v49 = vsel %vm5665_vm9, %v7442_v25, %v5703_v45  ;;  %7455 = vpow2.f32 %v1578_v34 }
  0xf7   : > { %v7446_v50 = vpop.eup %7445  ;;  %v5705_v51 = vsel %vm5667_vm10, %v7444_v48, %v5704_v49  ;;  %7457 = vpow2.f32 %v1580_v39  ;;  %v2125_v52 = vadd.f32 %v2124_v47, %v2123_v43 }
  0xf8   : > { %v7448_v55 = vpop.eup %7447  ;;  %v5706_v56 = vsel %vm5669_vm11, %v7446_v50, %v5705_v51  ;;  %7459 = vpow2.f32 %v1582_v42 }
  0xf9   : > { %v7450_v58 = vpop.eup %7449  ;;  %v5707_v59 = vsel %vm5671_vm12, %v7448_v55, %v5706_v56  ;;  %7461 = vpow2.f32 %v1584_v46  ;;  %v2126_v60 = vrot.slane %v2125_v52, 2 }
  0xfa   : > { %v7452_v11 = vpop.eup %7451  ;;  %5955 = vxpose.xlu1.b32.cont [2/4] (short) (narrow) %v5707_v59, 16  ;;  %v2130_v22 = vsel %vm2066_vm4, %v7450_v58, 0.0  ;;  %7463 = vlog2.f32 %v609_v54  ;;  %v357_v59 = vld [vmem:[%s9304_s29 + $0x2a0] sm:$0xff] }
  0xfb   : > { %v7454_v32 = vpop.eup %7453  ;;  %v2127_v1 = vadd.f32 %v2126_v60, %v2125_v52  ;;  %v2131_v2 = vrot.slane %v2130_v22, 4  ;;  %v2137_v3 = vsel %vm2066_vm4, %v7452_v11, 0.0  ;;  %7465 = vlog2.f32 %v610_v57 }
  0xfc   : > { %v7456_v4 = vpop.eup %7455  ;;  %v2138_v6 = vrot.slane %v2137_v3, 4  ;;  %v2144_v7 = vsel %vm2066_vm4, %v7454_v32, 0.0  ;;  %7467 = vlog2.f32 %v611_v62 }
  0xfd   : > { %v7458_v15 = vpop.eup %7457  ;;  %v2128_v40 = vrot.slane %v2127_v1, 1  ;;  %v2132_v10 = vadd.f32 %v2131_v2, %v2130_v22  ;;  %v2145_v63 = vrot.slane %v2144_v7, 4  ;;  %v2151_v12 = vsel %vm2066_vm4, %v7456_v4, 0.0 }
  0xfe   : > { %v7460_v13 = vpop.eup %7459  ;;  %v2139_v17 = vadd.f32 %v2138_v6, %v2137_v3  ;;  %v2152_v20 = vrot.slane %v2151_v12, 4  ;;  %v2158_v21 = vsel %vm2066_vm4, %v7458_v15, 0.0  ;;  %v613_v6 = vmax.f32 %v357_v59, 1e-06 }
  0xff   : > { %v7462_v24 = vpop.eup %7461  ;;  %v2129_v26 = vadd.f32 %v2128_v40, %v2127_v1  ;;  %v2133_v9 = vrot.slane %v2132_v10, 2  ;;  %v2146_v27 = vadd.f32 %v2145_v63, %v2144_v7  ;;  %v2159_v14 = vrot.slane %v2158_v21, 4  ;;  %v358_v40 = vld [vmem:[%s9304_s29 + $0x2a8] sm:$0xff] }
 0x100   : > { %v2140_v28 = vrot.slane %v2139_v17, 2  ;;  %v2153_v29 = vadd.f32 %v2152_v20, %v2151_v12  ;;  %v2165_v16 = vsel %vm2066_vm4, %v7460_v13, 0.0  ;;  %v2172_v30 = vsel %vm2066_vm4, %v7462_v24, 0.0  ;;  %v7464_v18 = vpop.eup %7463  ;;  %v359_v12 = vld [vmem:[%s9304_s29 + $0x2b0] sm:$0xff] }
 0x101   : > { %v2134_v33 = vadd.f32 %v2133_v9, %v2132_v10  ;;  %v2147_v19 = vrot.slane %v2146_v27, 2  ;;  %v2160_v23 = vadd.f32 %v2159_v14, %v2158_v21  ;;  %v2166_v34 = vrot.slane %v2165_v16, 4  ;;  %v7466_v35 = vpop.eup %7465  ;;  %v360_v21 = vld [vmem:[%s9304_s29 + $0x2b8] sm:$0xff] }
 0x102   : > { %v2141_v37 = vadd.f32 %v2140_v28, %v2139_v17  ;;  %v2154_v38 = vrot.slane %v2153_v29, 2  ;;  %v2173_v39 = vrot.slane %v2172_v30, 4  ;;  %v3874_v41 = vmul.f32 %v9361_v36, %v2129_v26  ;;  %v7468_v45 = vpop.eup %7467 }
 0x103   : > { %v2135_v42 = vrot.slane %v2134_v33, 1  ;;  %v2148_v43 = vadd.f32 %v2147_v19, %v2146_v27  ;;  %v2161_v44 = vrot.slane %v2160_v23, 2  ;;  %v2167_v25 = vadd.f32 %v2166_v34, %v2165_v16 }
 0x104   : > { %v2142_v46 = vrot.slane %v2141_v37, 1  ;;  %v2155_v47 = vadd.f32 %v2154_v38, %v2153_v29  ;;  %v2174_v31 = vadd.f32 %v2173_v39, %v2172_v30  ;;  %7469 = vlog2.f32 %v3874_v41 }
 0x105   : > { %v2136_v48 = vadd.f32 %v2135_v42, %v2134_v33  ;;  %v2149_v49 = vrot.slane %v2148_v43, 1  ;;  %v2162_v50 = vadd.f32 %v2161_v44, %v2160_v23  ;;  %v2168_v51 = vrot.slane %v2167_v25, 2 }
 0x106   : > { %v2143_v52 = vadd.f32 %v2142_v46, %v2141_v37  ;;  %v2156_v53 = vrot.slane %v2155_v47, 1  ;;  %v2175_v54 = vrot.slane %v2174_v31, 2  ;;  %7471 = vlog2.f32 %v612_v8 }
 0x107   : > { %v2150_v55 = vadd.f32 %v2149_v49, %v2148_v43  ;;  %v2163_v56 = vrot.slane %v2162_v50, 1  ;;  %v2169_v57 = vadd.f32 %v2168_v51, %v2167_v25  ;;  %v3875_v58 = vmul.f32 %v9361_v36, %v2136_v48 }
 0x108   : > { %v2157_v60 = vadd.f32 %v2156_v53, %v2155_v47  ;;  %v2176_v61 = vadd.f32 %v2175_v54, %v2174_v31  ;;  %v3876_v11 = vmul.f32 %v9361_v36, %v2143_v52  ;;  %v946_v22 = vmul.f32 0.6931472, %v7464_v18 }
 0x109   : > { %v2164_v62 = vadd.f32 %v2163_v56, %v2162_v50  ;;  %v2170_v32 = vrot.slane %v2169_v57, 1  ;;  %v3877_v1 = vmul.f32 %v9361_v36, %v2150_v55  ;;  %7473 = vlog2.f32 %v3875_v58 }
 0x10a   : > { %v7470_v2 = vpop.eup %7469  ;;  %v2177_v3 = vrot.slane %v2176_v61, 1  ;;  %v3878_v4 = vmul.f32 %v9361_v36, %v2157_v60  ;;  %7475 = vlog2.f32 %v3876_v11  ;;  %v948_v13 = vmul.f32 0.6931472, %v7466_v35 }
 0x10b   : > { %v2171_v7 = vadd.f32 %v2170_v32, %v2169_v57  ;;  %v3879_v8 = vmul.f32 %v9361_v36, %v2164_v62  ;;  %v4139_v15 = vmul.f32 0.6931472, %v7470_v2  ;;  %7477 = vlog2.f32 %v3877_v1 }
 0x10c   : > { %v7472_v10 = vpop.eup %7471  ;;  %v2178_v63 = vadd.f32 %v2177_v3, %v2176_v61  ;;  %7479 = vlog2.f32 %v3878_v4  ;;  %v1378_v24 = vmul.f32 %v946_v22, %v9299_v0  ;;  %v614_v9 = vmax.f32 %v358_v40, 1e-06 }
 0x10d   : > { %v3880_v17 = vmul.f32 %v9361_v36, %v2171_v7  ;;  %7481 = vlog2.f32 %v3879_v8  ;;  %v4643_v20 = vmul.f32 %v9419_v5, %v4139_v15  ;;  %v950_v27 = vmul.f32 0.6931472, %v7468_v45 }
 0x10e   : > { %v3881_v26 = vmul.f32 %v9361_v36, %v2178_v63  ;;  %7483 = vlog2.f32 %v613_v6  ;;  %v615_v29 = vmax.f32 %v359_v12, 1e-06  ;;  %v952_v16 = vmul.f32 0.6931472, %v7472_v10 }
 0x10f   : > { %v7474_v14 = vpop.eup %7473  ;;  %7485 = vlog2.f32 %v3880_v17  ;;  %v4907_v28 = vmul.f32 1.442695, %v4643_v20  ;;  %v616_v33 = vmax.f32 %v360_v21, 1e-06  ;;  %v1379_v34 = vmul.f32 %v948_v13, %v9299_v0 }
 0x110   : > { %v7476_v30 = vpop.eup %7475  ;;  %v4141_v18 = vmul.f32 0.6931472, %v7474_v14  ;;  %7487 = vlog2.f32 %v3881_v26  ;;  %v1714_v35 = vmul.f32 1.442695, %v1378_v24  ;;  %v1380_v41 = vmul.f32 %v950_v27, %v9299_v0 }
 0x111   : > { %v7478_v19 = vpop.eup %7477  ;;  %v4143_v23 = vmul.f32 0.6931472, %v7476_v30  ;;  %7489 = vpow2.f32 %v4907_v28  ;;  %v1381_v25 = vmul.f32 %v952_v16, %v9299_v0  ;;  %v1716_v59 = vmul.f32 1.442695, %v1379_v34 }
 0x112   : > { %v7480_v37 = vpop.eup %7479  ;;  %v4145_v38 = vmul.f32 0.6931472, %v7478_v19  ;;  %v4644_v39 = vmul.f32 %v9419_v5, %v4141_v18  ;;  %7491 = vlog2.f32 %v614_v9  ;;  %v1718_v2 = vmul.f32 1.442695, %v1380_v41 }
 0x113   : > { %v7482_v42 = vpop.eup %7481  ;;  %v4147_v43 = vmul.f32 0.6931472, %v7480_v37  ;;  %v4645_v44 = vmul.f32 %v9419_v5, %v4143_v23  ;;  %7493 = vlog2.f32 %v615_v29  ;;  %v1720_v7 = vmul.f32 1.442695, %v1381_v25  ;;  %v321_v29 = vld [vmem:[%s9304_s29 + $0x180] sm:$0xff] }
 0x114   : > { %v7484_v45 = vpop.eup %7483  ;;  %v4149_v46 = vmul.f32 0.6931472, %v7482_v42  ;;  %v4646_v47 = vmul.f32 %v9419_v5, %v4145_v38  ;;  %v4909_v31 = vmul.f32 1.442695, %v4644_v39  ;;  %7495 = vlog2.f32 %v616_v33  ;;  %v322_v33 = vld [vmem:[%s9304_s29 + $0x188] sm:$0xff] }
 0x115   : > { %v7486_v48 = vpop.eup %7485  ;;  %v4647_v49 = vmul.f32 %v9419_v5, %v4147_v43  ;;  %v4911_v50 = vmul.f32 1.442695, %v4645_v44  ;;  %v954_v51 = vmul.f32 0.6931472, %v7484_v45  ;;  %7497 = vpow2.f32 %v1714_v35  ;;  %v323_v35 = vld [vmem:[%s9304_s29 + $0x190] sm:$0xff]  ;;  %v9686_v44 = vld [vmem:[%s9304_s29 + $0x198] sm:$0xff] }
 0x116   : > { %v7488_v52 = vpop.eup %7487  ;;  %v4151_v53 = vmul.f32 0.6931472, %v7486_v48  ;;  %v4648_v54 = vmul.f32 %v9419_v5, %v4149_v46  ;;  %7499 = vpow2.f32 %v4909_v31  ;;  %v4913_v55 = vmul.f32 1.442695, %v4646_v47 }
 0x117   : > { %v7490_v56 = vpop.eup %7489  ;;  %v4153_v57 = vmul.f32 0.6931472, %v7488_v52  ;;  %7501 = vpow2.f32 %v4911_v50  ;;  %v4915_v58 = vmul.f32 1.442695, %v4647_v49  ;;  %v1382_v22 = vmul.f32 %v954_v51, %v9299_v0 }
 0x118   : > { %v7492_v60 = vpop.eup %7491  ;;  %v4649_v61 = vmul.f32 %v9419_v5, %v4151_v53  ;;  %7503 = vpow2.f32 %v4913_v55  ;;  %v4917_v11 = vmul.f32 1.442695, %v4648_v54  ;;  %v577_v39 = vmax.f32 %v321_v29, 1e-06 }
 0x119   : > { %v7494_v62 = vpop.eup %7493  ;;  %v4650_v32 = vmul.f32 %v9419_v5, %v4153_v57  ;;  %7505 = vpow2.f32 %v4915_v58  ;;  %v956_v1 = vmul.f32 0.6931472, %v7492_v60  ;;  %v1722_v13 = vmul.f32 1.442695, %v1382_v22 }
 0x11a   : > { %v7496_v3 = vpop.eup %7495  ;;  %7507 = vpow2.f32 %v4917_v11  ;;  %v4919_v4 = vmul.f32 1.442695, %v4649_v61  ;;  %v958_v6 = vmul.f32 0.6931472, %v7494_v62  ;;  %v578_v25 = vmax.f32 %v322_v33, 1e-06 }
 0x11b   : > { %v7498_v8 = vpop.eup %7497  ;;  %v4921_v15 = vmul.f32 1.442695, %v4650_v32  ;;  %v960_v40 = vmul.f32 0.6931472, %v7496_v3  ;;  %v1383_v10 = vmul.f32 %v956_v1, %v9299_v0  ;;  %7509 = vpow2.f32 %v1716_v59 }
 0x11c   : > { %v7500_v63 = vpop.eup %7499  ;;  %7511 = vpow2.f32 %v4919_v4  ;;  %v1384_v12 = vmul.f32 %v958_v6, %v9299_v0  ;;  %v2627_v17 = vsel %vm2066_vm4, %v7498_v8, 0.0  ;;  %v579_v31 = vmax.f32 %v323_v35, 1e-06 }
 0x11d   : > { %v7502_v20 = vpop.eup %7501  ;;  %7513 = vpow2.f32 %v4921_v15  ;;  %v5673_v21 = vsel %vm5659_vm6, %v7500_v63, %v7490_v56  ;;  %v1385_v24 = vmul.f32 %v960_v40, %v9299_v0  ;;  %v1724_v26 = vmul.f32 1.442695, %v1383_v10 }
 0x11e   : > { %v7504_v9 = vpop.eup %7503  ;;  %v5674_v27 = vsel %vm5661_vm7, %v7502_v20, %v5673_v21  ;;  %7515 = vpow2.f32 %v1718_v2  ;;  %v1726_v14 = vmul.f32 1.442695, %v1384_v12  ;;  %v2628_v28 = vrot.slane %v2627_v17, 4 }
 0x11f   : > { %v7506_v16 = vpop.eup %7505  ;;  %v5675_v30 = vsel %vm5663_vm8, %v7504_v9, %v5674_v27  ;;  %7517 = vpow2.f32 %v1720_v7  ;;  %v1728_v18 = vmul.f32 1.442695, %v1385_v24  ;;  %v580_v54 = vmax.f32 %v9686_v44, 1e-06 }
 0x120   : > { %v7508_v19 = vpop.eup %7507  ;;  %v5676_v23 = vsel %vm5665_vm9, %v7506_v16, %v5675_v30  ;;  %7519 = vpow2.f32 %v1722_v13  ;;  %v2629_v34 = vadd.f32 %v2628_v28, %v2627_v17 }
 0x121   : > { %v7510_v37 = vpop.eup %7509  ;;  %v5677_v38 = vsel %vm5667_vm10, %v7508_v19, %v5676_v23  ;;  %7521 = vpow2.f32 %v1724_v26 }
 0x122   : > { %v7512_v41 = vpop.eup %7511  ;;  %7523 = vpow2.f32 %v1726_v14  ;;  %v2630_v42 = vrot.slane %v2629_v34, 2  ;;  %v2634_v43 = vsel %vm2066_vm4, %v7510_v37, 0.0 }
 0x123   : > { %v7514_v45 = vpop.eup %7513  ;;  %v5678_v46 = vsel %vm5669_vm11, %v7512_v41, %v5677_v38  ;;  %7525 = vpow2.f32 %v1728_v18  ;;  %v2635_v47 = vrot.slane %v2634_v43, 4 }
 0x124   : > { %v7516_v48 = vpop.eup %7515  ;;  %v5679_v49 = vsel %vm5671_vm12, %v7514_v45, %v5678_v46  ;;  %v2631_v50 = vadd.f32 %v2630_v42, %v2629_v34  ;;  %7527 = vlog2.f32 %v577_v39 }
 0x125   : > { %v7518_v51 = vpop.eup %7517  ;;  %5923 = vxpose.xlu0.b32.cont [2/4] (short) (narrow) %v5679_v49, 16  ;;  %v2636_v52 = vadd.f32 %v2635_v47, %v2634_v43  ;;  %v2641_v53 = vsel %vm2066_vm4, %v7516_v48, 0.0  ;;  %7529 = vlog2.f32 %v578_v25 }
 0x126   : > { %v7520_v55 = vpop.eup %7519  ;;  %v2632_v56 = vrot.slane %v2631_v50, 1  ;;  %v2642_v57 = vrot.slane %v2641_v53, 4  ;;  %v2648_v58 = vsel %vm2066_vm4, %v7518_v51, 0.0  ;;  %7531 = vlog2.f32 %v579_v31 }
 0x127   : > { %v7522_v59 = vpop.eup %7521  ;;  %v2637_v60 = vrot.slane %v2636_v52, 2  ;;  %v2649_v61 = vrot.slane %v2648_v58, 4  ;;  %v2655_v11 = vsel %vm2066_vm4, %v7520_v55, 0.0 }
 0x128   : > { %v7524_v22 = vpop.eup %7523  ;;  %v2633_v62 = vadd.f32 %v2632_v56, %v2631_v50  ;;  %v2643_v32 = vadd.f32 %v2642_v57, %v2641_v53  ;;  %v2656_v1 = vrot.slane %v2655_v11, 4  ;;  %v2662_v2 = vsel %vm2066_vm4, %v7522_v59, 0.0  ;;  %v325_v50 = vld [vmem:[%s9304_s29 + $0x1a0] sm:$0xff] }
 0x129   : > { %v7526_v3 = vpop.eup %7525  ;;  %v2638_v4 = vadd.f32 %v2637_v60, %v2636_v52  ;;  %v2650_v6 = vadd.f32 %v2649_v61, %v2648_v58  ;;  %v2663_v7 = vrot.slane %v2662_v2, 4  ;;  %v2669_v8 = vsel %vm2066_vm4, %v7524_v22, 0.0  ;;  %v326_v58 = vld [vmem:[%s9304_s29 + $0x1a8] sm:$0xff]  ;;  %v327_v61 = vld [vmem:[%s9304_s29 + $0x1b0] sm:$0xff] }
 0x12a   : > { %v2644_v15 = vrot.slane %v2643_v32, 2  ;;  %v2657_v40 = vadd.f32 %v2656_v1, %v2655_v11  ;;  %v2670_v10 = vrot.slane %v2669_v8, 4  ;;  %v2676_v63 = vsel %vm2066_vm4, %v7526_v3, 0.0  ;;  %v7528_v12 = vpop.eup %7527  ;;  %v328_v3 = vld [vmem:[%s9304_s29 + $0x1b8] sm:$0xff] }
 0x12b   : > { %v2639_v13 = vrot.slane %v2638_v4, 1  ;;  %v2651_v17 = vrot.slane %v2650_v6, 2  ;;  %v2664_v20 = vadd.f32 %v2663_v7, %v2662_v2  ;;  %v2677_v21 = vrot.slane %v2676_v63, 4  ;;  %v7530_v24 = vpop.eup %7529 }
 0x12c   : > { %v2645_v26 = vadd.f32 %v2644_v15, %v2643_v32  ;;  %v2658_v9 = vrot.slane %v2657_v40, 2  ;;  %v2671_v27 = vadd.f32 %v2670_v10, %v2669_v8  ;;  %v3946_v14 = vmul.f32 %v9361_v36, %v2633_v62  ;;  %v7532_v28 = vpop.eup %7531 }
 0x12d   : > { %v2640_v29 = vadd.f32 %v2639_v13, %v2638_v4  ;;  %v2652_v16 = vadd.f32 %v2651_v17, %v2650_v6  ;;  %v2665_v30 = vrot.slane %v2664_v20, 2  ;;  %v2678_v18 = vadd.f32 %v2677_v21, %v2676_v63 }
 0x12e   : > { %v2646_v33 = vrot.slane %v2645_v26, 1  ;;  %v2659_v19 = vadd.f32 %v2658_v9, %v2657_v40  ;;  %v2672_v23 = vrot.slane %v2671_v27, 2  ;;  %7533 = vlog2.f32 %v3946_v14 }
 0x12f   : > { %v2653_v34 = vrot.slane %v2652_v16, 1  ;;  %v2666_v35 = vadd.f32 %v2665_v30, %v2664_v20  ;;  %v2679_v37 = vrot.slane %v2678_v18, 2  ;;  %v3947_v38 = vmul.f32 %v9361_v36, %v2640_v29 }
 0x130   : > { %v2647_v39 = vadd.f32 %v2646_v33, %v2645_v26  ;;  %v2660_v41 = vrot.slane %v2659_v19, 1  ;;  %v2673_v42 = vadd.f32 %v2672_v23, %v2671_v27  ;;  %7535 = vlog2.f32 %v580_v54 }
 0x131   : > { %v2654_v43 = vadd.f32 %v2653_v34, %v2652_v16  ;;  %v2667_v44 = vrot.slane %v2666_v35, 1  ;;  %v2680_v25 = vadd.f32 %v2679_v37, %v2678_v18  ;;  %7537 = vlog2.f32 %v3947_v38 }
 0x132   : > { %v2661_v45 = vadd.f32 %v2660_v41, %v2659_v19  ;;  %v2674_v46 = vrot.slane %v2673_v42, 1  ;;  %v3948_v47 = vmul.f32 %v9361_v36, %v2647_v39  ;;  %v882_v54 = vmul.f32 0.6931472, %v7528_v12 }
 0x133   : > { %v2668_v31 = vadd.f32 %v2667_v44, %v2666_v35  ;;  %v2681_v48 = vrot.slane %v2680_v25, 1  ;;  %v3949_v49 = vmul.f32 %v9361_v36, %v2654_v43  ;;  %v581_v11 = vmax.f32 %v325_v50, 1e-06 }
 0x134   : > { %v7534_v51 = vpop.eup %7533  ;;  %v2675_v52 = vadd.f32 %v2674_v46, %v2673_v42  ;;  %v3950_v53 = vmul.f32 %v9361_v36, %v2661_v45  ;;  %7539 = vlog2.f32 %v3948_v47  ;;  %v884_v1 = vmul.f32 0.6931472, %v7530_v24 }
 0x135   : > { %v2682_v55 = vadd.f32 %v2681_v48, %v2680_v25  ;;  %v3951_v56 = vmul.f32 %v9361_v36, %v2668_v31  ;;  %v4283_v57 = vmul.f32 0.6931472, %v7534_v51  ;;  %7541 = vlog2.f32 %v3949_v49 }
 0x136   : > { %v7536_v59 = vpop.eup %7535  ;;  %v3952_v60 = vmul.f32 %v9361_v36, %v2675_v52  ;;  %7543 = vlog2.f32 %v3950_v53  ;;  %v582_v4 = vmax.f32 %v326_v58, 1e-06  ;;  %v1346_v6 = vmul.f32 %v882_v54, %v9299_v0 }
 0x137   : > { %v7538_v22 = vpop.eup %7537  ;;  %v3953_v62 = vmul.f32 %v9361_v36, %v2682_v55  ;;  %7545 = vlog2.f32 %v3951_v56  ;;  %v4715_v32 = vmul.f32 %v9419_v5, %v4283_v57  ;;  %v583_v8 = vmax.f32 %v327_v61, 1e-06 }
 0x138   : > { %v4285_v2 = vmul.f32 0.6931472, %v7538_v22  ;;  %7547 = vlog2.f32 %v3952_v60  ;;  %v886_v15 = vmul.f32 0.6931472, %v7532_v28  ;;  %v888_v63 = vmul.f32 0.6931472, %v7536_v59 }
 0x139   : > { %7549 = vlog2.f32 %v3953_v62  ;;  %v5051_v7 = vmul.f32 1.442695, %v4715_v32  ;;  %v584_v17 = vmax.f32 %v328_v3, 1e-06  ;;  %v1347_v20 = vmul.f32 %v884_v1, %v9299_v0 }
 0x13a   : > { %v7540_v40 = vpop.eup %7539  ;;  %v4716_v10 = vmul.f32 %v9419_v5, %v4285_v2  ;;  %7551 = vlog2.f32 %v581_v11  ;;  %v1650_v9 = vmul.f32 1.442695, %v1346_v6  ;;  %v1348_v29 = vmul.f32 %v886_v15, %v9299_v0 }
 0x13b   : > { %v7542_v12 = vpop.eup %7541  ;;  %v4287_v13 = vmul.f32 0.6931472, %v7540_v40  ;;  %7553 = vpow2.f32 %v5051_v7  ;;  %v1349_v33 = vmul.f32 %v888_v63, %v9299_v0  ;;  %v1652_v31 = vmul.f32 1.442695, %v1347_v20  ;;  %v289_v7 = vld [vmem:[%s9304_s29 + $0x80] sm:$0xff] }
 0x13c   : > { %v7544_v21 = vpop.eup %7543  ;;  %v4289_v24 = vmul.f32 0.6931472, %v7542_v12  ;;  %v5053_v26 = vmul.f32 1.442695, %v4716_v10  ;;  %7555 = vlog2.f32 %v582_v4  ;;  %v1654_v55 = vmul.f32 1.442695, %v1348_v29 }
 0x13d   : > { %v7546_v27 = vpop.eup %7545  ;;  %v4291_v14 = vmul.f32 0.6931472, %v7544_v21  ;;  %v4717_v28 = vmul.f32 %v9419_v5, %v4287_v13  ;;  %7557 = vlog2.f32 %v583_v8  ;;  %v1656_v59 = vmul.f32 1.442695, %v1349_v33  ;;  %v290_v10 = vld [vmem:[%s9304_s29 + $0x88] sm:$0xff] }
 0x13e   : > { %v7548_v16 = vpop.eup %7547  ;;  %v4293_v30 = vmul.f32 0.6931472, %v7546_v27  ;;  %v4718_v18 = vmul.f32 %v9419_v5, %v4289_v24  ;;  %7559 = vpow2.f32 %v5053_v26  ;;  %v291_v24 = vld [vmem:[%s9304_s29 + $0x90] sm:$0xff]  ;;  %v545_v26 = vmax.f32 %v289_v7, 1e-06 }
 0x13f   : > { %v7550_v19 = vpop.eup %7549  ;;  %v4295_v23 = vmul.f32 0.6931472, %v7548_v16  ;;  %v4719_v34 = vmul.f32 %v9419_v5, %v4291_v14  ;;  %v5055_v35 = vmul.f32 1.442695, %v4717_v28  ;;  %7561 = vlog2.f32 %v584_v17 }
 0x140   : > { %v7552_v37 = vpop.eup %7551  ;;  %v4297_v38 = vmul.f32 0.6931472, %v7550_v19  ;;  %v4720_v39 = vmul.f32 %v9419_v5, %v4293_v30  ;;  %v5057_v41 = vmul.f32 1.442695, %v4718_v18  ;;  %7563 = vpow2.f32 %v1650_v9  ;;  %v292_v30 = vld [vmem:[%s9304_s29 + $0x98] sm:$0xff] }
 0x141   : > { %v7554_v42 = vpop.eup %7553  ;;  %v4721_v43 = vmul.f32 %v9419_v5, %v4295_v23  ;;  %7565 = vpow2.f32 %v5055_v35  ;;  %v5059_v44 = vmul.f32 1.442695, %v4719_v34  ;;  %v890_v25 = vmul.f32 0.6931472, %v7552_v37 }
 0x142   : > { %v7556_v45 = vpop.eup %7555  ;;  %v4722_v46 = vmul.f32 %v9419_v5, %v4297_v38  ;;  %7567 = vpow2.f32 %v5057_v41  ;;  %v5061_v47 = vmul.f32 1.442695, %v4720_v39  ;;  %v546_v14 = vmax.f32 %v290_v10, 1e-06 }
 0x143   : > { %v7558_v48 = vpop.eup %7557  ;;  %7569 = vpow2.f32 %v5059_v44  ;;  %v5063_v49 = vmul.f32 1.442695, %v4721_v43  ;;  %v892_v50 = vmul.f32 0.6931472, %v7556_v45  ;;  %v1350_v51 = vmul.f32 %v890_v25, %v9299_v0 }
 0x144   : > { %v7560_v52 = vpop.eup %7559  ;;  %7571 = vpow2.f32 %v5061_v47  ;;  %v5065_v53 = vmul.f32 1.442695, %v4722_v46  ;;  %v894_v54 = vmul.f32 0.6931472, %v7558_v48  ;;  %v547_v19 = vmax.f32 %v291_v24, 1e-06 }
 0x145   : > { %v7562_v56 = vpop.eup %7561  ;;  %7573 = vpow2.f32 %v5063_v49  ;;  %v5736_v57 = vsel %vm5659_vm6, %v7560_v52, %v7554_v42  ;;  %v1351_v58 = vmul.f32 %v892_v50, %v9299_v0  ;;  %v1658_v22 = vmul.f32 1.442695, %v1350_v51 }
 0x146   : > { %v7564_v60 = vpop.eup %7563  ;;  %7575 = vpow2.f32 %v5065_v53  ;;  %v896_v61 = vmul.f32 0.6931472, %v7562_v56  ;;  %v1352_v11 = vmul.f32 %v894_v54, %v9299_v0  ;;  %v548_v42 = vmax.f32 %v292_v30, 1e-06 }
 0x147   : > { %v7566_v62 = vpop.eup %7565  ;;  %7577 = vpow2.f32 %v1652_v31  ;;  %v1660_v32 = vmul.f32 1.442695, %v1351_v58  ;;  %v2403_v1 = vsel %vm2066_vm4, %v7564_v60, 0.0 }
 0x148   : > { %v7568_v2 = vpop.eup %7567  ;;  %v5737_v3 = vsel %vm5661_vm7, %v7566_v62, %v5736_v57  ;;  %v1353_v4 = vmul.f32 %v896_v61, %v9299_v0  ;;  %7579 = vpow2.f32 %v1654_v55  ;;  %v1662_v6 = vmul.f32 1.442695, %v1352_v11 }
 0x149   : > { %v7570_v8 = vpop.eup %7569  ;;  %v5738_v15 = vsel %vm5663_vm8, %v7568_v2, %v5737_v3  ;;  %7581 = vpow2.f32 %v1656_v59  ;;  %v2404_v40 = vrot.slane %v2403_v1, 4 }
 0x14a   : > { %v7572_v63 = vpop.eup %7571  ;;  %v5739_v12 = vsel %vm5665_vm9, %v7570_v8, %v5738_v15  ;;  %7583 = vpow2.f32 %v1658_v22  ;;  %v1664_v13 = vmul.f32 1.442695, %v1353_v4 }
 0x14b   : > { %v7574_v17 = vpop.eup %7573  ;;  %v5740_v20 = vsel %vm5667_vm10, %v7572_v63, %v5739_v12  ;;  %7585 = vpow2.f32 %v1660_v32  ;;  %v2405_v21 = vadd.f32 %v2404_v40, %v2403_v1 }
 0x14c   : > { %v7576_v9 = vpop.eup %7575  ;;  %v5741_v27 = vsel %vm5669_vm11, %v7574_v17, %v5740_v20  ;;  %7587 = vpow2.f32 %v1662_v6 }
 0x14d   : > { %v7578_v28 = vpop.eup %7577  ;;  %v5742_v29 = vsel %vm5671_vm12, %v7576_v9, %v5741_v27  ;;  %7589 = vpow2.f32 %v1664_v13  ;;  %v2406_v16 = vrot.slane %v2405_v21, 2 }
 0x14e   : > { %v7580_v18 = vpop.eup %7579  ;;  %5988 = vxpose.xlu2.b32.cont [3/4] (short) (narrow) %v5742_v29, 16  ;;  %v2410_v33 = vsel %vm2066_vm4, %v7578_v28, 0.0  ;;  %7591 = vlog2.f32 %v545_v26  ;;  %v293_v29 = vld [vmem:[%s9304_s29 + $0xa0] sm:$0xff] }
 0x14f   : > { %v7582_v23 = vpop.eup %7581  ;;  %v2407_v34 = vadd.f32 %v2406_v16, %v2405_v21  ;;  %v2411_v35 = vrot.slane %v2410_v33, 4  ;;  %v2417_v37 = vsel %vm2066_vm4, %v7580_v18, 0.0  ;;  %7593 = vlog2.f32 %v546_v14 }
 0x150   : > { %v7584_v38 = vpop.eup %7583  ;;  %v2418_v39 = vrot.slane %v2417_v37, 4  ;;  %v2424_v41 = vsel %vm2066_vm4, %v7582_v23, 0.0  ;;  %7595 = vlog2.f32 %v547_v19 }
 0x151   : > { %v7586_v43 = vpop.eup %7585  ;;  %v2408_v44 = vrot.slane %v2407_v34, 1  ;;  %v2412_v25 = vadd.f32 %v2411_v35, %v2410_v33  ;;  %v2425_v45 = vrot.slane %v2424_v41, 4  ;;  %v2431_v46 = vsel %vm2066_vm4, %v7584_v38, 0.0 }
 0x152   : > { %v7588_v47 = vpop.eup %7587  ;;  %v2419_v31 = vadd.f32 %v2418_v39, %v2417_v37  ;;  %v2432_v48 = vrot.slane %v2431_v46, 4  ;;  %v2438_v49 = vsel %vm2066_vm4, %v7586_v43, 0.0  ;;  %v549_v39 = vmax.f32 %v293_v29, 1e-06 }
 0x153   : > { %v7590_v50 = vpop.eup %7589  ;;  %v2409_v51 = vadd.f32 %v2408_v44, %v2407_v34  ;;  %v2413_v52 = vrot.slane %v2412_v25, 2  ;;  %v2426_v53 = vadd.f32 %v2425_v45, %v2424_v41  ;;  %v2439_v54 = vrot.slane %v2438_v49, 4  ;;  %v294_v44 = vld [vmem:[%s9304_s29 + $0xa8] sm:$0xff] }
 0x154   : > { %v2420_v55 = vrot.slane %v2419_v31, 2  ;;  %v2433_v56 = vadd.f32 %v2432_v48, %v2431_v46  ;;  %v2445_v57 = vsel %vm2066_vm4, %v7588_v47, 0.0  ;;  %v2452_v58 = vsel %vm2066_vm4, %v7590_v50, 0.0  ;;  %v7592_v59 = vpop.eup %7591  ;;  %v295_v46 = vld [vmem:[%s9304_s29 + $0xb0] sm:$0xff] }
 0x155   : > { %v2414_v60 = vadd.f32 %v2413_v52, %v2412_v25  ;;  %v2427_v61 = vrot.slane %v2426_v53, 2  ;;  %v2440_v11 = vadd.f32 %v2439_v54, %v2438_v49  ;;  %v2446_v22 = vrot.slane %v2445_v57, 4  ;;  %v7594_v62 = vpop.eup %7593  ;;  %v296_v49 = vld [vmem:[%s9304_s29 + $0xb8] sm:$0xff] }
 0x156   : > { %v2421_v32 = vadd.f32 %v2420_v55, %v2419_v31  ;;  %v2434_v1 = vrot.slane %v2433_v56, 2  ;;  %v2453_v2 = vrot.slane %v2452_v58, 4  ;;  %v3914_v3 = vmul.f32 %v9361_v36, %v2409_v51  ;;  %v7596_v15 = vpop.eup %7595 }
 0x157   : > { %v2415_v4 = vrot.slane %v2414_v60, 1  ;;  %v2428_v6 = vadd.f32 %v2427_v61, %v2426_v53  ;;  %v2441_v7 = vrot.slane %v2440_v11, 2  ;;  %v2447_v8 = vadd.f32 %v2446_v22, %v2445_v57 }
 0x158   : > { %v2422_v40 = vrot.slane %v2421_v32, 1  ;;  %v2435_v10 = vadd.f32 %v2434_v1, %v2433_v56  ;;  %v2454_v63 = vadd.f32 %v2453_v2, %v2452_v58  ;;  %7597 = vlog2.f32 %v3914_v3 }
 0x159   : > { %v2416_v12 = vadd.f32 %v2415_v4, %v2414_v60  ;;  %v2429_v13 = vrot.slane %v2428_v6, 1  ;;  %v2442_v17 = vadd.f32 %v2441_v7, %v2440_v11  ;;  %v2448_v20 = vrot.slane %v2447_v8, 2 }
 0x15a   : > { %v2423_v21 = vadd.f32 %v2422_v40, %v2421_v32  ;;  %v2436_v24 = vrot.slane %v2435_v10, 1  ;;  %v2455_v26 = vrot.slane %v2454_v63, 2  ;;  %7599 = vlog2.f32 %v548_v42 }
 0x15b   : > { %v2430_v9 = vadd.f32 %v2429_v13, %v2428_v6  ;;  %v2443_v27 = vrot.slane %v2442_v17, 1  ;;  %v2449_v14 = vadd.f32 %v2448_v20, %v2447_v8  ;;  %v3915_v28 = vmul.f32 %v9361_v36, %v2416_v12 }
 0x15c   : > { %v2437_v16 = vadd.f32 %v2436_v24, %v2435_v10  ;;  %v2456_v30 = vadd.f32 %v2455_v26, %v2454_v63  ;;  %v3916_v18 = vmul.f32 %v9361_v36, %v2423_v21  ;;  %v818_v33 = vmul.f32 0.6931472, %v7592_v59 }
 0x15d   : > { %v2444_v19 = vadd.f32 %v2443_v27, %v2442_v17  ;;  %v2450_v23 = vrot.slane %v2449_v14, 1  ;;  %v3917_v34 = vmul.f32 %v9361_v36, %v2430_v9  ;;  %7601 = vlog2.f32 %v3915_v28 }
 0x15e   : > { %v7598_v35 = vpop.eup %7597  ;;  %v2457_v37 = vrot.slane %v2456_v30, 1  ;;  %v3918_v38 = vmul.f32 %v9361_v36, %v2437_v16  ;;  %7603 = vlog2.f32 %v3916_v18  ;;  %v820_v47 = vmul.f32 0.6931472, %v7594_v62 }
 0x15f   : > { %v2451_v41 = vadd.f32 %v2450_v23, %v2449_v14  ;;  %v3919_v42 = vmul.f32 %v9361_v36, %v2444_v19  ;;  %v4219_v43 = vmul.f32 0.6931472, %v7598_v35  ;;  %7605 = vlog2.f32 %v3917_v34 }
 0x160   : > { %v7600_v25 = vpop.eup %7599  ;;  %v2458_v45 = vadd.f32 %v2457_v37, %v2456_v30  ;;  %7607 = vlog2.f32 %v3918_v38  ;;  %v1314_v50 = vmul.f32 %v818_v33, %v9299_v0  ;;  %v550_v52 = vmax.f32 %v294_v44, 1e-06 }
 0x161   : > { %v3920_v31 = vmul.f32 %v9361_v36, %v2451_v41  ;;  %7609 = vlog2.f32 %v3919_v42  ;;  %v4683_v48 = vmul.f32 %v9419_v5, %v4219_v43  ;;  %v822_v53 = vmul.f32 0.6931472, %v7596_v15 }
 0x162   : > { %v3921_v51 = vmul.f32 %v9361_v36, %v2458_v45  ;;  %7611 = vlog2.f32 %v549_v39  ;;  %v551_v56 = vmax.f32 %v295_v46, 1e-06  ;;  %v824_v57 = vmul.f32 0.6931472, %v7600_v25 }
 0x163   : > { %v7602_v54 = vpop.eup %7601  ;;  %7613 = vlog2.f32 %v3920_v31  ;;  %v4987_v55 = vmul.f32 1.442695, %v4683_v48  ;;  %v552_v60 = vmax.f32 %v296_v49, 1e-06  ;;  %v1315_v22 = vmul.f32 %v820_v47, %v9299_v0 }
 0x164   : > { %v7604_v58 = vpop.eup %7603  ;;  %v4221_v59 = vmul.f32 0.6931472, %v7602_v54  ;;  %7615 = vlog2.f32 %v3921_v51  ;;  %v1586_v62 = vmul.f32 1.442695, %v1314_v50  ;;  %v1316_v3 = vmul.f32 %v822_v53, %v9299_v0 }
 0x165   : > { %v7606_v61 = vpop.eup %7605  ;;  %v4223_v11 = vmul.f32 0.6931472, %v7604_v58  ;;  %7617 = vpow2.f32 %v4987_v55  ;;  %v1317_v8 = vmul.f32 %v824_v57, %v9299_v0  ;;  %v1588_v29 = vmul.f32 1.442695, %v1315_v22 }
 0x166   : > { %v7608_v32 = vpop.eup %7607  ;;  %v4225_v1 = vmul.f32 0.6931472, %v7606_v61  ;;  %v4684_v2 = vmul.f32 %v9419_v5, %v4221_v59  ;;  %7619 = vlog2.f32 %v550_v52  ;;  %v1590_v35 = vmul.f32 1.442695, %v1316_v3 }
 0x167   : > { %v7610_v4 = vpop.eup %7609  ;;  %v4227_v6 = vmul.f32 0.6931472, %v7608_v32  ;;  %v4685_v7 = vmul.f32 %v9419_v5, %v4223_v11  ;;  %7621 = vlog2.f32 %v551_v56  ;;  %v1592_v41 = vmul.f32 1.442695, %v1317_v8  ;;  %v361_v56 = vld [vmem:[%s9304_s29 + $0x2c0] sm:$0xff] }
 0x168   : > { %v7612_v15 = vpop.eup %7611  ;;  %v4229_v40 = vmul.f32 0.6931472, %v7610_v4  ;;  %v4686_v10 = vmul.f32 %v9419_v5, %v4225_v1  ;;  %v4989_v63 = vmul.f32 1.442695, %v4684_v2  ;;  %7623 = vlog2.f32 %v552_v60  ;;  %v362_v60 = vld [vmem:[%s9304_s29 + $0x2c8] sm:$0xff] }
 0x169   : > { %v7614_v12 = vpop.eup %7613  ;;  %v4687_v13 = vmul.f32 %v9419_v5, %v4227_v6  ;;  %v4991_v17 = vmul.f32 1.442695, %v4685_v7  ;;  %v826_v20 = vmul.f32 0.6931472, %v7612_v15  ;;  %7625 = vpow2.f32 %v1586_v62  ;;  %v363_v62 = vld [vmem:[%s9304_s29 + $0x2d0] sm:$0xff]  ;;  %v9783_v7 = vld [vmem:[%s9304_s29 + $0x2d8] sm:$0xff] }
 0x16a   : > { %v7616_v21 = vpop.eup %7615  ;;  %v4231_v24 = vmul.f32 0.6931472, %v7614_v12  ;;  %v4688_v26 = vmul.f32 %v9419_v5, %v4229_v40  ;;  %7627 = vpow2.f32 %v4989_v63  ;;  %v4993_v9 = vmul.f32 1.442695, %v4686_v10 }
 0x16b   : > { %v7618_v27 = vpop.eup %7617  ;;  %v4233_v14 = vmul.f32 0.6931472, %v7616_v21  ;;  %7629 = vpow2.f32 %v4991_v17  ;;  %v4995_v28 = vmul.f32 1.442695, %v4687_v13  ;;  %v1318_v33 = vmul.f32 %v826_v20, %v9299_v0 }
 0x16c   : > { %v7620_v16 = vpop.eup %7619  ;;  %v4689_v30 = vmul.f32 %v9419_v5, %v4231_v24  ;;  %7631 = vpow2.f32 %v4993_v9  ;;  %v4997_v18 = vmul.f32 1.442695, %v4688_v26  ;;  %v617_v2 = vmax.f32 %v361_v56, 1e-06 }
 0x16d   : > { %v7622_v19 = vpop.eup %7621  ;;  %v4690_v23 = vmul.f32 %v9419_v5, %v4233_v14  ;;  %7633 = vpow2.f32 %v4995_v28  ;;  %v828_v34 = vmul.f32 0.6931472, %v7620_v16  ;;  %v1594_v47 = vmul.f32 1.442695, %v1318_v33 }
 0x16e   : > { %v7624_v37 = vpop.eup %7623  ;;  %7635 = vpow2.f32 %v4997_v18  ;;  %v4999_v38 = vmul.f32 1.442695, %v4689_v30  ;;  %v830_v39 = vmul.f32 0.6931472, %v7622_v19  ;;  %v618_v8 = vmax.f32 %v362_v60, 1e-06 }
 0x16f   : > { %v7626_v42 = vpop.eup %7625  ;;  %v5001_v43 = vmul.f32 1.442695, %v4690_v23  ;;  %v832_v44 = vmul.f32 0.6931472, %v7624_v37  ;;  %v1319_v25 = vmul.f32 %v828_v34, %v9299_v0  ;;  %7637 = vpow2.f32 %v1588_v29 }
 0x170   : > { %v7628_v45 = vpop.eup %7627  ;;  %7639 = vpow2.f32 %v4999_v38  ;;  %v1320_v46 = vmul.f32 %v830_v39, %v9299_v0  ;;  %v2179_v31 = vsel %vm2066_vm4, %v7626_v42, 0.0  ;;  %v619_v63 = vmax.f32 %v363_v62, 1e-06 }
 0x171   : > { %v7630_v48 = vpop.eup %7629  ;;  %7641 = vpow2.f32 %v5001_v43  ;;  %v5708_v49 = vsel %vm5659_vm6, %v7628_v45, %v7618_v27  ;;  %v1321_v50 = vmul.f32 %v832_v44, %v9299_v0  ;;  %v1596_v51 = vmul.f32 1.442695, %v1319_v25 }
 0x172   : > { %v7632_v52 = vpop.eup %7631  ;;  %v5709_v53 = vsel %vm5661_vm7, %v7630_v48, %v5708_v49  ;;  %7643 = vpow2.f32 %v1590_v35  ;;  %v1598_v54 = vmul.f32 1.442695, %v1320_v46  ;;  %v2180_v55 = vrot.slane %v2179_v31, 4 }
 0x173   : > { %v7634_v57 = vpop.eup %7633  ;;  %v5710_v58 = vsel %vm5663_vm8, %v7632_v52, %v5709_v53  ;;  %7645 = vpow2.f32 %v1592_v41  ;;  %v1600_v59 = vmul.f32 1.442695, %v1321_v50  ;;  %v620_v26 = vmax.f32 %v9783_v7, 1e-06 }
 0x174   : > { %v7636_v61 = vpop.eup %7635  ;;  %v5711_v11 = vsel %vm5665_vm9, %v7634_v57, %v5710_v58  ;;  %7647 = vpow2.f32 %v1594_v47  ;;  %v2181_v22 = vadd.f32 %v2180_v55, %v2179_v31 }
 0x175   : > { %v7638_v32 = vpop.eup %7637  ;;  %v5712_v1 = vsel %vm5667_vm10, %v7636_v61, %v5711_v11  ;;  %7649 = vpow2.f32 %v1596_v51 }
 0x176   : > { %v7640_v3 = vpop.eup %7639  ;;  %7651 = vpow2.f32 %v1598_v54  ;;  %v2182_v4 = vrot.slane %v2181_v22, 2  ;;  %v2186_v6 = vsel %vm2066_vm4, %v7638_v32, 0.0 }
 0x177   : > { %v7642_v15 = vpop.eup %7641  ;;  %v5713_v40 = vsel %vm5669_vm11, %v7640_v3, %v5712_v1  ;;  %7653 = vpow2.f32 %v1600_v59  ;;  %v2187_v10 = vrot.slane %v2186_v6, 4 }
 0x178   : > { %v7644_v12 = vpop.eup %7643  ;;  %v5714_v13 = vsel %vm5671_vm12, %v7642_v15, %v5713_v40  ;;  %v2183_v17 = vadd.f32 %v2182_v4, %v2181_v22  ;;  %7655 = vlog2.f32 %v617_v2 }
 0x179   : > { %v7646_v20 = vpop.eup %7645  ;;  %5956 = vxpose.xlu1.b32.cont [3/4] (short) (narrow) %v5714_v13, 16  ;;  %v2188_v21 = vadd.f32 %v2187_v10, %v2186_v6  ;;  %v2193_v24 = vsel %vm2066_vm4, %v7644_v12, 0.0  ;;  %7657 = vlog2.f32 %v618_v8 }
 0x17a   : > { %v7648_v9 = vpop.eup %7647  ;;  %v2184_v27 = vrot.slane %v2183_v17, 1  ;;  %v2194_v14 = vrot.slane %v2193_v24, 4  ;;  %v2200_v28 = vsel %vm2066_vm4, %v7646_v20, 0.0  ;;  %7659 = vlog2.f32 %v619_v63 }
 0x17b   : > { %v7650_v29 = vpop.eup %7649  ;;  %v2189_v16 = vrot.slane %v2188_v21, 2  ;;  %v2201_v30 = vrot.slane %v2200_v28, 4  ;;  %v2207_v18 = vsel %vm2066_vm4, %v7648_v9, 0.0 }
 0x17c   : > { %v7652_v33 = vpop.eup %7651  ;;  %v2185_v19 = vadd.f32 %v2184_v27, %v2183_v17  ;;  %v2195_v23 = vadd.f32 %v2194_v14, %v2193_v24  ;;  %v2208_v34 = vrot.slane %v2207_v18, 4  ;;  %v2214_v35 = vsel %vm2066_vm4, %v7650_v29, 0.0  ;;  %v365_v17 = vld [vmem:[%s9304_s29 + $0x2e0] sm:$0xff] }
 0x17d   : > { %v7654_v37 = vpop.eup %7653  ;;  %v2190_v38 = vadd.f32 %v2189_v16, %v2188_v21  ;;  %v2202_v39 = vadd.f32 %v2201_v30, %v2200_v28  ;;  %v2215_v41 = vrot.slane %v2214_v35, 4  ;;  %v2221_v42 = vsel %vm2066_vm4, %v7652_v33, 0.0  ;;  %v366_v28 = vld [vmem:[%s9304_s29 + $0x2e8] sm:$0xff]  ;;  %v367_v30 = vld [vmem:[%s9304_s29 + $0x2f0] sm:$0xff] }
 0x17e   : > { %v2196_v43 = vrot.slane %v2195_v23, 2  ;;  %v2209_v44 = vadd.f32 %v2208_v34, %v2207_v18  ;;  %v2222_v25 = vrot.slane %v2221_v42, 4  ;;  %v2228_v45 = vsel %vm2066_vm4, %v7654_v37, 0.0  ;;  %v7656_v46 = vpop.eup %7655  ;;  %v368_v37 = vld [vmem:[%s9304_s29 + $0x2f8] sm:$0xff] }
 0x17f   : > { %v2191_v47 = vrot.slane %v2190_v38, 1  ;;  %v2203_v31 = vrot.slane %v2202_v39, 2  ;;  %v2216_v48 = vadd.f32 %v2215_v41, %v2214_v35  ;;  %v2229_v49 = vrot.slane %v2228_v45, 4  ;;  %v7658_v50 = vpop.eup %7657 }
 0x180   : > { %v2197_v51 = vadd.f32 %v2196_v43, %v2195_v23  ;;  %v2210_v52 = vrot.slane %v2209_v44, 2  ;;  %v2223_v53 = vadd.f32 %v2222_v25, %v2221_v42  ;;  %v3882_v54 = vmul.f32 %v9361_v36, %v2185_v19  ;;  %v7660_v55 = vpop.eup %7659 }
 0x181   : > { %v2192_v56 = vadd.f32 %v2191_v47, %v2190_v38  ;;  %v2204_v57 = vadd.f32 %v2203_v31, %v2202_v39  ;;  %v2217_v58 = vrot.slane %v2216_v48, 2  ;;  %v2230_v59 = vadd.f32 %v2229_v49, %v2228_v45 }
 0x182   : > { %v2198_v60 = vrot.slane %v2197_v51, 1  ;;  %v2211_v61 = vadd.f32 %v2210_v52, %v2209_v44  ;;  %v2224_v11 = vrot.slane %v2223_v53, 2  ;;  %7661 = vlog2.f32 %v3882_v54 }
 0x183   : > { %v2205_v22 = vrot.slane %v2204_v57, 1  ;;  %v2218_v62 = vadd.f32 %v2217_v58, %v2216_v48  ;;  %v2231_v32 = vrot.slane %v2230_v59, 2  ;;  %v3883_v1 = vmul.f32 %v9361_v36, %v2192_v56 }
 0x184   : > { %v2199_v2 = vadd.f32 %v2198_v60, %v2197_v51  ;;  %v2212_v3 = vrot.slane %v2211_v61, 1  ;;  %v2225_v4 = vadd.f32 %v2224_v11, %v2223_v53  ;;  %7663 = vlog2.f32 %v620_v26 }
 0x185   : > { %v2206_v6 = vadd.f32 %v2205_v22, %v2204_v57  ;;  %v2219_v7 = vrot.slane %v2218_v62, 1  ;;  %v2232_v8 = vadd.f32 %v2231_v32, %v2230_v59  ;;  %7665 = vlog2.f32 %v3883_v1 }
 0x186   : > { %v2213_v15 = vadd.f32 %v2212_v3, %v2211_v61  ;;  %v2226_v40 = vrot.slane %v2225_v4, 1  ;;  %v3884_v10 = vmul.f32 %v9361_v36, %v2199_v2  ;;  %v962_v26 = vmul.f32 0.6931472, %v7656_v46 }
 0x187   : > { %v2220_v63 = vadd.f32 %v2219_v7, %v2218_v62  ;;  %v2233_v12 = vrot.slane %v2232_v8, 1  ;;  %v3885_v13 = vmul.f32 %v9361_v36, %v2206_v6  ;;  %v621_v18 = vmax.f32 %v365_v17, 1e-06 }
 0x188   : > { %v7662_v20 = vpop.eup %7661  ;;  %v2227_v21 = vadd.f32 %v2226_v40, %v2225_v4  ;;  %v3886_v24 = vmul.f32 %v9361_v36, %v2213_v15  ;;  %7667 = vlog2.f32 %v3884_v10  ;;  %v964_v34 = vmul.f32 0.6931472, %v7658_v50 }
 0x189   : > { %v2234_v9 = vadd.f32 %v2233_v12, %v2232_v8  ;;  %v3887_v27 = vmul.f32 %v9361_v36, %v2220_v63  ;;  %v4155_v14 = vmul.f32 0.6931472, %v7662_v20  ;;  %7669 = vlog2.f32 %v3885_v13 }
 0x18a   : > { %v7664_v29 = vpop.eup %7663  ;;  %v3888_v16 = vmul.f32 %v9361_v36, %v2227_v21  ;;  %7671 = vlog2.f32 %v3886_v24  ;;  %v622_v38 = vmax.f32 %v366_v28, 1e-06  ;;  %v1386_v39 = vmul.f32 %v962_v26, %v9299_v0 }
 0x18b   : > { %v7666_v33 = vpop.eup %7665  ;;  %v3889_v19 = vmul.f32 %v9361_v36, %v2234_v9  ;;  %7673 = vlog2.f32 %v3887_v27  ;;  %v4651_v23 = vmul.f32 %v9419_v5, %v4155_v14  ;;  %v623_v42 = vmax.f32 %v367_v30, 1e-06 }
 0x18c   : > { %v4157_v35 = vmul.f32 0.6931472, %v7666_v33  ;;  %7675 = vlog2.f32 %v3888_v16  ;;  %v966_v43 = vmul.f32 0.6931472, %v7660_v55  ;;  %v968_v45 = vmul.f32 0.6931472, %v7664_v29 }
 0x18d   : > { %7677 = vlog2.f32 %v3889_v19  ;;  %v4923_v41 = vmul.f32 1.442695, %v4651_v23  ;;  %v624_v31 = vmax.f32 %v368_v37, 1e-06  ;;  %v1387_v48 = vmul.f32 %v964_v34, %v9299_v0 }
 0x18e   : > { %v7668_v44 = vpop.eup %7667  ;;  %v4652_v25 = vmul.f32 %v9419_v5, %v4157_v35  ;;  %7679 = vlog2.f32 %v621_v18  ;;  %v1730_v52 = vmul.f32 1.442695, %v1386_v39  ;;  %v1388_v56 = vmul.f32 %v966_v43, %v9299_v0 }
 0x18f   : > { %v7670_v46 = vpop.eup %7669  ;;  %v4159_v47 = vmul.f32 0.6931472, %v7668_v44  ;;  %7681 = vpow2.f32 %v4923_v41  ;;  %v1389_v60 = vmul.f32 %v968_v45, %v9299_v0  ;;  %v1732_v63 = vmul.f32 1.442695, %v1387_v48  ;;  %v329_v41 = vld [vmem:[%s9304_s29 + $0x1c0] sm:$0xff] }
 0x190   : > { %v7672_v49 = vpop.eup %7671  ;;  %v4161_v50 = vmul.f32 0.6931472, %v7670_v46  ;;  %v4925_v51 = vmul.f32 1.442695, %v4652_v25  ;;  %7683 = vlog2.f32 %v622_v38  ;;  %v1734_v9 = vmul.f32 1.442695, %v1388_v56 }
 0x191   : > { %v7674_v53 = vpop.eup %7673  ;;  %v4163_v54 = vmul.f32 0.6931472, %v7672_v49  ;;  %v4653_v55 = vmul.f32 %v9419_v5, %v4159_v47  ;;  %7685 = vlog2.f32 %v623_v42  ;;  %v1736_v29 = vmul.f32 1.442695, %v1389_v60  ;;  %v330_v25 = vld [vmem:[%s9304_s29 + $0x1c8] sm:$0xff] }
 0x192   : > { %v7676_v57 = vpop.eup %7675  ;;  %v4165_v58 = vmul.f32 0.6931472, %v7674_v53  ;;  %v4654_v59 = vmul.f32 %v9419_v5, %v4161_v50  ;;  %7687 = vpow2.f32 %v4925_v51  ;;  %v331_v50 = vld [vmem:[%s9304_s29 + $0x1d0] sm:$0xff]  ;;  %v585_v51 = vmax.f32 %v329_v41, 1e-06 }
 0x193   : > { %v7678_v61 = vpop.eup %7677  ;;  %v4167_v11 = vmul.f32 0.6931472, %v7676_v57  ;;  %v4655_v22 = vmul.f32 %v9419_v5, %v4163_v54  ;;  %v4927_v62 = vmul.f32 1.442695, %v4653_v55  ;;  %7689 = vlog2.f32 %v624_v31 }
 0x194   : > { %v7680_v32 = vpop.eup %7679  ;;  %v4169_v1 = vmul.f32 0.6931472, %v7678_v61  ;;  %v4656_v2 = vmul.f32 %v9419_v5, %v4165_v58  ;;  %v4929_v3 = vmul.f32 1.442695, %v4654_v59  ;;  %7691 = vpow2.f32 %v1730_v52  ;;  %v332_v58 = vld [vmem:[%s9304_s29 + $0x1d8] sm:$0xff] }
 0x195   : > { %v7682_v4 = vpop.eup %7681  ;;  %v4657_v6 = vmul.f32 %v9419_v5, %v4167_v11  ;;  %7693 = vpow2.f32 %v4927_v62  ;;  %v4931_v7 = vmul.f32 1.442695, %v4655_v22  ;;  %v970_v8 = vmul.f32 0.6931472, %v7680_v32 }
 0x196   : > { %v7684_v15 = vpop.eup %7683  ;;  %v4658_v40 = vmul.f32 %v9419_v5, %v4169_v1  ;;  %7695 = vpow2.f32 %v4929_v3  ;;  %v4933_v10 = vmul.f32 1.442695, %v4656_v2  ;;  %v586_v54 = vmax.f32 %v330_v25, 1e-06 }
 0x197   : > { %v7686_v12 = vpop.eup %7685  ;;  %7697 = vpow2.f32 %v4931_v7  ;;  %v4935_v13 = vmul.f32 1.442695, %v4657_v6  ;;  %v972_v17 = vmul.f32 0.6931472, %v7684_v15  ;;  %v1390_v20 = vmul.f32 %v970_v8, %v9299_v0 }
 0x198   : > { %v7688_v21 = vpop.eup %7687  ;;  %7699 = vpow2.f32 %v4933_v10  ;;  %v4937_v24 = vmul.f32 1.442695, %v4658_v40  ;;  %v974_v26 = vmul.f32 0.6931472, %v7686_v12  ;;  %v587_v61 = vmax.f32 %v331_v50, 1e-06 }
 0x199   : > { %v7690_v27 = vpop.eup %7689  ;;  %7701 = vpow2.f32 %v4935_v13  ;;  %v5680_v14 = vsel %vm5659_vm6, %v7688_v21, %v7682_v4  ;;  %v1391_v28 = vmul.f32 %v972_v17, %v9299_v0  ;;  %v1738_v33 = vmul.f32 1.442695, %v1390_v20 }
 0x19a   : > { %v7692_v16 = vpop.eup %7691  ;;  %7703 = vpow2.f32 %v4937_v24  ;;  %v976_v30 = vmul.f32 0.6931472, %v7690_v27  ;;  %v1392_v18 = vmul.f32 %v974_v26, %v9299_v0  ;;  %v588_v4 = vmax.f32 %v332_v58, 1e-06 }
 0x19b   : > { %v7694_v19 = vpop.eup %7693  ;;  %7705 = vpow2.f32 %v1732_v63  ;;  %v1740_v23 = vmul.f32 1.442695, %v1391_v28  ;;  %v2683_v34 = vsel %vm2066_vm4, %v7692_v16, 0.0 }
 0x19c   : > { %v7696_v35 = vpop.eup %7695  ;;  %v5681_v37 = vsel %vm5661_vm7, %v7694_v19, %v5680_v14  ;;  %v1393_v38 = vmul.f32 %v976_v30, %v9299_v0  ;;  %7707 = vpow2.f32 %v1734_v9  ;;  %v1742_v39 = vmul.f32 1.442695, %v1392_v18 }
 0x19d   : > { %v7698_v42 = vpop.eup %7697  ;;  %v5682_v43 = vsel %vm5663_vm8, %v7696_v35, %v5681_v37  ;;  %7709 = vpow2.f32 %v1736_v29  ;;  %v2684_v44 = vrot.slane %v2683_v34, 4 }
 0x19e   : > { %v7700_v45 = vpop.eup %7699  ;;  %v5683_v46 = vsel %vm5665_vm9, %v7698_v42, %v5682_v43  ;;  %7711 = vpow2.f32 %v1738_v33  ;;  %v1744_v47 = vmul.f32 1.442695, %v1393_v38 }
 0x19f   : > { %v7702_v31 = vpop.eup %7701  ;;  %v5684_v48 = vsel %vm5667_vm10, %v7700_v45, %v5683_v46  ;;  %7713 = vpow2.f32 %v1740_v23  ;;  %v2685_v49 = vadd.f32 %v2684_v44, %v2683_v34 }
 0x1a0   : > { %v7704_v52 = vpop.eup %7703  ;;  %v5685_v53 = vsel %vm5669_vm11, %v7702_v31, %v5684_v48  ;;  %7715 = vpow2.f32 %v1742_v39 }
 0x1a1   : > { %v7706_v55 = vpop.eup %7705  ;;  %v5686_v56 = vsel %vm5671_vm12, %v7704_v52, %v5685_v53  ;;  %7717 = vpow2.f32 %v1744_v47  ;;  %v2686_v57 = vrot.slane %v2685_v49, 2 }
 0x1a2   : > { %v7708_v59 = vpop.eup %7707  ;;  %5924 = vxpose.xlu0.b32.cont [3/4] (short) (narrow) %v5686_v56, 16  ;;  %v2690_v60 = vsel %vm2066_vm4, %v7706_v55, 0.0  ;;  %7719 = vlog2.f32 %v585_v51  ;;  %v333_v56 = vld [vmem:[%s9304_s29 + $0x1e0] sm:$0xff] }
 0x1a3   : > { %v7710_v11 = vpop.eup %7709  ;;  %v2687_v22 = vadd.f32 %v2686_v57, %v2685_v49  ;;  %v2691_v62 = vrot.slane %v2690_v60, 4  ;;  %v2697_v32 = vsel %vm2066_vm4, %v7708_v59, 0.0  ;;  %7721 = vlog2.f32 %v586_v54 }
 0x1a4   : > { %v7712_v1 = vpop.eup %7711  ;;  %v2698_v2 = vrot.slane %v2697_v32, 4  ;;  %v2704_v3 = vsel %vm2066_vm4, %v7710_v11, 0.0  ;;  %7723 = vlog2.f32 %v587_v61 }
 0x1a5   : > { %v7714_v6 = vpop.eup %7713  ;;  %v2688_v7 = vrot.slane %v2687_v22, 1  ;;  %v2692_v8 = vadd.f32 %v2691_v62, %v2690_v60  ;;  %v2705_v15 = vrot.slane %v2704_v3, 4  ;;  %v2711_v40 = vsel %vm2066_vm4, %v7712_v1, 0.0 }
 0x1a6   : > { %v7716_v10 = vpop.eup %7715  ;;  %v2699_v63 = vadd.f32 %v2698_v2, %v2697_v32  ;;  %v2712_v12 = vrot.slane %v2711_v40, 4  ;;  %v2718_v13 = vsel %vm2066_vm4, %v7714_v6, 0.0  ;;  %v589_v2 = vmax.f32 %v333_v56, 1e-06 }
 0x1a7   : > { %v7718_v17 = vpop.eup %7717  ;;  %v2689_v20 = vadd.f32 %v2688_v7, %v2687_v22  ;;  %v2693_v21 = vrot.slane %v2692_v8, 2  ;;  %v2706_v24 = vadd.f32 %v2705_v15, %v2704_v3  ;;  %v2719_v26 = vrot.slane %v2718_v13, 4  ;;  %v334_v7 = vld [vmem:[%s9304_s29 + $0x1e8] sm:$0xff] }
 0x1a8   : > { %v2700_v9 = vrot.slane %v2699_v63, 2  ;;  %v2713_v27 = vadd.f32 %v2712_v12, %v2711_v40  ;;  %v2725_v14 = vsel %vm2066_vm4, %v7716_v10, 0.0  ;;  %v2732_v28 = vsel %vm2066_vm4, %v7718_v17, 0.0  ;;  %v7720_v29 = vpop.eup %7719  ;;  %v335_v40 = vld [vmem:[%s9304_s29 + $0x1f0] sm:$0xff] }
 0x1a9   : > { %v2694_v16 = vadd.f32 %v2693_v21, %v2692_v8  ;;  %v2707_v30 = vrot.slane %v2706_v24, 2  ;;  %v2720_v18 = vadd.f32 %v2719_v26, %v2718_v13  ;;  %v2726_v33 = vrot.slane %v2725_v14, 4  ;;  %v7722_v19 = vpop.eup %7721  ;;  %v336_v13 = vld [vmem:[%s9304_s29 + $0x1f8] sm:$0xff] }
 0x1aa   : > { %v2701_v23 = vadd.f32 %v2700_v9, %v2699_v63  ;;  %v2714_v34 = vrot.slane %v2713_v27, 2  ;;  %v2733_v35 = vrot.slane %v2732_v28, 4  ;;  %v3954_v37 = vmul.f32 %v9361_v36, %v2689_v20  ;;  %v7724_v43 = vpop.eup %7723 }
 0x1ab   : > { %v2695_v38 = vrot.slane %v2694_v16, 1  ;;  %v2708_v39 = vadd.f32 %v2707_v30, %v2706_v24  ;;  %v2721_v41 = vrot.slane %v2720_v18, 2  ;;  %v2727_v42 = vadd.f32 %v2726_v33, %v2725_v14 }
 0x1ac   : > { %v2702_v44 = vrot.slane %v2701_v23, 1  ;;  %v2715_v25 = vadd.f32 %v2714_v34, %v2713_v27  ;;  %v2734_v45 = vadd.f32 %v2733_v35, %v2732_v28  ;;  %7725 = vlog2.f32 %v3954_v37 }
 0x1ad   : > { %v2696_v46 = vadd.f32 %v2695_v38, %v2694_v16  ;;  %v2709_v47 = vrot.slane %v2708_v39, 1  ;;  %v2722_v31 = vadd.f32 %v2721_v41, %v2720_v18  ;;  %v2728_v48 = vrot.slane %v2727_v42, 2 }
 0x1ae   : > { %v2703_v49 = vadd.f32 %v2702_v44, %v2701_v23  ;;  %v2716_v50 = vrot.slane %v2715_v25, 1  ;;  %v2735_v51 = vrot.slane %v2734_v45, 2  ;;  %7727 = vlog2.f32 %v588_v4 }
 0x1af   : > { %v2710_v52 = vadd.f32 %v2709_v47, %v2708_v39  ;;  %v2723_v53 = vrot.slane %v2722_v31, 1  ;;  %v2729_v54 = vadd.f32 %v2728_v48, %v2727_v42  ;;  %v3955_v55 = vmul.f32 %v9361_v36, %v2696_v46 }
 0x1b0   : > { %v2717_v57 = vadd.f32 %v2716_v50, %v2715_v25  ;;  %v2736_v58 = vadd.f32 %v2735_v51, %v2734_v45  ;;  %v3956_v59 = vmul.f32 %v9361_v36, %v2703_v49  ;;  %v898_v60 = vmul.f32 0.6931472, %v7720_v29 }
 0x1b1   : > { %v2724_v61 = vadd.f32 %v2723_v53, %v2722_v31  ;;  %v2730_v11 = vrot.slane %v2729_v54, 1  ;;  %v3957_v22 = vmul.f32 %v9361_v36, %v2710_v52  ;;  %7729 = vlog2.f32 %v3955_v55 }
 0x1b2   : > { %v7726_v62 = vpop.eup %7725  ;;  %v2737_v32 = vrot.slane %v2736_v58, 1  ;;  %v3958_v1 = vmul.f32 %v9361_v36, %v2717_v57  ;;  %7731 = vlog2.f32 %v3956_v59  ;;  %v900_v10 = vmul.f32 0.6931472, %v7722_v19 }
 0x1b3   : > { %v2731_v3 = vadd.f32 %v2730_v11, %v2729_v54  ;;  %v3959_v4 = vmul.f32 %v9361_v36, %v2724_v61  ;;  %v4299_v6 = vmul.f32 0.6931472, %v7726_v62  ;;  %7733 = vlog2.f32 %v3957_v22 }
 0x1b4   : > { %v7728_v8 = vpop.eup %7727  ;;  %v2738_v15 = vadd.f32 %v2737_v32, %v2736_v58  ;;  %7735 = vlog2.f32 %v3958_v1  ;;  %v1354_v17 = vmul.f32 %v898_v60, %v9299_v0  ;;  %v590_v21 = vmax.f32 %v334_v7, 1e-06 }
 0x1b5   : > { %v3960_v63 = vmul.f32 %v9361_v36, %v2731_v3  ;;  %7737 = vlog2.f32 %v3959_v4  ;;  %v4723_v12 = vmul.f32 %v9419_v5, %v4299_v6  ;;  %v902_v24 = vmul.f32 0.6931472, %v7724_v43 }
 0x1b6   : > { %v3961_v20 = vmul.f32 %v9361_v36, %v2738_v15  ;;  %7739 = vlog2.f32 %v589_v2  ;;  %v591_v27 = vmax.f32 %v335_v40, 1e-06  ;;  %v904_v14 = vmul.f32 0.6931472, %v7728_v8 }
 0x1b7   : > { %v7730_v26 = vpop.eup %7729  ;;  %7741 = vlog2.f32 %v3960_v63  ;;  %v5067_v9 = vmul.f32 1.442695, %v4723_v12  ;;  %v592_v16 = vmax.f32 %v336_v13, 1e-06  ;;  %v1355_v33 = vmul.f32 %v900_v10, %v9299_v0 }
 0x1b8   : > { %v7732_v28 = vpop.eup %7731  ;;  %v4301_v29 = vmul.f32 0.6931472, %v7730_v26  ;;  %7743 = vlog2.f32 %v3961_v20  ;;  %v1666_v19 = vmul.f32 1.442695, %v1354_v17  ;;  %v1356_v37 = vmul.f32 %v902_v24, %v9299_v0 }
 0x1b9   : > { %v7734_v30 = vpop.eup %7733  ;;  %v4303_v18 = vmul.f32 0.6931472, %v7732_v28  ;;  %7745 = vpow2.f32 %v5067_v9  ;;  %v1357_v42 = vmul.f32 %v904_v14, %v9299_v0  ;;  %v1668_v56 = vmul.f32 1.442695, %v1355_v33 }
 0x1ba   : > { %v7736_v23 = vpop.eup %7735  ;;  %v4305_v34 = vmul.f32 0.6931472, %v7734_v30  ;;  %v4724_v35 = vmul.f32 %v9419_v5, %v4301_v29  ;;  %7747 = vlog2.f32 %v590_v21  ;;  %v1670_v62 = vmul.f32 1.442695, %v1356_v37 }
 0x1bb   : > { %v7738_v38 = vpop.eup %7737  ;;  %v4307_v39 = vmul.f32 0.6931472, %v7736_v23  ;;  %v4725_v41 = vmul.f32 %v9419_v5, %v4303_v18  ;;  %7749 = vlog2.f32 %v591_v27  ;;  %v1672_v3 = vmul.f32 1.442695, %v1357_v42  ;;  %v297_v27 = vld [vmem:[%s9304_s29 + $0xc0] sm:$0xff] }
 0x1bc   : > { %v7740_v43 = vpop.eup %7739  ;;  %v4309_v44 = vmul.f32 0.6931472, %v7738_v38  ;;  %v4726_v25 = vmul.f32 %v9419_v5, %v4305_v34  ;;  %v5069_v45 = vmul.f32 1.442695, %v4724_v35  ;;  %7751 = vlog2.f32 %v592_v16  ;;  %v298_v16 = vld [vmem:[%s9304_s29 + $0xc8] sm:$0xff] }
 0x1bd   : > { %v7742_v46 = vpop.eup %7741  ;;  %v4727_v47 = vmul.f32 %v9419_v5, %v4307_v39  ;;  %v5071_v31 = vmul.f32 1.442695, %v4725_v41  ;;  %v906_v48 = vmul.f32 0.6931472, %v7740_v43  ;;  %7753 = vpow2.f32 %v1666_v19  ;;  %v299_v19 = vld [vmem:[%s9304_s29 + $0xd0] sm:$0xff]  ;;  %v9880_v41 = vld [vmem:[%s9304_s29 + $0xd8] sm:$0xff] }
 0x1be   : > { %v7744_v49 = vpop.eup %7743  ;;  %v4311_v50 = vmul.f32 0.6931472, %v7742_v46  ;;  %v4728_v51 = vmul.f32 %v9419_v5, %v4309_v44  ;;  %7755 = vpow2.f32 %v5069_v45  ;;  %v5073_v52 = vmul.f32 1.442695, %v4726_v25 }
 0x1bf   : > { %v7746_v53 = vpop.eup %7745  ;;  %v4313_v54 = vmul.f32 0.6931472, %v7744_v49  ;;  %7757 = vpow2.f32 %v5071_v31  ;;  %v5075_v55 = vmul.f32 1.442695, %v4727_v47  ;;  %v1358_v60 = vmul.f32 %v906_v48, %v9299_v0 }
 0x1c0   : > { %v7748_v57 = vpop.eup %7747  ;;  %v4729_v58 = vmul.f32 %v9419_v5, %v4311_v50  ;;  %7759 = vpow2.f32 %v5073_v52  ;;  %v5077_v59 = vmul.f32 1.442695, %v4728_v51  ;;  %v553_v35 = vmax.f32 %v297_v27, 1e-06 }
 0x1c1   : > { %v7750_v61 = vpop.eup %7749  ;;  %v4730_v11 = vmul.f32 %v9419_v5, %v4313_v54  ;;  %7761 = vpow2.f32 %v5075_v55  ;;  %v908_v22 = vmul.f32 0.6931472, %v7748_v57  ;;  %v1674_v10 = vmul.f32 1.442695, %v1358_v60 }
 0x1c2   : > { %v7752_v32 = vpop.eup %7751  ;;  %7763 = vpow2.f32 %v5077_v59  ;;  %v5079_v1 = vmul.f32 1.442695, %v4729_v58  ;;  %v910_v2 = vmul.f32 0.6931472, %v7750_v61  ;;  %v554_v42 = vmax.f32 %v298_v16, 1e-06 }
 0x1c3   : > { %v7754_v4 = vpop.eup %7753  ;;  %v5081_v6 = vmul.f32 1.442695, %v4730_v11  ;;  %v912_v7 = vmul.f32 0.6931472, %v7752_v32  ;;  %v1359_v8 = vmul.f32 %v908_v22, %v9299_v0  ;;  %7765 = vpow2.f32 %v1668_v56 }
 0x1c4   : > { %v7756_v15 = vpop.eup %7755  ;;  %7767 = vpow2.f32 %v5079_v1  ;;  %v1360_v40 = vmul.f32 %v910_v2, %v9299_v0  ;;  %v2459_v63 = vsel %vm2066_vm4, %v7754_v4, 0.0  ;;  %v555_v45 = vmax.f32 %v299_v19, 1e-06 }
 0x1c5   : > { %v7758_v12 = vpop.eup %7757  ;;  %7769 = vpow2.f32 %v5081_v6  ;;  %v5743_v13 = vsel %vm5659_vm6, %v7756_v15, %v7746_v53  ;;  %v1361_v17 = vmul.f32 %v912_v7, %v9299_v0  ;;  %v1676_v20 = vmul.f32 1.442695, %v1359_v8 }
 0x1c6   : > { %v7760_v21 = vpop.eup %7759  ;;  %v5744_v24 = vsel %vm5661_vm7, %v7758_v12, %v5743_v13  ;;  %7771 = vpow2.f32 %v1670_v62  ;;  %v1678_v26 = vmul.f32 1.442695, %v1360_v40  ;;  %v2460_v9 = vrot.slane %v2459_v63, 4 }
 0x1c7   : > { %v7762_v14 = vpop.eup %7761  ;;  %v5745_v28 = vsel %vm5663_vm8, %v7760_v21, %v5744_v24  ;;  %7773 = vpow2.f32 %v1672_v3  ;;  %v1680_v29 = vmul.f32 1.442695, %v1361_v17  ;;  %v556_v51 = vmax.f32 %v9880_v41, 1e-06 }
 0x1c8   : > { %v7764_v30 = vpop.eup %7763  ;;  %v5746_v18 = vsel %vm5665_vm9, %v7762_v14, %v5745_v28  ;;  %7775 = vpow2.f32 %v1674_v10  ;;  %v2461_v33 = vadd.f32 %v2460_v9, %v2459_v63 }
 0x1c9   : > { %v7766_v23 = vpop.eup %7765  ;;  %v5747_v34 = vsel %vm5667_vm10, %v7764_v30, %v5746_v18  ;;  %7777 = vpow2.f32 %v1676_v20 }
 0x1ca   : > { %v7768_v37 = vpop.eup %7767  ;;  %7779 = vpow2.f32 %v1678_v26  ;;  %v2462_v38 = vrot.slane %v2461_v33, 2  ;;  %v2466_v39 = vsel %vm2066_vm4, %v7766_v23, 0.0 }
 0x1cb   : > { %v7770_v43 = vpop.eup %7769  ;;  %v5748_v44 = vsel %vm5669_vm11, %v7768_v37, %v5747_v34  ;;  %7781 = vpow2.f32 %v1680_v29  ;;  %v2467_v25 = vrot.slane %v2466_v39, 4 }
 0x1cc   : > { %v7772_v46 = vpop.eup %7771  ;;  %v5749_v47 = vsel %vm5671_vm12, %v7770_v43, %v5748_v44  ;;  %v2463_v31 = vadd.f32 %v2462_v38, %v2461_v33  ;;  %7783 = vlog2.f32 %v553_v35 }
 0x1cd   : > { %v7774_v48 = vpop.eup %7773  ;;  %5989 = vxpose.xlu2.b32.end [4/4] (short) (narrow) %v5749_v47, 16  ;;  %v2468_v49 = vadd.f32 %v2467_v25, %v2466_v39  ;;  %v2473_v50 = vsel %vm2066_vm4, %v7772_v46, 0.0  ;;  %7785 = vlog2.f32 %v554_v42 }
 0x1ce   : > { %v7776_v52 = vpop.eup %7775  ;;  %v2464_v53 = vrot.slane %v2463_v31, 1  ;;  %v2474_v54 = vrot.slane %v2473_v50, 4  ;;  %v2480_v55 = vsel %vm2066_vm4, %v7774_v48, 0.0  ;;  %7787 = vlog2.f32 %v555_v45 }
 0x1cf   : > { %v7778_v56 = vpop.eup %7777  ;;  %v2469_v57 = vrot.slane %v2468_v49, 2  ;;  %v2481_v58 = vrot.slane %v2480_v55, 4  ;;  %v2487_v59 = vsel %vm2066_vm4, %v7776_v52, 0.0 }
 0x1d0   : > { %v7780_v60 = vpop.eup %7779  ;;  %v2465_v61 = vadd.f32 %v2464_v53, %v2463_v31  ;;  %v2475_v11 = vadd.f32 %v2474_v54, %v2473_v50  ;;  %v2488_v22 = vrot.slane %v2487_v59, 4  ;;  %v2494_v62 = vsel %vm2066_vm4, %v7778_v56, 0.0  ;;  %v301_v31 = vld [vmem:[%s9304_s29 + $0xe0] sm:$0xff] }
 0x1d1   : > { %v7782_v32 = vpop.eup %7781  ;;  %v2470_v1 = vadd.f32 %v2469_v57, %v2468_v49  ;;  %v2482_v2 = vadd.f32 %v2481_v58, %v2480_v55  ;;  %v2495_v3 = vrot.slane %v2494_v62, 4  ;;  %v2501_v4 = vsel %vm2066_vm4, %v7780_v60, 0.0  ;;  %v302_v55 = vld [vmem:[%s9304_s29 + $0xe8] sm:$0xff]  ;;  %v303_v58 = vld [vmem:[%s9304_s29 + $0xf0] sm:$0xff] }
 0x1d2   : > { %v2476_v6 = vrot.slane %v2475_v11, 2  ;;  %v2489_v7 = vadd.f32 %v2488_v22, %v2487_v59  ;;  %v2502_v8 = vrot.slane %v2501_v4, 4  ;;  %v2508_v15 = vsel %vm2066_vm4, %v7782_v32, 0.0  ;;  %v7784_v40 = vpop.eup %7783  ;;  %v304_v32 = vld [vmem:[%s9304_s29 + $0xf8] sm:$0xff] }
 0x1d3   : > { %v2471_v10 = vrot.slane %v2470_v1, 1  ;;  %v2483_v63 = vrot.slane %v2482_v2, 2  ;;  %v2496_v12 = vadd.f32 %v2495_v3, %v2494_v62  ;;  %v2509_v13 = vrot.slane %v2508_v15, 4  ;;  %v7786_v17 = vpop.eup %7785 }
 0x1d4   : > { %v2477_v20 = vadd.f32 %v2476_v6, %v2475_v11  ;;  %v2490_v21 = vrot.slane %v2489_v7, 2  ;;  %v2503_v24 = vadd.f32 %v2502_v8, %v2501_v4  ;;  %v3922_v26 = vmul.f32 %v9361_v36, %v2465_v61  ;;  %v7788_v9 = vpop.eup %7787 }
 0x1d5   : > { %v2472_v27 = vadd.f32 %v2471_v10, %v2470_v1  ;;  %v2484_v14 = vadd.f32 %v2483_v63, %v2482_v2  ;;  %v2497_v28 = vrot.slane %v2496_v12, 2  ;;  %v2510_v29 = vadd.f32 %v2509_v13, %v2508_v15 }
 0x1d6   : > { %v2478_v16 = vrot.slane %v2477_v20, 1  ;;  %v2491_v30 = vadd.f32 %v2490_v21, %v2489_v7  ;;  %v2504_v18 = vrot.slane %v2503_v24, 2  ;;  %7789 = vlog2.f32 %v3922_v26 }
 0x1d7   : > { %v2485_v33 = vrot.slane %v2484_v14, 1  ;;  %v2498_v19 = vadd.f32 %v2497_v28, %v2496_v12  ;;  %v2511_v23 = vrot.slane %v2510_v29, 2  ;;  %v3923_v34 = vmul.f32 %v9361_v36, %v2472_v27 }
 0x1d8   : > { %v2479_v35 = vadd.f32 %v2478_v16, %v2477_v20  ;;  %v2492_v37 = vrot.slane %v2491_v30, 1  ;;  %v2505_v38 = vadd.f32 %v2504_v18, %v2503_v24  ;;  %7791 = vlog2.f32 %v556_v51 }
 0x1d9   : > { %v2486_v39 = vadd.f32 %v2485_v33, %v2484_v14  ;;  %v2499_v41 = vrot.slane %v2498_v19, 1  ;;  %v2512_v42 = vadd.f32 %v2511_v23, %v2510_v29  ;;  %7793 = vlog2.f32 %v3923_v34 }
 0x1da   : > { %v2493_v43 = vadd.f32 %v2492_v37, %v2491_v30  ;;  %v2506_v44 = vrot.slane %v2505_v38, 1  ;;  %v3924_v25 = vmul.f32 %v9361_v36, %v2479_v35  ;;  %v834_v51 = vmul.f32 0.6931472, %v7784_v40 }
 0x1db   : > { %v2500_v45 = vadd.f32 %v2499_v41, %v2498_v19  ;;  %v2513_v46 = vrot.slane %v2512_v42, 1  ;;  %v3925_v47 = vmul.f32 %v9361_v36, %v2486_v39  ;;  %v557_v59 = vmax.f32 %v301_v31, 1e-06 }
 0x1dc   : > { %v7790_v48 = vpop.eup %7789  ;;  %v2507_v49 = vadd.f32 %v2506_v44, %v2505_v38  ;;  %v3926_v50 = vmul.f32 %v9361_v36, %v2493_v43  ;;  %7795 = vlog2.f32 %v3924_v25  ;;  %v836_v22 = vmul.f32 0.6931472, %v7786_v17 }
 0x1dd   : > { %v2514_v52 = vadd.f32 %v2513_v46, %v2512_v42  ;;  %v3927_v53 = vmul.f32 %v9361_v36, %v2500_v45  ;;  %v4235_v54 = vmul.f32 0.6931472, %v7790_v48  ;;  %7797 = vlog2.f32 %v3925_v47 }
 0x1de   : > { %v7792_v56 = vpop.eup %7791  ;;  %v3928_v57 = vmul.f32 %v9361_v36, %v2507_v49  ;;  %7799 = vlog2.f32 %v3926_v50  ;;  %v558_v1 = vmax.f32 %v302_v55, 1e-06  ;;  %v1322_v2 = vmul.f32 %v834_v51, %v9299_v0 }
 0x1df   : > { %v7794_v60 = vpop.eup %7793  ;;  %v3929_v61 = vmul.f32 %v9361_v36, %v2514_v52  ;;  %7801 = vlog2.f32 %v3927_v53  ;;  %v4691_v11 = vmul.f32 %v9419_v5, %v4235_v54  ;;  %v559_v4 = vmax.f32 %v303_v58, 1e-06 }
 0x1e0   : > { %v4237_v62 = vmul.f32 0.6931472, %v7794_v60  ;;  %7803 = vlog2.f32 %v3928_v57  ;;  %v838_v6 = vmul.f32 0.6931472, %v7788_v9  ;;  %v840_v15 = vmul.f32 0.6931472, %v7792_v56 }
 0x1e1   : > { %7805 = vlog2.f32 %v3929_v61  ;;  %v5003_v3 = vmul.f32 1.442695, %v4691_v11  ;;  %v560_v63 = vmax.f32 %v304_v32, 1e-06  ;;  %v1323_v12 = vmul.f32 %v836_v22, %v9299_v0 }
 0x1e2   : > { %v7796_v7 = vpop.eup %7795  ;;  %v4692_v8 = vmul.f32 %v9419_v5, %v4237_v62  ;;  %7807 = vlog2.f32 %v557_v59  ;;  %v1602_v21 = vmul.f32 1.442695, %v1322_v2  ;;  %v1324_v27 = vmul.f32 %v838_v6, %v9299_v0 }
 0x1e3   : > { %v7798_v40 = vpop.eup %7797  ;;  %v4239_v10 = vmul.f32 0.6931472, %v7796_v7  ;;  %7809 = vpow2.f32 %v5003_v3  ;;  %v1325_v16 = vmul.f32 %v840_v15, %v9299_v0  ;;  %v1604_v45 = vmul.f32 1.442695, %v1323_v12  ;;  %v433_v3 = vld [vmem:[%s9304_s29 + $0x500] sm:$0xff] }
 0x1e4   : > { %v7800_v13 = vpop.eup %7799  ;;  %v4241_v17 = vmul.f32 0.6931472, %v7798_v40  ;;  %v5005_v20 = vmul.f32 1.442695, %v4692_v8  ;;  %7811 = vlog2.f32 %v558_v1  ;;  %v1606_v52 = vmul.f32 1.442695, %v1324_v27 }
 0x1e5   : > { %v7802_v24 = vpop.eup %7801  ;;  %v4243_v26 = vmul.f32 0.6931472, %v7800_v13  ;;  %v4693_v9 = vmul.f32 %v9419_v5, %v4239_v10  ;;  %7813 = vlog2.f32 %v559_v4  ;;  %v1608_v56 = vmul.f32 1.442695, %v1325_v16  ;;  %v434_v8 = vld [vmem:[%s9304_s29 + $0x508] sm:$0xff] }
 0x1e6   : > { %v7804_v14 = vpop.eup %7803  ;;  %v4245_v28 = vmul.f32 0.6931472, %v7802_v24  ;;  %v4694_v29 = vmul.f32 %v9419_v5, %v4241_v17  ;;  %7815 = vpow2.f32 %v5005_v20  ;;  %v435_v17 = vld [vmem:[%s9304_s29 + $0x510] sm:$0xff]  ;;  %v689_v20 = vmax.f32 %v433_v3, 1e-06 }
 0x1e7   : > { %v7806_v30 = vpop.eup %7805  ;;  %v4247_v18 = vmul.f32 0.6931472, %v7804_v14  ;;  %v4695_v33 = vmul.f32 %v9419_v5, %v4243_v26  ;;  %v5007_v19 = vmul.f32 1.442695, %v4693_v9  ;;  %7817 = vlog2.f32 %v560_v63 }
 0x1e8   : > { %v7808_v23 = vpop.eup %7807  ;;  %v4249_v34 = vmul.f32 0.6931472, %v7806_v30  ;;  %v4696_v35 = vmul.f32 %v9419_v5, %v4245_v28  ;;  %v5009_v37 = vmul.f32 1.442695, %v4694_v29  ;;  %7819 = vpow2.f32 %v1602_v21  ;;  %v436_v28 = vld [vmem:[%s9304_s29 + $0x518] sm:$0xff] }
 0x1e9   : > { %v7810_v38 = vpop.eup %7809  ;;  %v4697_v39 = vmul.f32 %v9419_v5, %v4247_v18  ;;  %7821 = vpow2.f32 %v5007_v19  ;;  %v5011_v41 = vmul.f32 1.442695, %v4695_v33  ;;  %v842_v42 = vmul.f32 0.6931472, %v7808_v23 }
 0x1ea   : > { %v7812_v43 = vpop.eup %7811  ;;  %v4698_v44 = vmul.f32 %v9419_v5, %v4249_v34  ;;  %7823 = vpow2.f32 %v5009_v37  ;;  %v5013_v25 = vmul.f32 1.442695, %v4696_v35  ;;  %v690_v26 = vmax.f32 %v434_v8, 1e-06 }
 0x1eb   : > { %v7814_v46 = vpop.eup %7813  ;;  %7825 = vpow2.f32 %v5011_v41  ;;  %v5015_v47 = vmul.f32 1.442695, %v4697_v39  ;;  %v844_v31 = vmul.f32 0.6931472, %v7812_v43  ;;  %v1326_v48 = vmul.f32 %v842_v42, %v9299_v0 }
 0x1ec   : > { %v7816_v49 = vpop.eup %7815  ;;  %7827 = vpow2.f32 %v5013_v25  ;;  %v5017_v50 = vmul.f32 1.442695, %v4698_v44  ;;  %v846_v51 = vmul.f32 0.6931472, %v7814_v46  ;;  %v691_v30 = vmax.f32 %v435_v17, 1e-06 }
 0x1ed   : > { %v7818_v53 = vpop.eup %7817  ;;  %7829 = vpow2.f32 %v5015_v47  ;;  %v5715_v54 = vsel %vm5659_vm6, %v7816_v49, %v7810_v38  ;;  %v1327_v55 = vmul.f32 %v844_v31, %v9299_v0  ;;  %v1610_v60 = vmul.f32 1.442695, %v1326_v48 }
 0x1ee   : > { %v7820_v57 = vpop.eup %7819  ;;  %7831 = vpow2.f32 %v5017_v50  ;;  %v848_v58 = vmul.f32 0.6931472, %v7818_v53  ;;  %v1328_v59 = vmul.f32 %v846_v51, %v9299_v0  ;;  %v692_v38 = vmax.f32 %v436_v28, 1e-06 }
 0x1ef   : > { %v7822_v61 = vpop.eup %7821  ;;  %7833 = vpow2.f32 %v1604_v45  ;;  %v1612_v11 = vmul.f32 1.442695, %v1327_v55  ;;  %v2235_v22 = vsel %vm2066_vm4, %v7820_v57, 0.0 }
 0x1f0   : > { %v7824_v62 = vpop.eup %7823  ;;  %v5716_v32 = vsel %vm5661_vm7, %v7822_v61, %v5715_v54  ;;  %v1329_v1 = vmul.f32 %v848_v58, %v9299_v0  ;;  %7835 = vpow2.f32 %v1606_v52  ;;  %v1614_v2 = vmul.f32 1.442695, %v1328_v59 }
 0x1f1   : > { %v7826_v4 = vpop.eup %7825  ;;  %v5717_v6 = vsel %vm5663_vm8, %v7824_v62, %v5716_v32  ;;  %7837 = vpow2.f32 %v1608_v56  ;;  %v2236_v7 = vrot.slane %v2235_v22, 4 }
 0x1f2   : > { %v7828_v15 = vpop.eup %7827  ;;  %v5718_v40 = vsel %vm5665_vm9, %v7826_v4, %v5717_v6  ;;  %7839 = vpow2.f32 %v1610_v60  ;;  %v1616_v10 = vmul.f32 1.442695, %v1329_v1 }
 0x1f3   : > { %v7830_v63 = vpop.eup %7829  ;;  %v5719_v12 = vsel %vm5667_vm10, %v7828_v15, %v5718_v40  ;;  %7841 = vpow2.f32 %v1612_v11  ;;  %v2237_v13 = vadd.f32 %v2236_v7, %v2235_v22 }
 0x1f4   : > { %v7832_v21 = vpop.eup %7831  ;;  %v5720_v24 = vsel %vm5669_vm11, %v7830_v63, %v5719_v12  ;;  %7843 = vpow2.f32 %v1614_v2 }
 0x1f5   : > { %v7834_v9 = vpop.eup %7833  ;;  %v5721_v27 = vsel %vm5671_vm12, %v7832_v21, %v5720_v24  ;;  %7845 = vpow2.f32 %v1616_v10  ;;  %v2238_v14 = vrot.slane %v2237_v13, 2 }
 0x1f6   : > { %v7836_v29 = vpop.eup %7835  ;;  %5957 = vxpose.xlu1.b32.end [4/4] (short) (narrow) %v5721_v27, 16  ;;  %v2242_v16 = vsel %vm2066_vm4, %v7834_v9, 0.0  ;;  %7847 = vlog2.f32 %v689_v20  ;;  %v437_v27 = vld [vmem:[%s9304_s29 + $0x520] sm:$0xff] }
 0x1f7   : > { %v7838_v18 = vpop.eup %7837  ;;  %v2239_v33 = vadd.f32 %v2238_v14, %v2237_v13  ;;  %v2243_v19 = vrot.slane %v2242_v16, 4  ;;  %v2249_v23 = vsel %vm2066_vm4, %v7836_v29, 0.0  ;;  %7849 = vlog2.f32 %v690_v26 }
 0x1f8   : > { %v7840_v34 = vpop.eup %7839  ;;  %v2250_v35 = vrot.slane %v2249_v23, 4  ;;  %v2256_v37 = vsel %vm2066_vm4, %v7838_v18, 0.0  ;;  %7851 = vlog2.f32 %v691_v30 }
 0x1f9   : > { %v7842_v39 = vpop.eup %7841  ;;  %v2240_v41 = vrot.slane %v2239_v33, 1  ;;  %v2244_v42 = vadd.f32 %v2243_v19, %v2242_v16  ;;  %v2257_v43 = vrot.slane %v2256_v37, 4  ;;  %v2263_v44 = vsel %vm2066_vm4, %v7840_v34, 0.0 }
 0x1fa   : > { %v7844_v25 = vpop.eup %7843  ;;  %v2251_v45 = vadd.f32 %v2250_v35, %v2249_v23  ;;  %v2264_v46 = vrot.slane %v2263_v44, 4  ;;  %v2270_v47 = vsel %vm2066_vm4, %v7842_v39, 0.0  ;;  %v693_v35 = vmax.f32 %v437_v27, 1e-06 }
 0x1fb   : > { %v7846_v31 = vpop.eup %7845  ;;  %v2241_v48 = vadd.f32 %v2240_v41, %v2239_v33  ;;  %v2245_v49 = vrot.slane %v2244_v42, 2  ;;  %v2258_v50 = vadd.f32 %v2257_v43, %v2256_v37  ;;  %v2271_v51 = vrot.slane %v2270_v47, 4  ;;  %v438_v41 = vld [vmem:[%s9304_s29 + $0x528] sm:$0xff] }
 0x1fc   : > { %v2252_v52 = vrot.slane %v2251_v45, 2  ;;  %v2265_v53 = vadd.f32 %v2264_v46, %v2263_v44  ;;  %v2277_v54 = vsel %vm2066_vm4, %v7844_v25, 0.0  ;;  %v2284_v55 = vsel %vm2066_vm4, %v7846_v31, 0.0  ;;  %v7848_v56 = vpop.eup %7847  ;;  %v439_v44 = vld [vmem:[%s9304_s29 + $0x530] sm:$0xff] }
 0x1fd   : > { %v2246_v57 = vadd.f32 %v2245_v49, %v2244_v42  ;;  %v2259_v58 = vrot.slane %v2258_v50, 2  ;;  %v2272_v59 = vadd.f32 %v2271_v51, %v2270_v47  ;;  %v2278_v60 = vrot.slane %v2277_v54, 4  ;;  %v7850_v61 = vpop.eup %7849  ;;  %v440_v47 = vld [vmem:[%s9304_s29 + $0x538] sm:$0xff] }
 0x1fe   : > { %v2253_v11 = vadd.f32 %v2252_v52, %v2251_v45  ;;  %v2266_v22 = vrot.slane %v2265_v53, 2  ;;  %v2285_v62 = vrot.slane %v2284_v55, 4  ;;  %v3890_v32 = vmul.f32 %v9361_v36, %v2241_v48  ;;  %v7852_v6 = vpop.eup %7851 }
 0x1ff   : > { %v2247_v1 = vrot.slane %v2246_v57, 1  ;;  %v2260_v2 = vadd.f32 %v2259_v58, %v2258_v50  ;;  %v2273_v3 = vrot.slane %v2272_v59, 2  ;;  %v2279_v4 = vadd.f32 %v2278_v60, %v2277_v54 }
 0x200   : > { %v2254_v7 = vrot.slane %v2253_v11, 1  ;;  %v2267_v8 = vadd.f32 %v2266_v22, %v2265_v53  ;;  %v2286_v15 = vadd.f32 %v2285_v62, %v2284_v55  ;;  %7853 = vlog2.f32 %v3890_v32 }
 0x201   : > { %v2248_v40 = vadd.f32 %v2247_v1, %v2246_v57  ;;  %v2261_v10 = vrot.slane %v2260_v2, 1  ;;  %v2274_v63 = vadd.f32 %v2273_v3, %v2272_v59  ;;  %v2280_v12 = vrot.slane %v2279_v4, 2 }
 0x202   : > { %v2255_v13 = vadd.f32 %v2254_v7, %v2253_v11  ;;  %v2268_v17 = vrot.slane %v2267_v8, 1  ;;  %v2287_v20 = vrot.slane %v2286_v15, 2  ;;  %7855 = vlog2.f32 %v692_v38 }
 0x203   : > { %v2262_v21 = vadd.f32 %v2261_v10, %v2260_v2  ;;  %v2275_v24 = vrot.slane %v2274_v63, 1  ;;  %v2281_v26 = vadd.f32 %v2280_v12, %v2279_v4  ;;  %v3891_v9 = vmul.f32 %v9361_v36, %v2248_v40 }
 0x204   : > { %v2269_v14 = vadd.f32 %v2268_v17, %v2267_v8  ;;  %v2288_v28 = vadd.f32 %v2287_v20, %v2286_v15  ;;  %v3892_v29 = vmul.f32 %v9361_v36, %v2255_v13  ;;  %v1106_v16 = vmul.f32 0.6931472, %v7848_v56 }
 0x205   : > { %v2276_v30 = vadd.f32 %v2275_v24, %v2274_v63  ;;  %v2282_v18 = vrot.slane %v2281_v26, 1  ;;  %v3893_v33 = vmul.f32 %v9361_v36, %v2262_v21  ;;  %7857 = vlog2.f32 %v3891_v9 }
 0x206   : > { %v7854_v19 = vpop.eup %7853  ;;  %v2289_v23 = vrot.slane %v2288_v28, 1  ;;  %v3894_v34 = vmul.f32 %v9361_v36, %v2269_v14  ;;  %7859 = vlog2.f32 %v3892_v29  ;;  %v1108_v25 = vmul.f32 0.6931472, %v7850_v61 }
 0x207   : > { %v2283_v37 = vadd.f32 %v2282_v18, %v2281_v26  ;;  %v3895_v38 = vmul.f32 %v9361_v36, %v2276_v30  ;;  %v4171_v39 = vmul.f32 0.6931472, %v7854_v19  ;;  %7861 = vlog2.f32 %v3893_v33 }
 0x208   : > { %v7856_v42 = vpop.eup %7855  ;;  %v2290_v43 = vadd.f32 %v2289_v23, %v2288_v28  ;;  %7863 = vlog2.f32 %v3894_v34  ;;  %v1458_v31 = vmul.f32 %v1106_v16, %v9299_v0  ;;  %v694_v49 = vmax.f32 %v438_v41, 1e-06 }
 0x209   : > { %v3896_v45 = vmul.f32 %v9361_v36, %v2283_v37  ;;  %7865 = vlog2.f32 %v3895_v38  ;;  %v4659_v46 = vmul.f32 %v9419_v5, %v4171_v39  ;;  %v1110_v50 = vmul.f32 0.6931472, %v7852_v6 }
 0x20a   : > { %v3897_v48 = vmul.f32 %v9361_v36, %v2290_v43  ;;  %7867 = vlog2.f32 %v693_v35  ;;  %v695_v53 = vmax.f32 %v439_v44, 1e-06  ;;  %v1112_v54 = vmul.f32 0.6931472, %v7856_v42 }
 0x20b   : > { %v7858_v51 = vpop.eup %7857  ;;  %7869 = vlog2.f32 %v3896_v45  ;;  %v4939_v52 = vmul.f32 1.442695, %v4659_v46  ;;  %v696_v57 = vmax.f32 %v440_v47, 1e-06  ;;  %v1459_v60 = vmul.f32 %v1108_v25, %v9299_v0 }
 0x20c   : > { %v7860_v55 = vpop.eup %7859  ;;  %v4173_v56 = vmul.f32 0.6931472, %v7858_v51  ;;  %7871 = vlog2.f32 %v3897_v48  ;;  %v1874_v61 = vmul.f32 1.442695, %v1458_v31  ;;  %v1460_v32 = vmul.f32 %v1110_v50, %v9299_v0 }
 0x20d   : > { %v7862_v58 = vpop.eup %7861  ;;  %v4175_v59 = vmul.f32 0.6931472, %v7860_v55  ;;  %7873 = vpow2.f32 %v4939_v52  ;;  %v1461_v4 = vmul.f32 %v1112_v54, %v9299_v0  ;;  %v1876_v27 = vmul.f32 1.442695, %v1459_v60 }
 0x20e   : > { %v7864_v11 = vpop.eup %7863  ;;  %v4177_v22 = vmul.f32 0.6931472, %v7862_v58  ;;  %v4660_v62 = vmul.f32 %v9419_v5, %v4173_v56  ;;  %7875 = vlog2.f32 %v694_v49  ;;  %v1878_v19 = vmul.f32 1.442695, %v1460_v32 }
 0x20f   : > { %v7866_v1 = vpop.eup %7865  ;;  %v4179_v2 = vmul.f32 0.6931472, %v7864_v11  ;;  %v4661_v3 = vmul.f32 %v9419_v5, %v4175_v59  ;;  %7877 = vlog2.f32 %v695_v53  ;;  %v1880_v37 = vmul.f32 1.442695, %v1461_v4  ;;  %v401_v53 = vld [vmem:[%s9304_s29 + $0x400] sm:$0xff] }
 0x210   : > { %v7868_v6 = vpop.eup %7867  ;;  %v4181_v7 = vmul.f32 0.6931472, %v7866_v1  ;;  %v4662_v8 = vmul.f32 %v9419_v5, %v4177_v22  ;;  %v4941_v15 = vmul.f32 1.442695, %v4660_v62  ;;  %7879 = vlog2.f32 %v696_v57  ;;  %v402_v57 = vld [vmem:[%s9304_s29 + $0x408] sm:$0xff] }
 0x211   : > { %v7870_v40 = vpop.eup %7869  ;;  %v4663_v10 = vmul.f32 %v9419_v5, %v4179_v2  ;;  %v4943_v63 = vmul.f32 1.442695, %v4661_v3  ;;  %v1114_v12 = vmul.f32 0.6931472, %v7868_v6  ;;  %7881 = vpow2.f32 %v1874_v61  ;;  %v403_v61 = vld [vmem:[%s9304_s29 + $0x410] sm:$0xff]  ;;  %v9977_v3 = vld [vmem:[%s9304_s29 + $0x418] sm:$0xff] }
 0x212   : > { %v7872_v13 = vpop.eup %7871  ;;  %v4183_v17 = vmul.f32 0.6931472, %v7870_v40  ;;  %v4664_v20 = vmul.f32 %v9419_v5, %v4181_v7  ;;  %7883 = vpow2.f32 %v4941_v15  ;;  %v4945_v21 = vmul.f32 1.442695, %v4662_v8 }
 0x213   : > { %v7874_v24 = vpop.eup %7873  ;;  %v4185_v26 = vmul.f32 0.6931472, %v7872_v13  ;;  %7885 = vpow2.f32 %v4943_v63  ;;  %v4947_v9 = vmul.f32 1.442695, %v4663_v10  ;;  %v1462_v16 = vmul.f32 %v1114_v12, %v9299_v0 }
 0x214   : > { %v7876_v14 = vpop.eup %7875  ;;  %v4665_v28 = vmul.f32 %v9419_v5, %v4183_v17  ;;  %7887 = vpow2.f32 %v4945_v21  ;;  %v4949_v29 = vmul.f32 1.442695, %v4664_v20  ;;  %v657_v62 = vmax.f32 %v401_v53, 1e-06 }
 0x215   : > { %v7878_v30 = vpop.eup %7877  ;;  %v4666_v18 = vmul.f32 %v9419_v5, %v4185_v26  ;;  %7889 = vpow2.f32 %v4947_v9  ;;  %v1116_v33 = vmul.f32 0.6931472, %v7876_v14  ;;  %v1882_v25 = vmul.f32 1.442695, %v1462_v16 }
 0x216   : > { %v7880_v23 = vpop.eup %7879  ;;  %7891 = vpow2.f32 %v4949_v29  ;;  %v4951_v34 = vmul.f32 1.442695, %v4665_v28  ;;  %v1118_v35 = vmul.f32 0.6931472, %v7878_v30  ;;  %v658_v4 = vmax.f32 %v402_v57, 1e-06 }
 0x217   : > { %v7882_v38 = vpop.eup %7881  ;;  %v4953_v39 = vmul.f32 1.442695, %v4666_v18  ;;  %v1120_v41 = vmul.f32 0.6931472, %v7880_v23  ;;  %v1463_v42 = vmul.f32 %v1116_v33, %v9299_v0  ;;  %7893 = vpow2.f32 %v1876_v27 }
 0x218   : > { %v7884_v43 = vpop.eup %7883  ;;  %7895 = vpow2.f32 %v4951_v34  ;;  %v1464_v44 = vmul.f32 %v1118_v35, %v9299_v0  ;;  %v3187_v45 = vsel %vm2066_vm4, %v7882_v38, 0.0  ;;  %v659_v15 = vmax.f32 %v403_v61, 1e-06 }
 0x219   : > { %v7886_v46 = vpop.eup %7885  ;;  %7897 = vpow2.f32 %v4953_v39  ;;  %v5687_v47 = vsel %vm5659_vm6, %v7884_v43, %v7874_v24  ;;  %v1465_v31 = vmul.f32 %v1120_v41, %v9299_v0  ;;  %v1884_v48 = vmul.f32 1.442695, %v1463_v42 }
 0x21a   : > { %v7888_v49 = vpop.eup %7887  ;;  %v5688_v50 = vsel %vm5661_vm7, %v7886_v46, %v5687_v47  ;;  %7899 = vpow2.f32 %v1878_v19  ;;  %v1886_v51 = vmul.f32 1.442695, %v1464_v44  ;;  %v3188_v52 = vrot.slane %v3187_v45, 4 }
 0x21b   : > { %v7890_v54 = vpop.eup %7889  ;;  %v5689_v55 = vsel %vm5663_vm8, %v7888_v49, %v5688_v50  ;;  %7901 = vpow2.f32 %v1880_v37  ;;  %v1888_v56 = vmul.f32 1.442695, %v1465_v31  ;;  %v660_v20 = vmax.f32 %v9977_v3, 1e-06 }
 0x21c   : > { %v7892_v58 = vpop.eup %7891  ;;  %v5690_v59 = vsel %vm5665_vm9, %v7890_v54, %v5689_v55  ;;  %7903 = vpow2.f32 %v1882_v25  ;;  %v3189_v60 = vadd.f32 %v3188_v52, %v3187_v45 }
 0x21d   : > { %v7894_v11 = vpop.eup %7893  ;;  %v5691_v22 = vsel %vm5667_vm10, %v7892_v58, %v5690_v59  ;;  %7905 = vpow2.f32 %v1884_v48 }
 0x21e   : > { %v7896_v32 = vpop.eup %7895  ;;  %7907 = vpow2.f32 %v1886_v51  ;;  %v3190_v1 = vrot.slane %v3189_v60, 2  ;;  %v3194_v2 = vsel %vm2066_vm4, %v7894_v11, 0.0 }
 0x21f   : > { %v7898_v6 = vpop.eup %7897  ;;  %v5692_v7 = vsel %vm5669_vm11, %v7896_v32, %v5691_v22  ;;  %7909 = vpow2.f32 %v1888_v56  ;;  %v3195_v8 = vrot.slane %v3194_v2, 4 }
 0x220   : > { %v7900_v40 = vpop.eup %7899  ;;  %v5693_v10 = vsel %vm5671_vm12, %v7898_v6, %v5692_v7  ;;  %v3191_v63 = vadd.f32 %v3190_v1, %v3189_v60  ;;  %7911 = vlog2.f32 %v657_v62 }
 0x221   : > { %v7902_v12 = vpop.eup %7901  ;;  %5925 = vxpose.xlu0.b32.end [4/4] (short) (narrow) %v5693_v10, 16  ;;  %v3196_v13 = vadd.f32 %v3195_v8, %v3194_v2  ;;  %v3201_v17 = vsel %vm2066_vm4, %v7900_v40, 0.0  ;;  %7913 = vlog2.f32 %v658_v4 }
 0x222   : > { %v7904_v21 = vpop.eup %7903  ;;  %v3192_v24 = vrot.slane %v3191_v63, 1  ;;  %v3202_v26 = vrot.slane %v3201_v17, 4  ;;  %v3208_v9 = vsel %vm2066_vm4, %v7902_v12, 0.0  ;;  %7915 = vlog2.f32 %v659_v15 }
 0x223   : > { %v7906_v27 = vpop.eup %7905  ;;  %v3197_v14 = vrot.slane %v3196_v13, 2  ;;  %v3209_v28 = vrot.slane %v3208_v9, 4  ;;  %v3215_v29 = vsel %vm2066_vm4, %v7904_v21, 0.0 }
 0x224   : > { %v7908_v16 = vpop.eup %7907  ;;  %v3193_v30 = vadd.f32 %v3192_v24, %v3191_v63  ;;  %v3203_v18 = vadd.f32 %v3202_v26, %v3201_v17  ;;  %v3216_v33 = vrot.slane %v3215_v29, 4  ;;  %v3222_v19 = vsel %vm2066_vm4, %v7906_v27, 0.0  ;;  %v405_v63 = vld [vmem:[%s9304_s29 + $0x420] sm:$0xff] }
 0x225   : > { %v7910_v23 = vpop.eup %7909  ;;  %v3198_v34 = vadd.f32 %v3197_v14, %v3196_v13  ;;  %v3210_v35 = vadd.f32 %v3209_v28, %v3208_v9  ;;  %v3223_v37 = vrot.slane %v3222_v19, 4  ;;  %v3229_v38 = vsel %vm2066_vm4, %v7908_v16, 0.0  ;;  %v406_v9 = vld [vmem:[%s9304_s29 + $0x428] sm:$0xff]  ;;  %v407_v28 = vld [vmem:[%s9304_s29 + $0x430] sm:$0xff] }
 0x226   : > { %v3204_v39 = vrot.slane %v3203_v18, 2  ;;  %v3217_v41 = vadd.f32 %v3216_v33, %v3215_v29  ;;  %v3230_v42 = vrot.slane %v3229_v38, 4  ;;  %v3236_v43 = vsel %vm2066_vm4, %v7910_v23, 0.0  ;;  %v7912_v44 = vpop.eup %7911  ;;  %v408_v23 = vld [vmem:[%s9304_s29 + $0x438] sm:$0xff] }
 0x227   : > { %v3199_v25 = vrot.slane %v3198_v34, 1  ;;  %v3211_v45 = vrot.slane %v3210_v35, 2  ;;  %v3224_v46 = vadd.f32 %v3223_v37, %v3222_v19  ;;  %v3237_v47 = vrot.slane %v3236_v43, 4  ;;  %v7914_v31 = vpop.eup %7913 }
 0x228   : > { %v3205_v48 = vadd.f32 %v3204_v39, %v3203_v18  ;;  %v3218_v49 = vrot.slane %v3217_v41, 2  ;;  %v3231_v50 = vadd.f32 %v3230_v42, %v3229_v38  ;;  %v4026_v51 = vmul.f32 %v9361_v36, %v3193_v30  ;;  %v7916_v52 = vpop.eup %7915 }
 0x229   : > { %v3200_v53 = vadd.f32 %v3199_v25, %v3198_v34  ;;  %v3212_v54 = vadd.f32 %v3211_v45, %v3210_v35  ;;  %v3225_v55 = vrot.slane %v3224_v46, 2  ;;  %v3238_v56 = vadd.f32 %v3237_v47, %v3236_v43 }
 0x22a   : > { %v3206_v57 = vrot.slane %v3205_v48, 1  ;;  %v3219_v58 = vadd.f32 %v3218_v49, %v3217_v41  ;;  %v3232_v59 = vrot.slane %v3231_v50, 2  ;;  %7917 = vlog2.f32 %v4026_v51 }
 0x22b   : > { %v3213_v60 = vrot.slane %v3212_v54, 1  ;;  %v3226_v61 = vadd.f32 %v3225_v55, %v3224_v46  ;;  %v3239_v11 = vrot.slane %v3238_v56, 2  ;;  %v4027_v22 = vmul.f32 %v9361_v36, %v3200_v53 }
 0x22c   : > { %v3207_v62 = vadd.f32 %v3206_v57, %v3205_v48  ;;  %v3220_v32 = vrot.slane %v3219_v58, 1  ;;  %v3233_v1 = vadd.f32 %v3232_v59, %v3231_v50  ;;  %7919 = vlog2.f32 %v660_v20 }
 0x22d   : > { %v3214_v2 = vadd.f32 %v3213_v60, %v3212_v54  ;;  %v3227_v3 = vrot.slane %v3226_v61, 1  ;;  %v3240_v4 = vadd.f32 %v3239_v11, %v3238_v56  ;;  %7921 = vlog2.f32 %v4027_v22 }
 0x22e   : > { %v3221_v6 = vadd.f32 %v3220_v32, %v3219_v58  ;;  %v3234_v7 = vrot.slane %v3233_v1, 1  ;;  %v4028_v8 = vmul.f32 %v9361_v36, %v3207_v62  ;;  %v1042_v20 = vmul.f32 0.6931472, %v7912_v44 }
 0x22f   : > { %v3228_v15 = vadd.f32 %v3227_v3, %v3226_v61  ;;  %v3241_v40 = vrot.slane %v3240_v4, 1  ;;  %v4029_v10 = vmul.f32 %v9361_v36, %v3214_v2  ;;  %v661_v29 = vmax.f32 %v405_v63, 1e-06 }
 0x230   : > { %v7918_v12 = vpop.eup %7917  ;;  %v3235_v13 = vadd.f32 %v3234_v7, %v3233_v1  ;;  %v4030_v17 = vmul.f32 %v9361_v36, %v3221_v6  ;;  %7923 = vlog2.f32 %v4028_v8  ;;  %v1044_v33 = vmul.f32 0.6931472, %v7914_v31 }
 0x231   : > { %v3242_v21 = vadd.f32 %v3241_v40, %v3240_v4  ;;  %v4031_v24 = vmul.f32 %v9361_v36, %v3228_v15  ;;  %v4443_v26 = vmul.f32 0.6931472, %v7918_v12  ;;  %7925 = vlog2.f32 %v4029_v10 }
 0x232   : > { %v7920_v27 = vpop.eup %7919  ;;  %v4032_v14 = vmul.f32 %v9361_v36, %v3235_v13  ;;  %7927 = vlog2.f32 %v4030_v17  ;;  %v662_v34 = vmax.f32 %v406_v9, 1e-06  ;;  %v1426_v35 = vmul.f32 %v1042_v20, %v9299_v0 }
 0x233   : > { %v7922_v16 = vpop.eup %7921  ;;  %v4033_v30 = vmul.f32 %v9361_v36, %v3242_v21  ;;  %7929 = vlog2.f32 %v4031_v24  ;;  %v4795_v18 = vmul.f32 %v9419_v5, %v4443_v26  ;;  %v663_v38 = vmax.f32 %v407_v28, 1e-06 }
 0x234   : > { %v4445_v19 = vmul.f32 0.6931472, %v7922_v16  ;;  %7931 = vlog2.f32 %v4032_v14  ;;  %v1046_v39 = vmul.f32 0.6931472, %v7916_v52  ;;  %v1048_v43 = vmul.f32 0.6931472, %v7920_v27 }
 0x235   : > { %7933 = vlog2.f32 %v4033_v30  ;;  %v5211_v37 = vmul.f32 1.442695, %v4795_v18  ;;  %v664_v45 = vmax.f32 %v408_v23, 1e-06  ;;  %v1427_v46 = vmul.f32 %v1044_v33, %v9299_v0 }
 0x236   : > { %v7924_v41 = vpop.eup %7923  ;;  %v4796_v42 = vmul.f32 %v9419_v5, %v4445_v19  ;;  %7935 = vlog2.f32 %v661_v29  ;;  %v1810_v49 = vmul.f32 1.442695, %v1426_v35  ;;  %v1428_v53 = vmul.f32 %v1046_v39, %v9299_v0 }
 0x237   : > { %v7926_v44 = vpop.eup %7925  ;;  %v4447_v25 = vmul.f32 0.6931472, %v7924_v41  ;;  %7937 = vpow2.f32 %v5211_v37  ;;  %v1429_v57 = vmul.f32 %v1048_v43, %v9299_v0  ;;  %v1812_v15 = vmul.f32 1.442695, %v1427_v46  ;;  %v369_v37 = vld [vmem:[%s9304_s29 + $0x300] sm:$0xff] }
 0x238   : > { %v7928_v47 = vpop.eup %7927  ;;  %v4449_v31 = vmul.f32 0.6931472, %v7926_v44  ;;  %v5213_v48 = vmul.f32 1.442695, %v4796_v42  ;;  %7939 = vlog2.f32 %v662_v34  ;;  %v1814_v21 = vmul.f32 1.442695, %v1428_v53 }
 0x239   : > { %v7930_v50 = vpop.eup %7929  ;;  %v4451_v51 = vmul.f32 0.6931472, %v7928_v47  ;;  %v4797_v52 = vmul.f32 %v9419_v5, %v4447_v25  ;;  %7941 = vlog2.f32 %v663_v38  ;;  %v1816_v27 = vmul.f32 1.442695, %v1429_v57  ;;  %v370_v42 = vld [vmem:[%s9304_s29 + $0x308] sm:$0xff] }
 0x23a   : > { %v7932_v54 = vpop.eup %7931  ;;  %v4453_v55 = vmul.f32 0.6931472, %v7930_v50  ;;  %v4798_v56 = vmul.f32 %v9419_v5, %v4449_v31  ;;  %7943 = vpow2.f32 %v5213_v48  ;;  %v371_v31 = vld [vmem:[%s9304_s29 + $0x310] sm:$0xff]  ;;  %v625_v48 = vmax.f32 %v369_v37, 1e-06 }
 0x23b   : > { %v7934_v58 = vpop.eup %7933  ;;  %v4455_v59 = vmul.f32 0.6931472, %v7932_v54  ;;  %v4799_v60 = vmul.f32 %v9419_v5, %v4451_v51  ;;  %v5215_v61 = vmul.f32 1.442695, %v4797_v52  ;;  %7945 = vlog2.f32 %v664_v45 }
 0x23c   : > { %v7936_v11 = vpop.eup %7935  ;;  %v4457_v22 = vmul.f32 0.6931472, %v7934_v58  ;;  %v4800_v62 = vmul.f32 %v9419_v5, %v4453_v55  ;;  %v5217_v32 = vmul.f32 1.442695, %v4798_v56  ;;  %7947 = vpow2.f32 %v1810_v49  ;;  %v372_v55 = vld [vmem:[%s9304_s29 + $0x318] sm:$0xff] }
 0x23d   : > { %v7938_v1 = vpop.eup %7937  ;;  %v4801_v2 = vmul.f32 %v9419_v5, %v4455_v59  ;;  %7949 = vpow2.f32 %v5215_v61  ;;  %v5219_v3 = vmul.f32 1.442695, %v4799_v60  ;;  %v1050_v4 = vmul.f32 0.6931472, %v7936_v11 }
 0x23e   : > { %v7940_v6 = vpop.eup %7939  ;;  %v4802_v7 = vmul.f32 %v9419_v5, %v4457_v22  ;;  %7951 = vpow2.f32 %v5217_v32  ;;  %v5221_v8 = vmul.f32 1.442695, %v4800_v62  ;;  %v626_v51 = vmax.f32 %v370_v42, 1e-06 }
 0x23f   : > { %v7942_v40 = vpop.eup %7941  ;;  %7953 = vpow2.f32 %v5219_v3  ;;  %v5223_v10 = vmul.f32 1.442695, %v4801_v2  ;;  %v1052_v63 = vmul.f32 0.6931472, %v7940_v6  ;;  %v1430_v12 = vmul.f32 %v1050_v4, %v9299_v0 }
 0x240   : > { %v7944_v13 = vpop.eup %7943  ;;  %7955 = vpow2.f32 %v5221_v8  ;;  %v5225_v17 = vmul.f32 1.442695, %v4802_v7  ;;  %v1054_v20 = vmul.f32 0.6931472, %v7942_v40  ;;  %v627_v58 = vmax.f32 %v371_v31, 1e-06 }
 0x241   : > { %v7946_v24 = vpop.eup %7945  ;;  %7957 = vpow2.f32 %v5223_v10  ;;  %v5806_v26 = vsel %vm5659_vm6, %v7944_v13, %v7938_v1  ;;  %v1431_v9 = vmul.f32 %v1052_v63, %v9299_v0  ;;  %v1818_v16 = vmul.f32 1.442695, %v1430_v12 }
 0x242   : > { %v7948_v14 = vpop.eup %7947  ;;  %7959 = vpow2.f32 %v5225_v17  ;;  %v1056_v28 = vmul.f32 0.6931472, %v7946_v24  ;;  %v1432_v29 = vmul.f32 %v1054_v20, %v9299_v0  ;;  %v628_v1 = vmax.f32 %v372_v55, 1e-06 }
 0x243   : > { %v7950_v30 = vpop.eup %7949  ;;  %7961 = vpow2.f32 %v1812_v15  ;;  %v1820_v18 = vmul.f32 1.442695, %v1431_v9  ;;  %v2963_v33 = vsel %vm2066_vm4, %v7948_v14, 0.0 }
 0x244   : > { %v7952_v19 = vpop.eup %7951  ;;  %v5807_v23 = vsel %vm5661_vm7, %v7950_v30, %v5806_v26  ;;  %v1433_v34 = vmul.f32 %v1056_v28, %v9299_v0  ;;  %7963 = vpow2.f32 %v1814_v21  ;;  %v1822_v35 = vmul.f32 1.442695, %v1432_v29 }
 0x245   : > { %v7954_v38 = vpop.eup %7953  ;;  %v5808_v39 = vsel %vm5663_vm8, %v7952_v19, %v5807_v23  ;;  %7965 = vpow2.f32 %v1816_v27  ;;  %v2964_v41 = vrot.slane %v2963_v33, 4 }
 0x246   : > { %v7956_v43 = vpop.eup %7955  ;;  %v5809_v44 = vsel %vm5665_vm9, %v7954_v38, %v5808_v39  ;;  %7967 = vpow2.f32 %v1818_v16  ;;  %v1824_v25 = vmul.f32 1.442695, %v1433_v34 }
 0x247   : > { %v7958_v45 = vpop.eup %7957  ;;  %v5810_v46 = vsel %vm5667_vm10, %v7956_v43, %v5809_v44  ;;  %7969 = vpow2.f32 %v1820_v18  ;;  %v2965_v47 = vadd.f32 %v2964_v41, %v2963_v33 }
 0x248   : > { %v7960_v49 = vpop.eup %7959  ;;  %v5811_v50 = vsel %vm5669_vm11, %v7958_v45, %v5810_v46  ;;  %7971 = vpow2.f32 %v1822_v35 }
 0x249   : > { %v7962_v52 = vpop.eup %7961  ;;  %v5812_v53 = vsel %vm5671_vm12, %v7960_v49, %v5811_v50  ;;  %7973 = vpow2.f32 %v1824_v25  ;;  %v2966_v54 = vrot.slane %v2965_v47, 2 }
 0x24a   : > { %v7964_v56 = vpop.eup %7963  ;;  %6082 = vxpose.xlu2.b32.start [1/4] (short) (narrow) %v5812_v53, 16  ;;  %v2970_v57 = vsel %vm2066_vm4, %v7962_v52, 0.0  ;;  %7975 = vlog2.f32 %v625_v48  ;;  %v373_v53 = vld [vmem:[%s9304_s29 + $0x320] sm:$0xff] }
 0x24b   : > { %v7966_v59 = vpop.eup %7965  ;;  %v2967_v60 = vadd.f32 %v2966_v54, %v2965_v47  ;;  %v2971_v61 = vrot.slane %v2970_v57, 4  ;;  %v2977_v11 = vsel %vm2066_vm4, %v7964_v56, 0.0  ;;  %7977 = vlog2.f32 %v626_v51 }
 0x24c   : > { %v7968_v22 = vpop.eup %7967  ;;  %v2978_v62 = vrot.slane %v2977_v11, 4  ;;  %v2984_v32 = vsel %vm2066_vm4, %v7966_v59, 0.0  ;;  %7979 = vlog2.f32 %v627_v58 }
 0x24d   : > { %v7970_v2 = vpop.eup %7969  ;;  %v2968_v3 = vrot.slane %v2967_v60, 1  ;;  %v2972_v4 = vadd.f32 %v2971_v61, %v2970_v57  ;;  %v2985_v6 = vrot.slane %v2984_v32, 4  ;;  %v2991_v7 = vsel %vm2066_vm4, %v7968_v22, 0.0 }
 0x24e   : > { %v7972_v8 = vpop.eup %7971  ;;  %v2979_v15 = vadd.f32 %v2978_v62, %v2977_v11  ;;  %v2992_v40 = vrot.slane %v2991_v7, 4  ;;  %v2998_v10 = vsel %vm2066_vm4, %v7970_v2, 0.0  ;;  %v629_v62 = vmax.f32 %v373_v53, 1e-06 }
 0x24f   : > { %v7974_v63 = vpop.eup %7973  ;;  %v2969_v12 = vadd.f32 %v2968_v3, %v2967_v60  ;;  %v2973_v13 = vrot.slane %v2972_v4, 2  ;;  %v2986_v17 = vadd.f32 %v2985_v6, %v2984_v32  ;;  %v2999_v20 = vrot.slane %v2998_v10, 4  ;;  %v374_v3 = vld [vmem:[%s9304_s29 + $0x328] sm:$0xff] }
 0x250   : > { %v2980_v21 = vrot.slane %v2979_v15, 2  ;;  %v2993_v24 = vadd.f32 %v2992_v40, %v2991_v7  ;;  %v3005_v26 = vsel %vm2066_vm4, %v7972_v8, 0.0  ;;  %v3012_v9 = vsel %vm2066_vm4, %v7974_v63, 0.0  ;;  %v7976_v27 = vpop.eup %7975  ;;  %v375_v7 = vld [vmem:[%s9304_s29 + $0x330] sm:$0xff] }
 0x251   : > { %v2974_v14 = vadd.f32 %v2973_v13, %v2972_v4  ;;  %v2987_v28 = vrot.slane %v2986_v17, 2  ;;  %v3000_v29 = vadd.f32 %v2999_v20, %v2998_v10  ;;  %v3006_v16 = vrot.slane %v3005_v26, 4  ;;  %v7978_v30 = vpop.eup %7977  ;;  %v376_v10 = vld [vmem:[%s9304_s29 + $0x338] sm:$0xff] }
 0x252   : > { %v2981_v18 = vadd.f32 %v2980_v21, %v2979_v15  ;;  %v2994_v33 = vrot.slane %v2993_v24, 2  ;;  %v3013_v19 = vrot.slane %v3012_v9, 4  ;;  %v3994_v23 = vmul.f32 %v9361_v36, %v2969_v12  ;;  %v7980_v39 = vpop.eup %7979 }
 0x253   : > { %v2975_v34 = vrot.slane %v2974_v14, 1  ;;  %v2988_v35 = vadd.f32 %v2987_v28, %v2986_v17  ;;  %v3001_v37 = vrot.slane %v3000_v29, 2  ;;  %v3007_v38 = vadd.f32 %v3006_v16, %v3005_v26 }
 0x254   : > { %v2982_v41 = vrot.slane %v2981_v18, 1  ;;  %v2995_v42 = vadd.f32 %v2994_v33, %v2993_v24  ;;  %v3014_v43 = vadd.f32 %v3013_v19, %v3012_v9  ;;  %7981 = vlog2.f32 %v3994_v23 }
 0x255   : > { %v2976_v44 = vadd.f32 %v2975_v34, %v2974_v14  ;;  %v2989_v25 = vrot.slane %v2988_v35, 1  ;;  %v3002_v45 = vadd.f32 %v3001_v37, %v3000_v29  ;;  %v3008_v46 = vrot.slane %v3007_v38, 2 }
 0x256   : > { %v2983_v47 = vadd.f32 %v2982_v41, %v2981_v18  ;;  %v2996_v31 = vrot.slane %v2995_v42, 1  ;;  %v3015_v48 = vrot.slane %v3014_v43, 2  ;;  %7983 = vlog2.f32 %v628_v1 }
 0x257   : > { %v2990_v49 = vadd.f32 %v2989_v25, %v2988_v35  ;;  %v3003_v50 = vrot.slane %v3002_v45, 1  ;;  %v3009_v51 = vadd.f32 %v3008_v46, %v3007_v38  ;;  %v3995_v52 = vmul.f32 %v9361_v36, %v2976_v44 }
 0x258   : > { %v2997_v54 = vadd.f32 %v2996_v31, %v2995_v42  ;;  %v3016_v55 = vadd.f32 %v3015_v48, %v3014_v43  ;;  %v3996_v56 = vmul.f32 %v9361_v36, %v2983_v47  ;;  %v978_v57 = vmul.f32 0.6931472, %v7976_v27 }
 0x259   : > { %v3004_v58 = vadd.f32 %v3003_v50, %v3002_v45  ;;  %v3010_v59 = vrot.slane %v3009_v51, 1  ;;  %v3997_v60 = vmul.f32 %v9361_v36, %v2990_v49  ;;  %7985 = vlog2.f32 %v3995_v52 }
 0x25a   : > { %v7982_v61 = vpop.eup %7981  ;;  %v3017_v11 = vrot.slane %v3016_v55, 1  ;;  %v3998_v22 = vmul.f32 %v9361_v36, %v2997_v54  ;;  %7987 = vlog2.f32 %v3996_v56  ;;  %v980_v8 = vmul.f32 0.6931472, %v7978_v30 }
 0x25b   : > { %v3011_v32 = vadd.f32 %v3010_v59, %v3009_v51  ;;  %v3999_v1 = vmul.f32 %v9361_v36, %v3004_v58  ;;  %v4379_v2 = vmul.f32 0.6931472, %v7982_v61  ;;  %7989 = vlog2.f32 %v3997_v60 }
 0x25c   : > { %v7984_v4 = vpop.eup %7983  ;;  %v3018_v6 = vadd.f32 %v3017_v11, %v3016_v55  ;;  %7991 = vlog2.f32 %v3998_v22  ;;  %v1394_v63 = vmul.f32 %v978_v57, %v9299_v0  ;;  %v630_v13 = vmax.f32 %v374_v3, 1e-06 }
 0x25d   : > { %v4000_v15 = vmul.f32 %v9361_v36, %v3011_v32  ;;  %7993 = vlog2.f32 %v3999_v1  ;;  %v4763_v40 = vmul.f32 %v9419_v5, %v4379_v2  ;;  %v982_v17 = vmul.f32 0.6931472, %v7980_v39 }
 0x25e   : > { %v4001_v12 = vmul.f32 %v9361_v36, %v3018_v6  ;;  %7995 = vlog2.f32 %v629_v62  ;;  %v631_v24 = vmax.f32 %v375_v7, 1e-06  ;;  %v984_v26 = vmul.f32 0.6931472, %v7984_v4 }
 0x25f   : > { %v7986_v20 = vpop.eup %7985  ;;  %7997 = vlog2.f32 %v4000_v15  ;;  %v5147_v21 = vmul.f32 1.442695, %v4763_v40  ;;  %v632_v14 = vmax.f32 %v376_v10, 1e-06  ;;  %v1395_v16 = vmul.f32 %v980_v8, %v9299_v0 }
 0x260   : > { %v7988_v9 = vpop.eup %7987  ;;  %v4381_v27 = vmul.f32 0.6931472, %v7986_v20  ;;  %7999 = vlog2.f32 %v4001_v12  ;;  %v1746_v30 = vmul.f32 1.442695, %v1394_v63  ;;  %v1396_v23 = vmul.f32 %v982_v17, %v9299_v0 }
 0x261   : > { %v7990_v28 = vpop.eup %7989  ;;  %v4383_v29 = vmul.f32 0.6931472, %v7988_v9  ;;  %8001 = vpow2.f32 %v5147_v21  ;;  %v1397_v38 = vmul.f32 %v984_v26, %v9299_v0  ;;  %v1748_v53 = vmul.f32 1.442695, %v1395_v16 }
 0x262   : > { %v7992_v18 = vpop.eup %7991  ;;  %v4385_v33 = vmul.f32 0.6931472, %v7990_v28  ;;  %v4764_v19 = vmul.f32 %v9419_v5, %v4381_v27  ;;  %8003 = vlog2.f32 %v630_v13  ;;  %v1750_v61 = vmul.f32 1.442695, %v1396_v23 }
 0x263   : > { %v7994_v34 = vpop.eup %7993  ;;  %v4387_v35 = vmul.f32 0.6931472, %v7992_v18  ;;  %v4765_v37 = vmul.f32 %v9419_v5, %v4383_v29  ;;  %8005 = vlog2.f32 %v631_v24  ;;  %v1752_v32 = vmul.f32 1.442695, %v1397_v38  ;;  %v441_v24 = vld [vmem:[%s9304_s29 + $0x540] sm:$0xff] }
 0x264   : > { %v7996_v39 = vpop.eup %7995  ;;  %v4389_v41 = vmul.f32 0.6931472, %v7994_v34  ;;  %v4766_v42 = vmul.f32 %v9419_v5, %v4385_v33  ;;  %v5149_v43 = vmul.f32 1.442695, %v4764_v19  ;;  %8007 = vlog2.f32 %v632_v14  ;;  %v442_v14 = vld [vmem:[%s9304_s29 + $0x548] sm:$0xff] }
 0x265   : > { %v7998_v44 = vpop.eup %7997  ;;  %v4767_v25 = vmul.f32 %v9419_v5, %v4387_v35  ;;  %v5151_v45 = vmul.f32 1.442695, %v4765_v37  ;;  %v986_v46 = vmul.f32 0.6931472, %v7996_v39  ;;  %8009 = vpow2.f32 %v1746_v30  ;;  %v443_v30 = vld [vmem:[%s9304_s29 + $0x550] sm:$0xff]  ;;  %v10074_v37 = vld [vmem:[%s9304_s29 + $0x558] sm:$0xff] }
 0x266   : > { %v8000_v47 = vpop.eup %7999  ;;  %v4391_v31 = vmul.f32 0.6931472, %v7998_v44  ;;  %v4768_v48 = vmul.f32 %v9419_v5, %v4389_v41  ;;  %8011 = vpow2.f32 %v5149_v43  ;;  %v5153_v49 = vmul.f32 1.442695, %v4766_v42 }
 0x267   : > { %v8002_v50 = vpop.eup %8001  ;;  %v4393_v51 = vmul.f32 0.6931472, %v8000_v47  ;;  %8013 = vpow2.f32 %v5151_v45  ;;  %v5155_v52 = vmul.f32 1.442695, %v4767_v25  ;;  %v1398_v57 = vmul.f32 %v986_v46, %v9299_v0 }
 0x268   : > { %v8004_v54 = vpop.eup %8003  ;;  %v4769_v55 = vmul.f32 %v9419_v5, %v4391_v31  ;;  %8015 = vpow2.f32 %v5153_v49  ;;  %v5157_v56 = vmul.f32 1.442695, %v4768_v48  ;;  %v697_v19 = vmax.f32 %v441_v24, 1e-06 }
 0x269   : > { %v8006_v58 = vpop.eup %8005  ;;  %v4770_v59 = vmul.f32 %v9419_v5, %v4393_v51  ;;  %8017 = vpow2.f32 %v5155_v52  ;;  %v988_v60 = vmul.f32 0.6931472, %v8004_v54  ;;  %v1754_v8 = vmul.f32 1.442695, %v1398_v57 }
 0x26a   : > { %v8008_v11 = vpop.eup %8007  ;;  %8019 = vpow2.f32 %v5157_v56  ;;  %v5159_v22 = vmul.f32 1.442695, %v4769_v55  ;;  %v990_v62 = vmul.f32 0.6931472, %v8006_v58  ;;  %v698_v38 = vmax.f32 %v442_v14, 1e-06 }
 0x26b   : > { %v8010_v1 = vpop.eup %8009  ;;  %v5161_v2 = vmul.f32 1.442695, %v4770_v59  ;;  %v992_v3 = vmul.f32 0.6931472, %v8008_v11  ;;  %v1399_v4 = vmul.f32 %v988_v60, %v9299_v0  ;;  %8021 = vpow2.f32 %v1748_v53 }
 0x26c   : > { %v8012_v6 = vpop.eup %8011  ;;  %8023 = vpow2.f32 %v5159_v22  ;;  %v1400_v7 = vmul.f32 %v990_v62, %v9299_v0  ;;  %v2739_v15 = vsel %vm2066_vm4, %v8010_v1, 0.0  ;;  %v699_v43 = vmax.f32 %v443_v30, 1e-06 }
 0x26d   : > { %v8014_v40 = vpop.eup %8013  ;;  %8025 = vpow2.f32 %v5161_v2  ;;  %v5778_v10 = vsel %vm5659_vm6, %v8012_v6, %v8002_v50  ;;  %v1401_v63 = vmul.f32 %v992_v3, %v9299_v0  ;;  %v1756_v12 = vmul.f32 1.442695, %v1399_v4 }
 0x26e   : > { %v8016_v13 = vpop.eup %8015  ;;  %v5779_v17 = vsel %vm5661_vm7, %v8014_v40, %v5778_v10  ;;  %8027 = vpow2.f32 %v1750_v61  ;;  %v1758_v20 = vmul.f32 1.442695, %v1400_v7  ;;  %v2740_v21 = vrot.slane %v2739_v15, 4 }
 0x26f   : > { %v8018_v26 = vpop.eup %8017  ;;  %v5780_v9 = vsel %vm5663_vm8, %v8016_v13, %v5779_v17  ;;  %8029 = vpow2.f32 %v1752_v32  ;;  %v1760_v27 = vmul.f32 1.442695, %v1401_v63  ;;  %v700_v48 = vmax.f32 %v10074_v37, 1e-06 }
 0x270   : > { %v8020_v28 = vpop.eup %8019  ;;  %v5781_v29 = vsel %vm5665_vm9, %v8018_v26, %v5780_v9  ;;  %8031 = vpow2.f32 %v1754_v8  ;;  %v2741_v16 = vadd.f32 %v2740_v21, %v2739_v15 }
 0x271   : > { %v8022_v18 = vpop.eup %8021  ;;  %v5782_v33 = vsel %vm5667_vm10, %v8020_v28, %v5781_v29  ;;  %8033 = vpow2.f32 %v1756_v12 }
 0x272   : > { %v8024_v23 = vpop.eup %8023  ;;  %8035 = vpow2.f32 %v1758_v20  ;;  %v2742_v34 = vrot.slane %v2741_v16, 2  ;;  %v2746_v35 = vsel %vm2066_vm4, %v8022_v18, 0.0 }
 0x273   : > { %v8026_v39 = vpop.eup %8025  ;;  %v5783_v41 = vsel %vm5669_vm11, %v8024_v23, %v5782_v33  ;;  %8037 = vpow2.f32 %v1760_v27  ;;  %v2747_v42 = vrot.slane %v2746_v35, 4 }
 0x274   : > { %v8028_v44 = vpop.eup %8027  ;;  %v5784_v25 = vsel %vm5671_vm12, %v8026_v39, %v5783_v41  ;;  %v2743_v45 = vadd.f32 %v2742_v34, %v2741_v16  ;;  %8039 = vlog2.f32 %v697_v19 }
 0x275   : > { %v8030_v46 = vpop.eup %8029  ;;  %6050 = vxpose.xlu1.b32.start [1/4] (short) (narrow) %v5784_v25, 16  ;;  %v2748_v47 = vadd.f32 %v2747_v42, %v2746_v35  ;;  %v2753_v31 = vsel %vm2066_vm4, %v8028_v44, 0.0  ;;  %8041 = vlog2.f32 %v698_v38 }
 0x276   : > { %v8032_v49 = vpop.eup %8031  ;;  %v2744_v50 = vrot.slane %v2743_v45, 1  ;;  %v2754_v51 = vrot.slane %v2753_v31, 4  ;;  %v2760_v52 = vsel %vm2066_vm4, %v8030_v46, 0.0  ;;  %8043 = vlog2.f32 %v699_v43 }
 0x277   : > { %v8034_v53 = vpop.eup %8033  ;;  %v2749_v54 = vrot.slane %v2748_v47, 2  ;;  %v2761_v55 = vrot.slane %v2760_v52, 4  ;;  %v2767_v56 = vsel %vm2066_vm4, %v8032_v49, 0.0 }
 0x278   : > { %v8036_v57 = vpop.eup %8035  ;;  %v2745_v58 = vadd.f32 %v2744_v50, %v2743_v45  ;;  %v2755_v59 = vadd.f32 %v2754_v51, %v2753_v31  ;;  %v2768_v60 = vrot.slane %v2767_v56, 4  ;;  %v2774_v61 = vsel %vm2066_vm4, %v8034_v53, 0.0  ;;  %v445_v45 = vld [vmem:[%s9304_s29 + $0x560] sm:$0xff] }
 0x279   : > { %v8038_v11 = vpop.eup %8037  ;;  %v2750_v22 = vadd.f32 %v2749_v54, %v2748_v47  ;;  %v2762_v62 = vadd.f32 %v2761_v55, %v2760_v52  ;;  %v2775_v32 = vrot.slane %v2774_v61, 4  ;;  %v2781_v1 = vsel %vm2066_vm4, %v8036_v57, 0.0  ;;  %v446_v52 = vld [vmem:[%s9304_s29 + $0x568] sm:$0xff]  ;;  %v447_v55 = vld [vmem:[%s9304_s29 + $0x570] sm:$0xff] }
 0x27a   : > { %v2756_v2 = vrot.slane %v2755_v59, 2  ;;  %v2769_v3 = vadd.f32 %v2768_v60, %v2767_v56  ;;  %v2782_v4 = vrot.slane %v2781_v1, 4  ;;  %v2788_v6 = vsel %vm2066_vm4, %v8038_v11, 0.0  ;;  %v8040_v7 = vpop.eup %8039  ;;  %v448_v11 = vld [vmem:[%s9304_s29 + $0x578] sm:$0xff] }
 0x27b   : > { %v2751_v8 = vrot.slane %v2750_v22, 1  ;;  %v2763_v15 = vrot.slane %v2762_v62, 2  ;;  %v2776_v40 = vadd.f32 %v2775_v32, %v2774_v61  ;;  %v2789_v10 = vrot.slane %v2788_v6, 4  ;;  %v8042_v63 = vpop.eup %8041 }
 0x27c   : > { %v2757_v12 = vadd.f32 %v2756_v2, %v2755_v59  ;;  %v2770_v13 = vrot.slane %v2769_v3, 2  ;;  %v2783_v17 = vadd.f32 %v2782_v4, %v2781_v1  ;;  %v3962_v20 = vmul.f32 %v9361_v36, %v2745_v58  ;;  %v8044_v21 = vpop.eup %8043 }
 0x27d   : > { %v2752_v24 = vadd.f32 %v2751_v8, %v2750_v22  ;;  %v2764_v26 = vadd.f32 %v2763_v15, %v2762_v62  ;;  %v2777_v9 = vrot.slane %v2776_v40, 2  ;;  %v2790_v27 = vadd.f32 %v2789_v10, %v2788_v6 }
 0x27e   : > { %v2758_v14 = vrot.slane %v2757_v12, 1  ;;  %v2771_v28 = vadd.f32 %v2770_v13, %v2769_v3  ;;  %v2784_v29 = vrot.slane %v2783_v17, 2  ;;  %8045 = vlog2.f32 %v3962_v20 }
 0x27f   : > { %v2765_v16 = vrot.slane %v2764_v26, 1  ;;  %v2778_v30 = vadd.f32 %v2777_v9, %v2776_v40  ;;  %v2791_v18 = vrot.slane %v2790_v27, 2  ;;  %v3963_v33 = vmul.f32 %v9361_v36, %v2752_v24 }
 0x280   : > { %v2759_v19 = vadd.f32 %v2758_v14, %v2757_v12  ;;  %v2772_v23 = vrot.slane %v2771_v28, 1  ;;  %v2785_v34 = vadd.f32 %v2784_v29, %v2783_v17  ;;  %8047 = vlog2.f32 %v700_v48 }
 0x281   : > { %v2766_v35 = vadd.f32 %v2765_v16, %v2764_v26  ;;  %v2779_v37 = vrot.slane %v2778_v30, 1  ;;  %v2792_v38 = vadd.f32 %v2791_v18, %v2790_v27  ;;  %8049 = vlog2.f32 %v3963_v33 }
 0x282   : > { %v2773_v39 = vadd.f32 %v2772_v23, %v2771_v28  ;;  %v2786_v41 = vrot.slane %v2785_v34, 1  ;;  %v3964_v42 = vmul.f32 %v9361_v36, %v2759_v19  ;;  %v1122_v48 = vmul.f32 0.6931472, %v8040_v7 }
 0x283   : > { %v2780_v43 = vadd.f32 %v2779_v37, %v2778_v30  ;;  %v2793_v44 = vrot.slane %v2792_v38, 1  ;;  %v3965_v25 = vmul.f32 %v9361_v36, %v2766_v35  ;;  %v701_v56 = vmax.f32 %v445_v45, 1e-06 }
 0x284   : > { %v8046_v46 = vpop.eup %8045  ;;  %v2787_v47 = vadd.f32 %v2786_v41, %v2785_v34  ;;  %v3966_v31 = vmul.f32 %v9361_v36, %v2773_v39  ;;  %8051 = vlog2.f32 %v3964_v42  ;;  %v1124_v60 = vmul.f32 0.6931472, %v8042_v63 }
 0x285   : > { %v2794_v49 = vadd.f32 %v2793_v44, %v2792_v38  ;;  %v3967_v50 = vmul.f32 %v9361_v36, %v2780_v43  ;;  %v4315_v51 = vmul.f32 0.6931472, %v8046_v46  ;;  %8053 = vlog2.f32 %v3965_v25 }
 0x286   : > { %v8048_v53 = vpop.eup %8047  ;;  %v3968_v54 = vmul.f32 %v9361_v36, %v2787_v47  ;;  %8055 = vlog2.f32 %v3966_v31  ;;  %v702_v22 = vmax.f32 %v446_v52, 1e-06  ;;  %v1466_v62 = vmul.f32 %v1122_v48, %v9299_v0 }
 0x287   : > { %v8050_v57 = vpop.eup %8049  ;;  %v3969_v58 = vmul.f32 %v9361_v36, %v2794_v49  ;;  %8057 = vlog2.f32 %v3967_v50  ;;  %v4731_v59 = vmul.f32 %v9419_v5, %v4315_v51  ;;  %v703_v1 = vmax.f32 %v447_v55, 1e-06 }
 0x288   : > { %v4317_v61 = vmul.f32 0.6931472, %v8050_v57  ;;  %8059 = vlog2.f32 %v3968_v54  ;;  %v1126_v2 = vmul.f32 0.6931472, %v8044_v21  ;;  %v1128_v6 = vmul.f32 0.6931472, %v8048_v53 }
 0x289   : > { %8061 = vlog2.f32 %v3969_v58  ;;  %v5083_v32 = vmul.f32 1.442695, %v4731_v59  ;;  %v704_v15 = vmax.f32 %v448_v11, 1e-06  ;;  %v1467_v40 = vmul.f32 %v1124_v60, %v9299_v0 }
 0x28a   : > { %v8052_v3 = vpop.eup %8051  ;;  %v4732_v4 = vmul.f32 %v9419_v5, %v4317_v61  ;;  %8063 = vlog2.f32 %v701_v56  ;;  %v1890_v13 = vmul.f32 1.442695, %v1466_v62  ;;  %v1468_v24 = vmul.f32 %v1126_v2, %v9299_v0 }
 0x28b   : > { %v8054_v7 = vpop.eup %8053  ;;  %v4319_v8 = vmul.f32 0.6931472, %v8052_v3  ;;  %8065 = vpow2.f32 %v5083_v32  ;;  %v1469_v14 = vmul.f32 %v1128_v6, %v9299_v0  ;;  %v1892_v43 = vmul.f32 1.442695, %v1467_v40  ;;  %v409_v32 = vld [vmem:[%s9304_s29 + $0x440] sm:$0xff] }
 0x28c   : > { %v8056_v10 = vpop.eup %8055  ;;  %v4321_v63 = vmul.f32 0.6931472, %v8054_v7  ;;  %v5085_v12 = vmul.f32 1.442695, %v4732_v4  ;;  %8067 = vlog2.f32 %v702_v22  ;;  %v1894_v49 = vmul.f32 1.442695, %v1468_v24 }
 0x28d   : > { %v8058_v17 = vpop.eup %8057  ;;  %v4323_v20 = vmul.f32 0.6931472, %v8056_v10  ;;  %v4733_v21 = vmul.f32 %v9419_v5, %v4319_v8  ;;  %8069 = vlog2.f32 %v703_v1  ;;  %v1896_v53 = vmul.f32 1.442695, %v1469_v14  ;;  %v410_v4 = vld [vmem:[%s9304_s29 + $0x448] sm:$0xff] }
 0x28e   : > { %v8060_v26 = vpop.eup %8059  ;;  %v4325_v9 = vmul.f32 0.6931472, %v8058_v17  ;;  %v4734_v27 = vmul.f32 %v9419_v5, %v4321_v63  ;;  %8071 = vpow2.f32 %v5085_v12  ;;  %v411_v63 = vld [vmem:[%s9304_s29 + $0x450] sm:$0xff]  ;;  %v665_v12 = vmax.f32 %v409_v32, 1e-06 }
 0x28f   : > { %v8062_v28 = vpop.eup %8061  ;;  %v4327_v29 = vmul.f32 0.6931472, %v8060_v26  ;;  %v4735_v16 = vmul.f32 %v9419_v5, %v4323_v20  ;;  %v5087_v30 = vmul.f32 1.442695, %v4733_v21  ;;  %8073 = vlog2.f32 %v704_v15 }
 0x290   : > { %v8064_v18 = vpop.eup %8063  ;;  %v4329_v33 = vmul.f32 0.6931472, %v8062_v28  ;;  %v4736_v19 = vmul.f32 %v9419_v5, %v4325_v9  ;;  %v5089_v23 = vmul.f32 1.442695, %v4734_v27  ;;  %8075 = vpow2.f32 %v1890_v13  ;;  %v412_v9 = vld [vmem:[%s9304_s29 + $0x458] sm:$0xff] }
 0x291   : > { %v8066_v34 = vpop.eup %8065  ;;  %v4737_v35 = vmul.f32 %v9419_v5, %v4327_v29  ;;  %8077 = vpow2.f32 %v5087_v30  ;;  %v5091_v37 = vmul.f32 1.442695, %v4735_v16  ;;  %v1130_v38 = vmul.f32 0.6931472, %v8064_v18 }
 0x292   : > { %v8068_v39 = vpop.eup %8067  ;;  %v4738_v41 = vmul.f32 %v9419_v5, %v4329_v33  ;;  %8079 = vpow2.f32 %v5089_v23  ;;  %v5093_v42 = vmul.f32 1.442695, %v4736_v19  ;;  %v666_v20 = vmax.f32 %v410_v4, 1e-06 }
 0x293   : > { %v8070_v44 = vpop.eup %8069  ;;  %8081 = vpow2.f32 %v5091_v37  ;;  %v5095_v25 = vmul.f32 1.442695, %v4737_v35  ;;  %v1132_v45 = vmul.f32 0.6931472, %v8068_v39  ;;  %v1470_v46 = vmul.f32 %v1130_v38, %v9299_v0 }
 0x294   : > { %v8072_v47 = vpop.eup %8071  ;;  %8083 = vpow2.f32 %v5093_v42  ;;  %v5097_v31 = vmul.f32 1.442695, %v4738_v41  ;;  %v1134_v48 = vmul.f32 0.6931472, %v8070_v44  ;;  %v667_v28 = vmax.f32 %v411_v63, 1e-06 }
 0x295   : > { %v8074_v50 = vpop.eup %8073  ;;  %8085 = vpow2.f32 %v5095_v25  ;;  %v5750_v51 = vsel %vm5659_vm6, %v8072_v47, %v8066_v34  ;;  %v1471_v52 = vmul.f32 %v1132_v45, %v9299_v0  ;;  %v1898_v57 = vmul.f32 1.442695, %v1470_v46 }
 0x296   : > { %v8076_v54 = vpop.eup %8075  ;;  %8087 = vpow2.f32 %v5097_v31  ;;  %v1136_v55 = vmul.f32 0.6931472, %v8074_v50  ;;  %v1472_v56 = vmul.f32 %v1134_v48, %v9299_v0  ;;  %v668_v34 = vmax.f32 %v412_v9, 1e-06 }
 0x297   : > { %v8078_v58 = vpop.eup %8077  ;;  %8089 = vpow2.f32 %v1892_v43  ;;  %v1900_v59 = vmul.f32 1.442695, %v1471_v52  ;;  %v3243_v60 = vsel %vm2066_vm4, %v8076_v54, 0.0 }
 0x298   : > { %v8080_v61 = vpop.eup %8079  ;;  %v5751_v11 = vsel %vm5661_vm7, %v8078_v58, %v5750_v51  ;;  %v1473_v22 = vmul.f32 %v1136_v55, %v9299_v0  ;;  %8091 = vpow2.f32 %v1894_v49  ;;  %v1902_v62 = vmul.f32 1.442695, %v1472_v56 }
 0x299   : > { %v8082_v1 = vpop.eup %8081  ;;  %v5752_v2 = vsel %vm5663_vm8, %v8080_v61, %v5751_v11  ;;  %8093 = vpow2.f32 %v1896_v53  ;;  %v3244_v3 = vrot.slane %v3243_v60, 4 }
 0x29a   : > { %v8084_v6 = vpop.eup %8083  ;;  %v5753_v7 = vsel %vm5665_vm9, %v8082_v1, %v5752_v2  ;;  %8095 = vpow2.f32 %v1898_v57  ;;  %v1904_v8 = vmul.f32 1.442695, %v1473_v22 }
 0x29b   : > { %v8086_v15 = vpop.eup %8085  ;;  %v5754_v40 = vsel %vm5667_vm10, %v8084_v6, %v5753_v7  ;;  %8097 = vpow2.f32 %v1900_v59  ;;  %v3245_v10 = vadd.f32 %v3244_v3, %v3243_v60 }
 0x29c   : > { %v8088_v13 = vpop.eup %8087  ;;  %v5755_v17 = vsel %vm5669_vm11, %v8086_v15, %v5754_v40  ;;  %8099 = vpow2.f32 %v1902_v62 }
 0x29d   : > { %v8090_v21 = vpop.eup %8089  ;;  %v5756_v24 = vsel %vm5671_vm12, %v8088_v13, %v5755_v17  ;;  %8101 = vpow2.f32 %v1904_v8  ;;  %v3246_v26 = vrot.slane %v3245_v10, 2 }
 0x29e   : > { %v8092_v27 = vpop.eup %8091  ;;  %6018 = vxpose.xlu0.b32.start [1/4] (short) (narrow) %v5756_v24, 16  ;;  %v3250_v14 = vsel %vm2066_vm4, %v8090_v21, 0.0  ;;  %8103 = vlog2.f32 %v665_v12  ;;  %v413_v24 = vld [vmem:[%s9304_s29 + $0x460] sm:$0xff] }
 0x29f   : > { %v8094_v29 = vpop.eup %8093  ;;  %v3247_v16 = vadd.f32 %v3246_v26, %v3245_v10  ;;  %v3251_v30 = vrot.slane %v3250_v14, 4  ;;  %v3257_v18 = vsel %vm2066_vm4, %v8092_v27, 0.0  ;;  %8105 = vlog2.f32 %v666_v20 }
 0x2a0   : > { %v8096_v33 = vpop.eup %8095  ;;  %v3258_v19 = vrot.slane %v3257_v18, 4  ;;  %v3264_v23 = vsel %vm2066_vm4, %v8094_v29, 0.0  ;;  %8107 = vlog2.f32 %v667_v28 }
 0x2a1   : > { %v8098_v35 = vpop.eup %8097  ;;  %v3248_v37 = vrot.slane %v3247_v16, 1  ;;  %v3252_v38 = vadd.f32 %v3251_v30, %v3250_v14  ;;  %v3265_v39 = vrot.slane %v3264_v23, 4  ;;  %v3271_v41 = vsel %vm2066_vm4, %v8096_v33, 0.0 }
 0x2a2   : > { %v8100_v42 = vpop.eup %8099  ;;  %v3259_v43 = vadd.f32 %v3258_v19, %v3257_v18  ;;  %v3272_v44 = vrot.slane %v3271_v41, 4  ;;  %v3278_v25 = vsel %vm2066_vm4, %v8098_v35, 0.0  ;;  %v669_v19 = vmax.f32 %v413_v24, 1e-06 }
 0x2a3   : > { %v8102_v45 = vpop.eup %8101  ;;  %v3249_v46 = vadd.f32 %v3248_v37, %v3247_v16  ;;  %v3253_v47 = vrot.slane %v3252_v38, 2  ;;  %v3266_v31 = vadd.f32 %v3265_v39, %v3264_v23  ;;  %v3279_v48 = vrot.slane %v3278_v25, 4  ;;  %v414_v37 = vld [vmem:[%s9304_s29 + $0x468] sm:$0xff] }
 0x2a4   : > { %v3260_v49 = vrot.slane %v3259_v43, 2  ;;  %v3273_v50 = vadd.f32 %v3272_v44, %v3271_v41  ;;  %v3285_v51 = vsel %vm2066_vm4, %v8100_v42, 0.0  ;;  %v3292_v52 = vsel %vm2066_vm4, %v8102_v45, 0.0  ;;  %v8104_v53 = vpop.eup %8103  ;;  %v415_v41 = vld [vmem:[%s9304_s29 + $0x470] sm:$0xff] }
 0x2a5   : > { %v3254_v54 = vadd.f32 %v3253_v47, %v3252_v38  ;;  %v3267_v55 = vrot.slane %v3266_v31, 2  ;;  %v3280_v56 = vadd.f32 %v3279_v48, %v3278_v25  ;;  %v3286_v57 = vrot.slane %v3285_v51, 4  ;;  %v8106_v58 = vpop.eup %8105  ;;  %v416_v25 = vld [vmem:[%s9304_s29 + $0x478] sm:$0xff] }
 0x2a6   : > { %v3261_v59 = vadd.f32 %v3260_v49, %v3259_v43  ;;  %v3274_v60 = vrot.slane %v3273_v50, 2  ;;  %v3293_v61 = vrot.slane %v3292_v52, 4  ;;  %v4034_v11 = vmul.f32 %v9361_v36, %v3249_v46  ;;  %v8108_v2 = vpop.eup %8107 }
 0x2a7   : > { %v3255_v22 = vrot.slane %v3254_v54, 1  ;;  %v3268_v62 = vadd.f32 %v3267_v55, %v3266_v31  ;;  %v3281_v32 = vrot.slane %v3280_v56, 2  ;;  %v3287_v1 = vadd.f32 %v3286_v57, %v3285_v51 }
 0x2a8   : > { %v3262_v3 = vrot.slane %v3261_v59, 1  ;;  %v3275_v4 = vadd.f32 %v3274_v60, %v3273_v50  ;;  %v3294_v6 = vadd.f32 %v3293_v61, %v3292_v52  ;;  %8109 = vlog2.f32 %v4034_v11 }
 0x2a9   : > { %v3256_v7 = vadd.f32 %v3255_v22, %v3254_v54  ;;  %v3269_v8 = vrot.slane %v3268_v62, 1  ;;  %v3282_v15 = vadd.f32 %v3281_v32, %v3280_v56  ;;  %v3288_v40 = vrot.slane %v3287_v1, 2 }
 0x2aa   : > { %v3263_v10 = vadd.f32 %v3262_v3, %v3261_v59  ;;  %v3276_v63 = vrot.slane %v3275_v4, 1  ;;  %v3295_v12 = vrot.slane %v3294_v6, 2  ;;  %8111 = vlog2.f32 %v668_v34 }
 0x2ab   : > { %v3270_v13 = vadd.f32 %v3269_v8, %v3268_v62  ;;  %v3283_v17 = vrot.slane %v3282_v15, 1  ;;  %v3289_v20 = vadd.f32 %v3288_v40, %v3287_v1  ;;  %v4035_v21 = vmul.f32 %v9361_v36, %v3256_v7 }
 0x2ac   : > { %v3277_v26 = vadd.f32 %v3276_v63, %v3275_v4  ;;  %v3296_v9 = vadd.f32 %v3295_v12, %v3294_v6  ;;  %v4036_v27 = vmul.f32 %v9361_v36, %v3263_v10  ;;  %v1058_v14 = vmul.f32 0.6931472, %v8104_v53 }
 0x2ad   : > { %v3284_v28 = vadd.f32 %v3283_v17, %v3282_v15  ;;  %v3290_v29 = vrot.slane %v3289_v20, 1  ;;  %v4037_v16 = vmul.f32 %v9361_v36, %v3270_v13  ;;  %8113 = vlog2.f32 %v4035_v21 }
 0x2ae   : > { %v8110_v30 = vpop.eup %8109  ;;  %v3297_v18 = vrot.slane %v3296_v9, 1  ;;  %v4038_v33 = vmul.f32 %v9361_v36, %v3277_v26  ;;  %8115 = vlog2.f32 %v4036_v27  ;;  %v1060_v42 = vmul.f32 0.6931472, %v8106_v58 }
 0x2af   : > { %v3291_v23 = vadd.f32 %v3290_v29, %v3289_v20  ;;  %v4039_v34 = vmul.f32 %v9361_v36, %v3284_v28  ;;  %v4459_v35 = vmul.f32 0.6931472, %v8110_v30  ;;  %8117 = vlog2.f32 %v4037_v16 }
 0x2b0   : > { %v8112_v38 = vpop.eup %8111  ;;  %v3298_v39 = vadd.f32 %v3297_v18, %v3296_v9  ;;  %8119 = vlog2.f32 %v4038_v33  ;;  %v1434_v45 = vmul.f32 %v1058_v14, %v9299_v0  ;;  %v670_v47 = vmax.f32 %v414_v37, 1e-06 }
 0x2b1   : > { %v4040_v43 = vmul.f32 %v9361_v36, %v3291_v23  ;;  %8121 = vlog2.f32 %v4039_v34  ;;  %v4803_v44 = vmul.f32 %v9419_v5, %v4459_v35  ;;  %v1062_v31 = vmul.f32 0.6931472, %v8108_v2 }
 0x2b2   : > { %v4041_v46 = vmul.f32 %v9361_v36, %v3298_v39  ;;  %8123 = vlog2.f32 %v669_v19  ;;  %v671_v50 = vmax.f32 %v415_v41, 1e-06  ;;  %v1064_v51 = vmul.f32 0.6931472, %v8112_v38 }
 0x2b3   : > { %v8114_v48 = vpop.eup %8113  ;;  %8125 = vlog2.f32 %v4040_v43  ;;  %v5227_v49 = vmul.f32 1.442695, %v4803_v44  ;;  %v672_v54 = vmax.f32 %v416_v25, 1e-06  ;;  %v1435_v57 = vmul.f32 %v1060_v42, %v9299_v0 }
 0x2b4   : > { %v8116_v52 = vpop.eup %8115  ;;  %v4461_v53 = vmul.f32 0.6931472, %v8114_v48  ;;  %8127 = vlog2.f32 %v4041_v46  ;;  %v1826_v58 = vmul.f32 1.442695, %v1434_v45  ;;  %v1436_v11 = vmul.f32 %v1062_v31, %v9299_v0 }
 0x2b5   : > { %v8118_v55 = vpop.eup %8117  ;;  %v4463_v56 = vmul.f32 0.6931472, %v8116_v52  ;;  %8129 = vpow2.f32 %v5227_v49  ;;  %v1437_v1 = vmul.f32 %v1064_v51, %v9299_v0  ;;  %v1828_v24 = vmul.f32 1.442695, %v1435_v57 }
 0x2b6   : > { %v8120_v59 = vpop.eup %8119  ;;  %v4465_v60 = vmul.f32 0.6931472, %v8118_v55  ;;  %v4804_v61 = vmul.f32 %v9419_v5, %v4461_v53  ;;  %8131 = vlog2.f32 %v670_v47  ;;  %v1830_v30 = vmul.f32 1.442695, %v1436_v11 }
 0x2b7   : > { %v8122_v22 = vpop.eup %8121  ;;  %v4467_v62 = vmul.f32 0.6931472, %v8120_v59  ;;  %v4805_v32 = vmul.f32 %v9419_v5, %v4463_v56  ;;  %8133 = vlog2.f32 %v671_v50  ;;  %v1832_v23 = vmul.f32 1.442695, %v1437_v1  ;;  %v377_v50 = vld [vmem:[%s9304_s29 + $0x340] sm:$0xff] }
 0x2b8   : > { %v8124_v2 = vpop.eup %8123  ;;  %v4469_v3 = vmul.f32 0.6931472, %v8122_v22  ;;  %v4806_v4 = vmul.f32 %v9419_v5, %v4465_v60  ;;  %v5229_v6 = vmul.f32 1.442695, %v4804_v61  ;;  %8135 = vlog2.f32 %v672_v54  ;;  %v378_v54 = vld [vmem:[%s9304_s29 + $0x348] sm:$0xff] }
 0x2b9   : > { %v8126_v7 = vpop.eup %8125  ;;  %v4807_v8 = vmul.f32 %v9419_v5, %v4467_v62  ;;  %v5231_v15 = vmul.f32 1.442695, %v4805_v32  ;;  %v1066_v40 = vmul.f32 0.6931472, %v8124_v2  ;;  %8137 = vpow2.f32 %v1826_v58  ;;  %v379_v58 = vld [vmem:[%s9304_s29 + $0x350] sm:$0xff]  ;;  %v10171_v32 = vld [vmem:[%s9304_s29 + $0x358] sm:$0xff] }
 0x2ba   : > { %v8128_v10 = vpop.eup %8127  ;;  %v4471_v63 = vmul.f32 0.6931472, %v8126_v7  ;;  %v4808_v12 = vmul.f32 %v9419_v5, %v4469_v3  ;;  %8139 = vpow2.f32 %v5229_v6  ;;  %v5233_v13 = vmul.f32 1.442695, %v4806_v4 }
 0x2bb   : > { %v8130_v17 = vpop.eup %8129  ;;  %v4473_v20 = vmul.f32 0.6931472, %v8128_v10  ;;  %8141 = vpow2.f32 %v5231_v15  ;;  %v5235_v21 = vmul.f32 1.442695, %v4807_v8  ;;  %v1438_v14 = vmul.f32 %v1066_v40, %v9299_v0 }
 0x2bc   : > { %v8132_v26 = vpop.eup %8131  ;;  %v4809_v9 = vmul.f32 %v9419_v5, %v4471_v63  ;;  %8143 = vpow2.f32 %v5233_v13  ;;  %v5237_v27 = vmul.f32 1.442695, %v4808_v12  ;;  %v633_v61 = vmax.f32 %v377_v50, 1e-06 }
 0x2bd   : > { %v8134_v28 = vpop.eup %8133  ;;  %v4810_v29 = vmul.f32 %v9419_v5, %v4473_v20  ;;  %8145 = vpow2.f32 %v5235_v21  ;;  %v1068_v16 = vmul.f32 0.6931472, %v8132_v26  ;;  %v1834_v42 = vmul.f32 1.442695, %v1438_v14 }
 0x2be   : > { %v8136_v18 = vpop.eup %8135  ;;  %8147 = vpow2.f32 %v5237_v27  ;;  %v5239_v33 = vmul.f32 1.442695, %v4809_v9  ;;  %v1070_v19 = vmul.f32 0.6931472, %v8134_v28  ;;  %v634_v1 = vmax.f32 %v378_v54, 1e-06 }
 0x2bf   : > { %v8138_v34 = vpop.eup %8137  ;;  %v5241_v35 = vmul.f32 1.442695, %v4810_v29  ;;  %v1072_v37 = vmul.f32 0.6931472, %v8136_v18  ;;  %v1439_v38 = vmul.f32 %v1068_v16, %v9299_v0  ;;  %8149 = vpow2.f32 %v1828_v24 }
 0x2c0   : > { %v8140_v39 = vpop.eup %8139  ;;  %8151 = vpow2.f32 %v5239_v33  ;;  %v1440_v41 = vmul.f32 %v1070_v19, %v9299_v0  ;;  %v3019_v43 = vsel %vm2066_vm4, %v8138_v34, 0.0  ;;  %v635_v6 = vmax.f32 %v379_v58, 1e-06 }
 0x2c1   : > { %v8142_v44 = vpop.eup %8141  ;;  %8153 = vpow2.f32 %v5241_v35  ;;  %v5813_v25 = vsel %vm5659_vm6, %v8140_v39, %v8130_v17  ;;  %v1441_v45 = vmul.f32 %v1072_v37, %v9299_v0  ;;  %v1836_v46 = vmul.f32 1.442695, %v1439_v38 }
 0x2c2   : > { %v8144_v47 = vpop.eup %8143  ;;  %v5814_v31 = vsel %vm5661_vm7, %v8142_v44, %v5813_v25  ;;  %8155 = vpow2.f32 %v1830_v30  ;;  %v1838_v48 = vmul.f32 1.442695, %v1440_v41  ;;  %v3020_v49 = vrot.slane %v3019_v43, 4 }
 0x2c3   : > { %v8146_v51 = vpop.eup %8145  ;;  %v5815_v52 = vsel %vm5663_vm8, %v8144_v47, %v5814_v31  ;;  %8157 = vpow2.f32 %v1832_v23  ;;  %v1840_v53 = vmul.f32 1.442695, %v1441_v45  ;;  %v636_v12 = vmax.f32 %v10171_v32, 1e-06 }
 0x2c4   : > { %v8148_v55 = vpop.eup %8147  ;;  %v5816_v56 = vsel %vm5665_vm9, %v8146_v51, %v5815_v52  ;;  %8159 = vpow2.f32 %v1834_v42  ;;  %v3021_v57 = vadd.f32 %v3020_v49, %v3019_v43 }
 0x2c5   : > { %v8150_v59 = vpop.eup %8149  ;;  %v5817_v60 = vsel %vm5667_vm10, %v8148_v55, %v5816_v56  ;;  %8161 = vpow2.f32 %v1836_v46 }
 0x2c6   : > { %v8152_v11 = vpop.eup %8151  ;;  %8163 = vpow2.f32 %v1838_v48  ;;  %v3022_v22 = vrot.slane %v3021_v57, 2  ;;  %v3026_v62 = vsel %vm2066_vm4, %v8150_v59, 0.0 }
 0x2c7   : > { %v8154_v2 = vpop.eup %8153  ;;  %v5818_v3 = vsel %vm5669_vm11, %v8152_v11, %v5817_v60  ;;  %8165 = vpow2.f32 %v1840_v53  ;;  %v3027_v4 = vrot.slane %v3026_v62, 4 }
 0x2c8   : > { %v8156_v7 = vpop.eup %8155  ;;  %v5819_v8 = vsel %vm5671_vm12, %v8154_v2, %v5818_v3  ;;  %v3023_v15 = vadd.f32 %v3022_v22, %v3021_v57  ;;  %8167 = vlog2.f32 %v633_v61 }
 0x2c9   : > { %v8158_v40 = vpop.eup %8157  ;;  %6083 = vxpose.xlu2.b32.cont [2/4] (short) (narrow) %v5819_v8, 16  ;;  %v3028_v10 = vadd.f32 %v3027_v4, %v3026_v62  ;;  %v3033_v63 = vsel %vm2066_vm4, %v8156_v7, 0.0  ;;  %8169 = vlog2.f32 %v634_v1 }
 0x2ca   : > { %v8160_v13 = vpop.eup %8159  ;;  %v3024_v17 = vrot.slane %v3023_v15, 1  ;;  %v3034_v20 = vrot.slane %v3033_v63, 4  ;;  %v3040_v21 = vsel %vm2066_vm4, %v8158_v40, 0.0  ;;  %8171 = vlog2.f32 %v635_v6 }
 0x2cb   : > { %v8162_v24 = vpop.eup %8161  ;;  %v3029_v26 = vrot.slane %v3028_v10, 2  ;;  %v3041_v9 = vrot.slane %v3040_v21, 4  ;;  %v3047_v27 = vsel %vm2066_vm4, %v8160_v13, 0.0 }
 0x2cc   : > { %v8164_v14 = vpop.eup %8163  ;;  %v3025_v28 = vadd.f32 %v3024_v17, %v3023_v15  ;;  %v3035_v29 = vadd.f32 %v3034_v20, %v3033_v63  ;;  %v3048_v16 = vrot.slane %v3047_v27, 4  ;;  %v3054_v30 = vsel %vm2066_vm4, %v8162_v24, 0.0  ;;  %v381_v15 = vld [vmem:[%s9304_s29 + $0x360] sm:$0xff] }
 0x2cd   : > { %v8166_v18 = vpop.eup %8165  ;;  %v3030_v33 = vadd.f32 %v3029_v26, %v3028_v10  ;;  %v3042_v19 = vadd.f32 %v3041_v9, %v3040_v21  ;;  %v3055_v23 = vrot.slane %v3054_v30, 4  ;;  %v3061_v34 = vsel %vm2066_vm4, %v8164_v14, 0.0  ;;  %v382_v21 = vld [vmem:[%s9304_s29 + $0x368] sm:$0xff]  ;;  %v383_v9 = vld [vmem:[%s9304_s29 + $0x370] sm:$0xff] }
 0x2ce   : > { %v3036_v35 = vrot.slane %v3035_v29, 2  ;;  %v3049_v37 = vadd.f32 %v3048_v16, %v3047_v27  ;;  %v3062_v38 = vrot.slane %v3061_v34, 4  ;;  %v3068_v39 = vsel %vm2066_vm4, %v8166_v18, 0.0  ;;  %v8168_v41 = vpop.eup %8167  ;;  %v384_v18 = vld [vmem:[%s9304_s29 + $0x378] sm:$0xff] }
 0x2cf   : > { %v3031_v42 = vrot.slane %v3030_v33, 1  ;;  %v3043_v43 = vrot.slane %v3042_v19, 2  ;;  %v3056_v44 = vadd.f32 %v3055_v23, %v3054_v30  ;;  %v3069_v25 = vrot.slane %v3068_v39, 4  ;;  %v8170_v45 = vpop.eup %8169 }
 0x2d0   : > { %v3037_v46 = vadd.f32 %v3036_v35, %v3035_v29  ;;  %v3050_v47 = vrot.slane %v3049_v37, 2  ;;  %v3063_v31 = vadd.f32 %v3062_v38, %v3061_v34  ;;  %v4002_v48 = vmul.f32 %v9361_v36, %v3025_v28  ;;  %v8172_v49 = vpop.eup %8171 }
 0x2d1   : > { %v3032_v50 = vadd.f32 %v3031_v42, %v3030_v33  ;;  %v3044_v51 = vadd.f32 %v3043_v43, %v3042_v19  ;;  %v3057_v52 = vrot.slane %v3056_v44, 2  ;;  %v3070_v53 = vadd.f32 %v3069_v25, %v3068_v39 }
 0x2d2   : > { %v3038_v54 = vrot.slane %v3037_v46, 1  ;;  %v3051_v55 = vadd.f32 %v3050_v47, %v3049_v37  ;;  %v3064_v56 = vrot.slane %v3063_v31, 2  ;;  %8173 = vlog2.f32 %v4002_v48 }
 0x2d3   : > { %v3045_v57 = vrot.slane %v3044_v51, 1  ;;  %v3058_v58 = vadd.f32 %v3057_v52, %v3056_v44  ;;  %v3071_v59 = vrot.slane %v3070_v53, 2  ;;  %v4003_v60 = vmul.f32 %v9361_v36, %v3032_v50 }
 0x2d4   : > { %v3039_v61 = vadd.f32 %v3038_v54, %v3037_v46  ;;  %v3052_v11 = vrot.slane %v3051_v55, 1  ;;  %v3065_v22 = vadd.f32 %v3064_v56, %v3063_v31  ;;  %8175 = vlog2.f32 %v636_v12 }
 0x2d5   : > { %v3046_v62 = vadd.f32 %v3045_v57, %v3044_v51  ;;  %v3059_v32 = vrot.slane %v3058_v58, 1  ;;  %v3072_v1 = vadd.f32 %v3071_v59, %v3070_v53  ;;  %8177 = vlog2.f32 %v4003_v60 }
 0x2d6   : > { %v3053_v2 = vadd.f32 %v3052_v11, %v3051_v55  ;;  %v3066_v3 = vrot.slane %v3065_v22, 1  ;;  %v4004_v4 = vmul.f32 %v9361_v36, %v3039_v61  ;;  %v994_v12 = vmul.f32 0.6931472, %v8168_v41 }
 0x2d7   : > { %v3060_v6 = vadd.f32 %v3059_v32, %v3058_v58  ;;  %v3073_v7 = vrot.slane %v3072_v1, 1  ;;  %v4005_v8 = vmul.f32 %v9361_v36, %v3046_v62  ;;  %v637_v27 = vmax.f32 %v381_v15, 1e-06 }
 0x2d8   : > { %v8174_v40 = vpop.eup %8173  ;;  %v3067_v10 = vadd.f32 %v3066_v3, %v3065_v22  ;;  %v4006_v63 = vmul.f32 %v9361_v36, %v3053_v2  ;;  %8179 = vlog2.f32 %v4004_v4  ;;  %v996_v16 = vmul.f32 0.6931472, %v8170_v45 }
 0x2d9   : > { %v3074_v13 = vadd.f32 %v3073_v7, %v3072_v1  ;;  %v4007_v17 = vmul.f32 %v9361_v36, %v3060_v6  ;;  %v4395_v20 = vmul.f32 0.6931472, %v8174_v40  ;;  %8181 = vlog2.f32 %v4005_v8 }
 0x2da   : > { %v8176_v24 = vpop.eup %8175  ;;  %v4008_v26 = vmul.f32 %v9361_v36, %v3067_v10  ;;  %8183 = vlog2.f32 %v4006_v63  ;;  %v638_v33 = vmax.f32 %v382_v21, 1e-06  ;;  %v1402_v19 = vmul.f32 %v994_v12, %v9299_v0 }
 0x2db   : > { %v8178_v14 = vpop.eup %8177  ;;  %v4009_v28 = vmul.f32 %v9361_v36, %v3074_v13  ;;  %8185 = vlog2.f32 %v4007_v17  ;;  %v4771_v29 = vmul.f32 %v9419_v5, %v4395_v20  ;;  %v639_v34 = vmax.f32 %v383_v9, 1e-06 }
 0x2dc   : > { %v4397_v30 = vmul.f32 0.6931472, %v8178_v14  ;;  %8187 = vlog2.f32 %v4008_v26  ;;  %v998_v35 = vmul.f32 0.6931472, %v8172_v49  ;;  %v1000_v39 = vmul.f32 0.6931472, %v8176_v24 }
 0x2dd   : > { %8189 = vlog2.f32 %v4009_v28  ;;  %v5163_v23 = vmul.f32 1.442695, %v4771_v29  ;;  %v640_v43 = vmax.f32 %v384_v18, 1e-06  ;;  %v1403_v44 = vmul.f32 %v996_v16, %v9299_v0 }
 0x2de   : > { %v8180_v37 = vpop.eup %8179  ;;  %v4772_v38 = vmul.f32 %v9419_v5, %v4397_v30  ;;  %8191 = vlog2.f32 %v637_v27  ;;  %v1762_v47 = vmul.f32 1.442695, %v1402_v19  ;;  %v1404_v50 = vmul.f32 %v998_v35, %v9299_v0 }
 0x2df   : > { %v8182_v41 = vpop.eup %8181  ;;  %v4399_v42 = vmul.f32 0.6931472, %v8180_v37  ;;  %8193 = vpow2.f32 %v5163_v23  ;;  %v1405_v54 = vmul.f32 %v1000_v39, %v9299_v0  ;;  %v1764_v6 = vmul.f32 1.442695, %v1403_v44  ;;  %v449_v23 = vld [vmem:[%s9304_s29 + $0x580] sm:$0xff] }
 0x2e0   : > { %v8184_v25 = vpop.eup %8183  ;;  %v4401_v45 = vmul.f32 0.6931472, %v8182_v41  ;;  %v5165_v46 = vmul.f32 1.442695, %v4772_v38  ;;  %8195 = vlog2.f32 %v638_v33  ;;  %v1766_v13 = vmul.f32 1.442695, %v1404_v50 }
 0x2e1   : > { %v8186_v31 = vpop.eup %8185  ;;  %v4403_v48 = vmul.f32 0.6931472, %v8184_v25  ;;  %v4773_v49 = vmul.f32 %v9419_v5, %v4399_v42  ;;  %8197 = vlog2.f32 %v639_v34  ;;  %v1768_v24 = vmul.f32 1.442695, %v1405_v54  ;;  %v450_v38 = vld [vmem:[%s9304_s29 + $0x588] sm:$0xff] }
 0x2e2   : > { %v8188_v51 = vpop.eup %8187  ;;  %v4405_v52 = vmul.f32 0.6931472, %v8186_v31  ;;  %v4774_v53 = vmul.f32 %v9419_v5, %v4401_v45  ;;  %8199 = vpow2.f32 %v5165_v46  ;;  %v451_v45 = vld [vmem:[%s9304_s29 + $0x590] sm:$0xff]  ;;  %v705_v46 = vmax.f32 %v449_v23, 1e-06 }
 0x2e3   : > { %v8190_v55 = vpop.eup %8189  ;;  %v4407_v56 = vmul.f32 0.6931472, %v8188_v51  ;;  %v4775_v57 = vmul.f32 %v9419_v5, %v4403_v48  ;;  %v5167_v58 = vmul.f32 1.442695, %v4773_v49  ;;  %8201 = vlog2.f32 %v640_v43 }
 0x2e4   : > { %v8192_v59 = vpop.eup %8191  ;;  %v4409_v60 = vmul.f32 0.6931472, %v8190_v55  ;;  %v4776_v61 = vmul.f32 %v9419_v5, %v4405_v52  ;;  %v5169_v11 = vmul.f32 1.442695, %v4774_v53  ;;  %8203 = vpow2.f32 %v1762_v47  ;;  %v452_v52 = vld [vmem:[%s9304_s29 + $0x598] sm:$0xff] }
 0x2e5   : > { %v8194_v22 = vpop.eup %8193  ;;  %v4777_v62 = vmul.f32 %v9419_v5, %v4407_v56  ;;  %8205 = vpow2.f32 %v5167_v58  ;;  %v5171_v32 = vmul.f32 1.442695, %v4775_v57  ;;  %v1002_v1 = vmul.f32 0.6931472, %v8192_v59 }
 0x2e6   : > { %v8196_v2 = vpop.eup %8195  ;;  %v4778_v3 = vmul.f32 %v9419_v5, %v4409_v60  ;;  %8207 = vpow2.f32 %v5169_v11  ;;  %v5173_v4 = vmul.f32 1.442695, %v4776_v61  ;;  %v706_v48 = vmax.f32 %v450_v38, 1e-06 }
 0x2e7   : > { %v8198_v7 = vpop.eup %8197  ;;  %8209 = vpow2.f32 %v5171_v32  ;;  %v5175_v8 = vmul.f32 1.442695, %v4777_v62  ;;  %v1004_v15 = vmul.f32 0.6931472, %v8196_v2  ;;  %v1406_v40 = vmul.f32 %v1002_v1, %v9299_v0 }
 0x2e8   : > { %v8200_v10 = vpop.eup %8199  ;;  %8211 = vpow2.f32 %v5173_v4  ;;  %v5177_v63 = vmul.f32 1.442695, %v4778_v3  ;;  %v1006_v12 = vmul.f32 0.6931472, %v8198_v7  ;;  %v707_v55 = vmax.f32 %v451_v45, 1e-06 }
 0x2e9   : > { %v8202_v17 = vpop.eup %8201  ;;  %8213 = vpow2.f32 %v5175_v8  ;;  %v5785_v20 = vsel %vm5659_vm6, %v8200_v10, %v8194_v22  ;;  %v1407_v21 = vmul.f32 %v1004_v15, %v9299_v0  ;;  %v1770_v14 = vmul.f32 1.442695, %v1406_v40 }
 0x2ea   : > { %v8204_v26 = vpop.eup %8203  ;;  %8215 = vpow2.f32 %v5177_v63  ;;  %v1008_v9 = vmul.f32 0.6931472, %v8202_v17  ;;  %v1408_v27 = vmul.f32 %v1006_v12, %v9299_v0  ;;  %v708_v22 = vmax.f32 %v452_v52, 1e-06 }
 0x2eb   : > { %v8206_v28 = vpop.eup %8205  ;;  %8217 = vpow2.f32 %v1764_v6  ;;  %v1772_v29 = vmul.f32 1.442695, %v1407_v21  ;;  %v2795_v16 = vsel %vm2066_vm4, %v8204_v26, 0.0 }
 0x2ec   : > { %v8208_v30 = vpop.eup %8207  ;;  %v5786_v18 = vsel %vm5661_vm7, %v8206_v28, %v5785_v20  ;;  %v1409_v33 = vmul.f32 %v1008_v9, %v9299_v0  ;;  %8219 = vpow2.f32 %v1766_v13  ;;  %v1774_v19 = vmul.f32 1.442695, %v1408_v27 }
 0x2ed   : > { %v8210_v34 = vpop.eup %8209  ;;  %v5787_v35 = vsel %vm5663_vm8, %v8208_v30, %v5786_v18  ;;  %8221 = vpow2.f32 %v1768_v24  ;;  %v2796_v37 = vrot.slane %v2795_v16, 4 }
 0x2ee   : > { %v8212_v39 = vpop.eup %8211  ;;  %v5788_v41 = vsel %vm5665_vm9, %v8210_v34, %v5787_v35  ;;  %8223 = vpow2.f32 %v1770_v14  ;;  %v1776_v42 = vmul.f32 1.442695, %v1409_v33 }
 0x2ef   : > { %v8214_v43 = vpop.eup %8213  ;;  %v5789_v44 = vsel %vm5667_vm10, %v8212_v39, %v5788_v41  ;;  %8225 = vpow2.f32 %v1772_v29  ;;  %v2797_v25 = vadd.f32 %v2796_v37, %v2795_v16 }
 0x2f0   : > { %v8216_v47 = vpop.eup %8215  ;;  %v5790_v31 = vsel %vm5669_vm11, %v8214_v43, %v5789_v44  ;;  %8227 = vpow2.f32 %v1774_v19 }
 0x2f1   : > { %v8218_v49 = vpop.eup %8217  ;;  %v5791_v50 = vsel %vm5671_vm12, %v8216_v47, %v5790_v31  ;;  %8229 = vpow2.f32 %v1776_v42  ;;  %v2798_v51 = vrot.slane %v2797_v25, 2 }
 0x2f2   : > { %v8220_v53 = vpop.eup %8219  ;;  %6051 = vxpose.xlu1.b32.cont [2/4] (short) (narrow) %v5791_v50, 16  ;;  %v2802_v54 = vsel %vm2066_vm4, %v8218_v49, 0.0  ;;  %8231 = vlog2.f32 %v705_v46  ;;  %v453_v50 = vld [vmem:[%s9304_s29 + $0x5a0] sm:$0xff] }
 0x2f3   : > { %v8222_v56 = vpop.eup %8221  ;;  %v2799_v57 = vadd.f32 %v2798_v51, %v2797_v25  ;;  %v2803_v58 = vrot.slane %v2802_v54, 4  ;;  %v2809_v59 = vsel %vm2066_vm4, %v8220_v53, 0.0  ;;  %8233 = vlog2.f32 %v706_v48 }
 0x2f4   : > { %v8224_v60 = vpop.eup %8223  ;;  %v2810_v61 = vrot.slane %v2809_v59, 4  ;;  %v2816_v11 = vsel %vm2066_vm4, %v8222_v56, 0.0  ;;  %8235 = vlog2.f32 %v707_v55 }
 0x2f5   : > { %v8226_v62 = vpop.eup %8225  ;;  %v2800_v32 = vrot.slane %v2799_v57, 1  ;;  %v2804_v1 = vadd.f32 %v2803_v58, %v2802_v54  ;;  %v2817_v2 = vrot.slane %v2816_v11, 4  ;;  %v2823_v3 = vsel %vm2066_vm4, %v8224_v60, 0.0 }
 0x2f6   : > { %v8228_v4 = vpop.eup %8227  ;;  %v2811_v6 = vadd.f32 %v2810_v61, %v2809_v59  ;;  %v2824_v7 = vrot.slane %v2823_v3, 4  ;;  %v2830_v8 = vsel %vm2066_vm4, %v8226_v62, 0.0  ;;  %v709_v61 = vmax.f32 %v453_v50, 1e-06 }
 0x2f7   : > { %v8230_v15 = vpop.eup %8229  ;;  %v2801_v40 = vadd.f32 %v2800_v32, %v2799_v57  ;;  %v2805_v10 = vrot.slane %v2804_v1, 2  ;;  %v2818_v63 = vadd.f32 %v2817_v2, %v2816_v11  ;;  %v2831_v12 = vrot.slane %v2830_v8, 4  ;;  %v454_v32 = vld [vmem:[%s9304_s29 + $0x5a8] sm:$0xff] }
 0x2f8   : > { %v2812_v13 = vrot.slane %v2811_v6, 2  ;;  %v2825_v17 = vadd.f32 %v2824_v7, %v2823_v3  ;;  %v2837_v20 = vsel %vm2066_vm4, %v8228_v4, 0.0  ;;  %v2844_v21 = vsel %vm2066_vm4, %v8230_v15, 0.0  ;;  %v8232_v24 = vpop.eup %8231  ;;  %v455_v3 = vld [vmem:[%s9304_s29 + $0x5b0] sm:$0xff] }
 0x2f9   : > { %v2806_v26 = vadd.f32 %v2805_v10, %v2804_v1  ;;  %v2819_v9 = vrot.slane %v2818_v63, 2  ;;  %v2832_v27 = vadd.f32 %v2831_v12, %v2830_v8  ;;  %v2838_v14 = vrot.slane %v2837_v20, 4  ;;  %v8234_v28 = vpop.eup %8233  ;;  %v456_v8 = vld [vmem:[%s9304_s29 + $0x5b8] sm:$0xff] }
 0x2fa   : > { %v2813_v29 = vadd.f32 %v2812_v13, %v2811_v6  ;;  %v2826_v16 = vrot.slane %v2825_v17, 2  ;;  %v2845_v30 = vrot.slane %v2844_v21, 4  ;;  %v3970_v18 = vmul.f32 %v9361_v36, %v2801_v40  ;;  %v8236_v35 = vpop.eup %8235 }
 0x2fb   : > { %v2807_v33 = vrot.slane %v2806_v26, 1  ;;  %v2820_v19 = vadd.f32 %v2819_v9, %v2818_v63  ;;  %v2833_v23 = vrot.slane %v2832_v27, 2  ;;  %v2839_v34 = vadd.f32 %v2838_v14, %v2837_v20 }
 0x2fc   : > { %v2814_v37 = vrot.slane %v2813_v29, 1  ;;  %v2827_v38 = vadd.f32 %v2826_v16, %v2825_v17  ;;  %v2846_v39 = vadd.f32 %v2845_v30, %v2844_v21  ;;  %8237 = vlog2.f32 %v3970_v18 }
 0x2fd   : > { %v2808_v41 = vadd.f32 %v2807_v33, %v2806_v26  ;;  %v2821_v42 = vrot.slane %v2820_v19, 1  ;;  %v2834_v43 = vadd.f32 %v2833_v23, %v2832_v27  ;;  %v2840_v44 = vrot.slane %v2839_v34, 2 }
 0x2fe   : > { %v2815_v25 = vadd.f32 %v2814_v37, %v2813_v29  ;;  %v2828_v45 = vrot.slane %v2827_v38, 1  ;;  %v2847_v46 = vrot.slane %v2846_v39, 2  ;;  %8239 = vlog2.f32 %v708_v22 }
 0x2ff   : > { %v2822_v47 = vadd.f32 %v2821_v42, %v2820_v19  ;;  %v2835_v31 = vrot.slane %v2834_v43, 1  ;;  %v2841_v48 = vadd.f32 %v2840_v44, %v2839_v34  ;;  %v3971_v49 = vmul.f32 %v9361_v36, %v2808_v41 }
 0x300   : > { %v2829_v51 = vadd.f32 %v2828_v45, %v2827_v38  ;;  %v2848_v52 = vadd.f32 %v2847_v46, %v2846_v39  ;;  %v3972_v53 = vmul.f32 %v9361_v36, %v2815_v25  ;;  %v1138_v54 = vmul.f32 0.6931472, %v8232_v24 }
 0x301   : > { %v2836_v55 = vadd.f32 %v2835_v31, %v2834_v43  ;;  %v2842_v56 = vrot.slane %v2841_v48, 1  ;;  %v3973_v57 = vmul.f32 %v9361_v36, %v2822_v47  ;;  %8241 = vlog2.f32 %v3971_v49 }
 0x302   : > { %v8238_v58 = vpop.eup %8237  ;;  %v2849_v59 = vrot.slane %v2848_v52, 1  ;;  %v3974_v60 = vmul.f32 %v9361_v36, %v2829_v51  ;;  %8243 = vlog2.f32 %v3972_v53  ;;  %v1140_v4 = vmul.f32 0.6931472, %v8234_v28 }
 0x303   : > { %v2843_v11 = vadd.f32 %v2842_v56, %v2841_v48  ;;  %v3975_v22 = vmul.f32 %v9361_v36, %v2836_v55  ;;  %v4331_v62 = vmul.f32 0.6931472, %v8238_v58  ;;  %8245 = vlog2.f32 %v3973_v57 }
 0x304   : > { %v8240_v1 = vpop.eup %8239  ;;  %v2850_v2 = vadd.f32 %v2849_v59, %v2848_v52  ;;  %8247 = vlog2.f32 %v3974_v60  ;;  %v1474_v15 = vmul.f32 %v1138_v54, %v9299_v0  ;;  %v710_v10 = vmax.f32 %v454_v32, 1e-06 }
 0x305   : > { %v3976_v6 = vmul.f32 %v9361_v36, %v2843_v11  ;;  %8249 = vlog2.f32 %v3975_v22  ;;  %v4739_v7 = vmul.f32 %v9419_v5, %v4331_v62  ;;  %v1142_v63 = vmul.f32 0.6931472, %v8236_v35 }
 0x306   : > { %v3977_v40 = vmul.f32 %v9361_v36, %v2850_v2  ;;  %8251 = vlog2.f32 %v709_v61  ;;  %v711_v17 = vmax.f32 %v455_v3, 1e-06  ;;  %v1144_v20 = vmul.f32 0.6931472, %v8240_v1 }
 0x307   : > { %v8242_v12 = vpop.eup %8241  ;;  %8253 = vlog2.f32 %v3976_v6  ;;  %v5099_v13 = vmul.f32 1.442695, %v4739_v7  ;;  %v712_v26 = vmax.f32 %v456_v8, 1e-06  ;;  %v1475_v14 = vmul.f32 %v1140_v4, %v9299_v0 }
 0x308   : > { %v8244_v21 = vpop.eup %8243  ;;  %v4333_v24 = vmul.f32 0.6931472, %v8242_v12  ;;  %8255 = vlog2.f32 %v3977_v40  ;;  %v1906_v28 = vmul.f32 1.442695, %v1474_v15  ;;  %v1476_v18 = vmul.f32 %v1142_v63, %v9299_v0 }
 0x309   : > { %v8246_v9 = vpop.eup %8245  ;;  %v4335_v27 = vmul.f32 0.6931472, %v8244_v21  ;;  %8257 = vpow2.f32 %v5099_v13  ;;  %v1477_v34 = vmul.f32 %v1144_v20, %v9299_v0  ;;  %v1908_v50 = vmul.f32 1.442695, %v1475_v14 }
 0x30a   : > { %v8248_v29 = vpop.eup %8247  ;;  %v4337_v16 = vmul.f32 0.6931472, %v8246_v9  ;;  %v4740_v30 = vmul.f32 %v9419_v5, %v4333_v24  ;;  %8259 = vlog2.f32 %v710_v10  ;;  %v1910_v58 = vmul.f32 1.442695, %v1476_v18 }
 0x30b   : > { %v8250_v33 = vpop.eup %8249  ;;  %v4339_v19 = vmul.f32 0.6931472, %v8248_v29  ;;  %v4741_v23 = vmul.f32 %v9419_v5, %v4335_v27  ;;  %8261 = vlog2.f32 %v711_v17  ;;  %v1912_v11 = vmul.f32 1.442695, %v1477_v34  ;;  %v417_v17 = vld [vmem:[%s9304_s29 + $0x480] sm:$0xff] }
 0x30c   : > { %v8252_v35 = vpop.eup %8251  ;;  %v4341_v37 = vmul.f32 0.6931472, %v8250_v33  ;;  %v4742_v38 = vmul.f32 %v9419_v5, %v4337_v16  ;;  %v5101_v39 = vmul.f32 1.442695, %v4740_v30  ;;  %8263 = vlog2.f32 %v712_v26  ;;  %v418_v26 = vld [vmem:[%s9304_s29 + $0x488] sm:$0xff] }
 0x30d   : > { %v8254_v41 = vpop.eup %8253  ;;  %v4743_v42 = vmul.f32 %v9419_v5, %v4339_v19  ;;  %v5103_v43 = vmul.f32 1.442695, %v4741_v23  ;;  %v1146_v44 = vmul.f32 0.6931472, %v8252_v35  ;;  %8265 = vpow2.f32 %v1906_v28  ;;  %v419_v28 = vld [vmem:[%s9304_s29 + $0x490] sm:$0xff]  ;;  %v10268_v23 = vld [vmem:[%s9304_s29 + $0x498] sm:$0xff] }
 0x30e   : > { %v8256_v25 = vpop.eup %8255  ;;  %v4343_v45 = vmul.f32 0.6931472, %v8254_v41  ;;  %v4744_v46 = vmul.f32 %v9419_v5, %v4341_v37  ;;  %8267 = vpow2.f32 %v5101_v39  ;;  %v5105_v47 = vmul.f32 1.442695, %v4742_v38 }
 0x30f   : > { %v8258_v31 = vpop.eup %8257  ;;  %v4345_v48 = vmul.f32 0.6931472, %v8256_v25  ;;  %8269 = vpow2.f32 %v5103_v43  ;;  %v5107_v49 = vmul.f32 1.442695, %v4743_v42  ;;  %v1478_v54 = vmul.f32 %v1146_v44, %v9299_v0 }
 0x310   : > { %v8260_v51 = vpop.eup %8259  ;;  %v4745_v52 = vmul.f32 %v9419_v5, %v4343_v45  ;;  %8271 = vpow2.f32 %v5105_v47  ;;  %v5109_v53 = vmul.f32 1.442695, %v4744_v46  ;;  %v673_v30 = vmax.f32 %v417_v17, 1e-06 }
 0x311   : > { %v8262_v55 = vpop.eup %8261  ;;  %v4746_v56 = vmul.f32 %v9419_v5, %v4345_v48  ;;  %8273 = vpow2.f32 %v5107_v49  ;;  %v1148_v57 = vmul.f32 0.6931472, %v8260_v51  ;;  %v1914_v4 = vmul.f32 1.442695, %v1478_v54 }
 0x312   : > { %v8264_v59 = vpop.eup %8263  ;;  %8275 = vpow2.f32 %v5109_v53  ;;  %v5111_v60 = vmul.f32 1.442695, %v4745_v52  ;;  %v1150_v61 = vmul.f32 0.6931472, %v8262_v55  ;;  %v674_v34 = vmax.f32 %v418_v26, 1e-06 }
 0x313   : > { %v8266_v22 = vpop.eup %8265  ;;  %v5113_v62 = vmul.f32 1.442695, %v4746_v56  ;;  %v1152_v32 = vmul.f32 0.6931472, %v8264_v59  ;;  %v1479_v1 = vmul.f32 %v1148_v57, %v9299_v0  ;;  %8277 = vpow2.f32 %v1908_v50 }
 0x314   : > { %v8268_v2 = vpop.eup %8267  ;;  %8279 = vpow2.f32 %v5111_v60  ;;  %v1480_v3 = vmul.f32 %v1150_v61, %v9299_v0  ;;  %v3299_v6 = vsel %vm2066_vm4, %v8266_v22, 0.0  ;;  %v675_v39 = vmax.f32 %v419_v28, 1e-06 }
 0x315   : > { %v8270_v7 = vpop.eup %8269  ;;  %8281 = vpow2.f32 %v5113_v62  ;;  %v5757_v8 = vsel %vm5659_vm6, %v8268_v2, %v8258_v31  ;;  %v1481_v15 = vmul.f32 %v1152_v32, %v9299_v0  ;;  %v1916_v40 = vmul.f32 1.442695, %v1479_v1 }
 0x316   : > { %v8272_v10 = vpop.eup %8271  ;;  %v5758_v63 = vsel %vm5661_vm7, %v8270_v7, %v5757_v8  ;;  %8283 = vpow2.f32 %v1910_v58  ;;  %v1918_v12 = vmul.f32 1.442695, %v1480_v3  ;;  %v3300_v13 = vrot.slane %v3299_v6, 4 }
 0x317   : > { %v8274_v20 = vpop.eup %8273  ;;  %v5759_v21 = vsel %vm5663_vm8, %v8272_v10, %v5758_v63  ;;  %8285 = vpow2.f32 %v1912_v11  ;;  %v1920_v24 = vmul.f32 1.442695, %v1481_v15  ;;  %v676_v46 = vmax.f32 %v10268_v23, 1e-06 }
 0x318   : > { %v8276_v9 = vpop.eup %8275  ;;  %v5760_v27 = vsel %vm5665_vm9, %v8274_v20, %v5759_v21  ;;  %8287 = vpow2.f32 %v1914_v4  ;;  %v3301_v14 = vadd.f32 %v3300_v13, %v3299_v6 }
 0x319   : > { %v8278_v29 = vpop.eup %8277  ;;  %v5761_v16 = vsel %vm5667_vm10, %v8276_v9, %v5760_v27  ;;  %8289 = vpow2.f32 %v1916_v40 }
 0x31a   : > { %v8280_v18 = vpop.eup %8279  ;;  %8291 = vpow2.f32 %v1918_v12  ;;  %v3302_v33 = vrot.slane %v3301_v14, 2  ;;  %v3306_v19 = vsel %vm2066_vm4, %v8278_v29, 0.0 }
 0x31b   : > { %v8282_v35 = vpop.eup %8281  ;;  %v5762_v37 = vsel %vm5669_vm11, %v8280_v18, %v5761_v16  ;;  %8293 = vpow2.f32 %v1920_v24  ;;  %v3307_v38 = vrot.slane %v3306_v19, 4 }
 0x31c   : > { %v8284_v41 = vpop.eup %8283  ;;  %v5763_v42 = vsel %vm5671_vm12, %v8282_v35, %v5762_v37  ;;  %v3303_v43 = vadd.f32 %v3302_v33, %v3301_v14  ;;  %8295 = vlog2.f32 %v673_v30 }
 0x31d   : > { %v8286_v44 = vpop.eup %8285  ;;  %6019 = vxpose.xlu0.b32.cont [2/4] (short) (narrow) %v5763_v42, 16  ;;  %v3308_v25 = vadd.f32 %v3307_v38, %v3306_v19  ;;  %v3313_v45 = vsel %vm2066_vm4, %v8284_v41, 0.0  ;;  %8297 = vlog2.f32 %v674_v34 }
 0x31e   : > { %v8288_v47 = vpop.eup %8287  ;;  %v3304_v31 = vrot.slane %v3303_v43, 1  ;;  %v3314_v48 = vrot.slane %v3313_v45, 4  ;;  %v3320_v49 = vsel %vm2066_vm4, %v8286_v44, 0.0  ;;  %8299 = vlog2.f32 %v675_v39 }
 0x31f   : > { %v8290_v50 = vpop.eup %8289  ;;  %v3309_v51 = vrot.slane %v3308_v25, 2  ;;  %v3321_v52 = vrot.slane %v3320_v49, 4  ;;  %v3327_v53 = vsel %vm2066_vm4, %v8288_v47, 0.0 }
 0x320   : > { %v8292_v54 = vpop.eup %8291  ;;  %v3305_v55 = vadd.f32 %v3304_v31, %v3303_v43  ;;  %v3315_v56 = vadd.f32 %v3314_v48, %v3313_v45  ;;  %v3328_v57 = vrot.slane %v3327_v53, 4  ;;  %v3334_v58 = vsel %vm2066_vm4, %v8290_v50, 0.0  ;;  %v421_v43 = vld [vmem:[%s9304_s29 + $0x4a0] sm:$0xff] }
 0x321   : > { %v8294_v59 = vpop.eup %8293  ;;  %v3310_v60 = vadd.f32 %v3309_v51, %v3308_v25  ;;  %v3322_v61 = vadd.f32 %v3321_v52, %v3320_v49  ;;  %v3335_v11 = vrot.slane %v3334_v58, 4  ;;  %v3341_v22 = vsel %vm2066_vm4, %v8292_v54, 0.0  ;;  %v422_v49 = vld [vmem:[%s9304_s29 + $0x4a8] sm:$0xff]  ;;  %v423_v52 = vld [vmem:[%s9304_s29 + $0x4b0] sm:$0xff] }
 0x322   : > { %v3316_v62 = vrot.slane %v3315_v56, 2  ;;  %v3329_v32 = vadd.f32 %v3328_v57, %v3327_v53  ;;  %v3342_v1 = vrot.slane %v3341_v22, 4  ;;  %v3348_v2 = vsel %vm2066_vm4, %v8294_v59, 0.0  ;;  %v8296_v3 = vpop.eup %8295  ;;  %v424_v59 = vld [vmem:[%s9304_s29 + $0x4b8] sm:$0xff] }
 0x323   : > { %v3311_v4 = vrot.slane %v3310_v60, 1  ;;  %v3323_v6 = vrot.slane %v3322_v61, 2  ;;  %v3336_v7 = vadd.f32 %v3335_v11, %v3334_v58  ;;  %v3349_v8 = vrot.slane %v3348_v2, 4  ;;  %v8298_v15 = vpop.eup %8297 }
 0x324   : > { %v3317_v40 = vadd.f32 %v3316_v62, %v3315_v56  ;;  %v3330_v10 = vrot.slane %v3329_v32, 2  ;;  %v3343_v63 = vadd.f32 %v3342_v1, %v3341_v22  ;;  %v4042_v12 = vmul.f32 %v9361_v36, %v3305_v55  ;;  %v8300_v13 = vpop.eup %8299 }
 0x325   : > { %v3312_v17 = vadd.f32 %v3311_v4, %v3310_v60  ;;  %v3324_v20 = vadd.f32 %v3323_v6, %v3322_v61  ;;  %v3337_v21 = vrot.slane %v3336_v7, 2  ;;  %v3350_v24 = vadd.f32 %v3349_v8, %v3348_v2 }
 0x326   : > { %v3318_v26 = vrot.slane %v3317_v40, 1  ;;  %v3331_v9 = vadd.f32 %v3330_v10, %v3329_v32  ;;  %v3344_v27 = vrot.slane %v3343_v63, 2  ;;  %8301 = vlog2.f32 %v4042_v12 }
 0x327   : > { %v3325_v14 = vrot.slane %v3324_v20, 1  ;;  %v3338_v28 = vadd.f32 %v3337_v21, %v3336_v7  ;;  %v3351_v29 = vrot.slane %v3350_v24, 2  ;;  %v4043_v16 = vmul.f32 %v9361_v36, %v3312_v17 }
 0x328   : > { %v3319_v30 = vadd.f32 %v3318_v26, %v3317_v40  ;;  %v3332_v18 = vrot.slane %v3331_v9, 1  ;;  %v3345_v33 = vadd.f32 %v3344_v27, %v3343_v63  ;;  %8303 = vlog2.f32 %v676_v46 }
 0x329   : > { %v3326_v19 = vadd.f32 %v3325_v14, %v3324_v20  ;;  %v3339_v23 = vrot.slane %v3338_v28, 1  ;;  %v3352_v34 = vadd.f32 %v3351_v29, %v3350_v24  ;;  %8305 = vlog2.f32 %v4043_v16 }
 0x32a   : > { %v3333_v35 = vadd.f32 %v3332_v18, %v3331_v9  ;;  %v3346_v37 = vrot.slane %v3345_v33, 1  ;;  %v4044_v38 = vmul.f32 %v9361_v36, %v3319_v30  ;;  %v1074_v46 = vmul.f32 0.6931472, %v8296_v3 }
 0x32b   : > { %v3340_v39 = vadd.f32 %v3339_v23, %v3338_v28  ;;  %v3353_v41 = vrot.slane %v3352_v34, 1  ;;  %v4045_v42 = vmul.f32 %v9361_v36, %v3326_v19  ;;  %v677_v53 = vmax.f32 %v421_v43, 1e-06 }
 0x32c   : > { %v8302_v44 = vpop.eup %8301  ;;  %v3347_v25 = vadd.f32 %v3346_v37, %v3345_v33  ;;  %v4046_v45 = vmul.f32 %v9361_v36, %v3333_v35  ;;  %8307 = vlog2.f32 %v4044_v38  ;;  %v1076_v57 = vmul.f32 0.6931472, %v8298_v15 }
 0x32d   : > { %v3354_v47 = vadd.f32 %v3353_v41, %v3352_v34  ;;  %v4047_v31 = vmul.f32 %v9361_v36, %v3340_v39  ;;  %v4475_v48 = vmul.f32 0.6931472, %v8302_v44  ;;  %8309 = vlog2.f32 %v4045_v42 }
 0x32e   : > { %v8304_v50 = vpop.eup %8303  ;;  %v4048_v51 = vmul.f32 %v9361_v36, %v3347_v25  ;;  %8311 = vlog2.f32 %v4046_v45  ;;  %v678_v60 = vmax.f32 %v422_v49, 1e-06  ;;  %v1442_v61 = vmul.f32 %v1074_v46, %v9299_v0 }
 0x32f   : > { %v8306_v54 = vpop.eup %8305  ;;  %v4049_v55 = vmul.f32 %v9361_v36, %v3354_v47  ;;  %8313 = vlog2.f32 %v4047_v31  ;;  %v4811_v56 = vmul.f32 %v9419_v5, %v4475_v48  ;;  %v679_v22 = vmax.f32 %v423_v52, 1e-06 }
 0x330   : > { %v4477_v58 = vmul.f32 0.6931472, %v8306_v54  ;;  %8315 = vlog2.f32 %v4048_v51  ;;  %v1078_v62 = vmul.f32 0.6931472, %v8300_v13  ;;  %v1080_v2 = vmul.f32 0.6931472, %v8304_v50 }
 0x331   : > { %8317 = vlog2.f32 %v4049_v55  ;;  %v5243_v11 = vmul.f32 1.442695, %v4811_v56  ;;  %v680_v6 = vmax.f32 %v424_v59, 1e-06  ;;  %v1443_v7 = vmul.f32 %v1076_v57, %v9299_v0 }
 0x332   : > { %v8308_v32 = vpop.eup %8307  ;;  %v4812_v1 = vmul.f32 %v9419_v5, %v4477_v58  ;;  %8319 = vlog2.f32 %v677_v53  ;;  %v1842_v10 = vmul.f32 1.442695, %v1442_v61  ;;  %v1444_v17 = vmul.f32 %v1078_v62, %v9299_v0 }
 0x333   : > { %v8310_v3 = vpop.eup %8309  ;;  %v4479_v4 = vmul.f32 0.6931472, %v8308_v32  ;;  %8321 = vpow2.f32 %v5243_v11  ;;  %v1445_v26 = vmul.f32 %v1080_v2, %v9299_v0  ;;  %v1844_v39 = vmul.f32 1.442695, %v1443_v7  ;;  %v385_v11 = vld [vmem:[%s9304_s29 + $0x380] sm:$0xff] }
 0x334   : > { %v8312_v8 = vpop.eup %8311  ;;  %v4481_v15 = vmul.f32 0.6931472, %v8310_v3  ;;  %v5245_v40 = vmul.f32 1.442695, %v4812_v1  ;;  %8323 = vlog2.f32 %v678_v60  ;;  %v1846_v47 = vmul.f32 1.442695, %v1444_v17 }
 0x335   : > { %v8314_v63 = vpop.eup %8313  ;;  %v4483_v12 = vmul.f32 0.6931472, %v8312_v8  ;;  %v4813_v13 = vmul.f32 %v9419_v5, %v4479_v4  ;;  %8325 = vlog2.f32 %v679_v22  ;;  %v1848_v50 = vmul.f32 1.442695, %v1445_v26  ;;  %v386_v1 = vld [vmem:[%s9304_s29 + $0x388] sm:$0xff] }
 0x336   : > { %v8316_v20 = vpop.eup %8315  ;;  %v4485_v21 = vmul.f32 0.6931472, %v8314_v63  ;;  %v4814_v24 = vmul.f32 %v9419_v5, %v4481_v15  ;;  %8327 = vpow2.f32 %v5245_v40  ;;  %v387_v15 = vld [vmem:[%s9304_s29 + $0x390] sm:$0xff]  ;;  %v641_v40 = vmax.f32 %v385_v11, 1e-06 }
 0x337   : > { %v8318_v9 = vpop.eup %8317  ;;  %v4487_v27 = vmul.f32 0.6931472, %v8316_v20  ;;  %v4815_v14 = vmul.f32 %v9419_v5, %v4483_v12  ;;  %v5247_v28 = vmul.f32 1.442695, %v4813_v13  ;;  %8329 = vlog2.f32 %v680_v6 }
 0x338   : > { %v8320_v29 = vpop.eup %8319  ;;  %v4489_v16 = vmul.f32 0.6931472, %v8318_v9  ;;  %v4816_v30 = vmul.f32 %v9419_v5, %v4485_v21  ;;  %v5249_v18 = vmul.f32 1.442695, %v4814_v24  ;;  %8331 = vpow2.f32 %v1842_v10  ;;  %v388_v21 = vld [vmem:[%s9304_s29 + $0x398] sm:$0xff] }
 0x339   : > { %v8322_v33 = vpop.eup %8321  ;;  %v4817_v19 = vmul.f32 %v9419_v5, %v4487_v27  ;;  %8333 = vpow2.f32 %v5247_v28  ;;  %v5251_v23 = vmul.f32 1.442695, %v4815_v14  ;;  %v1082_v34 = vmul.f32 0.6931472, %v8320_v29 }
 0x33a   : > { %v8324_v35 = vpop.eup %8323  ;;  %v4818_v37 = vmul.f32 %v9419_v5, %v4489_v16  ;;  %8335 = vpow2.f32 %v5249_v18  ;;  %v5253_v38 = vmul.f32 1.442695, %v4816_v30  ;;  %v642_v12 = vmax.f32 %v386_v1, 1e-06 }
 0x33b   : > { %v8326_v41 = vpop.eup %8325  ;;  %8337 = vpow2.f32 %v5251_v23  ;;  %v5255_v42 = vmul.f32 1.442695, %v4817_v19  ;;  %v1084_v43 = vmul.f32 0.6931472, %v8324_v35  ;;  %v1446_v44 = vmul.f32 %v1082_v34, %v9299_v0 }
 0x33c   : > { %v8328_v25 = vpop.eup %8327  ;;  %8339 = vpow2.f32 %v5253_v38  ;;  %v5257_v45 = vmul.f32 1.442695, %v4818_v37  ;;  %v1086_v46 = vmul.f32 0.6931472, %v8326_v41  ;;  %v643_v9 = vmax.f32 %v387_v15, 1e-06 }
 0x33d   : > { %v8330_v31 = vpop.eup %8329  ;;  %8341 = vpow2.f32 %v5255_v42  ;;  %v5820_v48 = vsel %vm5659_vm6, %v8328_v25, %v8322_v33  ;;  %v1447_v49 = vmul.f32 %v1084_v43, %v9299_v0  ;;  %v1850_v54 = vmul.f32 1.442695, %v1446_v44 }
 0x33e   : > { %v8332_v51 = vpop.eup %8331  ;;  %8343 = vpow2.f32 %v5257_v45  ;;  %v1088_v52 = vmul.f32 0.6931472, %v8330_v31  ;;  %v1448_v53 = vmul.f32 %v1086_v46, %v9299_v0  ;;  %v644_v33 = vmax.f32 %v388_v21, 1e-06 }
 0x33f   : > { %v8334_v55 = vpop.eup %8333  ;;  %8345 = vpow2.f32 %v1844_v39  ;;  %v1852_v56 = vmul.f32 1.442695, %v1447_v49  ;;  %v3075_v57 = vsel %vm2066_vm4, %v8332_v51, 0.0 }
 0x340   : > { %v8336_v58 = vpop.eup %8335  ;;  %v5821_v59 = vsel %vm5661_vm7, %v8334_v55, %v5820_v48  ;;  %v1449_v60 = vmul.f32 %v1088_v52, %v9299_v0  ;;  %8347 = vpow2.f32 %v1846_v47  ;;  %v1854_v61 = vmul.f32 1.442695, %v1448_v53 }
 0x341   : > { %v8338_v22 = vpop.eup %8337  ;;  %v5822_v62 = vsel %vm5663_vm8, %v8336_v58, %v5821_v59  ;;  %8349 = vpow2.f32 %v1848_v50  ;;  %v3076_v32 = vrot.slane %v3075_v57, 4 }
 0x342   : > { %v8340_v2 = vpop.eup %8339  ;;  %v5823_v3 = vsel %vm5665_vm9, %v8338_v22, %v5822_v62  ;;  %8351 = vpow2.f32 %v1850_v54  ;;  %v1856_v4 = vmul.f32 1.442695, %v1449_v60 }
 0x343   : > { %v8342_v6 = vpop.eup %8341  ;;  %v5824_v7 = vsel %vm5667_vm10, %v8340_v2, %v5823_v3  ;;  %8353 = vpow2.f32 %v1852_v56  ;;  %v3077_v8 = vadd.f32 %v3076_v32, %v3075_v57 }
 0x344   : > { %v8344_v10 = vpop.eup %8343  ;;  %v5825_v63 = vsel %vm5669_vm11, %v8342_v6, %v5824_v7  ;;  %8355 = vpow2.f32 %v1854_v61 }
 0x345   : > { %v8346_v13 = vpop.eup %8345  ;;  %v5826_v17 = vsel %vm5671_vm12, %v8344_v10, %v5825_v63  ;;  %8357 = vpow2.f32 %v1856_v4  ;;  %v3078_v20 = vrot.slane %v3077_v8, 2 }
 0x346   : > { %v8348_v24 = vpop.eup %8347  ;;  %6084 = vxpose.xlu2.b32.cont [3/4] (short) (narrow) %v5826_v17, 16  ;;  %v3082_v26 = vsel %vm2066_vm4, %v8346_v13, 0.0  ;;  %8359 = vlog2.f32 %v641_v40  ;;  %v389_v17 = vld [vmem:[%s9304_s29 + $0x3a0] sm:$0xff] }
 0x347   : > { %v8350_v27 = vpop.eup %8349  ;;  %v3079_v14 = vadd.f32 %v3078_v20, %v3077_v8  ;;  %v3083_v28 = vrot.slane %v3082_v26, 4  ;;  %v3089_v29 = vsel %vm2066_vm4, %v8348_v24, 0.0  ;;  %8361 = vlog2.f32 %v642_v12 }
 0x348   : > { %v8352_v16 = vpop.eup %8351  ;;  %v3090_v30 = vrot.slane %v3089_v29, 4  ;;  %v3096_v18 = vsel %vm2066_vm4, %v8350_v27, 0.0  ;;  %8363 = vlog2.f32 %v643_v9 }
 0x349   : > { %v8354_v19 = vpop.eup %8353  ;;  %v3080_v23 = vrot.slane %v3079_v14, 1  ;;  %v3084_v34 = vadd.f32 %v3083_v28, %v3082_v26  ;;  %v3097_v35 = vrot.slane %v3096_v18, 4  ;;  %v3103_v37 = vsel %vm2066_vm4, %v8352_v16, 0.0 }
 0x34a   : > { %v8356_v38 = vpop.eup %8355  ;;  %v3091_v39 = vadd.f32 %v3090_v30, %v3089_v29  ;;  %v3104_v41 = vrot.slane %v3103_v37, 4  ;;  %v3110_v42 = vsel %vm2066_vm4, %v8354_v19, 0.0  ;;  %v645_v30 = vmax.f32 %v389_v17, 1e-06 }
 0x34b   : > { %v8358_v43 = vpop.eup %8357  ;;  %v3081_v44 = vadd.f32 %v3080_v23, %v3079_v14  ;;  %v3085_v25 = vrot.slane %v3084_v34, 2  ;;  %v3098_v45 = vadd.f32 %v3097_v35, %v3096_v18  ;;  %v3111_v46 = vrot.slane %v3110_v42, 4  ;;  %v390_v23 = vld [vmem:[%s9304_s29 + $0x3a8] sm:$0xff] }
 0x34c   : > { %v3092_v47 = vrot.slane %v3091_v39, 2  ;;  %v3105_v31 = vadd.f32 %v3104_v41, %v3103_v37  ;;  %v3117_v48 = vsel %vm2066_vm4, %v8356_v38, 0.0  ;;  %v3124_v49 = vsel %vm2066_vm4, %v8358_v43, 0.0  ;;  %v8360_v50 = vpop.eup %8359  ;;  %v391_v37 = vld [vmem:[%s9304_s29 + $0x3b0] sm:$0xff] }
 0x34d   : > { %v3086_v51 = vadd.f32 %v3085_v25, %v3084_v34  ;;  %v3099_v52 = vrot.slane %v3098_v45, 2  ;;  %v3112_v53 = vadd.f32 %v3111_v46, %v3110_v42  ;;  %v3118_v54 = vrot.slane %v3117_v48, 4  ;;  %v8362_v55 = vpop.eup %8361  ;;  %v392_v42 = vld [vmem:[%s9304_s29 + $0x3b8] sm:$0xff] }
 0x34e   : > { %v3093_v56 = vadd.f32 %v3092_v47, %v3091_v39  ;;  %v3106_v57 = vrot.slane %v3105_v31, 2  ;;  %v3125_v58 = vrot.slane %v3124_v49, 4  ;;  %v4010_v59 = vmul.f32 %v9361_v36, %v3081_v44  ;;  %v8364_v62 = vpop.eup %8363 }
 0x34f   : > { %v3087_v60 = vrot.slane %v3086_v51, 1  ;;  %v3100_v61 = vadd.f32 %v3099_v52, %v3098_v45  ;;  %v3113_v11 = vrot.slane %v3112_v53, 2  ;;  %v3119_v22 = vadd.f32 %v3118_v54, %v3117_v48 }
 0x350   : > { %v3094_v32 = vrot.slane %v3093_v56, 1  ;;  %v3107_v1 = vadd.f32 %v3106_v57, %v3105_v31  ;;  %v3126_v2 = vadd.f32 %v3125_v58, %v3124_v49  ;;  %8365 = vlog2.f32 %v4010_v59 }
 0x351   : > { %v3088_v3 = vadd.f32 %v3087_v60, %v3086_v51  ;;  %v3101_v4 = vrot.slane %v3100_v61, 1  ;;  %v3114_v6 = vadd.f32 %v3113_v11, %v3112_v53  ;;  %v3120_v7 = vrot.slane %v3119_v22, 2 }
 0x352   : > { %v3095_v8 = vadd.f32 %v3094_v32, %v3093_v56  ;;  %v3108_v15 = vrot.slane %v3107_v1, 1  ;;  %v3127_v40 = vrot.slane %v3126_v2, 2  ;;  %8367 = vlog2.f32 %v644_v33 }
 0x353   : > { %v3102_v10 = vadd.f32 %v3101_v4, %v3100_v61  ;;  %v3115_v63 = vrot.slane %v3114_v6, 1  ;;  %v3121_v12 = vadd.f32 %v3120_v7, %v3119_v22  ;;  %v4011_v13 = vmul.f32 %v9361_v36, %v3088_v3 }
 0x354   : > { %v3109_v20 = vadd.f32 %v3108_v15, %v3107_v1  ;;  %v3128_v21 = vadd.f32 %v3127_v40, %v3126_v2  ;;  %v4012_v24 = vmul.f32 %v9361_v36, %v3095_v8  ;;  %v1010_v26 = vmul.f32 0.6931472, %v8360_v50 }
 0x355   : > { %v3116_v9 = vadd.f32 %v3115_v63, %v3114_v6  ;;  %v3122_v27 = vrot.slane %v3121_v12, 1  ;;  %v4013_v14 = vmul.f32 %v9361_v36, %v3102_v10  ;;  %8369 = vlog2.f32 %v4011_v13 }
 0x356   : > { %v8366_v28 = vpop.eup %8365  ;;  %v3129_v29 = vrot.slane %v3128_v21, 1  ;;  %v4014_v16 = vmul.f32 %v9361_v36, %v3109_v20  ;;  %8371 = vlog2.f32 %v4012_v24  ;;  %v1012_v38 = vmul.f32 0.6931472, %v8362_v55 }
 0x357   : > { %v3123_v18 = vadd.f32 %v3122_v27, %v3121_v12  ;;  %v4015_v33 = vmul.f32 %v9361_v36, %v3116_v9  ;;  %v4411_v19 = vmul.f32 0.6931472, %v8366_v28  ;;  %8373 = vlog2.f32 %v4013_v14 }
 0x358   : > { %v8368_v34 = vpop.eup %8367  ;;  %v3130_v35 = vadd.f32 %v3129_v29, %v3128_v21  ;;  %8375 = vlog2.f32 %v4014_v16  ;;  %v1410_v43 = vmul.f32 %v1010_v26, %v9299_v0  ;;  %v646_v25 = vmax.f32 %v390_v23, 1e-06 }
 0x359   : > { %v4016_v39 = vmul.f32 %v9361_v36, %v3123_v18  ;;  %8377 = vlog2.f32 %v4015_v33  ;;  %v4779_v41 = vmul.f32 %v9419_v5, %v4411_v19  ;;  %v1014_v45 = vmul.f32 0.6931472, %v8364_v62 }
 0x35a   : > { %v4017_v44 = vmul.f32 %v9361_v36, %v3130_v35  ;;  %8379 = vlog2.f32 %v645_v30  ;;  %v647_v31 = vmax.f32 %v391_v37, 1e-06  ;;  %v1016_v48 = vmul.f32 0.6931472, %v8368_v34 }
 0x35b   : > { %v8370_v46 = vpop.eup %8369  ;;  %8381 = vlog2.f32 %v4016_v39  ;;  %v5179_v47 = vmul.f32 1.442695, %v4779_v41  ;;  %v648_v51 = vmax.f32 %v392_v42, 1e-06  ;;  %v1411_v54 = vmul.f32 %v1012_v38, %v9299_v0 }
 0x35c   : > { %v8372_v49 = vpop.eup %8371  ;;  %v4413_v50 = vmul.f32 0.6931472, %v8370_v46  ;;  %8383 = vlog2.f32 %v4017_v44  ;;  %v1778_v55 = vmul.f32 1.442695, %v1410_v43  ;;  %v1412_v59 = vmul.f32 %v1014_v45, %v9299_v0 }
 0x35d   : > { %v8374_v52 = vpop.eup %8373  ;;  %v4415_v53 = vmul.f32 0.6931472, %v8372_v49  ;;  %8385 = vpow2.f32 %v5179_v47  ;;  %v1413_v22 = vmul.f32 %v1016_v48, %v9299_v0  ;;  %v1780_v17 = vmul.f32 1.442695, %v1411_v54 }
 0x35e   : > { %v8376_v56 = vpop.eup %8375  ;;  %v4417_v57 = vmul.f32 0.6931472, %v8374_v52  ;;  %v4780_v58 = vmul.f32 %v9419_v5, %v4413_v50  ;;  %8387 = vlog2.f32 %v646_v25  ;;  %v1782_v28 = vmul.f32 1.442695, %v1412_v59 }
 0x35f   : > { %v8378_v60 = vpop.eup %8377  ;;  %v4419_v61 = vmul.f32 0.6931472, %v8376_v56  ;;  %v4781_v11 = vmul.f32 %v9419_v5, %v4415_v53  ;;  %8389 = vlog2.f32 %v647_v31  ;;  %v1784_v18 = vmul.f32 1.442695, %v1413_v22  ;;  %v457_v31 = vld [vmem:[%s9304_s29 + $0x5c0] sm:$0xff] }
 0x360   : > { %v8380_v62 = vpop.eup %8379  ;;  %v4421_v32 = vmul.f32 0.6931472, %v8378_v60  ;;  %v4782_v1 = vmul.f32 %v9419_v5, %v4417_v57  ;;  %v5181_v2 = vmul.f32 1.442695, %v4780_v58  ;;  %8391 = vlog2.f32 %v648_v51  ;;  %v458_v51 = vld [vmem:[%s9304_s29 + $0x5c8] sm:$0xff] }
 0x361   : > { %v8382_v3 = vpop.eup %8381  ;;  %v4783_v4 = vmul.f32 %v9419_v5, %v4419_v61  ;;  %v5183_v6 = vmul.f32 1.442695, %v4781_v11  ;;  %v1018_v7 = vmul.f32 0.6931472, %v8380_v62  ;;  %8393 = vpow2.f32 %v1778_v55  ;;  %v459_v55 = vld [vmem:[%s9304_s29 + $0x5d0] sm:$0xff]  ;;  %v10365_v11 = vld [vmem:[%s9304_s29 + $0x5d8] sm:$0xff] }
 0x362   : > { %v8384_v8 = vpop.eup %8383  ;;  %v4423_v15 = vmul.f32 0.6931472, %v8382_v3  ;;  %v4784_v40 = vmul.f32 %v9419_v5, %v4421_v32  ;;  %8395 = vpow2.f32 %v5181_v2  ;;  %v5185_v10 = vmul.f32 1.442695, %v4782_v1 }
 0x363   : > { %v8386_v63 = vpop.eup %8385  ;;  %v4425_v12 = vmul.f32 0.6931472, %v8384_v8  ;;  %8397 = vpow2.f32 %v5183_v6  ;;  %v5187_v13 = vmul.f32 1.442695, %v4783_v4  ;;  %v1414_v26 = vmul.f32 %v1018_v7, %v9299_v0 }
 0x364   : > { %v8388_v20 = vpop.eup %8387  ;;  %v4785_v21 = vmul.f32 %v9419_v5, %v4423_v15  ;;  %8399 = vpow2.f32 %v5185_v10  ;;  %v5189_v24 = vmul.f32 1.442695, %v4784_v40  ;;  %v713_v58 = vmax.f32 %v457_v31, 1e-06 }
 0x365   : > { %v8390_v9 = vpop.eup %8389  ;;  %v4786_v27 = vmul.f32 %v9419_v5, %v4425_v12  ;;  %8401 = vpow2.f32 %v5187_v13  ;;  %v1020_v14 = vmul.f32 0.6931472, %v8388_v20  ;;  %v1786_v38 = vmul.f32 1.442695, %v1414_v26 }
 0x366   : > { %v8392_v29 = vpop.eup %8391  ;;  %8403 = vpow2.f32 %v5189_v24  ;;  %v5191_v16 = vmul.f32 1.442695, %v4785_v21  ;;  %v1022_v30 = vmul.f32 0.6931472, %v8390_v9  ;;  %v714_v22 = vmax.f32 %v458_v51, 1e-06 }
 0x367   : > { %v8394_v33 = vpop.eup %8393  ;;  %v5193_v19 = vmul.f32 1.442695, %v4786_v27  ;;  %v1024_v23 = vmul.f32 0.6931472, %v8392_v29  ;;  %v1415_v34 = vmul.f32 %v1020_v14, %v9299_v0  ;;  %8405 = vpow2.f32 %v1780_v17 }
 0x368   : > { %v8396_v35 = vpop.eup %8395  ;;  %8407 = vpow2.f32 %v5191_v16  ;;  %v1416_v37 = vmul.f32 %v1022_v30, %v9299_v0  ;;  %v2851_v39 = vsel %vm2066_vm4, %v8394_v33, 0.0  ;;  %v715_v2 = vmax.f32 %v459_v55, 1e-06 }
 0x369   : > { %v8398_v41 = vpop.eup %8397  ;;  %8409 = vpow2.f32 %v5193_v19  ;;  %v5792_v42 = vsel %vm5659_vm6, %v8396_v35, %v8386_v63  ;;  %v1417_v43 = vmul.f32 %v1024_v23, %v9299_v0  ;;  %v1788_v44 = vmul.f32 1.442695, %v1415_v34 }
 0x36a   : > { %v8400_v25 = vpop.eup %8399  ;;  %v5793_v45 = vsel %vm5661_vm7, %v8398_v41, %v5792_v42  ;;  %8411 = vpow2.f32 %v1782_v28  ;;  %v1790_v46 = vmul.f32 1.442695, %v1416_v37  ;;  %v2852_v47 = vrot.slane %v2851_v39, 4 }
 0x36b   : > { %v8402_v48 = vpop.eup %8401  ;;  %v5794_v49 = vsel %vm5663_vm8, %v8400_v25, %v5793_v45  ;;  %8413 = vpow2.f32 %v1784_v18  ;;  %v1792_v50 = vmul.f32 1.442695, %v1417_v43  ;;  %v716_v40 = vmax.f32 %v10365_v11, 1e-06 }
 0x36c   : > { %v8404_v52 = vpop.eup %8403  ;;  %v5795_v53 = vsel %vm5665_vm9, %v8402_v48, %v5794_v49  ;;  %8415 = vpow2.f32 %v1786_v38  ;;  %v2853_v54 = vadd.f32 %v2852_v47, %v2851_v39 }
 0x36d   : > { %v8406_v56 = vpop.eup %8405  ;;  %v5796_v57 = vsel %vm5667_vm10, %v8404_v52, %v5795_v53  ;;  %8417 = vpow2.f32 %v1788_v44 }
 0x36e   : > { %v8408_v59 = vpop.eup %8407  ;;  %8419 = vpow2.f32 %v1790_v46  ;;  %v2854_v60 = vrot.slane %v2853_v54, 2  ;;  %v2858_v61 = vsel %vm2066_vm4, %v8406_v56, 0.0 }
 0x36f   : > { %v8410_v62 = vpop.eup %8409  ;;  %v5797_v32 = vsel %vm5669_vm11, %v8408_v59, %v5796_v57  ;;  %8421 = vpow2.f32 %v1792_v50  ;;  %v2859_v1 = vrot.slane %v2858_v61, 4 }
 0x370   : > { %v8412_v3 = vpop.eup %8411  ;;  %v5798_v4 = vsel %vm5671_vm12, %v8410_v62, %v5797_v32  ;;  %v2855_v6 = vadd.f32 %v2854_v60, %v2853_v54  ;;  %8423 = vlog2.f32 %v713_v58 }
 0x371   : > { %v8414_v7 = vpop.eup %8413  ;;  %6052 = vxpose.xlu1.b32.cont [3/4] (short) (narrow) %v5798_v4, 16  ;;  %v2860_v8 = vadd.f32 %v2859_v1, %v2858_v61  ;;  %v2865_v15 = vsel %vm2066_vm4, %v8412_v3, 0.0  ;;  %8425 = vlog2.f32 %v714_v22 }
 0x372   : > { %v8416_v10 = vpop.eup %8415  ;;  %v2856_v63 = vrot.slane %v2855_v6, 1  ;;  %v2866_v12 = vrot.slane %v2865_v15, 4  ;;  %v2872_v13 = vsel %vm2066_vm4, %v8414_v7, 0.0  ;;  %8427 = vlog2.f32 %v715_v2 }
 0x373   : > { %v8418_v17 = vpop.eup %8417  ;;  %v2861_v20 = vrot.slane %v2860_v8, 2  ;;  %v2873_v21 = vrot.slane %v2872_v13, 4  ;;  %v2879_v24 = vsel %vm2066_vm4, %v8416_v10, 0.0 }
 0x374   : > { %v8420_v26 = vpop.eup %8419  ;;  %v2857_v9 = vadd.f32 %v2856_v63, %v2855_v6  ;;  %v2867_v27 = vadd.f32 %v2866_v12, %v2865_v15  ;;  %v2880_v14 = vrot.slane %v2879_v24, 4  ;;  %v2886_v28 = vsel %vm2066_vm4, %v8418_v17, 0.0  ;;  %v461_v6 = vld [vmem:[%s9304_s29 + $0x5e0] sm:$0xff] }
 0x375   : > { %v8422_v29 = vpop.eup %8421  ;;  %v2862_v16 = vadd.f32 %v2861_v20, %v2860_v8  ;;  %v2874_v30 = vadd.f32 %v2873_v21, %v2872_v13  ;;  %v2887_v18 = vrot.slane %v2886_v28, 4  ;;  %v2893_v33 = vsel %vm2066_vm4, %v8420_v26, 0.0  ;;  %v462_v13 = vld [vmem:[%s9304_s29 + $0x5e8] sm:$0xff]  ;;  %v463_v21 = vld [vmem:[%s9304_s29 + $0x5f0] sm:$0xff] }
 0x376   : > { %v2868_v19 = vrot.slane %v2867_v27, 2  ;;  %v2881_v23 = vadd.f32 %v2880_v14, %v2879_v24  ;;  %v2894_v34 = vrot.slane %v2893_v33, 4  ;;  %v2900_v35 = vsel %vm2066_vm4, %v8422_v29, 0.0  ;;  %v8424_v37 = vpop.eup %8423  ;;  %v464_v29 = vld [vmem:[%s9304_s29 + $0x5f8] sm:$0xff] }
 0x377   : > { %v2863_v38 = vrot.slane %v2862_v16, 1  ;;  %v2875_v39 = vrot.slane %v2874_v30, 2  ;;  %v2888_v41 = vadd.f32 %v2887_v18, %v2886_v28  ;;  %v2901_v42 = vrot.slane %v2900_v35, 4  ;;  %v8426_v43 = vpop.eup %8425 }
 0x378   : > { %v2869_v44 = vadd.f32 %v2868_v19, %v2867_v27  ;;  %v2882_v25 = vrot.slane %v2881_v23, 2  ;;  %v2895_v45 = vadd.f32 %v2894_v34, %v2893_v33  ;;  %v3978_v46 = vmul.f32 %v9361_v36, %v2857_v9  ;;  %v8428_v47 = vpop.eup %8427 }
 0x379   : > { %v2864_v31 = vadd.f32 %v2863_v38, %v2862_v16  ;;  %v2876_v48 = vadd.f32 %v2875_v39, %v2874_v30  ;;  %v2889_v49 = vrot.slane %v2888_v41, 2  ;;  %v2902_v50 = vadd.f32 %v2901_v42, %v2900_v35 }
 0x37a   : > { %v2870_v51 = vrot.slane %v2869_v44, 1  ;;  %v2883_v52 = vadd.f32 %v2882_v25, %v2881_v23  ;;  %v2896_v53 = vrot.slane %v2895_v45, 2  ;;  %8429 = vlog2.f32 %v3978_v46 }
 0x37b   : > { %v2877_v54 = vrot.slane %v2876_v48, 1  ;;  %v2890_v55 = vadd.f32 %v2889_v49, %v2888_v41  ;;  %v2903_v56 = vrot.slane %v2902_v50, 2  ;;  %v3979_v57 = vmul.f32 %v9361_v36, %v2864_v31 }
 0x37c   : > { %v2871_v58 = vadd.f32 %v2870_v51, %v2869_v44  ;;  %v2884_v59 = vrot.slane %v2883_v52, 1  ;;  %v2897_v60 = vadd.f32 %v2896_v53, %v2895_v45  ;;  %8431 = vlog2.f32 %v716_v40 }
 0x37d   : > { %v2878_v61 = vadd.f32 %v2877_v54, %v2876_v48  ;;  %v2891_v11 = vrot.slane %v2890_v55, 1  ;;  %v2904_v22 = vadd.f32 %v2903_v56, %v2902_v50  ;;  %8433 = vlog2.f32 %v3979_v57 }
 0x37e   : > { %v2885_v62 = vadd.f32 %v2884_v59, %v2883_v52  ;;  %v2898_v32 = vrot.slane %v2897_v60, 1  ;;  %v3980_v1 = vmul.f32 %v9361_v36, %v2871_v58  ;;  %v1154_v40 = vmul.f32 0.6931472, %v8424_v37 }
 0x37f   : > { %v2892_v2 = vadd.f32 %v2891_v11, %v2890_v55  ;;  %v2905_v3 = vrot.slane %v2904_v22, 1  ;;  %v3981_v4 = vmul.f32 %v9361_v36, %v2878_v61  ;;  %v717_v24 = vmax.f32 %v461_v6, 1e-06 }
 0x380   : > { %v8430_v7 = vpop.eup %8429  ;;  %v2899_v8 = vadd.f32 %v2898_v32, %v2897_v60  ;;  %v3982_v15 = vmul.f32 %v9361_v36, %v2885_v62  ;;  %8435 = vlog2.f32 %v3980_v1  ;;  %v1156_v14 = vmul.f32 0.6931472, %v8426_v43 }
 0x381   : > { %v2906_v10 = vadd.f32 %v2905_v3, %v2904_v22  ;;  %v3983_v63 = vmul.f32 %v9361_v36, %v2892_v2  ;;  %v4347_v12 = vmul.f32 0.6931472, %v8430_v7  ;;  %8437 = vlog2.f32 %v3981_v4 }
 0x382   : > { %v8432_v17 = vpop.eup %8431  ;;  %v3984_v20 = vmul.f32 %v9361_v36, %v2899_v8  ;;  %8439 = vlog2.f32 %v3982_v15  ;;  %v718_v16 = vmax.f32 %v462_v13, 1e-06  ;;  %v1482_v30 = vmul.f32 %v1154_v40, %v9299_v0 }
 0x383   : > { %v8434_v26 = vpop.eup %8433  ;;  %v3985_v9 = vmul.f32 %v9361_v36, %v2906_v10  ;;  %8441 = vlog2.f32 %v3983_v63  ;;  %v4747_v27 = vmul.f32 %v9419_v5, %v4347_v12  ;;  %v719_v33 = vmax.f32 %v463_v21, 1e-06 }
 0x384   : > { %v4349_v28 = vmul.f32 0.6931472, %v8434_v26  ;;  %8443 = vlog2.f32 %v3984_v20  ;;  %v1158_v19 = vmul.f32 0.6931472, %v8428_v47  ;;  %v1160_v35 = vmul.f32 0.6931472, %v8432_v17 }
 0x385   : > { %8445 = vlog2.f32 %v3985_v9  ;;  %v5115_v18 = vmul.f32 1.442695, %v4747_v27  ;;  %v720_v39 = vmax.f32 %v464_v29, 1e-06  ;;  %v1483_v41 = vmul.f32 %v1156_v14, %v9299_v0 }
 0x386   : > { %v8436_v23 = vpop.eup %8435  ;;  %v4748_v34 = vmul.f32 %v9419_v5, %v4349_v28  ;;  %8447 = vlog2.f32 %v717_v24  ;;  %v1922_v25 = vmul.f32 1.442695, %v1482_v30  ;;  %v1484_v31 = vmul.f32 %v1158_v19, %v9299_v0 }
 0x387   : > { %v8438_v37 = vpop.eup %8437  ;;  %v4351_v38 = vmul.f32 0.6931472, %v8436_v23  ;;  %8449 = vpow2.f32 %v5115_v18  ;;  %v1485_v51 = vmul.f32 %v1160_v35, %v9299_v0  ;;  %v1924_v2 = vmul.f32 1.442695, %v1483_v41  ;;  %v425_v18 = vld [vmem:[%s9304_s29 + $0x4c0] sm:$0xff] }
 0x388   : > { %v8440_v42 = vpop.eup %8439  ;;  %v4353_v43 = vmul.f32 0.6931472, %v8438_v37  ;;  %v5117_v44 = vmul.f32 1.442695, %v4748_v34  ;;  %8451 = vlog2.f32 %v718_v16  ;;  %v1926_v10 = vmul.f32 1.442695, %v1484_v31 }
 0x389   : > { %v8442_v45 = vpop.eup %8441  ;;  %v4355_v46 = vmul.f32 0.6931472, %v8440_v42  ;;  %v4749_v47 = vmul.f32 %v9419_v5, %v4351_v38  ;;  %8453 = vlog2.f32 %v719_v33  ;;  %v1928_v17 = vmul.f32 1.442695, %v1485_v51  ;;  %v426_v34 = vld [vmem:[%s9304_s29 + $0x4c8] sm:$0xff] }
 0x38a   : > { %v8444_v48 = vpop.eup %8443  ;;  %v4357_v49 = vmul.f32 0.6931472, %v8442_v45  ;;  %v4750_v50 = vmul.f32 %v9419_v5, %v4353_v43  ;;  %8455 = vpow2.f32 %v5117_v44  ;;  %v427_v43 = vld [vmem:[%s9304_s29 + $0x4d0] sm:$0xff]  ;;  %v681_v44 = vmax.f32 %v425_v18, 1e-06 }
 0x38b   : > { %v8446_v52 = vpop.eup %8445  ;;  %v4359_v53 = vmul.f32 0.6931472, %v8444_v48  ;;  %v4751_v54 = vmul.f32 %v9419_v5, %v4355_v46  ;;  %v5119_v55 = vmul.f32 1.442695, %v4749_v47  ;;  %8457 = vlog2.f32 %v720_v39 }
 0x38c   : > { %v8448_v56 = vpop.eup %8447  ;;  %v4361_v57 = vmul.f32 0.6931472, %v8446_v52  ;;  %v4752_v58 = vmul.f32 %v9419_v5, %v4357_v49  ;;  %v5121_v59 = vmul.f32 1.442695, %v4750_v50  ;;  %8459 = vpow2.f32 %v1922_v25  ;;  %v428_v49 = vld [vmem:[%s9304_s29 + $0x4d8] sm:$0xff] }
 0x38d   : > { %v8450_v60 = vpop.eup %8449  ;;  %v4753_v61 = vmul.f32 %v9419_v5, %v4359_v53  ;;  %8461 = vpow2.f32 %v5119_v55  ;;  %v5123_v11 = vmul.f32 1.442695, %v4751_v54  ;;  %v1162_v22 = vmul.f32 0.6931472, %v8448_v56 }
 0x38e   : > { %v8452_v62 = vpop.eup %8451  ;;  %v4754_v32 = vmul.f32 %v9419_v5, %v4361_v57  ;;  %8463 = vpow2.f32 %v5121_v59  ;;  %v5125_v1 = vmul.f32 1.442695, %v4752_v58  ;;  %v682_v46 = vmax.f32 %v426_v34, 1e-06 }
 0x38f   : > { %v8454_v3 = vpop.eup %8453  ;;  %8465 = vpow2.f32 %v5123_v11  ;;  %v5127_v4 = vmul.f32 1.442695, %v4753_v61  ;;  %v1164_v6 = vmul.f32 0.6931472, %v8452_v62  ;;  %v1486_v7 = vmul.f32 %v1162_v22, %v9299_v0 }
 0x390   : > { %v8456_v8 = vpop.eup %8455  ;;  %8467 = vpow2.f32 %v5125_v1  ;;  %v5129_v15 = vmul.f32 1.442695, %v4754_v32  ;;  %v1166_v40 = vmul.f32 0.6931472, %v8454_v3  ;;  %v683_v52 = vmax.f32 %v427_v43, 1e-06 }
 0x391   : > { %v8458_v63 = vpop.eup %8457  ;;  %8469 = vpow2.f32 %v5127_v4  ;;  %v5764_v12 = vsel %vm5659_vm6, %v8456_v8, %v8450_v60  ;;  %v1487_v13 = vmul.f32 %v1164_v6, %v9299_v0  ;;  %v1930_v26 = vmul.f32 1.442695, %v1486_v7 }
 0x392   : > { %v8460_v20 = vpop.eup %8459  ;;  %8471 = vpow2.f32 %v5129_v15  ;;  %v1168_v21 = vmul.f32 0.6931472, %v8458_v63  ;;  %v1488_v24 = vmul.f32 %v1166_v40, %v9299_v0  ;;  %v684_v60 = vmax.f32 %v428_v49, 1e-06 }
 0x393   : > { %v8462_v9 = vpop.eup %8461  ;;  %8473 = vpow2.f32 %v1924_v2  ;;  %v1932_v27 = vmul.f32 1.442695, %v1487_v13  ;;  %v3355_v14 = vsel %vm2066_vm4, %v8460_v20, 0.0 }
 0x394   : > { %v8464_v28 = vpop.eup %8463  ;;  %v5765_v29 = vsel %vm5661_vm7, %v8462_v9, %v5764_v12  ;;  %v1489_v16 = vmul.f32 %v1168_v21, %v9299_v0  ;;  %8475 = vpow2.f32 %v1926_v10  ;;  %v1934_v30 = vmul.f32 1.442695, %v1488_v24 }
 0x395   : > { %v8466_v33 = vpop.eup %8465  ;;  %v5766_v19 = vsel %vm5663_vm8, %v8464_v28, %v5765_v29  ;;  %8477 = vpow2.f32 %v1928_v17  ;;  %v3356_v23 = vrot.slane %v3355_v14, 4 }
 0x396   : > { %v8468_v35 = vpop.eup %8467  ;;  %v5767_v37 = vsel %vm5665_vm9, %v8466_v33, %v5766_v19  ;;  %8479 = vpow2.f32 %v1930_v26  ;;  %v1936_v38 = vmul.f32 1.442695, %v1489_v16 }
 0x397   : > { %v8470_v39 = vpop.eup %8469  ;;  %v5768_v41 = vsel %vm5667_vm10, %v8468_v35, %v5767_v37  ;;  %8481 = vpow2.f32 %v1932_v27  ;;  %v3357_v42 = vadd.f32 %v3356_v23, %v3355_v14 }
 0x398   : > { %v8472_v25 = vpop.eup %8471  ;;  %v5769_v45 = vsel %vm5669_vm11, %v8470_v39, %v5768_v41  ;;  %8483 = vpow2.f32 %v1934_v30 }
 0x399   : > { %v8474_v47 = vpop.eup %8473  ;;  %v5770_v31 = vsel %vm5671_vm12, %v8472_v25, %v5769_v45  ;;  %8485 = vpow2.f32 %v1936_v38  ;;  %v3358_v48 = vrot.slane %v3357_v42, 2 }
 0x39a   : > { %v8476_v50 = vpop.eup %8475  ;;  %6020 = vxpose.xlu0.b32.cont [3/4] (short) (narrow) %v5770_v31, 16  ;;  %v3362_v51 = vsel %vm2066_vm4, %v8474_v47, 0.0  ;;  %8487 = vlog2.f32 %v681_v44  ;;  %v429_v31 = vld [vmem:[%s9304_s29 + $0x4e0] sm:$0xff] }
 0x39b   : > { %v8478_v53 = vpop.eup %8477  ;;  %v3359_v54 = vadd.f32 %v3358_v48, %v3357_v42  ;;  %v3363_v55 = vrot.slane %v3362_v51, 4  ;;  %v3369_v56 = vsel %vm2066_vm4, %v8476_v50, 0.0  ;;  %8489 = vlog2.f32 %v682_v46 }
 0x39c   : > { %v8480_v57 = vpop.eup %8479  ;;  %v3370_v58 = vrot.slane %v3369_v56, 4  ;;  %v3376_v59 = vsel %vm2066_vm4, %v8478_v53, 0.0  ;;  %8491 = vlog2.f32 %v683_v52 }
 0x39d   : > { %v8482_v61 = vpop.eup %8481  ;;  %v3360_v11 = vrot.slane %v3359_v54, 1  ;;  %v3364_v22 = vadd.f32 %v3363_v55, %v3362_v51  ;;  %v3377_v62 = vrot.slane %v3376_v59, 4  ;;  %v3383_v32 = vsel %vm2066_vm4, %v8480_v57, 0.0 }
 0x39e   : > { %v8484_v1 = vpop.eup %8483  ;;  %v3371_v2 = vadd.f32 %v3370_v58, %v3369_v56  ;;  %v3384_v3 = vrot.slane %v3383_v32, 4  ;;  %v3390_v4 = vsel %vm2066_vm4, %v8482_v61, 0.0  ;;  %v685_v58 = vmax.f32 %v429_v31, 1e-06 }
 0x39f   : > { %v8486_v6 = vpop.eup %8485  ;;  %v3361_v7 = vadd.f32 %v3360_v11, %v3359_v54  ;;  %v3365_v8 = vrot.slane %v3364_v22, 2  ;;  %v3378_v15 = vadd.f32 %v3377_v62, %v3376_v59  ;;  %v3391_v40 = vrot.slane %v3390_v4, 4  ;;  %v430_v11 = vld [vmem:[%s9304_s29 + $0x4e8] sm:$0xff] }
 0x3a0   : > { %v3372_v10 = vrot.slane %v3371_v2, 2  ;;  %v3385_v63 = vadd.f32 %v3384_v3, %v3383_v32  ;;  %v3397_v12 = vsel %vm2066_vm4, %v8484_v1, 0.0  ;;  %v3404_v13 = vsel %vm2066_vm4, %v8486_v6, 0.0  ;;  %v8488_v17 = vpop.eup %8487  ;;  %v431_v32 = vld [vmem:[%s9304_s29 + $0x4f0] sm:$0xff] }
 0x3a1   : > { %v3366_v20 = vadd.f32 %v3365_v8, %v3364_v22  ;;  %v3379_v21 = vrot.slane %v3378_v15, 2  ;;  %v3392_v24 = vadd.f32 %v3391_v40, %v3390_v4  ;;  %v3398_v26 = vrot.slane %v3397_v12, 4  ;;  %v8490_v9 = vpop.eup %8489  ;;  %v432_v4 = vld [vmem:[%s9304_s29 + $0x4f8] sm:$0xff] }
 0x3a2   : > { %v3373_v27 = vadd.f32 %v3372_v10, %v3371_v2  ;;  %v3386_v14 = vrot.slane %v3385_v63, 2  ;;  %v3405_v28 = vrot.slane %v3404_v13, 4  ;;  %v4050_v29 = vmul.f32 %v9361_v36, %v3361_v7  ;;  %v8492_v19 = vpop.eup %8491 }
 0x3a3   : > { %v3367_v16 = vrot.slane %v3366_v20, 1  ;;  %v3380_v30 = vadd.f32 %v3379_v21, %v3378_v15  ;;  %v3393_v18 = vrot.slane %v3392_v24, 2  ;;  %v3399_v33 = vadd.f32 %v3398_v26, %v3397_v12 }
 0x3a4   : > { %v3374_v23 = vrot.slane %v3373_v27, 1  ;;  %v3387_v34 = vadd.f32 %v3386_v14, %v3385_v63  ;;  %v3406_v35 = vadd.f32 %v3405_v28, %v3404_v13  ;;  %8493 = vlog2.f32 %v4050_v29 }
 0x3a5   : > { %v3368_v37 = vadd.f32 %v3367_v16, %v3366_v20  ;;  %v3381_v38 = vrot.slane %v3380_v30, 1  ;;  %v3394_v39 = vadd.f32 %v3393_v18, %v3392_v24  ;;  %v3400_v41 = vrot.slane %v3399_v33, 2 }
 0x3a6   : > { %v3375_v42 = vadd.f32 %v3374_v23, %v3373_v27  ;;  %v3388_v43 = vrot.slane %v3387_v34, 1  ;;  %v3407_v44 = vrot.slane %v3406_v35, 2  ;;  %8495 = vlog2.f32 %v684_v60 }
 0x3a7   : > { %v3382_v25 = vadd.f32 %v3381_v38, %v3380_v30  ;;  %v3395_v45 = vrot.slane %v3394_v39, 1  ;;  %v3401_v46 = vadd.f32 %v3400_v41, %v3399_v33  ;;  %v4051_v47 = vmul.f32 %v9361_v36, %v3368_v37 }
 0x3a8   : > { %v3389_v48 = vadd.f32 %v3388_v43, %v3387_v34  ;;  %v3408_v49 = vadd.f32 %v3407_v44, %v3406_v35  ;;  %v4052_v50 = vmul.f32 %v9361_v36, %v3375_v42  ;;  %v1090_v51 = vmul.f32 0.6931472, %v8488_v17 }
 0x3a9   : > { %v3396_v52 = vadd.f32 %v3395_v45, %v3394_v39  ;;  %v3402_v53 = vrot.slane %v3401_v46, 1  ;;  %v4053_v54 = vmul.f32 %v9361_v36, %v3382_v25  ;;  %8497 = vlog2.f32 %v4051_v47 }
 0x3aa   : > { %v8494_v55 = vpop.eup %8493  ;;  %v3409_v56 = vrot.slane %v3408_v49, 1  ;;  %v4054_v57 = vmul.f32 %v9361_v36, %v3389_v48  ;;  %8499 = vlog2.f32 %v4052_v50  ;;  %v1092_v1 = vmul.f32 0.6931472, %v8490_v9 }
 0x3ab   : > { %v3403_v59 = vadd.f32 %v3402_v53, %v3401_v46  ;;  %v4055_v60 = vmul.f32 %v9361_v36, %v3396_v52  ;;  %v4491_v61 = vmul.f32 0.6931472, %v8494_v55  ;;  %8501 = vlog2.f32 %v4053_v54 }
 0x3ac   : > { %v8496_v22 = vpop.eup %8495  ;;  %v3410_v62 = vadd.f32 %v3409_v56, %v3408_v49  ;;  %8503 = vlog2.f32 %v4054_v57  ;;  %v1450_v6 = vmul.f32 %v1090_v51, %v9299_v0  ;;  %v686_v8 = vmax.f32 %v430_v11, 1e-06 }
 0x3ad   : > { %v4056_v2 = vmul.f32 %v9361_v36, %v3403_v59  ;;  %8505 = vlog2.f32 %v4055_v60  ;;  %v4819_v3 = vmul.f32 %v9419_v5, %v4491_v61  ;;  %v1094_v15 = vmul.f32 0.6931472, %v8492_v19 }
 0x3ae   : > { %v4057_v7 = vmul.f32 %v9361_v36, %v3410_v62  ;;  %8507 = vlog2.f32 %v685_v58  ;;  %v687_v63 = vmax.f32 %v431_v32, 1e-06  ;;  %v1096_v12 = vmul.f32 0.6931472, %v8496_v22 }
 0x3af   : > { %v8498_v40 = vpop.eup %8497  ;;  %8509 = vlog2.f32 %v4056_v2  ;;  %v5259_v10 = vmul.f32 1.442695, %v4819_v3  ;;  %v688_v20 = vmax.f32 %v432_v4, 1e-06  ;;  %v1451_v26 = vmul.f32 %v1092_v1, %v9299_v0 }
 0x3b0   : > { %v8500_v13 = vpop.eup %8499  ;;  %v4493_v17 = vmul.f32 0.6931472, %v8498_v40  ;;  %8511 = vlog2.f32 %v4057_v7  ;;  %v1858_v9 = vmul.f32 1.442695, %v1450_v6  ;;  %v1452_v29 = vmul.f32 %v1094_v15, %v9299_v0 }
 0x3b1   : > { %v8502_v21 = vpop.eup %8501  ;;  %v4495_v24 = vmul.f32 0.6931472, %v8500_v13  ;;  %8513 = vpow2.f32 %v5259_v10  ;;  %v1453_v33 = vmul.f32 %v1096_v12, %v9299_v0  ;;  %v1860_v31 = vmul.f32 1.442695, %v1451_v26 }
 0x3b2   : > { %v8504_v27 = vpop.eup %8503  ;;  %v4497_v14 = vmul.f32 0.6931472, %v8502_v21  ;;  %v4820_v28 = vmul.f32 %v9419_v5, %v4493_v17  ;;  %8515 = vlog2.f32 %v686_v8  ;;  %v1862_v55 = vmul.f32 1.442695, %v1452_v29 }
 0x3b3   : > { %v8506_v16 = vpop.eup %8505  ;;  %v4499_v30 = vmul.f32 0.6931472, %v8504_v27  ;;  %v4821_v18 = vmul.f32 %v9419_v5, %v4495_v24  ;;  %8517 = vlog2.f32 %v687_v63  ;;  %v1864_v59 = vmul.f32 1.442695, %v1453_v33  ;;  %v393_v63 = vld [vmem:[%s9304_s29 + $0x3c0] sm:$0xff] }
 0x3b4   : > { %v8508_v19 = vpop.eup %8507  ;;  %v4501_v23 = vmul.f32 0.6931472, %v8506_v16  ;;  %v4822_v34 = vmul.f32 %v9419_v5, %v4497_v14  ;;  %v5261_v35 = vmul.f32 1.442695, %v4820_v28  ;;  %8519 = vlog2.f32 %v688_v20  ;;  %v394_v20 = vld [vmem:[%s9304_s29 + $0x3c8] sm:$0xff] }
 0x3b5   : > { %v8510_v37 = vpop.eup %8509  ;;  %v4823_v38 = vmul.f32 %v9419_v5, %v4499_v30  ;;  %v5263_v39 = vmul.f32 1.442695, %v4821_v18  ;;  %v1098_v41 = vmul.f32 0.6931472, %v8508_v19  ;;  %8521 = vpow2.f32 %v1858_v9  ;;  %v395_v9 = vld [vmem:[%s9304_s29 + $0x3d0] sm:$0xff]  ;;  %v10462_v18 = vld [vmem:[%s9304_s29 + $0x3d8] sm:$0xff] }
 0x3b6   : > { %v8512_v42 = vpop.eup %8511  ;;  %v4503_v43 = vmul.f32 0.6931472, %v8510_v37  ;;  %v4824_v44 = vmul.f32 %v9419_v5, %v4501_v23  ;;  %8523 = vpow2.f32 %v5261_v35  ;;  %v5265_v25 = vmul.f32 1.442695, %v4822_v34 }
 0x3b7   : > { %v8514_v45 = vpop.eup %8513  ;;  %v4505_v46 = vmul.f32 0.6931472, %v8512_v42  ;;  %8525 = vpow2.f32 %v5263_v39  ;;  %v5267_v47 = vmul.f32 1.442695, %v4823_v38  ;;  %v1454_v51 = vmul.f32 %v1098_v41, %v9299_v0 }
 0x3b8   : > { %v8516_v48 = vpop.eup %8515  ;;  %v4825_v49 = vmul.f32 %v9419_v5, %v4503_v43  ;;  %8527 = vpow2.f32 %v5265_v25  ;;  %v5269_v50 = vmul.f32 1.442695, %v4824_v44  ;;  %v649_v28 = vmax.f32 %v393_v63, 1e-06 }
 0x3b9   : > { %v8518_v52 = vpop.eup %8517  ;;  %v4826_v53 = vmul.f32 %v9419_v5, %v4505_v46  ;;  %8529 = vpow2.f32 %v5267_v47  ;;  %v1100_v54 = vmul.f32 0.6931472, %v8516_v48  ;;  %v1866_v1 = vmul.f32 1.442695, %v1454_v51 }
 0x3ba   : > { %v8520_v56 = vpop.eup %8519  ;;  %8531 = vpow2.f32 %v5269_v50  ;;  %v5271_v57 = vmul.f32 1.442695, %v4825_v49  ;;  %v1102_v58 = vmul.f32 0.6931472, %v8518_v52  ;;  %v650_v33 = vmax.f32 %v394_v20, 1e-06 }
 0x3bb   : > { %v8522_v60 = vpop.eup %8521  ;;  %v5273_v61 = vmul.f32 1.442695, %v4826_v53  ;;  %v1104_v11 = vmul.f32 0.6931472, %v8520_v56  ;;  %v1455_v22 = vmul.f32 %v1100_v54, %v9299_v0  ;;  %8533 = vpow2.f32 %v1860_v31 }
 0x3bc   : > { %v8524_v62 = vpop.eup %8523  ;;  %8535 = vpow2.f32 %v5271_v57  ;;  %v1456_v32 = vmul.f32 %v1102_v58, %v9299_v0  ;;  %v3131_v2 = vsel %vm2066_vm4, %v8522_v60, 0.0  ;;  %v651_v35 = vmax.f32 %v395_v9, 1e-06 }
 0x3bd   : > { %v8526_v3 = vpop.eup %8525  ;;  %8537 = vpow2.f32 %v5273_v61  ;;  %v5827_v4 = vsel %vm5659_vm6, %v8524_v62, %v8514_v45  ;;  %v1457_v6 = vmul.f32 %v1104_v11, %v9299_v0  ;;  %v1868_v7 = vmul.f32 1.442695, %v1455_v22 }
 0x3be   : > { %v8528_v8 = vpop.eup %8527  ;;  %v5828_v15 = vsel %vm5661_vm7, %v8526_v3, %v5827_v4  ;;  %8539 = vpow2.f32 %v1862_v55  ;;  %v1870_v40 = vmul.f32 1.442695, %v1456_v32  ;;  %v3132_v10 = vrot.slane %v3131_v2, 4 }
 0x3bf   : > { %v8530_v12 = vpop.eup %8529  ;;  %v5829_v13 = vsel %vm5663_vm8, %v8528_v8, %v5828_v15  ;;  %8541 = vpow2.f32 %v1864_v59  ;;  %v1872_v17 = vmul.f32 1.442695, %v1457_v6  ;;  %v652_v44 = vmax.f32 %v10462_v18, 1e-06 }
 0x3c0   : > { %v8532_v21 = vpop.eup %8531  ;;  %v5830_v24 = vsel %vm5665_vm9, %v8530_v12, %v5829_v13  ;;  %8543 = vpow2.f32 %v1866_v1  ;;  %v3133_v26 = vadd.f32 %v3132_v10, %v3131_v2 }
 0x3c1   : > { %v8534_v27 = vpop.eup %8533  ;;  %v5831_v14 = vsel %vm5667_vm10, %v8532_v21, %v5830_v24  ;;  %8545 = vpow2.f32 %v1868_v7 }
 0x3c2   : > { %v8536_v29 = vpop.eup %8535  ;;  %8547 = vpow2.f32 %v1870_v40  ;;  %v3134_v16 = vrot.slane %v3133_v26, 2  ;;  %v3138_v30 = vsel %vm2066_vm4, %v8534_v27, 0.0 }
 0x3c3   : > { %v8538_v19 = vpop.eup %8537  ;;  %v5832_v23 = vsel %vm5669_vm11, %v8536_v29, %v5831_v14  ;;  %8549 = vpow2.f32 %v1872_v17  ;;  %v3139_v34 = vrot.slane %v3138_v30, 4 }
 0x3c4   : > { %v8540_v37 = vpop.eup %8539  ;;  %v5833_v38 = vsel %vm5671_vm12, %v8538_v19, %v5832_v23  ;;  %v3135_v39 = vadd.f32 %v3134_v16, %v3133_v26  ;;  %8551 = vlog2.f32 %v649_v28 }
 0x3c5   : > { %v8542_v41 = vpop.eup %8541  ;;  %6085 = vxpose.xlu2.b32.end [4/4] (short) (narrow) %v5833_v38, 16  ;;  %v3140_v42 = vadd.f32 %v3139_v34, %v3138_v30  ;;  %v3145_v43 = vsel %vm2066_vm4, %v8540_v37, 0.0  ;;  %8553 = vlog2.f32 %v650_v33 }
 0x3c6   : > { %v8544_v25 = vpop.eup %8543  ;;  %v3136_v45 = vrot.slane %v3135_v39, 1  ;;  %v3146_v46 = vrot.slane %v3145_v43, 4  ;;  %v3152_v47 = vsel %vm2066_vm4, %v8542_v41, 0.0  ;;  %8555 = vlog2.f32 %v651_v35 }
 0x3c7   : > { %v8546_v31 = vpop.eup %8545  ;;  %v3141_v48 = vrot.slane %v3140_v42, 2  ;;  %v3153_v49 = vrot.slane %v3152_v47, 4  ;;  %v3159_v50 = vsel %vm2066_vm4, %v8544_v25, 0.0 }
 0x3c8   : > { %v8548_v51 = vpop.eup %8547  ;;  %v3137_v52 = vadd.f32 %v3136_v45, %v3135_v39  ;;  %v3147_v53 = vadd.f32 %v3146_v46, %v3145_v43  ;;  %v3160_v54 = vrot.slane %v3159_v50, 4  ;;  %v3166_v55 = vsel %vm2066_vm4, %v8546_v31, 0.0  ;;  %v397_v39 = vld [vmem:[%s9304_s29 + $0x3e0] sm:$0xff] }
 0x3c9   : > { %v8550_v56 = vpop.eup %8549  ;;  %v3142_v57 = vadd.f32 %v3141_v48, %v3140_v42  ;;  %v3154_v58 = vadd.f32 %v3153_v49, %v3152_v47  ;;  %v3167_v59 = vrot.slane %v3166_v55, 4  ;;  %v3173_v60 = vsel %vm2066_vm4, %v8548_v51, 0.0  ;;  %v398_v47 = vld [vmem:[%s9304_s29 + $0x3e8] sm:$0xff]  ;;  %v399_v49 = vld [vmem:[%s9304_s29 + $0x3f0] sm:$0xff] }
 0x3ca   : > { %v3148_v61 = vrot.slane %v3147_v53, 2  ;;  %v3161_v11 = vadd.f32 %v3160_v54, %v3159_v50  ;;  %v3174_v22 = vrot.slane %v3173_v60, 4  ;;  %v3180_v62 = vsel %vm2066_vm4, %v8550_v56, 0.0  ;;  %v8552_v32 = vpop.eup %8551  ;;  %v400_v56 = vld [vmem:[%s9304_s29 + $0x3f8] sm:$0xff] }
 0x3cb   : > { %v3143_v1 = vrot.slane %v3142_v57, 1  ;;  %v3155_v2 = vrot.slane %v3154_v58, 2  ;;  %v3168_v3 = vadd.f32 %v3167_v59, %v3166_v55  ;;  %v3181_v4 = vrot.slane %v3180_v62, 4  ;;  %v8554_v6 = vpop.eup %8553 }
 0x3cc   : > { %v3149_v7 = vadd.f32 %v3148_v61, %v3147_v53  ;;  %v3162_v8 = vrot.slane %v3161_v11, 2  ;;  %v3175_v15 = vadd.f32 %v3174_v22, %v3173_v60  ;;  %v4018_v40 = vmul.f32 %v9361_v36, %v3137_v52  ;;  %v8556_v10 = vpop.eup %8555 }
 0x3cd   : > { %v3144_v63 = vadd.f32 %v3143_v1, %v3142_v57  ;;  %v3156_v12 = vadd.f32 %v3155_v2, %v3154_v58  ;;  %v3169_v13 = vrot.slane %v3168_v3, 2  ;;  %v3182_v17 = vadd.f32 %v3181_v4, %v3180_v62 }
 0x3ce   : > { %v3150_v20 = vrot.slane %v3149_v7, 1  ;;  %v3163_v21 = vadd.f32 %v3162_v8, %v3161_v11  ;;  %v3176_v24 = vrot.slane %v3175_v15, 2  ;;  %8557 = vlog2.f32 %v4018_v40 }
 0x3cf   : > { %v3157_v26 = vrot.slane %v3156_v12, 1  ;;  %v3170_v9 = vadd.f32 %v3169_v13, %v3168_v3  ;;  %v3183_v27 = vrot.slane %v3182_v17, 2  ;;  %v4019_v14 = vmul.f32 %v9361_v36, %v3144_v63 }
 0x3d0   : > { %v3151_v28 = vadd.f32 %v3150_v20, %v3149_v7  ;;  %v3164_v29 = vrot.slane %v3163_v21, 1  ;;  %v3177_v16 = vadd.f32 %v3176_v24, %v3175_v15  ;;  %8559 = vlog2.f32 %v652_v44 }
 0x3d1   : > { %v3158_v30 = vadd.f32 %v3157_v26, %v3156_v12  ;;  %v3171_v18 = vrot.slane %v3170_v9, 1  ;;  %v3184_v33 = vadd.f32 %v3183_v27, %v3182_v17  ;;  %8561 = vlog2.f32 %v4019_v14 }
 0x3d2   : > { %v3165_v19 = vadd.f32 %v3164_v29, %v3163_v21  ;;  %v3178_v23 = vrot.slane %v3177_v16, 1  ;;  %v4020_v34 = vmul.f32 %v9361_v36, %v3151_v28  ;;  %v1026_v44 = vmul.f32 0.6931472, %v8552_v32 }
 0x3d3   : > { %v3172_v35 = vadd.f32 %v3171_v18, %v3170_v9  ;;  %v3185_v37 = vrot.slane %v3184_v33, 1  ;;  %v4021_v38 = vmul.f32 %v9361_v36, %v3158_v30  ;;  %v653_v50 = vmax.f32 %v397_v39, 1e-06 }
 0x3d4   : > { %v8558_v41 = vpop.eup %8557  ;;  %v3179_v42 = vadd.f32 %v3178_v23, %v3177_v16  ;;  %v4022_v43 = vmul.f32 %v9361_v36, %v3165_v19  ;;  %8563 = vlog2.f32 %v4020_v34  ;;  %v1028_v54 = vmul.f32 0.6931472, %v8554_v6 }
 0x3d5   : > { %v3186_v25 = vadd.f32 %v3185_v37, %v3184_v33  ;;  %v4023_v45 = vmul.f32 %v9361_v36, %v3172_v35  ;;  %v4427_v46 = vmul.f32 0.6931472, %v8558_v41  ;;  %8565 = vlog2.f32 %v4021_v38 }
 0x3d6   : > { %v8560_v31 = vpop.eup %8559  ;;  %v4024_v48 = vmul.f32 %v9361_v36, %v3179_v42  ;;  %8567 = vlog2.f32 %v4022_v43  ;;  %v654_v57 = vmax.f32 %v398_v47, 1e-06  ;;  %v1418_v58 = vmul.f32 %v1026_v44, %v9299_v0 }
 0x3d7   : > { %v8562_v51 = vpop.eup %8561  ;;  %v4025_v52 = vmul.f32 %v9361_v36, %v3186_v25  ;;  %8569 = vlog2.f32 %v4023_v45  ;;  %v4787_v53 = vmul.f32 %v9419_v5, %v4427_v46  ;;  %v655_v60 = vmax.f32 %v399_v49, 1e-06 }
 0x3d8   : > { %v4429_v55 = vmul.f32 0.6931472, %v8562_v51  ;;  %8571 = vlog2.f32 %v4024_v48  ;;  %v1030_v61 = vmul.f32 0.6931472, %v8556_v10  ;;  %v1032_v62 = vmul.f32 0.6931472, %v8560_v31 }
 0x3d9   : > { %8573 = vlog2.f32 %v4025_v52  ;;  %v5195_v59 = vmul.f32 1.442695, %v4787_v53  ;;  %v656_v2 = vmax.f32 %v400_v56, 1e-06  ;;  %v1419_v3 = vmul.f32 %v1028_v54, %v9299_v0 }
 0x3da   : > { %v8564_v11 = vpop.eup %8563  ;;  %v4788_v22 = vmul.f32 %v9419_v5, %v4429_v55  ;;  %8575 = vlog2.f32 %v653_v50  ;;  %v1794_v8 = vmul.f32 1.442695, %v1418_v58  ;;  %v1420_v63 = vmul.f32 %v1030_v61, %v9299_v0 }
 0x3db   : > { %v8566_v32 = vpop.eup %8565  ;;  %v4431_v1 = vmul.f32 0.6931472, %v8564_v11  ;;  %8577 = vpow2.f32 %v5195_v59  ;;  %v1421_v20 = vmul.f32 %v1032_v62, %v9299_v0  ;;  %v1796_v35 = vmul.f32 1.442695, %v1419_v3  ;;  %v497_v59 = vld [vmem:[%s9304_s29 + $0x700] sm:$0xff] }
 0x3dc   : > { %v8568_v4 = vpop.eup %8567  ;;  %v4433_v6 = vmul.f32 0.6931472, %v8566_v32  ;;  %v5197_v7 = vmul.f32 1.442695, %v4788_v22  ;;  %8579 = vlog2.f32 %v654_v57  ;;  %v1798_v25 = vmul.f32 1.442695, %v1420_v63 }
 0x3dd   : > { %v8570_v15 = vpop.eup %8569  ;;  %v4435_v40 = vmul.f32 0.6931472, %v8568_v4  ;;  %v4789_v10 = vmul.f32 %v9419_v5, %v4431_v1  ;;  %8581 = vlog2.f32 %v655_v60  ;;  %v1800_v31 = vmul.f32 1.442695, %v1421_v20  ;;  %v498_v22 = vld [vmem:[%s9304_s29 + $0x708] sm:$0xff] }
 0x3de   : > { %v8572_v12 = vpop.eup %8571  ;;  %v4437_v13 = vmul.f32 0.6931472, %v8570_v15  ;;  %v4790_v17 = vmul.f32 %v9419_v5, %v4433_v6  ;;  %8583 = vpow2.f32 %v5197_v7  ;;  %v499_v6 = vld [vmem:[%s9304_s29 + $0x710] sm:$0xff]  ;;  %v753_v7 = vmax.f32 %v497_v59, 1e-06 }
 0x3df   : > { %v8574_v21 = vpop.eup %8573  ;;  %v4439_v24 = vmul.f32 0.6931472, %v8572_v12  ;;  %v4791_v26 = vmul.f32 %v9419_v5, %v4435_v40  ;;  %v5199_v9 = vmul.f32 1.442695, %v4789_v10  ;;  %8585 = vlog2.f32 %v656_v2 }
 0x3e0   : > { %v8576_v27 = vpop.eup %8575  ;;  %v4441_v14 = vmul.f32 0.6931472, %v8574_v21  ;;  %v4792_v28 = vmul.f32 %v9419_v5, %v4437_v13  ;;  %v5201_v29 = vmul.f32 1.442695, %v4790_v17  ;;  %8587 = vpow2.f32 %v1794_v8  ;;  %v500_v13 = vld [vmem:[%s9304_s29 + $0x718] sm:$0xff] }
 0x3e1   : > { %v8578_v16 = vpop.eup %8577  ;;  %v4793_v30 = vmul.f32 %v9419_v5, %v4439_v24  ;;  %8589 = vpow2.f32 %v5199_v9  ;;  %v5203_v18 = vmul.f32 1.442695, %v4791_v26  ;;  %v1034_v33 = vmul.f32 0.6931472, %v8576_v27 }
 0x3e2   : > { %v8580_v19 = vpop.eup %8579  ;;  %v4794_v23 = vmul.f32 %v9419_v5, %v4441_v14  ;;  %8591 = vpow2.f32 %v5201_v29  ;;  %v5205_v34 = vmul.f32 1.442695, %v4792_v28  ;;  %v754_v40 = vmax.f32 %v498_v22, 1e-06 }
 0x3e3   : > { %v8582_v37 = vpop.eup %8581  ;;  %8593 = vpow2.f32 %v5203_v18  ;;  %v5207_v38 = vmul.f32 1.442695, %v4793_v30  ;;  %v1036_v39 = vmul.f32 0.6931472, %v8580_v19  ;;  %v1422_v41 = vmul.f32 %v1034_v33, %v9299_v0 }
 0x3e4   : > { %v8584_v42 = vpop.eup %8583  ;;  %8595 = vpow2.f32 %v5205_v34  ;;  %v5209_v43 = vmul.f32 1.442695, %v4794_v23  ;;  %v1038_v44 = vmul.f32 0.6931472, %v8582_v37  ;;  %v755_v21 = vmax.f32 %v499_v6, 1e-06 }
 0x3e5   : > { %v8586_v45 = vpop.eup %8585  ;;  %8597 = vpow2.f32 %v5207_v38  ;;  %v5799_v46 = vsel %vm5659_vm6, %v8584_v42, %v8578_v16  ;;  %v1423_v47 = vmul.f32 %v1036_v39, %v9299_v0  ;;  %v1802_v51 = vmul.f32 1.442695, %v1422_v41 }
 0x3e6   : > { %v8588_v48 = vpop.eup %8587  ;;  %8599 = vpow2.f32 %v5209_v43  ;;  %v1040_v49 = vmul.f32 0.6931472, %v8586_v45  ;;  %v1424_v50 = vmul.f32 %v1038_v44, %v9299_v0  ;;  %v756_v16 = vmax.f32 %v500_v13, 1e-06 }
 0x3e7   : > { %v8590_v52 = vpop.eup %8589  ;;  %8601 = vpow2.f32 %v1796_v35  ;;  %v1804_v53 = vmul.f32 1.442695, %v1423_v47  ;;  %v2907_v54 = vsel %vm2066_vm4, %v8588_v48, 0.0 }
 0x3e8   : > { %v8592_v55 = vpop.eup %8591  ;;  %v5800_v56 = vsel %vm5661_vm7, %v8590_v52, %v5799_v46  ;;  %v1425_v57 = vmul.f32 %v1040_v49, %v9299_v0  ;;  %8603 = vpow2.f32 %v1798_v25  ;;  %v1806_v58 = vmul.f32 1.442695, %v1424_v50 }
 0x3e9   : > { %v8594_v60 = vpop.eup %8593  ;;  %v5801_v61 = vsel %vm5663_vm8, %v8592_v55, %v5800_v56  ;;  %8605 = vpow2.f32 %v1800_v31  ;;  %v2908_v11 = vrot.slane %v2907_v54, 4 }
 0x3ea   : > { %v8596_v62 = vpop.eup %8595  ;;  %v5802_v32 = vsel %vm5665_vm9, %v8594_v60, %v5801_v61  ;;  %8607 = vpow2.f32 %v1802_v51  ;;  %v1808_v1 = vmul.f32 1.442695, %v1425_v57 }
 0x3eb   : > { %v8598_v2 = vpop.eup %8597  ;;  %v5803_v3 = vsel %vm5667_vm10, %v8596_v62, %v5802_v32  ;;  %8609 = vpow2.f32 %v1804_v53  ;;  %v2909_v4 = vadd.f32 %v2908_v11, %v2907_v54 }
 0x3ec   : > { %v8600_v8 = vpop.eup %8599  ;;  %v5804_v15 = vsel %vm5669_vm11, %v8598_v2, %v5803_v3  ;;  %8611 = vpow2.f32 %v1806_v58 }
 0x3ed   : > { %v8602_v10 = vpop.eup %8601  ;;  %v5805_v63 = vsel %vm5671_vm12, %v8600_v8, %v5804_v15  ;;  %8613 = vpow2.f32 %v1808_v1  ;;  %v2910_v12 = vrot.slane %v2909_v4, 2 }
 0x3ee   : > { %v8604_v17 = vpop.eup %8603  ;;  %6053 = vxpose.xlu1.b32.end [4/4] (short) (narrow) %v5805_v63, 16  ;;  %v2914_v20 = vsel %vm2066_vm4, %v8602_v10, 0.0  ;;  %8615 = vlog2.f32 %v753_v7  ;;  %v501_v63 = vld [vmem:[%s9304_s29 + $0x720] sm:$0xff] }
 0x3ef   : > { %v8606_v24 = vpop.eup %8605  ;;  %v2911_v26 = vadd.f32 %v2910_v12, %v2909_v4  ;;  %v2915_v9 = vrot.slane %v2914_v20, 4  ;;  %v2921_v27 = vsel %vm2066_vm4, %v8604_v17, 0.0  ;;  %8617 = vlog2.f32 %v754_v40 }
 0x3f0   : > { %v8608_v14 = vpop.eup %8607  ;;  %v2922_v28 = vrot.slane %v2921_v27, 4  ;;  %v2928_v29 = vsel %vm2066_vm4, %v8606_v24, 0.0  ;;  %8619 = vlog2.f32 %v755_v21 }
 0x3f1   : > { %v8610_v30 = vpop.eup %8609  ;;  %v2912_v18 = vrot.slane %v2911_v26, 1  ;;  %v2916_v33 = vadd.f32 %v2915_v9, %v2914_v20  ;;  %v2929_v19 = vrot.slane %v2928_v29, 4  ;;  %v2935_v23 = vsel %vm2066_vm4, %v8608_v14, 0.0 }
 0x3f2   : > { %v8612_v34 = vpop.eup %8611  ;;  %v2923_v35 = vadd.f32 %v2922_v28, %v2921_v27  ;;  %v2936_v37 = vrot.slane %v2935_v23, 4  ;;  %v2942_v38 = vsel %vm2066_vm4, %v8610_v30, 0.0  ;;  %v757_v28 = vmax.f32 %v501_v63, 1e-06 }
 0x3f3   : > { %v8614_v39 = vpop.eup %8613  ;;  %v2913_v41 = vadd.f32 %v2912_v18, %v2911_v26  ;;  %v2917_v42 = vrot.slane %v2916_v33, 2  ;;  %v2930_v43 = vadd.f32 %v2929_v19, %v2928_v29  ;;  %v2943_v44 = vrot.slane %v2942_v38, 4  ;;  %v502_v18 = vld [vmem:[%s9304_s29 + $0x728] sm:$0xff] }
 0x3f4   : > { %v2924_v25 = vrot.slane %v2923_v35, 2  ;;  %v2937_v45 = vadd.f32 %v2936_v37, %v2935_v23  ;;  %v2949_v46 = vsel %vm2066_vm4, %v8612_v34, 0.0  ;;  %v2956_v47 = vsel %vm2066_vm4, %v8614_v39, 0.0  ;;  %v8616_v31 = vpop.eup %8615  ;;  %v503_v23 = vld [vmem:[%s9304_s29 + $0x730] sm:$0xff] }
 0x3f5   : > { %v2918_v48 = vadd.f32 %v2917_v42, %v2916_v33  ;;  %v2931_v49 = vrot.slane %v2930_v43, 2  ;;  %v2944_v50 = vadd.f32 %v2943_v44, %v2942_v38  ;;  %v2950_v51 = vrot.slane %v2949_v46, 4  ;;  %v8618_v52 = vpop.eup %8617  ;;  %v504_v38 = vld [vmem:[%s9304_s29 + $0x738] sm:$0xff] }
 0x3f6   : > { %v2925_v53 = vadd.f32 %v2924_v25, %v2923_v35  ;;  %v2938_v54 = vrot.slane %v2937_v45, 2  ;;  %v2957_v55 = vrot.slane %v2956_v47, 4  ;;  %v3986_v56 = vmul.f32 %v9361_v36, %v2913_v41  ;;  %v8620_v61 = vpop.eup %8619 }
 0x3f7   : > { %v2919_v57 = vrot.slane %v2918_v48, 1  ;;  %v2932_v58 = vadd.f32 %v2931_v49, %v2930_v43  ;;  %v2945_v59 = vrot.slane %v2944_v50, 2  ;;  %v2951_v60 = vadd.f32 %v2950_v51, %v2949_v46 }
 0x3f8   : > { %v2926_v11 = vrot.slane %v2925_v53, 1  ;;  %v2939_v22 = vadd.f32 %v2938_v54, %v2937_v45  ;;  %v2958_v62 = vadd.f32 %v2957_v55, %v2956_v47  ;;  %8621 = vlog2.f32 %v3986_v56 }
 0x3f9   : > { %v2920_v32 = vadd.f32 %v2919_v57, %v2918_v48  ;;  %v2933_v1 = vrot.slane %v2932_v58, 1  ;;  %v2946_v2 = vadd.f32 %v2945_v59, %v2944_v50  ;;  %v2952_v3 = vrot.slane %v2951_v60, 2 }
 0x3fa   : > { %v2927_v4 = vadd.f32 %v2926_v11, %v2925_v53  ;;  %v2940_v6 = vrot.slane %v2939_v22, 1  ;;  %v2959_v7 = vrot.slane %v2958_v62, 2  ;;  %8623 = vlog2.f32 %v756_v16 }
 0x3fb   : > { %v2934_v8 = vadd.f32 %v2933_v1, %v2932_v58  ;;  %v2947_v15 = vrot.slane %v2946_v2, 1  ;;  %v2953_v40 = vadd.f32 %v2952_v3, %v2951_v60  ;;  %v3987_v10 = vmul.f32 %v9361_v36, %v2920_v32 }
 0x3fc   : > { %v2941_v12 = vadd.f32 %v2940_v6, %v2939_v22  ;;  %v2960_v13 = vadd.f32 %v2959_v7, %v2958_v62  ;;  %v3988_v17 = vmul.f32 %v9361_v36, %v2927_v4  ;;  %v1234_v20 = vmul.f32 0.6931472, %v8616_v31 }
 0x3fd   : > { %v2948_v21 = vadd.f32 %v2947_v15, %v2946_v2  ;;  %v2954_v24 = vrot.slane %v2953_v40, 1  ;;  %v3989_v26 = vmul.f32 %v9361_v36, %v2934_v8  ;;  %8625 = vlog2.f32 %v3987_v10 }
 0x3fe   : > { %v8622_v9 = vpop.eup %8621  ;;  %v2961_v27 = vrot.slane %v2960_v13, 1  ;;  %v3990_v14 = vmul.f32 %v9361_v36, %v2941_v12  ;;  %8627 = vlog2.f32 %v3988_v17  ;;  %v1236_v34 = vmul.f32 0.6931472, %v8618_v52 }
 0x3ff   : > { %v2955_v29 = vadd.f32 %v2954_v24, %v2953_v40  ;;  %v3991_v16 = vmul.f32 %v9361_v36, %v2948_v21  ;;  %v4363_v30 = vmul.f32 0.6931472, %v8622_v9  ;;  %8629 = vlog2.f32 %v3989_v26 }
 0x400   : > { %v8624_v33 = vpop.eup %8623  ;;  %v2962_v19 = vadd.f32 %v2961_v27, %v2960_v13  ;;  %8631 = vlog2.f32 %v3990_v14  ;;  %v1522_v39 = vmul.f32 %v1234_v20, %v9299_v0  ;;  %v758_v42 = vmax.f32 %v502_v18, 1e-06 }
 0x401   : > { %v3992_v35 = vmul.f32 %v9361_v36, %v2955_v29  ;;  %8633 = vlog2.f32 %v3991_v16  ;;  %v4755_v37 = vmul.f32 %v9419_v5, %v4363_v30  ;;  %v1238_v43 = vmul.f32 0.6931472, %v8620_v61 }
 0x402   : > { %v3993_v41 = vmul.f32 %v9361_v36, %v2962_v19  ;;  %8635 = vlog2.f32 %v757_v28  ;;  %v759_v45 = vmax.f32 %v503_v23, 1e-06  ;;  %v1240_v46 = vmul.f32 0.6931472, %v8624_v33 }
 0x403   : > { %v8626_v44 = vpop.eup %8625  ;;  %8637 = vlog2.f32 %v3992_v35  ;;  %v5131_v25 = vmul.f32 1.442695, %v4755_v37  ;;  %v760_v48 = vmax.f32 %v504_v38, 1e-06  ;;  %v1523_v51 = vmul.f32 %v1236_v34, %v9299_v0 }
 0x404   : > { %v8628_v47 = vpop.eup %8627  ;;  %v4365_v31 = vmul.f32 0.6931472, %v8626_v44  ;;  %8639 = vlog2.f32 %v3993_v41  ;;  %v2002_v52 = vmul.f32 1.442695, %v1522_v39  ;;  %v1524_v56 = vmul.f32 %v1238_v43, %v9299_v0 }
 0x405   : > { %v8630_v49 = vpop.eup %8629  ;;  %v4367_v50 = vmul.f32 0.6931472, %v8628_v47  ;;  %8641 = vpow2.f32 %v5131_v25  ;;  %v1525_v60 = vmul.f32 %v1240_v46, %v9299_v0  ;;  %v2004_v63 = vmul.f32 1.442695, %v1523_v51 }
 0x406   : > { %v8632_v53 = vpop.eup %8631  ;;  %v4369_v54 = vmul.f32 0.6931472, %v8630_v49  ;;  %v4756_v55 = vmul.f32 %v9419_v5, %v4365_v31  ;;  %8643 = vlog2.f32 %v758_v42  ;;  %v2006_v9 = vmul.f32 1.442695, %v1524_v56 }
 0x407   : > { %v8634_v57 = vpop.eup %8633  ;;  %v4371_v58 = vmul.f32 0.6931472, %v8632_v53  ;;  %v4757_v59 = vmul.f32 %v9419_v5, %v4367_v50  ;;  %8645 = vlog2.f32 %v759_v45  ;;  %v2008_v29 = vmul.f32 1.442695, %v1525_v60  ;;  %v465_v45 = vld [vmem:[%s9304_s29 + $0x600] sm:$0xff] }
 0x408   : > { %v8636_v61 = vpop.eup %8635  ;;  %v4373_v11 = vmul.f32 0.6931472, %v8634_v57  ;;  %v4758_v22 = vmul.f32 %v9419_v5, %v4369_v54  ;;  %v5133_v62 = vmul.f32 1.442695, %v4756_v55  ;;  %8647 = vlog2.f32 %v760_v48  ;;  %v466_v48 = vld [vmem:[%s9304_s29 + $0x608] sm:$0xff] }
 0x409   : > { %v8638_v32 = vpop.eup %8637  ;;  %v4759_v1 = vmul.f32 %v9419_v5, %v4371_v58  ;;  %v5135_v2 = vmul.f32 1.442695, %v4757_v59  ;;  %v1242_v3 = vmul.f32 0.6931472, %v8636_v61  ;;  %8649 = vpow2.f32 %v2002_v52  ;;  %v467_v52 = vld [vmem:[%s9304_s29 + $0x610] sm:$0xff]  ;;  %v10559_v59 = vld [vmem:[%s9304_s29 + $0x618] sm:$0xff] }
 0x40a   : > { %v8640_v4 = vpop.eup %8639  ;;  %v4375_v6 = vmul.f32 0.6931472, %v8638_v32  ;;  %v4760_v7 = vmul.f32 %v9419_v5, %v4373_v11  ;;  %8651 = vpow2.f32 %v5133_v62  ;;  %v5137_v8 = vmul.f32 1.442695, %v4758_v22 }
 0x40b   : > { %v8642_v15 = vpop.eup %8641  ;;  %v4377_v40 = vmul.f32 0.6931472, %v8640_v4  ;;  %8653 = vpow2.f32 %v5135_v2  ;;  %v5139_v10 = vmul.f32 1.442695, %v4759_v1  ;;  %v1526_v20 = vmul.f32 %v1242_v3, %v9299_v0 }
 0x40c   : > { %v8644_v12 = vpop.eup %8643  ;;  %v4761_v13 = vmul.f32 %v9419_v5, %v4375_v6  ;;  %8655 = vpow2.f32 %v5137_v8  ;;  %v5141_v17 = vmul.f32 1.442695, %v4760_v7  ;;  %v721_v55 = vmax.f32 %v465_v45, 1e-06 }
 0x40d   : > { %v8646_v21 = vpop.eup %8645  ;;  %v4762_v24 = vmul.f32 %v9419_v5, %v4377_v40  ;;  %8657 = vpow2.f32 %v5139_v10  ;;  %v1244_v26 = vmul.f32 0.6931472, %v8644_v12  ;;  %v2010_v34 = vmul.f32 1.442695, %v1526_v20 }
 0x40e   : > { %v8648_v27 = vpop.eup %8647  ;;  %8659 = vpow2.f32 %v5141_v17  ;;  %v5143_v14 = vmul.f32 1.442695, %v4761_v13  ;;  %v1246_v28 = vmul.f32 0.6931472, %v8646_v21  ;;  %v722_v60 = vmax.f32 %v466_v48, 1e-06 }
 0x40f   : > { %v8650_v16 = vpop.eup %8649  ;;  %v5145_v30 = vmul.f32 1.442695, %v4762_v24  ;;  %v1248_v18 = vmul.f32 0.6931472, %v8648_v27  ;;  %v1527_v33 = vmul.f32 %v1244_v26, %v9299_v0  ;;  %8661 = vpow2.f32 %v2004_v63 }
 0x410   : > { %v8652_v19 = vpop.eup %8651  ;;  %8663 = vpow2.f32 %v5143_v14  ;;  %v1528_v23 = vmul.f32 %v1246_v28, %v9299_v0  ;;  %v3635_v35 = vsel %vm2066_vm4, %v8650_v16, 0.0  ;;  %v723_v62 = vmax.f32 %v467_v52, 1e-06 }
 0x411   : > { %v8654_v37 = vpop.eup %8653  ;;  %8665 = vpow2.f32 %v5145_v30  ;;  %v5771_v38 = vsel %vm5659_vm6, %v8652_v19, %v8642_v15  ;;  %v1529_v39 = vmul.f32 %v1248_v18, %v9299_v0  ;;  %v2012_v41 = vmul.f32 1.442695, %v1527_v33 }
 0x412   : > { %v8656_v42 = vpop.eup %8655  ;;  %v5772_v43 = vsel %vm5661_vm7, %v8654_v37, %v5771_v38  ;;  %8667 = vpow2.f32 %v2006_v9  ;;  %v2014_v44 = vmul.f32 1.442695, %v1528_v23  ;;  %v3636_v25 = vrot.slane %v3635_v35, 4 }
 0x413   : > { %v8658_v46 = vpop.eup %8657  ;;  %v5773_v47 = vsel %vm5663_vm8, %v8656_v42, %v5772_v43  ;;  %8669 = vpow2.f32 %v2008_v29  ;;  %v2016_v31 = vmul.f32 1.442695, %v1529_v39  ;;  %v724_v7 = vmax.f32 %v10559_v59, 1e-06 }
 0x414   : > { %v8660_v49 = vpop.eup %8659  ;;  %v5774_v50 = vsel %vm5665_vm9, %v8658_v46, %v5773_v47  ;;  %8671 = vpow2.f32 %v2010_v34  ;;  %v3637_v51 = vadd.f32 %v3636_v25, %v3635_v35 }
 0x415   : > { %v8662_v53 = vpop.eup %8661  ;;  %v5775_v54 = vsel %vm5667_vm10, %v8660_v49, %v5774_v50  ;;  %8673 = vpow2.f32 %v2012_v41 }
 0x416   : > { %v8664_v56 = vpop.eup %8663  ;;  %8675 = vpow2.f32 %v2014_v44  ;;  %v3638_v57 = vrot.slane %v3637_v51, 2  ;;  %v3642_v58 = vsel %vm2066_vm4, %v8662_v53, 0.0 }
 0x417   : > { %v8666_v61 = vpop.eup %8665  ;;  %v5776_v11 = vsel %vm5669_vm11, %v8664_v56, %v5775_v54  ;;  %8677 = vpow2.f32 %v2016_v31  ;;  %v3643_v22 = vrot.slane %v3642_v58, 4 }
 0x418   : > { %v8668_v32 = vpop.eup %8667  ;;  %v5777_v1 = vsel %vm5671_vm12, %v8666_v61, %v5776_v11  ;;  %v3639_v2 = vadd.f32 %v3638_v57, %v3637_v51  ;;  %8679 = vlog2.f32 %v721_v55 }
 0x419   : > { %v8670_v3 = vpop.eup %8669  ;;  %6021 = vxpose.xlu0.b32.end [4/4] (short) (narrow) %v5777_v1, 16  ;;  %v3644_v4 = vadd.f32 %v3643_v22, %v3642_v58  ;;  %v3649_v6 = vsel %vm2066_vm4, %v8668_v32, 0.0  ;;  %8681 = vlog2.f32 %v722_v60 }
 0x41a   : > { %v8672_v8 = vpop.eup %8671  ;;  %v3640_v15 = vrot.slane %v3639_v2, 1  ;;  %v3650_v40 = vrot.slane %v3649_v6, 4  ;;  %v3656_v10 = vsel %vm2066_vm4, %v8670_v3, 0.0  ;;  %8683 = vlog2.f32 %v723_v62 }
 0x41b   : > { %v8674_v63 = vpop.eup %8673  ;;  %v3645_v12 = vrot.slane %v3644_v4, 2  ;;  %v3657_v13 = vrot.slane %v3656_v10, 4  ;;  %v3663_v17 = vsel %vm2066_vm4, %v8672_v8, 0.0 }
 0x41c   : > { %v8676_v20 = vpop.eup %8675  ;;  %v3641_v21 = vadd.f32 %v3640_v15, %v3639_v2  ;;  %v3651_v24 = vadd.f32 %v3650_v40, %v3649_v6  ;;  %v3664_v26 = vrot.slane %v3663_v17, 4  ;;  %v3670_v9 = vsel %vm2066_vm4, %v8674_v63, 0.0  ;;  %v469_v2 = vld [vmem:[%s9304_s29 + $0x620] sm:$0xff] }
 0x41d   : > { %v8678_v27 = vpop.eup %8677  ;;  %v3646_v14 = vadd.f32 %v3645_v12, %v3644_v4  ;;  %v3658_v28 = vadd.f32 %v3657_v13, %v3656_v10  ;;  %v3671_v29 = vrot.slane %v3670_v9, 4  ;;  %v3677_v16 = vsel %vm2066_vm4, %v8676_v20, 0.0  ;;  %v470_v10 = vld [vmem:[%s9304_s29 + $0x628] sm:$0xff]  ;;  %v471_v13 = vld [vmem:[%s9304_s29 + $0x630] sm:$0xff] }
 0x41e   : > { %v3652_v30 = vrot.slane %v3651_v24, 2  ;;  %v3665_v18 = vadd.f32 %v3664_v26, %v3663_v17  ;;  %v3678_v33 = vrot.slane %v3677_v16, 4  ;;  %v3684_v19 = vsel %vm2066_vm4, %v8678_v27, 0.0  ;;  %v8680_v23 = vpop.eup %8679  ;;  %v472_v27 = vld [vmem:[%s9304_s29 + $0x638] sm:$0xff] }
 0x41f   : > { %v3647_v34 = vrot.slane %v3646_v14, 1  ;;  %v3659_v35 = vrot.slane %v3658_v28, 2  ;;  %v3672_v37 = vadd.f32 %v3671_v29, %v3670_v9  ;;  %v3685_v38 = vrot.slane %v3684_v19, 4  ;;  %v8682_v39 = vpop.eup %8681 }
 0x420   : > { %v3653_v41 = vadd.f32 %v3652_v30, %v3651_v24  ;;  %v3666_v42 = vrot.slane %v3665_v18, 2  ;;  %v3679_v43 = vadd.f32 %v3678_v33, %v3677_v16  ;;  %v4090_v44 = vmul.f32 %v9361_v36, %v3641_v21  ;;  %v8684_v25 = vpop.eup %8683 }
 0x421   : > { %v3648_v45 = vadd.f32 %v3647_v34, %v3646_v14  ;;  %v3660_v46 = vadd.f32 %v3659_v35, %v3658_v28  ;;  %v3673_v47 = vrot.slane %v3672_v37, 2  ;;  %v3686_v31 = vadd.f32 %v3685_v38, %v3684_v19 }
 0x422   : > { %v3654_v48 = vrot.slane %v3653_v41, 1  ;;  %v3667_v49 = vadd.f32 %v3666_v42, %v3665_v18  ;;  %v3680_v50 = vrot.slane %v3679_v43, 2  ;;  %8685 = vlog2.f32 %v4090_v44 }
 0x423   : > { %v3661_v51 = vrot.slane %v3660_v46, 1  ;;  %v3674_v52 = vadd.f32 %v3673_v47, %v3672_v37  ;;  %v3687_v53 = vrot.slane %v3686_v31, 2  ;;  %v4091_v54 = vmul.f32 %v9361_v36, %v3648_v45 }
 0x424   : > { %v3655_v55 = vadd.f32 %v3654_v48, %v3653_v41  ;;  %v3668_v56 = vrot.slane %v3667_v49, 1  ;;  %v3681_v57 = vadd.f32 %v3680_v50, %v3679_v43  ;;  %8687 = vlog2.f32 %v724_v7 }
 0x425   : > { %v3662_v58 = vadd.f32 %v3661_v51, %v3660_v46  ;;  %v3675_v59 = vrot.slane %v3674_v52, 1  ;;  %v3688_v60 = vadd.f32 %v3687_v53, %v3686_v31  ;;  %8689 = vlog2.f32 %v4091_v54 }
 0x426   : > { %v3669_v61 = vadd.f32 %v3668_v56, %v3667_v49  ;;  %v3682_v11 = vrot.slane %v3681_v57, 1  ;;  %v4092_v22 = vmul.f32 %v9361_v36, %v3655_v55  ;;  %v1170_v7 = vmul.f32 0.6931472, %v8680_v23 }
 0x427   : > { %v3676_v62 = vadd.f32 %v3675_v59, %v3674_v52  ;;  %v3689_v32 = vrot.slane %v3688_v60, 1  ;;  %v4093_v1 = vmul.f32 %v9361_v36, %v3662_v58  ;;  %v725_v17 = vmax.f32 %v469_v2, 1e-06 }
 0x428   : > { %v8686_v3 = vpop.eup %8685  ;;  %v3683_v4 = vadd.f32 %v3682_v11, %v3681_v57  ;;  %v4094_v6 = vmul.f32 %v9361_v36, %v3669_v61  ;;  %8691 = vlog2.f32 %v4092_v22  ;;  %v1172_v26 = vmul.f32 0.6931472, %v8682_v39 }
 0x429   : > { %v3690_v8 = vadd.f32 %v3689_v32, %v3688_v60  ;;  %v4095_v15 = vmul.f32 %v9361_v36, %v3676_v62  ;;  %v4571_v40 = vmul.f32 0.6931472, %v8686_v3  ;;  %8693 = vlog2.f32 %v4093_v1 }
 0x42a   : > { %v8688_v63 = vpop.eup %8687  ;;  %v4096_v12 = vmul.f32 %v9361_v36, %v3683_v4  ;;  %8695 = vlog2.f32 %v4094_v6  ;;  %v726_v14 = vmax.f32 %v470_v10, 1e-06  ;;  %v1490_v28 = vmul.f32 %v1170_v7, %v9299_v0 }
 0x42b   : > { %v8690_v20 = vpop.eup %8689  ;;  %v4097_v21 = vmul.f32 %v9361_v36, %v3690_v8  ;;  %8697 = vlog2.f32 %v4095_v15  ;;  %v4859_v24 = vmul.f32 %v9419_v5, %v4571_v40  ;;  %v727_v16 = vmax.f32 %v471_v13, 1e-06 }
 0x42c   : > { %v4573_v9 = vmul.f32 0.6931472, %v8690_v20  ;;  %8699 = vlog2.f32 %v4096_v12  ;;  %v1174_v30 = vmul.f32 0.6931472, %v8684_v25  ;;  %v1176_v19 = vmul.f32 0.6931472, %v8688_v63 }
 0x42d   : > { %8701 = vlog2.f32 %v4097_v21  ;;  %v5339_v29 = vmul.f32 1.442695, %v4859_v24  ;;  %v728_v35 = vmax.f32 %v472_v27, 1e-06  ;;  %v1491_v37 = vmul.f32 %v1172_v26, %v9299_v0 }
 0x42e   : > { %v8692_v18 = vpop.eup %8691  ;;  %v4860_v33 = vmul.f32 %v9419_v5, %v4573_v9  ;;  %8703 = vlog2.f32 %v725_v17  ;;  %v1938_v42 = vmul.f32 1.442695, %v1490_v28  ;;  %v1492_v45 = vmul.f32 %v1174_v30, %v9299_v0 }
 0x42f   : > { %v8694_v23 = vpop.eup %8693  ;;  %v4575_v34 = vmul.f32 0.6931472, %v8692_v18  ;;  %8705 = vpow2.f32 %v5339_v29  ;;  %v1493_v48 = vmul.f32 %v1176_v19, %v9299_v0  ;;  %v1940_v62 = vmul.f32 1.442695, %v1491_v37  ;;  %v505_v29 = vld [vmem:[%s9304_s29 + $0x740] sm:$0xff] }
 0x430   : > { %v8696_v38 = vpop.eup %8695  ;;  %v4577_v39 = vmul.f32 0.6931472, %v8694_v23  ;;  %v5341_v41 = vmul.f32 1.442695, %v4860_v33  ;;  %8707 = vlog2.f32 %v726_v14  ;;  %v1942_v8 = vmul.f32 1.442695, %v1492_v45 }
 0x431   : > { %v8698_v43 = vpop.eup %8697  ;;  %v4579_v44 = vmul.f32 0.6931472, %v8696_v38  ;;  %v4861_v25 = vmul.f32 %v9419_v5, %v4575_v34  ;;  %8709 = vlog2.f32 %v727_v16  ;;  %v1944_v63 = vmul.f32 1.442695, %v1493_v48  ;;  %v506_v33 = vld [vmem:[%s9304_s29 + $0x748] sm:$0xff] }
 0x432   : > { %v8700_v46 = vpop.eup %8699  ;;  %v4581_v47 = vmul.f32 0.6931472, %v8698_v43  ;;  %v4862_v31 = vmul.f32 %v9419_v5, %v4577_v39  ;;  %8711 = vpow2.f32 %v5341_v41  ;;  %v507_v39 = vld [vmem:[%s9304_s29 + $0x750] sm:$0xff]  ;;  %v761_v41 = vmax.f32 %v505_v29, 1e-06 }
 0x433   : > { %v8702_v49 = vpop.eup %8701  ;;  %v4583_v50 = vmul.f32 0.6931472, %v8700_v46  ;;  %v4863_v51 = vmul.f32 %v9419_v5, %v4579_v44  ;;  %v5343_v52 = vmul.f32 1.442695, %v4861_v25  ;;  %8713 = vlog2.f32 %v728_v35 }
 0x434   : > { %v8704_v53 = vpop.eup %8703  ;;  %v4585_v54 = vmul.f32 0.6931472, %v8702_v49  ;;  %v4864_v55 = vmul.f32 %v9419_v5, %v4581_v47  ;;  %v5345_v56 = vmul.f32 1.442695, %v4862_v31  ;;  %8715 = vpow2.f32 %v1938_v42  ;;  %v508_v47 = vld [vmem:[%s9304_s29 + $0x758] sm:$0xff] }
 0x435   : > { %v8706_v57 = vpop.eup %8705  ;;  %v4865_v58 = vmul.f32 %v9419_v5, %v4583_v50  ;;  %8717 = vpow2.f32 %v5343_v52  ;;  %v5347_v59 = vmul.f32 1.442695, %v4863_v51  ;;  %v1178_v60 = vmul.f32 0.6931472, %v8704_v53 }
 0x436   : > { %v8708_v61 = vpop.eup %8707  ;;  %v4866_v11 = vmul.f32 %v9419_v5, %v4585_v54  ;;  %8719 = vpow2.f32 %v5345_v56  ;;  %v5349_v22 = vmul.f32 1.442695, %v4864_v55  ;;  %v762_v44 = vmax.f32 %v506_v33, 1e-06 }
 0x437   : > { %v8710_v32 = vpop.eup %8709  ;;  %8721 = vpow2.f32 %v5347_v59  ;;  %v5351_v1 = vmul.f32 1.442695, %v4865_v58  ;;  %v1180_v2 = vmul.f32 0.6931472, %v8708_v61  ;;  %v1494_v3 = vmul.f32 %v1178_v60, %v9299_v0 }
 0x438   : > { %v8712_v4 = vpop.eup %8711  ;;  %8723 = vpow2.f32 %v5349_v22  ;;  %v5353_v6 = vmul.f32 1.442695, %v4866_v11  ;;  %v1182_v7 = vmul.f32 0.6931472, %v8710_v32  ;;  %v763_v49 = vmax.f32 %v507_v39, 1e-06 }
 0x439   : > { %v8714_v15 = vpop.eup %8713  ;;  %8725 = vpow2.f32 %v5351_v1  ;;  %v5862_v40 = vsel %vm5659_vm6, %v8712_v4, %v8706_v57  ;;  %v1495_v10 = vmul.f32 %v1180_v2, %v9299_v0  ;;  %v1946_v20 = vmul.f32 1.442695, %v1494_v3 }
 0x43a   : > { %v8716_v12 = vpop.eup %8715  ;;  %8727 = vpow2.f32 %v5353_v6  ;;  %v1184_v13 = vmul.f32 0.6931472, %v8714_v15  ;;  %v1496_v17 = vmul.f32 %v1182_v7, %v9299_v0  ;;  %v764_v57 = vmax.f32 %v508_v47, 1e-06 }
 0x43b   : > { %v8718_v21 = vpop.eup %8717  ;;  %8729 = vpow2.f32 %v1940_v62  ;;  %v1948_v24 = vmul.f32 1.442695, %v1495_v10  ;;  %v3411_v26 = vsel %vm2066_vm4, %v8716_v12, 0.0 }
 0x43c   : > { %v8720_v9 = vpop.eup %8719  ;;  %v5863_v27 = vsel %vm5661_vm7, %v8718_v21, %v5862_v40  ;;  %v1497_v14 = vmul.f32 %v1184_v13, %v9299_v0  ;;  %8731 = vpow2.f32 %v1942_v8  ;;  %v1950_v28 = vmul.f32 1.442695, %v1496_v17 }
 0x43d   : > { %v8722_v16 = vpop.eup %8721  ;;  %v5864_v30 = vsel %vm5663_vm8, %v8720_v9, %v5863_v27  ;;  %8733 = vpow2.f32 %v1944_v63  ;;  %v3412_v18 = vrot.slane %v3411_v26, 4 }
 0x43e   : > { %v8724_v19 = vpop.eup %8723  ;;  %v5865_v23 = vsel %vm5665_vm9, %v8722_v16, %v5864_v30  ;;  %8735 = vpow2.f32 %v1946_v20  ;;  %v1952_v34 = vmul.f32 1.442695, %v1497_v14 }
 0x43f   : > { %v8726_v35 = vpop.eup %8725  ;;  %v5866_v37 = vsel %vm5667_vm10, %v8724_v19, %v5865_v23  ;;  %8737 = vpow2.f32 %v1948_v24  ;;  %v3413_v38 = vadd.f32 %v3412_v18, %v3411_v26 }
 0x440   : > { %v8728_v42 = vpop.eup %8727  ;;  %v5867_v43 = vsel %vm5669_vm11, %v8726_v35, %v5866_v37  ;;  %8739 = vpow2.f32 %v1950_v28 }
 0x441   : > { %v8730_v25 = vpop.eup %8729  ;;  %v5868_v45 = vsel %vm5671_vm12, %v8728_v42, %v5867_v43  ;;  %8741 = vpow2.f32 %v1952_v34  ;;  %v3414_v46 = vrot.slane %v3413_v38, 2 }
 0x442   : > { %v8732_v31 = vpop.eup %8731  ;;  %6146 = vxpose.xlu1.b32.start [1/4] (short) (narrow) %v5868_v45, 16  ;;  %v3418_v48 = vsel %vm2066_vm4, %v8730_v25, 0.0  ;;  %8743 = vlog2.f32 %v761_v41  ;;  %v509_v45 = vld [vmem:[%s9304_s29 + $0x760] sm:$0xff] }
 0x443   : > { %v8734_v50 = vpop.eup %8733  ;;  %v3415_v51 = vadd.f32 %v3414_v46, %v3413_v38  ;;  %v3419_v52 = vrot.slane %v3418_v48, 4  ;;  %v3425_v53 = vsel %vm2066_vm4, %v8732_v31, 0.0  ;;  %8745 = vlog2.f32 %v762_v44 }
 0x444   : > { %v8736_v54 = vpop.eup %8735  ;;  %v3426_v55 = vrot.slane %v3425_v53, 4  ;;  %v3432_v56 = vsel %vm2066_vm4, %v8734_v50, 0.0  ;;  %8747 = vlog2.f32 %v763_v49 }
 0x445   : > { %v8738_v58 = vpop.eup %8737  ;;  %v3416_v59 = vrot.slane %v3415_v51, 1  ;;  %v3420_v60 = vadd.f32 %v3419_v52, %v3418_v48  ;;  %v3433_v61 = vrot.slane %v3432_v56, 4  ;;  %v3439_v11 = vsel %vm2066_vm4, %v8736_v54, 0.0 }
 0x446   : > { %v8740_v22 = vpop.eup %8739  ;;  %v3427_v62 = vadd.f32 %v3426_v55, %v3425_v53  ;;  %v3440_v32 = vrot.slane %v3439_v11, 4  ;;  %v3446_v1 = vsel %vm2066_vm4, %v8738_v58, 0.0  ;;  %v765_v55 = vmax.f32 %v509_v45, 1e-06 }
 0x447   : > { %v8742_v2 = vpop.eup %8741  ;;  %v3417_v3 = vadd.f32 %v3416_v59, %v3415_v51  ;;  %v3421_v4 = vrot.slane %v3420_v60, 2  ;;  %v3434_v6 = vadd.f32 %v3433_v61, %v3432_v56  ;;  %v3447_v7 = vrot.slane %v3446_v1, 4  ;;  %v510_v59 = vld [vmem:[%s9304_s29 + $0x768] sm:$0xff] }
 0x448   : > { %v3428_v8 = vrot.slane %v3427_v62, 2  ;;  %v3441_v15 = vadd.f32 %v3440_v32, %v3439_v11  ;;  %v3453_v40 = vsel %vm2066_vm4, %v8740_v22, 0.0  ;;  %v3460_v10 = vsel %vm2066_vm4, %v8742_v2, 0.0  ;;  %v8744_v63 = vpop.eup %8743  ;;  %v511_v11 = vld [vmem:[%s9304_s29 + $0x770] sm:$0xff] }
 0x449   : > { %v3422_v12 = vadd.f32 %v3421_v4, %v3420_v60  ;;  %v3435_v13 = vrot.slane %v3434_v6, 2  ;;  %v3448_v17 = vadd.f32 %v3447_v7, %v3446_v1  ;;  %v3454_v20 = vrot.slane %v3453_v40, 4  ;;  %v8746_v21 = vpop.eup %8745  ;;  %v512_v1 = vld [vmem:[%s9304_s29 + $0x778] sm:$0xff] }
 0x44a   : > { %v3429_v24 = vadd.f32 %v3428_v8, %v3427_v62  ;;  %v3442_v26 = vrot.slane %v3441_v15, 2  ;;  %v3461_v9 = vrot.slane %v3460_v10, 4  ;;  %v4058_v27 = vmul.f32 %v9361_v36, %v3417_v3  ;;  %v8748_v30 = vpop.eup %8747 }
 0x44b   : > { %v3423_v14 = vrot.slane %v3422_v12, 1  ;;  %v3436_v28 = vadd.f32 %v3435_v13, %v3434_v6  ;;  %v3449_v29 = vrot.slane %v3448_v17, 2  ;;  %v3455_v16 = vadd.f32 %v3454_v20, %v3453_v40 }
 0x44c   : > { %v3430_v18 = vrot.slane %v3429_v24, 1  ;;  %v3443_v33 = vadd.f32 %v3442_v26, %v3441_v15  ;;  %v3462_v19 = vadd.f32 %v3461_v9, %v3460_v10  ;;  %8749 = vlog2.f32 %v4058_v27 }
 0x44d   : > { %v3424_v23 = vadd.f32 %v3423_v14, %v3422_v12  ;;  %v3437_v34 = vrot.slane %v3436_v28, 1  ;;  %v3450_v35 = vadd.f32 %v3449_v29, %v3448_v17  ;;  %v3456_v37 = vrot.slane %v3455_v16, 2 }
 0x44e   : > { %v3431_v38 = vadd.f32 %v3430_v18, %v3429_v24  ;;  %v3444_v39 = vrot.slane %v3443_v33, 1  ;;  %v3463_v41 = vrot.slane %v3462_v19, 2  ;;  %8751 = vlog2.f32 %v764_v57 }
 0x44f   : > { %v3438_v42 = vadd.f32 %v3437_v34, %v3436_v28  ;;  %v3451_v43 = vrot.slane %v3450_v35, 1  ;;  %v3457_v44 = vadd.f32 %v3456_v37, %v3455_v16  ;;  %v4059_v25 = vmul.f32 %v9361_v36, %v3424_v23 }
 0x450   : > { %v3445_v46 = vadd.f32 %v3444_v39, %v3443_v33  ;;  %v3464_v47 = vadd.f32 %v3463_v41, %v3462_v19  ;;  %v4060_v31 = vmul.f32 %v9361_v36, %v3431_v38  ;;  %v1250_v48 = vmul.f32 0.6931472, %v8744_v63 }
 0x451   : > { %v3452_v49 = vadd.f32 %v3451_v43, %v3450_v35  ;;  %v3458_v50 = vrot.slane %v3457_v44, 1  ;;  %v4061_v51 = vmul.f32 %v9361_v36, %v3438_v42  ;;  %8753 = vlog2.f32 %v4059_v25 }
 0x452   : > { %v8750_v52 = vpop.eup %8749  ;;  %v3465_v53 = vrot.slane %v3464_v47, 1  ;;  %v4062_v54 = vmul.f32 %v9361_v36, %v3445_v46  ;;  %8755 = vlog2.f32 %v4060_v31  ;;  %v1252_v22 = vmul.f32 0.6931472, %v8746_v21 }
 0x453   : > { %v3459_v56 = vadd.f32 %v3458_v50, %v3457_v44  ;;  %v4063_v57 = vmul.f32 %v9361_v36, %v3452_v49  ;;  %v4507_v58 = vmul.f32 0.6931472, %v8750_v52  ;;  %8757 = vlog2.f32 %v4061_v51 }
 0x454   : > { %v8752_v60 = vpop.eup %8751  ;;  %v3466_v61 = vadd.f32 %v3465_v53, %v3464_v47  ;;  %8759 = vlog2.f32 %v4062_v54  ;;  %v1530_v2 = vmul.f32 %v1250_v48, %v9299_v0  ;;  %v766_v4 = vmax.f32 %v510_v59, 1e-06 }
 0x455   : > { %v4064_v62 = vmul.f32 %v9361_v36, %v3459_v56  ;;  %8761 = vlog2.f32 %v4063_v57  ;;  %v4827_v32 = vmul.f32 %v9419_v5, %v4507_v58  ;;  %v1254_v6 = vmul.f32 0.6931472, %v8748_v30 }
 0x456   : > { %v4065_v3 = vmul.f32 %v9361_v36, %v3466_v61  ;;  %8763 = vlog2.f32 %v765_v55  ;;  %v767_v15 = vmax.f32 %v511_v11, 1e-06  ;;  %v1256_v40 = vmul.f32 0.6931472, %v8752_v60 }
 0x457   : > { %v8754_v7 = vpop.eup %8753  ;;  %8765 = vlog2.f32 %v4064_v62  ;;  %v5275_v8 = vmul.f32 1.442695, %v4827_v32  ;;  %v768_v12 = vmax.f32 %v512_v1, 1e-06  ;;  %v1531_v20 = vmul.f32 %v1252_v22, %v9299_v0 }
 0x458   : > { %v8756_v10 = vpop.eup %8755  ;;  %v4509_v63 = vmul.f32 0.6931472, %v8754_v7  ;;  %8767 = vlog2.f32 %v4065_v3  ;;  %v2018_v21 = vmul.f32 1.442695, %v1530_v2  ;;  %v1532_v27 = vmul.f32 %v1254_v6, %v9299_v0 }
 0x459   : > { %v8758_v13 = vpop.eup %8757  ;;  %v4511_v17 = vmul.f32 0.6931472, %v8756_v10  ;;  %8769 = vpow2.f32 %v5275_v8  ;;  %v1533_v16 = vmul.f32 %v1256_v40, %v9299_v0  ;;  %v2020_v45 = vmul.f32 1.442695, %v1531_v20 }
 0x45a   : > { %v8760_v24 = vpop.eup %8759  ;;  %v4513_v26 = vmul.f32 0.6931472, %v8758_v13  ;;  %v4828_v9 = vmul.f32 %v9419_v5, %v4509_v63  ;;  %8771 = vlog2.f32 %v766_v4  ;;  %v2022_v52 = vmul.f32 1.442695, %v1532_v27 }
 0x45b   : > { %v8762_v14 = vpop.eup %8761  ;;  %v4515_v28 = vmul.f32 0.6931472, %v8760_v24  ;;  %v4829_v29 = vmul.f32 %v9419_v5, %v4511_v17  ;;  %8773 = vlog2.f32 %v767_v15  ;;  %v2024_v56 = vmul.f32 1.442695, %v1533_v16  ;;  %v473_v15 = vld [vmem:[%s9304_s29 + $0x640] sm:$0xff] }
 0x45c   : > { %v8764_v30 = vpop.eup %8763  ;;  %v4517_v18 = vmul.f32 0.6931472, %v8762_v14  ;;  %v4830_v33 = vmul.f32 %v9419_v5, %v4513_v26  ;;  %v5277_v19 = vmul.f32 1.442695, %v4828_v9  ;;  %8775 = vlog2.f32 %v768_v12  ;;  %v474_v12 = vld [vmem:[%s9304_s29 + $0x648] sm:$0xff] }
 0x45d   : > { %v8766_v23 = vpop.eup %8765  ;;  %v4831_v34 = vmul.f32 %v9419_v5, %v4515_v28  ;;  %v5279_v35 = vmul.f32 1.442695, %v4829_v29  ;;  %v1258_v37 = vmul.f32 0.6931472, %v8764_v30  ;;  %8777 = vpow2.f32 %v2018_v21  ;;  %v475_v21 = vld [vmem:[%s9304_s29 + $0x650] sm:$0xff]  ;;  %v10656_v29 = vld [vmem:[%s9304_s29 + $0x658] sm:$0xff] }
 0x45e   : > { %v8768_v38 = vpop.eup %8767  ;;  %v4519_v39 = vmul.f32 0.6931472, %v8766_v23  ;;  %v4832_v41 = vmul.f32 %v9419_v5, %v4517_v18  ;;  %8779 = vpow2.f32 %v5277_v19  ;;  %v5281_v42 = vmul.f32 1.442695, %v4830_v33 }
 0x45f   : > { %v8770_v43 = vpop.eup %8769  ;;  %v4521_v44 = vmul.f32 0.6931472, %v8768_v38  ;;  %8781 = vpow2.f32 %v5279_v35  ;;  %v5283_v25 = vmul.f32 1.442695, %v4831_v34  ;;  %v1534_v48 = vmul.f32 %v1258_v37, %v9299_v0 }
 0x460   : > { %v8772_v46 = vpop.eup %8771  ;;  %v4833_v47 = vmul.f32 %v9419_v5, %v4519_v39  ;;  %8783 = vpow2.f32 %v5281_v42  ;;  %v5285_v31 = vmul.f32 1.442695, %v4832_v41  ;;  %v729_v9 = vmax.f32 %v473_v15, 1e-06 }
 0x461   : > { %v8774_v49 = vpop.eup %8773  ;;  %v4834_v50 = vmul.f32 %v9419_v5, %v4521_v44  ;;  %8785 = vpow2.f32 %v5283_v25  ;;  %v1260_v51 = vmul.f32 0.6931472, %v8772_v46  ;;  %v2026_v22 = vmul.f32 1.442695, %v1534_v48 }
 0x462   : > { %v8776_v53 = vpop.eup %8775  ;;  %8787 = vpow2.f32 %v5285_v31  ;;  %v5287_v54 = vmul.f32 1.442695, %v4833_v47  ;;  %v1262_v55 = vmul.f32 0.6931472, %v8774_v49  ;;  %v730_v16 = vmax.f32 %v474_v12, 1e-06 }
 0x463   : > { %v8778_v57 = vpop.eup %8777  ;;  %v5289_v58 = vmul.f32 1.442695, %v4834_v50  ;;  %v1264_v59 = vmul.f32 0.6931472, %v8776_v53  ;;  %v1535_v60 = vmul.f32 %v1260_v51, %v9299_v0  ;;  %8789 = vpow2.f32 %v2020_v45 }
 0x464   : > { %v8780_v61 = vpop.eup %8779  ;;  %8791 = vpow2.f32 %v5287_v54  ;;  %v1536_v11 = vmul.f32 %v1262_v55, %v9299_v0  ;;  %v3691_v62 = vsel %vm2066_vm4, %v8778_v57, 0.0  ;;  %v731_v19 = vmax.f32 %v475_v21, 1e-06 }
 0x465   : > { %v8782_v32 = vpop.eup %8781  ;;  %8793 = vpow2.f32 %v5289_v58  ;;  %v5834_v1 = vsel %vm5659_vm6, %v8780_v61, %v8770_v43  ;;  %v1537_v2 = vmul.f32 %v1264_v59, %v9299_v0  ;;  %v2028_v3 = vmul.f32 1.442695, %v1535_v60 }
 0x466   : > { %v8784_v4 = vpop.eup %8783  ;;  %v5835_v6 = vsel %vm5661_vm7, %v8782_v32, %v5834_v1  ;;  %8795 = vpow2.f32 %v2022_v52  ;;  %v2030_v7 = vmul.f32 1.442695, %v1536_v11  ;;  %v3692_v8 = vrot.slane %v3691_v62, 4 }
 0x467   : > { %v8786_v40 = vpop.eup %8785  ;;  %v5836_v10 = vsel %vm5663_vm8, %v8784_v4, %v5835_v6  ;;  %8797 = vpow2.f32 %v2024_v56  ;;  %v2032_v63 = vmul.f32 1.442695, %v1537_v2  ;;  %v732_v41 = vmax.f32 %v10656_v29, 1e-06 }
 0x468   : > { %v8788_v13 = vpop.eup %8787  ;;  %v5837_v17 = vsel %vm5665_vm9, %v8786_v40, %v5836_v10  ;;  %8799 = vpow2.f32 %v2026_v22  ;;  %v3693_v20 = vadd.f32 %v3692_v8, %v3691_v62 }
 0x469   : > { %v8790_v24 = vpop.eup %8789  ;;  %v5838_v26 = vsel %vm5667_vm10, %v8788_v13, %v5837_v17  ;;  %8801 = vpow2.f32 %v2028_v3 }
 0x46a   : > { %v8792_v27 = vpop.eup %8791  ;;  %8803 = vpow2.f32 %v2030_v7  ;;  %v3694_v14 = vrot.slane %v3693_v20, 2  ;;  %v3698_v28 = vsel %vm2066_vm4, %v8790_v24, 0.0 }
 0x46b   : > { %v8794_v30 = vpop.eup %8793  ;;  %v5839_v18 = vsel %vm5669_vm11, %v8792_v27, %v5838_v26  ;;  %8805 = vpow2.f32 %v2032_v63  ;;  %v3699_v33 = vrot.slane %v3698_v28, 4 }
 0x46c   : > { %v8796_v23 = vpop.eup %8795  ;;  %v5840_v34 = vsel %vm5671_vm12, %v8794_v30, %v5839_v18  ;;  %v3695_v35 = vadd.f32 %v3694_v14, %v3693_v20  ;;  %8807 = vlog2.f32 %v729_v9 }
 0x46d   : > { %v8798_v37 = vpop.eup %8797  ;;  %6114 = vxpose.xlu0.b32.start [1/4] (short) (narrow) %v5840_v34, 16  ;;  %v3700_v38 = vadd.f32 %v3699_v33, %v3698_v28  ;;  %v3705_v39 = vsel %vm2066_vm4, %v8796_v23, 0.0  ;;  %8809 = vlog2.f32 %v730_v16 }
 0x46e   : > { %v8800_v42 = vpop.eup %8799  ;;  %v3696_v43 = vrot.slane %v3695_v35, 1  ;;  %v3706_v44 = vrot.slane %v3705_v39, 4  ;;  %v3712_v25 = vsel %vm2066_vm4, %v8798_v37, 0.0  ;;  %8811 = vlog2.f32 %v731_v19 }
 0x46f   : > { %v8802_v45 = vpop.eup %8801  ;;  %v3701_v46 = vrot.slane %v3700_v38, 2  ;;  %v3713_v47 = vrot.slane %v3712_v25, 4  ;;  %v3719_v31 = vsel %vm2066_vm4, %v8800_v42, 0.0 }
 0x470   : > { %v8804_v48 = vpop.eup %8803  ;;  %v3697_v49 = vadd.f32 %v3696_v43, %v3695_v35  ;;  %v3707_v50 = vadd.f32 %v3706_v44, %v3705_v39  ;;  %v3720_v51 = vrot.slane %v3719_v31, 4  ;;  %v3726_v52 = vsel %vm2066_vm4, %v8802_v45, 0.0  ;;  %v477_v35 = vld [vmem:[%s9304_s29 + $0x660] sm:$0xff] }
 0x471   : > { %v8806_v53 = vpop.eup %8805  ;;  %v3702_v54 = vadd.f32 %v3701_v46, %v3700_v38  ;;  %v3714_v55 = vadd.f32 %v3713_v47, %v3712_v25  ;;  %v3727_v56 = vrot.slane %v3726_v52, 4  ;;  %v3733_v57 = vsel %vm2066_vm4, %v8804_v48, 0.0  ;;  %v478_v25 = vld [vmem:[%s9304_s29 + $0x668] sm:$0xff]  ;;  %v479_v47 = vld [vmem:[%s9304_s29 + $0x670] sm:$0xff] }
 0x472   : > { %v3708_v58 = vrot.slane %v3707_v50, 2  ;;  %v3721_v59 = vadd.f32 %v3720_v51, %v3719_v31  ;;  %v3734_v60 = vrot.slane %v3733_v57, 4  ;;  %v3740_v61 = vsel %vm2066_vm4, %v8806_v53, 0.0  ;;  %v8808_v11 = vpop.eup %8807  ;;  %v480_v53 = vld [vmem:[%s9304_s29 + $0x678] sm:$0xff] }
 0x473   : > { %v3703_v22 = vrot.slane %v3702_v54, 1  ;;  %v3715_v62 = vrot.slane %v3714_v55, 2  ;;  %v3728_v32 = vadd.f32 %v3727_v56, %v3726_v52  ;;  %v3741_v1 = vrot.slane %v3740_v61, 4  ;;  %v8810_v2 = vpop.eup %8809 }
 0x474   : > { %v3709_v3 = vadd.f32 %v3708_v58, %v3707_v50  ;;  %v3722_v4 = vrot.slane %v3721_v59, 2  ;;  %v3735_v6 = vadd.f32 %v3734_v60, %v3733_v57  ;;  %v4098_v7 = vmul.f32 %v9361_v36, %v3697_v49  ;;  %v8812_v8 = vpop.eup %8811 }
 0x475   : > { %v3704_v15 = vadd.f32 %v3703_v22, %v3702_v54  ;;  %v3716_v40 = vadd.f32 %v3715_v62, %v3714_v55  ;;  %v3729_v10 = vrot.slane %v3728_v32, 2  ;;  %v3742_v63 = vadd.f32 %v3741_v1, %v3740_v61 }
 0x476   : > { %v3710_v12 = vrot.slane %v3709_v3, 1  ;;  %v3723_v13 = vadd.f32 %v3722_v4, %v3721_v59  ;;  %v3736_v17 = vrot.slane %v3735_v6, 2  ;;  %8813 = vlog2.f32 %v4098_v7 }
 0x477   : > { %v3717_v20 = vrot.slane %v3716_v40, 1  ;;  %v3730_v21 = vadd.f32 %v3729_v10, %v3728_v32  ;;  %v3743_v24 = vrot.slane %v3742_v63, 2  ;;  %v4099_v26 = vmul.f32 %v9361_v36, %v3704_v15 }
 0x478   : > { %v3711_v9 = vadd.f32 %v3710_v12, %v3709_v3  ;;  %v3724_v27 = vrot.slane %v3723_v13, 1  ;;  %v3737_v14 = vadd.f32 %v3736_v17, %v3735_v6  ;;  %8815 = vlog2.f32 %v732_v41 }
 0x479   : > { %v3718_v28 = vadd.f32 %v3717_v20, %v3716_v40  ;;  %v3731_v29 = vrot.slane %v3730_v21, 1  ;;  %v3744_v16 = vadd.f32 %v3743_v24, %v3742_v63  ;;  %8817 = vlog2.f32 %v4099_v26 }
 0x47a   : > { %v3725_v30 = vadd.f32 %v3724_v27, %v3723_v13  ;;  %v3738_v18 = vrot.slane %v3737_v14, 1  ;;  %v4100_v33 = vmul.f32 %v9361_v36, %v3711_v9  ;;  %v1186_v41 = vmul.f32 0.6931472, %v8808_v11 }
 0x47b   : > { %v3732_v19 = vadd.f32 %v3731_v29, %v3730_v21  ;;  %v3745_v23 = vrot.slane %v3744_v16, 1  ;;  %v4101_v34 = vmul.f32 %v9361_v36, %v3718_v28  ;;  %v733_v31 = vmax.f32 %v477_v35, 1e-06 }
 0x47c   : > { %v8814_v37 = vpop.eup %8813  ;;  %v3739_v38 = vadd.f32 %v3738_v18, %v3737_v14  ;;  %v4102_v39 = vmul.f32 %v9361_v36, %v3725_v30  ;;  %8819 = vlog2.f32 %v4100_v33  ;;  %v1188_v51 = vmul.f32 0.6931472, %v8810_v2 }
 0x47d   : > { %v3746_v42 = vadd.f32 %v3745_v23, %v3744_v16  ;;  %v4103_v43 = vmul.f32 %v9361_v36, %v3732_v19  ;;  %v4587_v44 = vmul.f32 0.6931472, %v8814_v37  ;;  %8821 = vlog2.f32 %v4101_v34 }
 0x47e   : > { %v8816_v45 = vpop.eup %8815  ;;  %v4104_v46 = vmul.f32 %v9361_v36, %v3739_v38  ;;  %8823 = vlog2.f32 %v4102_v39  ;;  %v734_v54 = vmax.f32 %v478_v25, 1e-06  ;;  %v1498_v55 = vmul.f32 %v1186_v41, %v9299_v0 }
 0x47f   : > { %v8818_v48 = vpop.eup %8817  ;;  %v4105_v49 = vmul.f32 %v9361_v36, %v3746_v42  ;;  %8825 = vlog2.f32 %v4103_v43  ;;  %v4867_v50 = vmul.f32 %v9419_v5, %v4587_v44  ;;  %v735_v57 = vmax.f32 %v479_v47, 1e-06 }
 0x480   : > { %v4589_v52 = vmul.f32 0.6931472, %v8818_v48  ;;  %8827 = vlog2.f32 %v4104_v46  ;;  %v1190_v58 = vmul.f32 0.6931472, %v8812_v8  ;;  %v1192_v61 = vmul.f32 0.6931472, %v8816_v45 }
 0x481   : > { %8829 = vlog2.f32 %v4105_v49  ;;  %v5355_v56 = vmul.f32 1.442695, %v4867_v50  ;;  %v736_v62 = vmax.f32 %v480_v53, 1e-06  ;;  %v1499_v32 = vmul.f32 %v1188_v51, %v9299_v0 }
 0x482   : > { %v8820_v59 = vpop.eup %8819  ;;  %v4868_v60 = vmul.f32 %v9419_v5, %v4589_v52  ;;  %8831 = vlog2.f32 %v733_v31  ;;  %v1954_v4 = vmul.f32 1.442695, %v1498_v55  ;;  %v1500_v15 = vmul.f32 %v1190_v58, %v9299_v0 }
 0x483   : > { %v8822_v11 = vpop.eup %8821  ;;  %v4591_v22 = vmul.f32 0.6931472, %v8820_v59  ;;  %8833 = vpow2.f32 %v5355_v56  ;;  %v1501_v12 = vmul.f32 %v1192_v61, %v9299_v0  ;;  %v1956_v19 = vmul.f32 1.442695, %v1499_v32  ;;  %v513_v56 = vld [vmem:[%s9304_s29 + $0x780] sm:$0xff] }
 0x484   : > { %v8824_v1 = vpop.eup %8823  ;;  %v4593_v2 = vmul.f32 0.6931472, %v8822_v11  ;;  %v5357_v3 = vmul.f32 1.442695, %v4868_v60  ;;  %8835 = vlog2.f32 %v734_v54  ;;  %v1958_v42 = vmul.f32 1.442695, %v1500_v15 }
 0x485   : > { %v8826_v6 = vpop.eup %8825  ;;  %v4595_v7 = vmul.f32 0.6931472, %v8824_v1  ;;  %v4869_v8 = vmul.f32 %v9419_v5, %v4591_v22  ;;  %8837 = vlog2.f32 %v735_v57  ;;  %v1960_v45 = vmul.f32 1.442695, %v1501_v12  ;;  %v514_v60 = vld [vmem:[%s9304_s29 + $0x788] sm:$0xff] }
 0x486   : > { %v8828_v40 = vpop.eup %8827  ;;  %v4597_v10 = vmul.f32 0.6931472, %v8826_v6  ;;  %v4870_v63 = vmul.f32 %v9419_v5, %v4593_v2  ;;  %8839 = vpow2.f32 %v5357_v3  ;;  %v515_v2 = vld [vmem:[%s9304_s29 + $0x790] sm:$0xff]  ;;  %v769_v3 = vmax.f32 %v513_v56, 1e-06 }
 0x487   : > { %v8830_v13 = vpop.eup %8829  ;;  %v4599_v17 = vmul.f32 0.6931472, %v8828_v40  ;;  %v4871_v20 = vmul.f32 %v9419_v5, %v4595_v7  ;;  %v5359_v21 = vmul.f32 1.442695, %v4869_v8  ;;  %8841 = vlog2.f32 %v736_v62 }
 0x488   : > { %v8832_v24 = vpop.eup %8831  ;;  %v4601_v26 = vmul.f32 0.6931472, %v8830_v13  ;;  %v4872_v9 = vmul.f32 %v9419_v5, %v4597_v10  ;;  %v5361_v27 = vmul.f32 1.442695, %v4870_v63  ;;  %8843 = vpow2.f32 %v1954_v4  ;;  %v516_v10 = vld [vmem:[%s9304_s29 + $0x798] sm:$0xff] }
 0x489   : > { %v8834_v14 = vpop.eup %8833  ;;  %v4873_v28 = vmul.f32 %v9419_v5, %v4599_v17  ;;  %8845 = vpow2.f32 %v5359_v21  ;;  %v5363_v29 = vmul.f32 1.442695, %v4871_v20  ;;  %v1194_v16 = vmul.f32 0.6931472, %v8832_v24 }
 0x48a   : > { %v8836_v30 = vpop.eup %8835  ;;  %v4874_v18 = vmul.f32 %v9419_v5, %v4601_v26  ;;  %8847 = vpow2.f32 %v5361_v27  ;;  %v5365_v33 = vmul.f32 1.442695, %v4872_v9  ;;  %v770_v7 = vmax.f32 %v514_v60, 1e-06 }
 0x48b   : > { %v8838_v23 = vpop.eup %8837  ;;  %8849 = vpow2.f32 %v5363_v29  ;;  %v5367_v34 = vmul.f32 1.442695, %v4873_v28  ;;  %v1196_v35 = vmul.f32 0.6931472, %v8836_v30  ;;  %v1502_v37 = vmul.f32 %v1194_v16, %v9299_v0 }
 0x48c   : > { %v8840_v38 = vpop.eup %8839  ;;  %8851 = vpow2.f32 %v5365_v33  ;;  %v5369_v39 = vmul.f32 1.442695, %v4874_v18  ;;  %v1198_v41 = vmul.f32 0.6931472, %v8838_v23  ;;  %v771_v13 = vmax.f32 %v515_v2, 1e-06 }
 0x48d   : > { %v8842_v43 = vpop.eup %8841  ;;  %8853 = vpow2.f32 %v5367_v34  ;;  %v5869_v44 = vsel %vm5659_vm6, %v8840_v38, %v8834_v14  ;;  %v1503_v25 = vmul.f32 %v1196_v35, %v9299_v0  ;;  %v1962_v48 = vmul.f32 1.442695, %v1502_v37 }
 0x48e   : > { %v8844_v46 = vpop.eup %8843  ;;  %8855 = vpow2.f32 %v5369_v39  ;;  %v1200_v47 = vmul.f32 0.6931472, %v8842_v43  ;;  %v1504_v31 = vmul.f32 %v1198_v41, %v9299_v0  ;;  %v772_v14 = vmax.f32 %v516_v10, 1e-06 }
 0x48f   : > { %v8846_v49 = vpop.eup %8845  ;;  %8857 = vpow2.f32 %v1956_v19  ;;  %v1964_v50 = vmul.f32 1.442695, %v1503_v25  ;;  %v3467_v51 = vsel %vm2066_vm4, %v8844_v46, 0.0 }
 0x490   : > { %v8848_v52 = vpop.eup %8847  ;;  %v5870_v53 = vsel %vm5661_vm7, %v8846_v49, %v5869_v44  ;;  %v1505_v54 = vmul.f32 %v1200_v47, %v9299_v0  ;;  %8859 = vpow2.f32 %v1958_v42  ;;  %v1966_v55 = vmul.f32 1.442695, %v1504_v31 }
 0x491   : > { %v8850_v57 = vpop.eup %8849  ;;  %v5871_v58 = vsel %vm5663_vm8, %v8848_v52, %v5870_v53  ;;  %8861 = vpow2.f32 %v1960_v45  ;;  %v3468_v59 = vrot.slane %v3467_v51, 4 }
 0x492   : > { %v8852_v61 = vpop.eup %8851  ;;  %v5872_v11 = vsel %vm5665_vm9, %v8850_v57, %v5871_v58  ;;  %8863 = vpow2.f32 %v1962_v48  ;;  %v1968_v22 = vmul.f32 1.442695, %v1505_v54 }
 0x493   : > { %v8854_v62 = vpop.eup %8853  ;;  %v5873_v32 = vsel %vm5667_vm10, %v8852_v61, %v5872_v11  ;;  %8865 = vpow2.f32 %v1964_v50  ;;  %v3469_v1 = vadd.f32 %v3468_v59, %v3467_v51 }
 0x494   : > { %v8856_v4 = vpop.eup %8855  ;;  %v5874_v6 = vsel %vm5669_vm11, %v8854_v62, %v5873_v32  ;;  %8867 = vpow2.f32 %v1966_v55 }
 0x495   : > { %v8858_v8 = vpop.eup %8857  ;;  %v5875_v15 = vsel %vm5671_vm12, %v8856_v4, %v5874_v6  ;;  %8869 = vpow2.f32 %v1968_v22  ;;  %v3470_v40 = vrot.slane %v3469_v1, 2 }
 0x496   : > { %v8860_v63 = vpop.eup %8859  ;;  %6147 = vxpose.xlu1.b32.cont [2/4] (short) (narrow) %v5875_v15, 16  ;;  %v3474_v12 = vsel %vm2066_vm4, %v8858_v8, 0.0  ;;  %8871 = vlog2.f32 %v769_v3  ;;  %v517_v15 = vld [vmem:[%s9304_s29 + $0x7a0] sm:$0xff] }
 0x497   : > { %v8862_v17 = vpop.eup %8861  ;;  %v3471_v20 = vadd.f32 %v3470_v40, %v3469_v1  ;;  %v3475_v21 = vrot.slane %v3474_v12, 4  ;;  %v3481_v24 = vsel %vm2066_vm4, %v8860_v63, 0.0  ;;  %8873 = vlog2.f32 %v770_v7 }
 0x498   : > { %v8864_v26 = vpop.eup %8863  ;;  %v3482_v9 = vrot.slane %v3481_v24, 4  ;;  %v3488_v27 = vsel %vm2066_vm4, %v8862_v17, 0.0  ;;  %8875 = vlog2.f32 %v771_v13 }
 0x499   : > { %v8866_v28 = vpop.eup %8865  ;;  %v3472_v29 = vrot.slane %v3471_v20, 1  ;;  %v3476_v16 = vadd.f32 %v3475_v21, %v3474_v12  ;;  %v3489_v30 = vrot.slane %v3488_v27, 4  ;;  %v3495_v18 = vsel %vm2066_vm4, %v8864_v26, 0.0 }
 0x49a   : > { %v8868_v33 = vpop.eup %8867  ;;  %v3483_v19 = vadd.f32 %v3482_v9, %v3481_v24  ;;  %v3496_v23 = vrot.slane %v3495_v18, 4  ;;  %v3502_v34 = vsel %vm2066_vm4, %v8866_v28, 0.0  ;;  %v773_v9 = vmax.f32 %v517_v15, 1e-06 }
 0x49b   : > { %v8870_v35 = vpop.eup %8869  ;;  %v3473_v37 = vadd.f32 %v3472_v29, %v3471_v20  ;;  %v3477_v38 = vrot.slane %v3476_v16, 2  ;;  %v3490_v39 = vadd.f32 %v3489_v30, %v3488_v27  ;;  %v3503_v41 = vrot.slane %v3502_v34, 4  ;;  %v518_v29 = vld [vmem:[%s9304_s29 + $0x7a8] sm:$0xff] }
 0x49c   : > { %v3484_v42 = vrot.slane %v3483_v19, 2  ;;  %v3497_v43 = vadd.f32 %v3496_v23, %v3495_v18  ;;  %v3509_v44 = vsel %vm2066_vm4, %v8868_v33, 0.0  ;;  %v3516_v25 = vsel %vm2066_vm4, %v8870_v35, 0.0  ;;  %v8872_v45 = vpop.eup %8871  ;;  %v519_v18 = vld [vmem:[%s9304_s29 + $0x7b0] sm:$0xff] }
 0x49d   : > { %v3478_v46 = vadd.f32 %v3477_v38, %v3476_v16  ;;  %v3491_v47 = vrot.slane %v3490_v39, 2  ;;  %v3504_v31 = vadd.f32 %v3503_v41, %v3502_v34  ;;  %v3510_v48 = vrot.slane %v3509_v44, 4  ;;  %v8874_v49 = vpop.eup %8873  ;;  %v520_v34 = vld [vmem:[%s9304_s29 + $0x7b8] sm:$0xff] }
 0x49e   : > { %v3485_v50 = vadd.f32 %v3484_v42, %v3483_v19  ;;  %v3498_v51 = vrot.slane %v3497_v43, 2  ;;  %v3517_v52 = vrot.slane %v3516_v25, 4  ;;  %v4066_v53 = vmul.f32 %v9361_v36, %v3473_v37  ;;  %v8876_v58 = vpop.eup %8875 }
 0x49f   : > { %v3479_v54 = vrot.slane %v3478_v46, 1  ;;  %v3492_v55 = vadd.f32 %v3491_v47, %v3490_v39  ;;  %v3505_v56 = vrot.slane %v3504_v31, 2  ;;  %v3511_v57 = vadd.f32 %v3510_v48, %v3509_v44 }
 0x4a0   : > { %v3486_v59 = vrot.slane %v3485_v50, 1  ;;  %v3499_v60 = vadd.f32 %v3498_v51, %v3497_v43  ;;  %v3518_v61 = vadd.f32 %v3517_v52, %v3516_v25  ;;  %8877 = vlog2.f32 %v4066_v53 }
 0x4a1   : > { %v3480_v11 = vadd.f32 %v3479_v54, %v3478_v46  ;;  %v3493_v22 = vrot.slane %v3492_v55, 1  ;;  %v3506_v62 = vadd.f32 %v3505_v56, %v3504_v31  ;;  %v3512_v32 = vrot.slane %v3511_v57, 2 }
 0x4a2   : > { %v3487_v1 = vadd.f32 %v3486_v59, %v3485_v50  ;;  %v3500_v2 = vrot.slane %v3499_v60, 1  ;;  %v3519_v3 = vrot.slane %v3518_v61, 2  ;;  %8879 = vlog2.f32 %v772_v14 }
 0x4a3   : > { %v3494_v4 = vadd.f32 %v3493_v22, %v3492_v55  ;;  %v3507_v6 = vrot.slane %v3506_v62, 1  ;;  %v3513_v7 = vadd.f32 %v3512_v32, %v3511_v57  ;;  %v4067_v8 = vmul.f32 %v9361_v36, %v3480_v11 }
 0x4a4   : > { %v3501_v40 = vadd.f32 %v3500_v2, %v3499_v60  ;;  %v3520_v10 = vadd.f32 %v3519_v3, %v3518_v61  ;;  %v4068_v63 = vmul.f32 %v9361_v36, %v3487_v1  ;;  %v1266_v12 = vmul.f32 0.6931472, %v8872_v45 }
 0x4a5   : > { %v3508_v13 = vadd.f32 %v3507_v6, %v3506_v62  ;;  %v3514_v17 = vrot.slane %v3513_v7, 1  ;;  %v4069_v20 = vmul.f32 %v9361_v36, %v3494_v4  ;;  %8881 = vlog2.f32 %v4067_v8 }
 0x4a6   : > { %v8878_v21 = vpop.eup %8877  ;;  %v3521_v24 = vrot.slane %v3520_v10, 1  ;;  %v4070_v26 = vmul.f32 %v9361_v36, %v3501_v40  ;;  %8883 = vlog2.f32 %v4068_v63  ;;  %v1268_v33 = vmul.f32 0.6931472, %v8874_v49 }
 0x4a7   : > { %v3515_v27 = vadd.f32 %v3514_v17, %v3513_v7  ;;  %v4071_v14 = vmul.f32 %v9361_v36, %v3508_v13  ;;  %v4523_v28 = vmul.f32 0.6931472, %v8878_v21  ;;  %8885 = vlog2.f32 %v4069_v20 }
 0x4a8   : > { %v8880_v16 = vpop.eup %8879  ;;  %v3522_v30 = vadd.f32 %v3521_v24, %v3520_v10  ;;  %8887 = vlog2.f32 %v4070_v26  ;;  %v1538_v35 = vmul.f32 %v1266_v12, %v9299_v0  ;;  %v774_v38 = vmax.f32 %v518_v29, 1e-06 }
 0x4a9   : > { %v4072_v19 = vmul.f32 %v9361_v36, %v3515_v27  ;;  %8889 = vlog2.f32 %v4071_v14  ;;  %v4835_v23 = vmul.f32 %v9419_v5, %v4523_v28  ;;  %v1270_v39 = vmul.f32 0.6931472, %v8876_v58 }
 0x4aa   : > { %v4073_v37 = vmul.f32 %v9361_v36, %v3522_v30  ;;  %8891 = vlog2.f32 %v773_v9  ;;  %v775_v43 = vmax.f32 %v519_v18, 1e-06  ;;  %v1272_v44 = vmul.f32 0.6931472, %v8880_v16 }
 0x4ab   : > { %v8882_v41 = vpop.eup %8881  ;;  %8893 = vlog2.f32 %v4072_v19  ;;  %v5291_v42 = vmul.f32 1.442695, %v4835_v23  ;;  %v776_v46 = vmax.f32 %v520_v34, 1e-06  ;;  %v1539_v48 = vmul.f32 %v1268_v33, %v9299_v0 }
 0x4ac   : > { %v8884_v25 = vpop.eup %8883  ;;  %v4525_v45 = vmul.f32 0.6931472, %v8882_v41  ;;  %8895 = vlog2.f32 %v4073_v37  ;;  %v2034_v49 = vmul.f32 1.442695, %v1538_v35  ;;  %v1540_v53 = vmul.f32 %v1270_v39, %v9299_v0 }
 0x4ad   : > { %v8886_v47 = vpop.eup %8885  ;;  %v4527_v31 = vmul.f32 0.6931472, %v8884_v25  ;;  %8897 = vpow2.f32 %v5291_v42  ;;  %v1541_v57 = vmul.f32 %v1272_v44, %v9299_v0  ;;  %v2036_v15 = vmul.f32 1.442695, %v1539_v48 }
 0x4ae   : > { %v8888_v50 = vpop.eup %8887  ;;  %v4529_v51 = vmul.f32 0.6931472, %v8886_v47  ;;  %v4836_v52 = vmul.f32 %v9419_v5, %v4525_v45  ;;  %8899 = vlog2.f32 %v774_v38  ;;  %v2038_v21 = vmul.f32 1.442695, %v1540_v53 }
 0x4af   : > { %v8890_v54 = vpop.eup %8889  ;;  %v4531_v55 = vmul.f32 0.6931472, %v8888_v50  ;;  %v4837_v56 = vmul.f32 %v9419_v5, %v4527_v31  ;;  %8901 = vlog2.f32 %v775_v43  ;;  %v2040_v27 = vmul.f32 1.442695, %v1541_v57  ;;  %v481_v43 = vld [vmem:[%s9304_s29 + $0x680] sm:$0xff] }
 0x4b0   : > { %v8892_v58 = vpop.eup %8891  ;;  %v4533_v59 = vmul.f32 0.6931472, %v8890_v54  ;;  %v4838_v60 = vmul.f32 %v9419_v5, %v4529_v51  ;;  %v5293_v61 = vmul.f32 1.442695, %v4836_v52  ;;  %8903 = vlog2.f32 %v776_v46  ;;  %v482_v46 = vld [vmem:[%s9304_s29 + $0x688] sm:$0xff] }
 0x4b1   : > { %v8894_v11 = vpop.eup %8893  ;;  %v4839_v22 = vmul.f32 %v9419_v5, %v4531_v55  ;;  %v5295_v62 = vmul.f32 1.442695, %v4837_v56  ;;  %v1274_v32 = vmul.f32 0.6931472, %v8892_v58  ;;  %8905 = vpow2.f32 %v2034_v49  ;;  %v483_v49 = vld [vmem:[%s9304_s29 + $0x690] sm:$0xff]  ;;  %v10753_v56 = vld [vmem:[%s9304_s29 + $0x698] sm:$0xff] }
 0x4b2   : > { %v8896_v1 = vpop.eup %8895  ;;  %v4535_v2 = vmul.f32 0.6931472, %v8894_v11  ;;  %v4840_v3 = vmul.f32 %v9419_v5, %v4533_v59  ;;  %8907 = vpow2.f32 %v5293_v61  ;;  %v5297_v4 = vmul.f32 1.442695, %v4838_v60 }
 0x4b3   : > { %v8898_v6 = vpop.eup %8897  ;;  %v4537_v7 = vmul.f32 0.6931472, %v8896_v1  ;;  %8909 = vpow2.f32 %v5295_v62  ;;  %v5299_v8 = vmul.f32 1.442695, %v4839_v22  ;;  %v1542_v12 = vmul.f32 %v1274_v32, %v9299_v0 }
 0x4b4   : > { %v8900_v40 = vpop.eup %8899  ;;  %v4841_v10 = vmul.f32 %v9419_v5, %v4535_v2  ;;  %8911 = vpow2.f32 %v5297_v4  ;;  %v5301_v63 = vmul.f32 1.442695, %v4840_v3  ;;  %v737_v52 = vmax.f32 %v481_v43, 1e-06 }
 0x4b5   : > { %v8902_v13 = vpop.eup %8901  ;;  %v4842_v17 = vmul.f32 %v9419_v5, %v4537_v7  ;;  %8913 = vpow2.f32 %v5299_v8  ;;  %v1276_v20 = vmul.f32 0.6931472, %v8900_v40  ;;  %v2042_v33 = vmul.f32 1.442695, %v1542_v12 }
 0x4b6   : > { %v8904_v24 = vpop.eup %8903  ;;  %8915 = vpow2.f32 %v5301_v63  ;;  %v5303_v26 = vmul.f32 1.442695, %v4841_v10  ;;  %v1278_v9 = vmul.f32 0.6931472, %v8902_v13  ;;  %v738_v57 = vmax.f32 %v482_v46, 1e-06 }
 0x4b7   : > { %v8906_v14 = vpop.eup %8905  ;;  %v5305_v28 = vmul.f32 1.442695, %v4842_v17  ;;  %v1280_v29 = vmul.f32 0.6931472, %v8904_v24  ;;  %v1543_v16 = vmul.f32 %v1276_v20, %v9299_v0  ;;  %8917 = vpow2.f32 %v2036_v15 }
 0x4b8   : > { %v8908_v30 = vpop.eup %8907  ;;  %8919 = vpow2.f32 %v5303_v26  ;;  %v1544_v18 = vmul.f32 %v1278_v9, %v9299_v0  ;;  %v3747_v19 = vsel %vm2066_vm4, %v8906_v14, 0.0  ;;  %v739_v61 = vmax.f32 %v483_v49, 1e-06 }
 0x4b9   : > { %v8910_v23 = vpop.eup %8909  ;;  %8921 = vpow2.f32 %v5305_v28  ;;  %v5841_v34 = vsel %vm5659_vm6, %v8908_v30, %v8898_v6  ;;  %v1545_v35 = vmul.f32 %v1280_v29, %v9299_v0  ;;  %v2044_v37 = vmul.f32 1.442695, %v1543_v16 }
 0x4ba   : > { %v8912_v38 = vpop.eup %8911  ;;  %v5842_v39 = vsel %vm5661_vm7, %v8910_v23, %v5841_v34  ;;  %8923 = vpow2.f32 %v2038_v21  ;;  %v2046_v41 = vmul.f32 1.442695, %v1544_v18  ;;  %v3748_v42 = vrot.slane %v3747_v19, 4 }
 0x4bb   : > { %v8914_v44 = vpop.eup %8913  ;;  %v5843_v25 = vsel %vm5663_vm8, %v8912_v38, %v5842_v39  ;;  %8925 = vpow2.f32 %v2040_v27  ;;  %v2048_v45 = vmul.f32 1.442695, %v1545_v35  ;;  %v740_v3 = vmax.f32 %v10753_v56, 1e-06 }
 0x4bc   : > { %v8916_v47 = vpop.eup %8915  ;;  %v5844_v31 = vsel %vm5665_vm9, %v8914_v44, %v5843_v25  ;;  %8927 = vpow2.f32 %v2042_v33  ;;  %v3749_v48 = vadd.f32 %v3748_v42, %v3747_v19 }
 0x4bd   : > { %v8918_v50 = vpop.eup %8917  ;;  %v5845_v51 = vsel %vm5667_vm10, %v8916_v47, %v5844_v31  ;;  %8929 = vpow2.f32 %v2044_v37 }
 0x4be   : > { %v8920_v53 = vpop.eup %8919  ;;  %8931 = vpow2.f32 %v2046_v41  ;;  %v3750_v54 = vrot.slane %v3749_v48, 2  ;;  %v3754_v55 = vsel %vm2066_vm4, %v8918_v50, 0.0 }
 0x4bf   : > { %v8922_v58 = vpop.eup %8921  ;;  %v5846_v59 = vsel %vm5669_vm11, %v8920_v53, %v5845_v51  ;;  %8933 = vpow2.f32 %v2048_v45  ;;  %v3755_v60 = vrot.slane %v3754_v55, 4 }
 0x4c0   : > { %v8924_v11 = vpop.eup %8923  ;;  %v5847_v22 = vsel %vm5671_vm12, %v8922_v58, %v5846_v59  ;;  %v3751_v62 = vadd.f32 %v3750_v54, %v3749_v48  ;;  %8935 = vlog2.f32 %v737_v52 }
 0x4c1   : > { %v8926_v32 = vpop.eup %8925  ;;  %6115 = vxpose.xlu0.b32.cont [2/4] (short) (narrow) %v5847_v22, 16  ;;  %v3756_v1 = vadd.f32 %v3755_v60, %v3754_v55  ;;  %v3761_v2 = vsel %vm2066_vm4, %v8924_v11, 0.0  ;;  %8937 = vlog2.f32 %v738_v57 }
 0x4c2   : > { %v8928_v4 = vpop.eup %8927  ;;  %v3752_v6 = vrot.slane %v3751_v62, 1  ;;  %v3762_v7 = vrot.slane %v3761_v2, 4  ;;  %v3768_v8 = vsel %vm2066_vm4, %v8926_v32, 0.0  ;;  %8939 = vlog2.f32 %v739_v61 }
 0x4c3   : > { %v8930_v15 = vpop.eup %8929  ;;  %v3757_v40 = vrot.slane %v3756_v1, 2  ;;  %v3769_v10 = vrot.slane %v3768_v8, 4  ;;  %v3775_v63 = vsel %vm2066_vm4, %v8928_v4, 0.0 }
 0x4c4   : > { %v8932_v12 = vpop.eup %8931  ;;  %v3753_v13 = vadd.f32 %v3752_v6, %v3751_v62  ;;  %v3763_v17 = vadd.f32 %v3762_v7, %v3761_v2  ;;  %v3776_v20 = vrot.slane %v3775_v63, 4  ;;  %v3782_v21 = vsel %vm2066_vm4, %v8930_v15, 0.0  ;;  %v485_v62 = vld [vmem:[%s9304_s29 + $0x6a0] sm:$0xff] }
 0x4c5   : > { %v8934_v24 = vpop.eup %8933  ;;  %v3758_v26 = vadd.f32 %v3757_v40, %v3756_v1  ;;  %v3770_v9 = vadd.f32 %v3769_v10, %v3768_v8  ;;  %v3783_v27 = vrot.slane %v3782_v21, 4  ;;  %v3789_v14 = vsel %vm2066_vm4, %v8932_v12, 0.0  ;;  %v486_v8 = vld [vmem:[%s9304_s29 + $0x6a8] sm:$0xff]  ;;  %v487_v10 = vld [vmem:[%s9304_s29 + $0x6b0] sm:$0xff] }
 0x4c6   : > { %v3764_v28 = vrot.slane %v3763_v17, 2  ;;  %v3777_v29 = vadd.f32 %v3776_v20, %v3775_v63  ;;  %v3790_v16 = vrot.slane %v3789_v14, 4  ;;  %v3796_v30 = vsel %vm2066_vm4, %v8934_v24, 0.0  ;;  %v8936_v18 = vpop.eup %8935  ;;  %v488_v24 = vld [vmem:[%s9304_s29 + $0x6b8] sm:$0xff] }
 0x4c7   : > { %v3759_v33 = vrot.slane %v3758_v26, 1  ;;  %v3771_v19 = vrot.slane %v3770_v9, 2  ;;  %v3784_v23 = vadd.f32 %v3783_v27, %v3782_v21  ;;  %v3797_v34 = vrot.slane %v3796_v30, 4  ;;  %v8938_v35 = vpop.eup %8937 }
 0x4c8   : > { %v3765_v37 = vadd.f32 %v3764_v28, %v3763_v17  ;;  %v3778_v38 = vrot.slane %v3777_v29, 2  ;;  %v3791_v39 = vadd.f32 %v3790_v16, %v3789_v14  ;;  %v4106_v41 = vmul.f32 %v9361_v36, %v3753_v13  ;;  %v8940_v42 = vpop.eup %8939 }
 0x4c9   : > { %v3760_v43 = vadd.f32 %v3759_v33, %v3758_v26  ;;  %v3772_v44 = vadd.f32 %v3771_v19, %v3770_v9  ;;  %v3785_v25 = vrot.slane %v3784_v23, 2  ;;  %v3798_v45 = vadd.f32 %v3797_v34, %v3796_v30 }
 0x4ca   : > { %v3766_v46 = vrot.slane %v3765_v37, 1  ;;  %v3779_v47 = vadd.f32 %v3778_v38, %v3777_v29  ;;  %v3792_v31 = vrot.slane %v3791_v39, 2  ;;  %8941 = vlog2.f32 %v4106_v41 }
 0x4cb   : > { %v3773_v48 = vrot.slane %v3772_v44, 1  ;;  %v3786_v49 = vadd.f32 %v3785_v25, %v3784_v23  ;;  %v3799_v50 = vrot.slane %v3798_v45, 2  ;;  %v4107_v51 = vmul.f32 %v9361_v36, %v3760_v43 }
 0x4cc   : > { %v3767_v52 = vadd.f32 %v3766_v46, %v3765_v37  ;;  %v3780_v53 = vrot.slane %v3779_v47, 1  ;;  %v3793_v54 = vadd.f32 %v3792_v31, %v3791_v39  ;;  %8943 = vlog2.f32 %v740_v3 }
 0x4cd   : > { %v3774_v55 = vadd.f32 %v3773_v48, %v3772_v44  ;;  %v3787_v56 = vrot.slane %v3786_v49, 1  ;;  %v3800_v57 = vadd.f32 %v3799_v50, %v3798_v45  ;;  %8945 = vlog2.f32 %v4107_v51 }
 0x4ce   : > { %v3781_v58 = vadd.f32 %v3780_v53, %v3779_v47  ;;  %v3794_v59 = vrot.slane %v3793_v54, 1  ;;  %v4108_v60 = vmul.f32 %v9361_v36, %v3767_v52  ;;  %v1202_v3 = vmul.f32 0.6931472, %v8936_v18 }
 0x4cf   : > { %v3788_v61 = vadd.f32 %v3787_v56, %v3786_v49  ;;  %v3801_v11 = vrot.slane %v3800_v57, 1  ;;  %v4109_v22 = vmul.f32 %v9361_v36, %v3774_v55  ;;  %v741_v63 = vmax.f32 %v485_v62, 1e-06 }
 0x4d0   : > { %v8942_v32 = vpop.eup %8941  ;;  %v3795_v1 = vadd.f32 %v3794_v59, %v3793_v54  ;;  %v4110_v2 = vmul.f32 %v9361_v36, %v3781_v58  ;;  %8947 = vlog2.f32 %v4108_v60  ;;  %v1204_v20 = vmul.f32 0.6931472, %v8938_v35 }
 0x4d1   : > { %v3802_v4 = vadd.f32 %v3801_v11, %v3800_v57  ;;  %v4111_v6 = vmul.f32 %v9361_v36, %v3788_v61  ;;  %v4603_v7 = vmul.f32 0.6931472, %v8942_v32  ;;  %8949 = vlog2.f32 %v4109_v22 }
 0x4d2   : > { %v8944_v15 = vpop.eup %8943  ;;  %v4112_v40 = vmul.f32 %v9361_v36, %v3795_v1  ;;  %8951 = vlog2.f32 %v4110_v2  ;;  %v742_v26 = vmax.f32 %v486_v8, 1e-06  ;;  %v1506_v9 = vmul.f32 %v1202_v3, %v9299_v0 }
 0x4d3   : > { %v8946_v12 = vpop.eup %8945  ;;  %v4113_v13 = vmul.f32 %v9361_v36, %v3802_v4  ;;  %8953 = vlog2.f32 %v4111_v6  ;;  %v4875_v17 = vmul.f32 %v9419_v5, %v4603_v7  ;;  %v743_v14 = vmax.f32 %v487_v10, 1e-06 }
 0x4d4   : > { %v4605_v21 = vmul.f32 0.6931472, %v8946_v12  ;;  %8955 = vlog2.f32 %v4112_v40  ;;  %v1206_v28 = vmul.f32 0.6931472, %v8940_v42  ;;  %v1208_v30 = vmul.f32 0.6931472, %v8944_v15 }
 0x4d5   : > { %8957 = vlog2.f32 %v4113_v13  ;;  %v5371_v27 = vmul.f32 1.442695, %v4875_v17  ;;  %v744_v19 = vmax.f32 %v488_v24, 1e-06  ;;  %v1507_v23 = vmul.f32 %v1204_v20, %v9299_v0 }
 0x4d6   : > { %v8948_v29 = vpop.eup %8947  ;;  %v4876_v16 = vmul.f32 %v9419_v5, %v4605_v21  ;;  %8959 = vlog2.f32 %v741_v63  ;;  %v1970_v38 = vmul.f32 1.442695, %v1506_v9  ;;  %v1508_v43 = vmul.f32 %v1206_v28, %v9299_v0 }
 0x4d7   : > { %v8950_v18 = vpop.eup %8949  ;;  %v4607_v33 = vmul.f32 0.6931472, %v8948_v29  ;;  %8961 = vpow2.f32 %v5371_v27  ;;  %v1509_v46 = vmul.f32 %v1208_v30, %v9299_v0  ;;  %v1972_v61 = vmul.f32 1.442695, %v1507_v23  ;;  %v521_v27 = vld [vmem:[%s9304_s29 + $0x7c0] sm:$0xff] }
 0x4d8   : > { %v8952_v34 = vpop.eup %8951  ;;  %v4609_v35 = vmul.f32 0.6931472, %v8950_v18  ;;  %v5373_v37 = vmul.f32 1.442695, %v4876_v16  ;;  %8963 = vlog2.f32 %v742_v26  ;;  %v1974_v4 = vmul.f32 1.442695, %v1508_v43 }
 0x4d9   : > { %v8954_v39 = vpop.eup %8953  ;;  %v4611_v41 = vmul.f32 0.6931472, %v8952_v34  ;;  %v4877_v42 = vmul.f32 %v9419_v5, %v4607_v33  ;;  %8965 = vlog2.f32 %v743_v14  ;;  %v1976_v15 = vmul.f32 1.442695, %v1509_v46  ;;  %v522_v16 = vld [vmem:[%s9304_s29 + $0x7c8] sm:$0xff] }
 0x4da   : > { %v8956_v44 = vpop.eup %8955  ;;  %v4613_v25 = vmul.f32 0.6931472, %v8954_v39  ;;  %v4878_v45 = vmul.f32 %v9419_v5, %v4609_v35  ;;  %8967 = vpow2.f32 %v5373_v37  ;;  %v523_v35 = vld [vmem:[%s9304_s29 + $0x7d0] sm:$0xff]  ;;  %v777_v37 = vmax.f32 %v521_v27, 1e-06 }
 0x4db   : > { %v8958_v47 = vpop.eup %8957  ;;  %v4615_v31 = vmul.f32 0.6931472, %v8956_v44  ;;  %v4879_v48 = vmul.f32 %v9419_v5, %v4611_v41  ;;  %v5375_v49 = vmul.f32 1.442695, %v4877_v42  ;;  %8969 = vlog2.f32 %v744_v19 }
 0x4dc   : > { %v8960_v50 = vpop.eup %8959  ;;  %v4617_v51 = vmul.f32 0.6931472, %v8958_v47  ;;  %v4880_v52 = vmul.f32 %v9419_v5, %v4613_v25  ;;  %v5377_v53 = vmul.f32 1.442695, %v4878_v45  ;;  %8971 = vpow2.f32 %v1970_v38  ;;  %v524_v25 = vld [vmem:[%s9304_s29 + $0x7d8] sm:$0xff] }
 0x4dd   : > { %v8962_v54 = vpop.eup %8961  ;;  %v4881_v55 = vmul.f32 %v9419_v5, %v4615_v31  ;;  %8973 = vpow2.f32 %v5375_v49  ;;  %v5379_v56 = vmul.f32 1.442695, %v4879_v48  ;;  %v1210_v57 = vmul.f32 0.6931472, %v8960_v50 }
 0x4de   : > { %v8964_v58 = vpop.eup %8963  ;;  %v4882_v59 = vmul.f32 %v9419_v5, %v4617_v51  ;;  %8975 = vpow2.f32 %v5377_v53  ;;  %v5381_v60 = vmul.f32 1.442695, %v4880_v52  ;;  %v778_v41 = vmax.f32 %v522_v16, 1e-06 }
 0x4df   : > { %v8966_v11 = vpop.eup %8965  ;;  %8977 = vpow2.f32 %v5379_v56  ;;  %v5383_v22 = vmul.f32 1.442695, %v4881_v55  ;;  %v1212_v62 = vmul.f32 0.6931472, %v8964_v58  ;;  %v1510_v32 = vmul.f32 %v1210_v57, %v9299_v0 }
 0x4e0   : > { %v8968_v1 = vpop.eup %8967  ;;  %8979 = vpow2.f32 %v5381_v60  ;;  %v5385_v2 = vmul.f32 1.442695, %v4882_v59  ;;  %v1214_v3 = vmul.f32 0.6931472, %v8966_v11  ;;  %v779_v47 = vmax.f32 %v523_v35, 1e-06 }
 0x4e1   : > { %v8970_v6 = vpop.eup %8969  ;;  %8981 = vpow2.f32 %v5383_v22  ;;  %v5876_v7 = vsel %vm5659_vm6, %v8968_v1, %v8962_v54  ;;  %v1511_v8 = vmul.f32 %v1212_v62, %v9299_v0  ;;  %v1978_v12 = vmul.f32 1.442695, %v1510_v32 }
 0x4e2   : > { %v8972_v40 = vpop.eup %8971  ;;  %8983 = vpow2.f32 %v5385_v2  ;;  %v1216_v10 = vmul.f32 0.6931472, %v8970_v6  ;;  %v1512_v63 = vmul.f32 %v1214_v3, %v9299_v0  ;;  %v780_v54 = vmax.f32 %v524_v25, 1e-06 }
 0x4e3   : > { %v8974_v13 = vpop.eup %8973  ;;  %8985 = vpow2.f32 %v1972_v61  ;;  %v1980_v17 = vmul.f32 1.442695, %v1511_v8  ;;  %v3523_v20 = vsel %vm2066_vm4, %v8972_v40, 0.0 }
 0x4e4   : > { %v8976_v21 = vpop.eup %8975  ;;  %v5877_v24 = vsel %vm5661_vm7, %v8974_v13, %v5876_v7  ;;  %v1513_v26 = vmul.f32 %v1216_v10, %v9299_v0  ;;  %8987 = vpow2.f32 %v1974_v4  ;;  %v1982_v9 = vmul.f32 1.442695, %v1512_v63 }
 0x4e5   : > { %v8978_v14 = vpop.eup %8977  ;;  %v5878_v28 = vsel %vm5663_vm8, %v8976_v21, %v5877_v24  ;;  %8989 = vpow2.f32 %v1976_v15  ;;  %v3524_v29 = vrot.slane %v3523_v20, 4 }
 0x4e6   : > { %v8980_v30 = vpop.eup %8979  ;;  %v5879_v18 = vsel %vm5665_vm9, %v8978_v14, %v5878_v28  ;;  %8991 = vpow2.f32 %v1978_v12  ;;  %v1984_v33 = vmul.f32 1.442695, %v1513_v26 }
 0x4e7   : > { %v8982_v19 = vpop.eup %8981  ;;  %v5880_v23 = vsel %vm5667_vm10, %v8980_v30, %v5879_v18  ;;  %8993 = vpow2.f32 %v1980_v17  ;;  %v3525_v34 = vadd.f32 %v3524_v29, %v3523_v20 }
 0x4e8   : > { %v8984_v38 = vpop.eup %8983  ;;  %v5881_v39 = vsel %vm5669_vm11, %v8982_v19, %v5880_v23  ;;  %8995 = vpow2.f32 %v1982_v9 }
 0x4e9   : > { %v8986_v42 = vpop.eup %8985  ;;  %v5882_v43 = vsel %vm5671_vm12, %v8984_v38, %v5881_v39  ;;  %8997 = vpow2.f32 %v1984_v33  ;;  %v3526_v44 = vrot.slane %v3525_v34, 2 }
 0x4ea   : > { %v8988_v45 = vpop.eup %8987  ;;  %6148 = vxpose.xlu1.b32.cont [3/4] (short) (narrow) %v5882_v43, 16  ;;  %v3530_v46 = vsel %vm2066_vm4, %v8986_v42, 0.0  ;;  %8999 = vlog2.f32 %v777_v37  ;;  %v525_v43 = vld [vmem:[%s9304_s29 + $0x7e0] sm:$0xff] }
 0x4eb   : > { %v8990_v31 = vpop.eup %8989  ;;  %v3527_v48 = vadd.f32 %v3526_v44, %v3525_v34  ;;  %v3531_v49 = vrot.slane %v3530_v46, 4  ;;  %v3537_v50 = vsel %vm2066_vm4, %v8988_v45, 0.0  ;;  %9001 = vlog2.f32 %v778_v41 }
 0x4ec   : > { %v8992_v51 = vpop.eup %8991  ;;  %v3538_v52 = vrot.slane %v3537_v50, 4  ;;  %v3544_v53 = vsel %vm2066_vm4, %v8990_v31, 0.0  ;;  %9003 = vlog2.f32 %v779_v47 }
 0x4ed   : > { %v8994_v55 = vpop.eup %8993  ;;  %v3528_v56 = vrot.slane %v3527_v48, 1  ;;  %v3532_v57 = vadd.f32 %v3531_v49, %v3530_v46  ;;  %v3545_v58 = vrot.slane %v3544_v53, 4  ;;  %v3551_v59 = vsel %vm2066_vm4, %v8992_v51, 0.0 }
 0x4ee   : > { %v8996_v60 = vpop.eup %8995  ;;  %v3539_v61 = vadd.f32 %v3538_v52, %v3537_v50  ;;  %v3552_v11 = vrot.slane %v3551_v59, 4  ;;  %v3558_v22 = vsel %vm2066_vm4, %v8994_v55, 0.0  ;;  %v781_v52 = vmax.f32 %v525_v43, 1e-06 }
 0x4ef   : > { %v8998_v62 = vpop.eup %8997  ;;  %v3529_v32 = vadd.f32 %v3528_v56, %v3527_v48  ;;  %v3533_v1 = vrot.slane %v3532_v57, 2  ;;  %v3546_v2 = vadd.f32 %v3545_v58, %v3544_v53  ;;  %v3559_v3 = vrot.slane %v3558_v22, 4  ;;  %v526_v56 = vld [vmem:[%s9304_s29 + $0x7e8] sm:$0xff] }
 0x4f0   : > { %v3540_v4 = vrot.slane %v3539_v61, 2  ;;  %v3553_v6 = vadd.f32 %v3552_v11, %v3551_v59  ;;  %v3565_v7 = vsel %vm2066_vm4, %v8996_v60, 0.0  ;;  %v3572_v8 = vsel %vm2066_vm4, %v8998_v62, 0.0  ;;  %v9000_v15 = vpop.eup %8999  ;;  %v527_v59 = vld [vmem:[%s9304_s29 + $0x7f0] sm:$0xff] }
 0x4f1   : > { %v3534_v40 = vadd.f32 %v3533_v1, %v3532_v57  ;;  %v3547_v10 = vrot.slane %v3546_v2, 2  ;;  %v3560_v63 = vadd.f32 %v3559_v3, %v3558_v22  ;;  %v3566_v12 = vrot.slane %v3565_v7, 4  ;;  %v9002_v13 = vpop.eup %9001  ;;  %v528_v22 = vld [vmem:[%s9304_s29 + $0x7f8] sm:$0xff] }
 0x4f2   : > { %v3541_v17 = vadd.f32 %v3540_v4, %v3539_v61  ;;  %v3554_v20 = vrot.slane %v3553_v6, 2  ;;  %v3573_v21 = vrot.slane %v3572_v8, 4  ;;  %v4074_v24 = vmul.f32 %v9361_v36, %v3529_v32  ;;  %v9004_v28 = vpop.eup %9003 }
 0x4f3   : > { %v3535_v26 = vrot.slane %v3534_v40, 1  ;;  %v3548_v9 = vadd.f32 %v3547_v10, %v3546_v2  ;;  %v3561_v27 = vrot.slane %v3560_v63, 2  ;;  %v3567_v14 = vadd.f32 %v3566_v12, %v3565_v7 }
 0x4f4   : > { %v3542_v29 = vrot.slane %v3541_v17, 1  ;;  %v3555_v16 = vadd.f32 %v3554_v20, %v3553_v6  ;;  %v3574_v30 = vadd.f32 %v3573_v21, %v3572_v8  ;;  %9005 = vlog2.f32 %v4074_v24 }
 0x4f5   : > { %v3536_v18 = vadd.f32 %v3535_v26, %v3534_v40  ;;  %v3549_v33 = vrot.slane %v3548_v9, 1  ;;  %v3562_v19 = vadd.f32 %v3561_v27, %v3560_v63  ;;  %v3568_v23 = vrot.slane %v3567_v14, 2 }
 0x4f6   : > { %v3543_v34 = vadd.f32 %v3542_v29, %v3541_v17  ;;  %v3556_v35 = vrot.slane %v3555_v16, 1  ;;  %v3575_v37 = vrot.slane %v3574_v30, 2  ;;  %9007 = vlog2.f32 %v780_v54 }
 0x4f7   : > { %v3550_v38 = vadd.f32 %v3549_v33, %v3548_v9  ;;  %v3563_v39 = vrot.slane %v3562_v19, 1  ;;  %v3569_v41 = vadd.f32 %v3568_v23, %v3567_v14  ;;  %v4075_v42 = vmul.f32 %v9361_v36, %v3536_v18 }
 0x4f8   : > { %v3557_v44 = vadd.f32 %v3556_v35, %v3555_v16  ;;  %v3576_v25 = vadd.f32 %v3575_v37, %v3574_v30  ;;  %v4076_v45 = vmul.f32 %v9361_v36, %v3543_v34  ;;  %v1282_v46 = vmul.f32 0.6931472, %v9000_v15 }
 0x4f9   : > { %v3564_v47 = vadd.f32 %v3563_v39, %v3562_v19  ;;  %v3570_v31 = vrot.slane %v3569_v41, 1  ;;  %v4077_v48 = vmul.f32 %v9361_v36, %v3550_v38  ;;  %9009 = vlog2.f32 %v4075_v42 }
 0x4fa   : > { %v9006_v49 = vpop.eup %9005  ;;  %v3577_v50 = vrot.slane %v3576_v25, 1  ;;  %v4078_v51 = vmul.f32 %v9361_v36, %v3557_v44  ;;  %9011 = vlog2.f32 %v4076_v45  ;;  %v1284_v60 = vmul.f32 0.6931472, %v9002_v13 }
 0x4fb   : > { %v3571_v53 = vadd.f32 %v3570_v31, %v3569_v41  ;;  %v4079_v54 = vmul.f32 %v9361_v36, %v3564_v47  ;;  %v4539_v55 = vmul.f32 0.6931472, %v9006_v49  ;;  %9013 = vlog2.f32 %v4077_v48 }
 0x4fc   : > { %v9008_v57 = vpop.eup %9007  ;;  %v3578_v58 = vadd.f32 %v3577_v50, %v3576_v25  ;;  %9015 = vlog2.f32 %v4078_v51  ;;  %v1546_v62 = vmul.f32 %v1282_v46, %v9299_v0  ;;  %v782_v1 = vmax.f32 %v526_v56, 1e-06 }
 0x4fd   : > { %v4080_v61 = vmul.f32 %v9361_v36, %v3571_v53  ;;  %9017 = vlog2.f32 %v4079_v54  ;;  %v4843_v11 = vmul.f32 %v9419_v5, %v4539_v55  ;;  %v1286_v2 = vmul.f32 0.6931472, %v9004_v28 }
 0x4fe   : > { %v4081_v32 = vmul.f32 %v9361_v36, %v3578_v58  ;;  %9019 = vlog2.f32 %v781_v52  ;;  %v783_v6 = vmax.f32 %v527_v59, 1e-06  ;;  %v1288_v7 = vmul.f32 0.6931472, %v9008_v57 }
 0x4ff   : > { %v9010_v3 = vpop.eup %9009  ;;  %9021 = vlog2.f32 %v4080_v61  ;;  %v5307_v4 = vmul.f32 1.442695, %v4843_v11  ;;  %v784_v40 = vmax.f32 %v528_v22, 1e-06  ;;  %v1547_v12 = vmul.f32 %v1284_v60, %v9299_v0 }
 0x500   : > { %v9012_v8 = vpop.eup %9011  ;;  %v4541_v15 = vmul.f32 0.6931472, %v9010_v3  ;;  %9023 = vlog2.f32 %v4081_v32  ;;  %v2050_v13 = vmul.f32 1.442695, %v1546_v62  ;;  %v1548_v24 = vmul.f32 %v1286_v2, %v9299_v0 }
 0x501   : > { %v9014_v10 = vpop.eup %9013  ;;  %v4543_v63 = vmul.f32 0.6931472, %v9012_v8  ;;  %9025 = vpow2.f32 %v5307_v4  ;;  %v1549_v14 = vmul.f32 %v1288_v7, %v9299_v0  ;;  %v2052_v43 = vmul.f32 1.442695, %v1547_v12 }
 0x502   : > { %v9016_v17 = vpop.eup %9015  ;;  %v4545_v20 = vmul.f32 0.6931472, %v9014_v10  ;;  %v4844_v21 = vmul.f32 %v9419_v5, %v4541_v15  ;;  %9027 = vlog2.f32 %v782_v1  ;;  %v2054_v49 = vmul.f32 1.442695, %v1548_v24 }
 0x503   : > { %v9018_v26 = vpop.eup %9017  ;;  %v4547_v9 = vmul.f32 0.6931472, %v9016_v17  ;;  %v4845_v27 = vmul.f32 %v9419_v5, %v4543_v63  ;;  %9029 = vlog2.f32 %v783_v6  ;;  %v2056_v53 = vmul.f32 1.442695, %v1549_v14  ;;  %v489_v6 = vld [vmem:[%s9304_s29 + $0x6c0] sm:$0xff] }
 0x504   : > { %v9020_v28 = vpop.eup %9019  ;;  %v4549_v29 = vmul.f32 0.6931472, %v9018_v26  ;;  %v4846_v16 = vmul.f32 %v9419_v5, %v4545_v20  ;;  %v5309_v30 = vmul.f32 1.442695, %v4844_v21  ;;  %9031 = vlog2.f32 %v784_v40  ;;  %v490_v40 = vld [vmem:[%s9304_s29 + $0x6c8] sm:$0xff] }
 0x505   : > { %v9022_v18 = vpop.eup %9021  ;;  %v4847_v33 = vmul.f32 %v9419_v5, %v4547_v9  ;;  %v5311_v19 = vmul.f32 1.442695, %v4845_v27  ;;  %v1290_v23 = vmul.f32 0.6931472, %v9020_v28  ;;  %9033 = vpow2.f32 %v2050_v13  ;;  %v491_v13 = vld [vmem:[%s9304_s29 + $0x6d0] sm:$0xff]  ;;  %v10850_v27 = vld [vmem:[%s9304_s29 + $0x6d8] sm:$0xff] }
 0x506   : > { %v9024_v34 = vpop.eup %9023  ;;  %v4551_v35 = vmul.f32 0.6931472, %v9022_v18  ;;  %v4848_v37 = vmul.f32 %v9419_v5, %v4549_v29  ;;  %9035 = vpow2.f32 %v5309_v30  ;;  %v5313_v38 = vmul.f32 1.442695, %v4846_v16 }
 0x507   : > { %v9026_v39 = vpop.eup %9025  ;;  %v4553_v41 = vmul.f32 0.6931472, %v9024_v34  ;;  %9037 = vpow2.f32 %v5311_v19  ;;  %v5315_v42 = vmul.f32 1.442695, %v4847_v33  ;;  %v1550_v46 = vmul.f32 %v1290_v23, %v9299_v0 }
 0x508   : > { %v9028_v44 = vpop.eup %9027  ;;  %v4849_v25 = vmul.f32 %v9419_v5, %v4551_v35  ;;  %9039 = vpow2.f32 %v5313_v38  ;;  %v5317_v45 = vmul.f32 1.442695, %v4848_v37  ;;  %v745_v21 = vmax.f32 %v489_v6, 1e-06 }
 0x509   : > { %v9030_v47 = vpop.eup %9029  ;;  %v4850_v31 = vmul.f32 %v9419_v5, %v4553_v41  ;;  %9041 = vpow2.f32 %v5315_v42  ;;  %v1292_v48 = vmul.f32 0.6931472, %v9028_v44  ;;  %v2058_v60 = vmul.f32 1.442695, %v1550_v46 }
 0x50a   : > { %v9032_v50 = vpop.eup %9031  ;;  %9043 = vpow2.f32 %v5317_v45  ;;  %v5319_v51 = vmul.f32 1.442695, %v4849_v25  ;;  %v1294_v52 = vmul.f32 0.6931472, %v9030_v47  ;;  %v746_v14 = vmax.f32 %v490_v40, 1e-06 }
 0x50b   : > { %v9034_v54 = vpop.eup %9033  ;;  %v5321_v55 = vmul.f32 1.442695, %v4850_v31  ;;  %v1296_v56 = vmul.f32 0.6931472, %v9032_v50  ;;  %v1551_v57 = vmul.f32 %v1292_v48, %v9299_v0  ;;  %9045 = vpow2.f32 %v2052_v43 }
 0x50c   : > { %v9036_v58 = vpop.eup %9035  ;;  %9047 = vpow2.f32 %v5319_v51  ;;  %v1552_v59 = vmul.f32 %v1294_v52, %v9299_v0  ;;  %v3803_v61 = vsel %vm2066_vm4, %v9034_v54, 0.0  ;;  %v747_v30 = vmax.f32 %v491_v13, 1e-06 }
 0x50d   : > { %v9038_v11 = vpop.eup %9037  ;;  %9049 = vpow2.f32 %v5321_v55  ;;  %v5848_v22 = vsel %vm5659_vm6, %v9036_v58, %v9026_v39  ;;  %v1553_v62 = vmul.f32 %v1296_v56, %v9299_v0  ;;  %v2060_v32 = vmul.f32 1.442695, %v1551_v57 }
 0x50e   : > { %v9040_v1 = vpop.eup %9039  ;;  %v5849_v2 = vsel %vm5661_vm7, %v9038_v11, %v5848_v22  ;;  %9051 = vpow2.f32 %v2054_v49  ;;  %v2062_v3 = vmul.f32 1.442695, %v1552_v59  ;;  %v3804_v4 = vrot.slane %v3803_v61, 4 }
 0x50f   : > { %v9042_v7 = vpop.eup %9041  ;;  %v5850_v8 = vsel %vm5663_vm8, %v9040_v1, %v5849_v2  ;;  %9053 = vpow2.f32 %v2056_v53  ;;  %v2064_v15 = vmul.f32 1.442695, %v1553_v62  ;;  %v748_v37 = vmax.f32 %v10850_v27, 1e-06 }
 0x510   : > { %v9044_v10 = vpop.eup %9043  ;;  %v5851_v63 = vsel %vm5665_vm9, %v9042_v7, %v5850_v8  ;;  %9055 = vpow2.f32 %v2058_v60  ;;  %v3805_v12 = vadd.f32 %v3804_v4, %v3803_v61 }
 0x511   : > { %v9046_v17 = vpop.eup %9045  ;;  %v5852_v20 = vsel %vm5667_vm10, %v9044_v10, %v5851_v63  ;;  %9057 = vpow2.f32 %v2060_v32 }
 0x512   : > { %v9048_v24 = vpop.eup %9047  ;;  %9059 = vpow2.f32 %v2062_v3  ;;  %v3806_v26 = vrot.slane %v3805_v12, 2  ;;  %v3810_v9 = vsel %vm2066_vm4, %v9046_v17, 0.0 }
 0x513   : > { %v9050_v28 = vpop.eup %9049  ;;  %v5853_v29 = vsel %vm5669_vm11, %v9048_v24, %v5852_v20  ;;  %9061 = vpow2.f32 %v2064_v15  ;;  %v3811_v16 = vrot.slane %v3810_v9, 4 }
 0x514   : > { %v9052_v18 = vpop.eup %9051  ;;  %v5854_v33 = vsel %vm5671_vm12, %v9050_v28, %v5853_v29  ;;  %v3807_v19 = vadd.f32 %v3806_v26, %v3805_v12  ;;  %9063 = vlog2.f32 %v745_v21 }
 0x515   : > { %v9054_v23 = vpop.eup %9053  ;;  %6116 = vxpose.xlu0.b32.cont [3/4] (short) (narrow) %v5854_v33, 16  ;;  %v3812_v34 = vadd.f32 %v3811_v16, %v3810_v9  ;;  %v3817_v35 = vsel %vm2066_vm4, %v9052_v18, 0.0  ;;  %9065 = vlog2.f32 %v746_v14 }
 0x516   : > { %v9056_v38 = vpop.eup %9055  ;;  %v3808_v39 = vrot.slane %v3807_v19, 1  ;;  %v3818_v41 = vrot.slane %v3817_v35, 4  ;;  %v3824_v42 = vsel %vm2066_vm4, %v9054_v23, 0.0  ;;  %9067 = vlog2.f32 %v747_v30 }
 0x517   : > { %v9058_v43 = vpop.eup %9057  ;;  %v3813_v44 = vrot.slane %v3812_v34, 2  ;;  %v3825_v25 = vrot.slane %v3824_v42, 4  ;;  %v3831_v45 = vsel %vm2066_vm4, %v9056_v38, 0.0 }
 0x518   : > { %v9060_v46 = vpop.eup %9059  ;;  %v3809_v47 = vadd.f32 %v3808_v39, %v3807_v19  ;;  %v3819_v31 = vadd.f32 %v3818_v41, %v3817_v35  ;;  %v3832_v48 = vrot.slane %v3831_v45, 4  ;;  %v3838_v49 = vsel %vm2066_vm4, %v9058_v43, 0.0  ;;  %v493_v19 = vld [vmem:[%s9304_s29 + $0x6e0] sm:$0xff] }
 0x519   : > { %v9062_v50 = vpop.eup %9061  ;;  %v3814_v51 = vadd.f32 %v3813_v44, %v3812_v34  ;;  %v3826_v52 = vadd.f32 %v3825_v25, %v3824_v42  ;;  %v3839_v53 = vrot.slane %v3838_v49, 4  ;;  %v3845_v54 = vsel %vm2066_vm4, %v9060_v46, 0.0  ;;  %v494_v42 = vld [vmem:[%s9304_s29 + $0x6e8] sm:$0xff]  ;;  %v495_v25 = vld [vmem:[%s9304_s29 + $0x6f0] sm:$0xff] }
 0x51a   : > { %v3820_v55 = vrot.slane %v3819_v31, 2  ;;  %v3833_v56 = vadd.f32 %v3832_v48, %v3831_v45  ;;  %v3846_v57 = vrot.slane %v3845_v54, 4  ;;  %v3852_v58 = vsel %vm2066_vm4, %v9062_v50, 0.0  ;;  %v9064_v59 = vpop.eup %9063  ;;  %v496_v50 = vld [vmem:[%s9304_s29 + $0x6f8] sm:$0xff] }
 0x51b   : > { %v3815_v60 = vrot.slane %v3814_v51, 1  ;;  %v3827_v61 = vrot.slane %v3826_v52, 2  ;;  %v3840_v11 = vadd.f32 %v3839_v53, %v3838_v49  ;;  %v3853_v22 = vrot.slane %v3852_v58, 4  ;;  %v9066_v62 = vpop.eup %9065 }
 0x51c   : > { %v3821_v32 = vadd.f32 %v3820_v55, %v3819_v31  ;;  %v3834_v1 = vrot.slane %v3833_v56, 2  ;;  %v3847_v2 = vadd.f32 %v3846_v57, %v3845_v54  ;;  %v4114_v3 = vmul.f32 %v9361_v36, %v3809_v47  ;;  %v9068_v4 = vpop.eup %9067 }
 0x51d   : > { %v3816_v6 = vadd.f32 %v3815_v60, %v3814_v51  ;;  %v3828_v7 = vadd.f32 %v3827_v61, %v3826_v52  ;;  %v3841_v8 = vrot.slane %v3840_v11, 2  ;;  %v3854_v15 = vadd.f32 %v3853_v22, %v3852_v58 }
 0x51e   : > { %v3822_v40 = vrot.slane %v3821_v32, 1  ;;  %v3835_v10 = vadd.f32 %v3834_v1, %v3833_v56  ;;  %v3848_v63 = vrot.slane %v3847_v2, 2  ;;  %9069 = vlog2.f32 %v4114_v3 }
 0x51f   : > { %v3829_v12 = vrot.slane %v3828_v7, 1  ;;  %v3842_v13 = vadd.f32 %v3841_v8, %v3840_v11  ;;  %v3855_v17 = vrot.slane %v3854_v15, 2  ;;  %v4115_v20 = vmul.f32 %v9361_v36, %v3816_v6 }
 0x520   : > { %v3823_v21 = vadd.f32 %v3822_v40, %v3821_v32  ;;  %v3836_v24 = vrot.slane %v3835_v10, 1  ;;  %v3849_v26 = vadd.f32 %v3848_v63, %v3847_v2  ;;  %9071 = vlog2.f32 %v748_v37 }
 0x521   : > { %v3830_v9 = vadd.f32 %v3829_v12, %v3828_v7  ;;  %v3843_v27 = vrot.slane %v3842_v13, 1  ;;  %v3856_v14 = vadd.f32 %v3855_v17, %v3854_v15  ;;  %9073 = vlog2.f32 %v4115_v20 }
 0x522   : > { %v3837_v28 = vadd.f32 %v3836_v24, %v3835_v10  ;;  %v3850_v29 = vrot.slane %v3849_v26, 1  ;;  %v4116_v16 = vmul.f32 %v9361_v36, %v3823_v21  ;;  %v1218_v37 = vmul.f32 0.6931472, %v9064_v59 }
 0x523   : > { %v3844_v30 = vadd.f32 %v3843_v27, %v3842_v13  ;;  %v3857_v18 = vrot.slane %v3856_v14, 1  ;;  %v4117_v33 = vmul.f32 %v9361_v36, %v3830_v9  ;;  %v749_v45 = vmax.f32 %v493_v19, 1e-06 }
 0x524   : > { %v9070_v23 = vpop.eup %9069  ;;  %v3851_v34 = vadd.f32 %v3850_v29, %v3849_v26  ;;  %v4118_v35 = vmul.f32 %v9361_v36, %v3837_v28  ;;  %9075 = vlog2.f32 %v4116_v16  ;;  %v1220_v48 = vmul.f32 0.6931472, %v9066_v62 }
 0x525   : > { %v3858_v38 = vadd.f32 %v3857_v18, %v3856_v14  ;;  %v4119_v39 = vmul.f32 %v9361_v36, %v3844_v30  ;;  %v4619_v41 = vmul.f32 0.6931472, %v9070_v23  ;;  %9077 = vlog2.f32 %v4117_v33 }
 0x526   : > { %v9072_v43 = vpop.eup %9071  ;;  %v4120_v44 = vmul.f32 %v9361_v36, %v3851_v34  ;;  %9079 = vlog2.f32 %v4118_v35  ;;  %v750_v51 = vmax.f32 %v494_v42, 1e-06  ;;  %v1514_v52 = vmul.f32 %v1218_v37, %v9299_v0 }
 0x527   : > { %v9074_v46 = vpop.eup %9073  ;;  %v4121_v47 = vmul.f32 %v9361_v36, %v3858_v38  ;;  %9081 = vlog2.f32 %v4119_v39  ;;  %v4883_v31 = vmul.f32 %v9419_v5, %v4619_v41  ;;  %v751_v54 = vmax.f32 %v495_v25, 1e-06 }
 0x528   : > { %v4621_v49 = vmul.f32 0.6931472, %v9074_v46  ;;  %9083 = vlog2.f32 %v4120_v44  ;;  %v1222_v55 = vmul.f32 0.6931472, %v9068_v4  ;;  %v1224_v58 = vmul.f32 0.6931472, %v9072_v43 }
 0x529   : > { %9085 = vlog2.f32 %v4121_v47  ;;  %v5387_v53 = vmul.f32 1.442695, %v4883_v31  ;;  %v752_v61 = vmax.f32 %v496_v50, 1e-06  ;;  %v1515_v11 = vmul.f32 %v1220_v48, %v9299_v0 }
 0x52a   : > { %v9076_v56 = vpop.eup %9075  ;;  %v4884_v57 = vmul.f32 %v9419_v5, %v4621_v49  ;;  %9087 = vlog2.f32 %v749_v45  ;;  %v1986_v1 = vmul.f32 1.442695, %v1514_v52  ;;  %v1516_v6 = vmul.f32 %v1222_v55, %v9299_v0 }
 0x52b   : > { %v9078_v59 = vpop.eup %9077  ;;  %v4623_v60 = vmul.f32 0.6931472, %v9076_v56  ;;  %9089 = vpow2.f32 %v5387_v53  ;;  %v1517_v40 = vmul.f32 %v1224_v58, %v9299_v0  ;;  %v1988_v30 = vmul.f32 1.442695, %v1515_v11 }
 0x52c   : > { %v9080_v22 = vpop.eup %9079  ;;  %v4625_v62 = vmul.f32 0.6931472, %v9078_v59  ;;  %v5389_v32 = vmul.f32 1.442695, %v4884_v57  ;;  %9091 = vlog2.f32 %v750_v51  ;;  %v1990_v38 = vmul.f32 1.442695, %v1516_v6 }
 0x52d   : > { %v9082_v2 = vpop.eup %9081  ;;  %v4627_v3 = vmul.f32 0.6931472, %v9080_v22  ;;  %v4885_v4 = vmul.f32 %v9419_v5, %v4623_v60  ;;  %9093 = vlog2.f32 %v751_v54  ;;  %v1992_v43 = vmul.f32 1.442695, %v1517_v40 }
 0x52e   : > { %v9084_v7 = vpop.eup %9083  ;;  %v4629_v8 = vmul.f32 0.6931472, %v9082_v2  ;;  %v4886_v15 = vmul.f32 %v9419_v5, %v4625_v62  ;;  %9095 = vpow2.f32 %v5389_v32 }
 0x52f   : > { %v9086_v10 = vpop.eup %9085  ;;  %v4631_v63 = vmul.f32 0.6931472, %v9084_v7  ;;  %v4887_v12 = vmul.f32 %v9419_v5, %v4627_v3  ;;  %v5391_v13 = vmul.f32 1.442695, %v4885_v4  ;;  %9097 = vlog2.f32 %v752_v61 }
 0x530   : > { %v9088_v17 = vpop.eup %9087  ;;  %v4633_v20 = vmul.f32 0.6931472, %v9086_v10  ;;  %v4888_v21 = vmul.f32 %v9419_v5, %v4629_v8  ;;  %v5393_v24 = vmul.f32 1.442695, %v4886_v15  ;;  %9099 = vpow2.f32 %v1986_v1 }
 0x531   : > { %v9090_v26 = vpop.eup %9089  ;;  %v4889_v9 = vmul.f32 %v9419_v5, %v4631_v63  ;;  %9101 = vpow2.f32 %v5391_v13  ;;  %v5395_v27 = vmul.f32 1.442695, %v4887_v12  ;;  %v1226_v14 = vmul.f32 0.6931472, %v9088_v17 }
 0x532   : > { %v9092_v28 = vpop.eup %9091  ;;  %v4890_v29 = vmul.f32 %v9419_v5, %v4633_v20  ;;  %9103 = vpow2.f32 %v5393_v24  ;;  %v5397_v16 = vmul.f32 1.442695, %v4888_v21 }
 0x533   : > { %v9094_v18 = vpop.eup %9093  ;;  %9105 = vpow2.f32 %v5395_v27  ;;  %v5399_v33 = vmul.f32 1.442695, %v4889_v9  ;;  %v1228_v19 = vmul.f32 0.6931472, %v9092_v28  ;;  %v1518_v23 = vmul.f32 %v1226_v14, %v9299_v0 }
 0x534   : > { %v9096_v34 = vpop.eup %9095  ;;  %9107 = vpow2.f32 %v5397_v16  ;;  %v5401_v35 = vmul.f32 1.442695, %v4890_v29  ;;  %v1230_v37 = vmul.f32 0.6931472, %v9094_v18 }
 0x535   : > { %v9098_v39 = vpop.eup %9097  ;;  %9109 = vpow2.f32 %v5399_v33  ;;  %v5883_v41 = vsel %vm5659_vm6, %v9096_v34, %v9090_v26  ;;  %v1519_v42 = vmul.f32 %v1228_v19, %v9299_v0  ;;  %v1994_v46 = vmul.f32 1.442695, %v1518_v23 }
 0x536   : > { %v9100_v44 = vpop.eup %9099  ;;  %9111 = vpow2.f32 %v5401_v35  ;;  %v1232_v25 = vmul.f32 0.6931472, %v9098_v39  ;;  %v1520_v45 = vmul.f32 %v1230_v37, %v9299_v0 }
 0x537   : > { %v9102_v47 = vpop.eup %9101  ;;  %9113 = vpow2.f32 %v1988_v30  ;;  %v1996_v31 = vmul.f32 1.442695, %v1519_v42  ;;  %v3579_v48 = vsel %vm2066_vm4, %v9100_v44, 0.0 }
 0x538   : > { %v9104_v49 = vpop.eup %9103  ;;  %v5884_v50 = vsel %vm5661_vm7, %v9102_v47, %v5883_v41  ;;  %v1521_v51 = vmul.f32 %v1232_v25, %v9299_v0  ;;  %9115 = vpow2.f32 %v1990_v38  ;;  %v1998_v52 = vmul.f32 1.442695, %v1520_v45 }
 0x539   : > { %v9106_v53 = vpop.eup %9105  ;;  %v5885_v54 = vsel %vm5663_vm8, %v9104_v49, %v5884_v50  ;;  %9117 = vpow2.f32 %v1992_v43  ;;  %v3580_v55 = vrot.slane %v3579_v48, 4 }
 0x53a   : > { %v9108_v56 = vpop.eup %9107  ;;  %v5886_v57 = vsel %vm5665_vm9, %v9106_v53, %v5885_v54  ;;  %9119 = vpow2.f32 %v1994_v46  ;;  %v2000_v58 = vmul.f32 1.442695, %v1521_v51  ;;  %v6181_v51 = vld [vmem:[%s11339_s2 + $0x18] sm:$0xff] }
 0x53b   : > { %v9110_v59 = vpop.eup %9109  ;;  %v5887_v60 = vsel %vm5667_vm10, %v9108_v56, %v5886_v57  ;;  %9121 = vpow2.f32 %v1996_v31  ;;  %v3581_v61 = vadd.f32 %v3580_v55, %v3579_v48  ;;  %6247 = vmatpush.msra.mxu0 %v6181_v51  ;;  %7079 = vmatpush.msra.mxu3 %v6181_v51 }
 0x53c   : > { %v9112_v11 = vpop.eup %9111  ;;  %v5888_v0 = vsel %vm5669_vm11, %v9110_v59, %v5887_v60  ;;  %9123 = vpow2.f32 %v1998_v52  ;;  %v6180_v52 = vld [vmem:[%s11339_s2 + $0x10] sm:$0xff]  ;;  %v6179_v60 = vld [vmem:[%s11339_s2 + $0x8] sm:$0xff] }
 0x53d   : > { %v9114_v22 = vpop.eup %9113  ;;  %v5889_v62 = vsel %vm5671_vm12, %v9112_v11, %v5888_v0  ;;  %9125 = vpow2.f32 %v2000_v58  ;;  %v3582_v32 = vrot.slane %v3581_v61, 2  ;;  %6248 = vmatpush.msra.mxu0 %v6180_v52  ;;  %7080 = vmatpush.msra.mxu3 %v6180_v52 }
 0x53e   : > { %v9116_v1 = vpop.eup %9115  ;;  %6149 = vxpose.xlu1.b32.end [4/4] (short) (narrow) %v5889_v62, 16  ;;  %v3586_v2 = vsel %vm2066_vm4, %v9114_v22, 0.0  ;;  %v5938_v22 = vpop.trf.xlu0 }
 0x53f   : > { %v9118_v3 = vpop.eup %9117  ;;  %v3583_v4 = vadd.f32 %v3582_v32, %v3581_v61  ;;  %v3587_v6 = vrot.slane %v3586_v2, 4  ;;  %v3593_v7 = vsel %vm2066_vm4, %v9116_v1, 0.0  ;;  %6249 = vmatpush.msra.mxu0 %v6179_v60  ;;  %7081 = vmatpush.msra.mxu3 %v6179_v60 }
 0x540   : > { %v9120_v8 = vpop.eup %9119  ;;  %v3594_v15 = vrot.slane %v3593_v7, 4  ;;  %v3600_v40 = vsel %vm2066_vm4, %v9118_v3, 0.0 }
 0x541   : > { %v9122_v10 = vpop.eup %9121  ;;  %v3584_v63 = vrot.slane %v3583_v4, 1  ;;  %v3588_v12 = vadd.f32 %v3587_v6, %v3586_v2  ;;  %v3601_v13 = vrot.slane %v3600_v40, 4  ;;  %v3607_v17 = vsel %vm2066_vm4, %v9120_v8, 0.0  ;;  %v6178_v2 = vld [vmem:[%s11339_s2] sm:$0xff] }
 0x542   : > { %v9124_v20 = vpop.eup %9123  ;;  %v3595_v21 = vadd.f32 %v3594_v15, %v3593_v7  ;;  %v3608_v24 = vrot.slane %v3607_v17, 4  ;;  %v3614_v26 = vsel %vm2066_vm4, %v9122_v10, 0.0  ;;  %6250 = vmatpush.msra.mxu0 %v6178_v2  ;;  %7082 = vmatpush.msra.mxu3 %v6178_v2 }
 0x543   : > { %v9126_v9 = vpop.eup %9125  ;;  %v3585_v27 = vadd.f32 %v3584_v63, %v3583_v4  ;;  %v3589_v14 = vrot.slane %v3588_v12, 2  ;;  %v3602_v28 = vadd.f32 %v3601_v13, %v3600_v40  ;;  %v3615_v29 = vrot.slane %v3614_v26, 4  ;;  %7044 = vmatmul.msk.f32.vlgmr.msra.gmra.mxu0 %vm6186_vm13, %v5938_v22 }
 0x544   : > { %v3596_v16 = vrot.slane %v3595_v21, 2  ;;  %v3609_v30 = vadd.f32 %v3608_v24, %v3607_v17  ;;  %v3621_v18 = vsel %vm2066_vm4, %v9124_v20, 0.0  ;;  %v3628_v33 = vsel %vm2066_vm4, %v9126_v9, 0.0 }
 0x545   : > { %v3590_v19 = vadd.f32 %v3589_v14, %v3588_v12  ;;  %v3603_v23 = vrot.slane %v3602_v28, 2  ;;  %v3616_v34 = vadd.f32 %v3615_v29, %v3614_v26  ;;  %v3622_v35 = vrot.slane %v3621_v18, 4 }
 0x546   : > { %v3597_v37 = vadd.f32 %v3596_v16, %v3595_v21  ;;  %v3610_v38 = vrot.slane %v3609_v30, 2  ;;  %v3629_v39 = vrot.slane %v3628_v33, 4  ;;  %v4082_v41 = vmul.f32 %v9361_v36, %v3585_v27 }
 0x547   : > { %v3591_v42 = vrot.slane %v3590_v19, 1  ;;  %v3604_v43 = vadd.f32 %v3603_v23, %v3602_v28  ;;  %v3617_v44 = vrot.slane %v3616_v34, 2  ;;  %v3623_v25 = vadd.f32 %v3622_v35, %v3621_v18  ;;  %v5939_v28 = vpop.trf.xlu0  ;;  %v5970_v18 = vpop.trf.xlu1 }
 0x548   : > { %v3598_v45 = vrot.slane %v3597_v37, 1  ;;  %v3611_v46 = vadd.f32 %v3610_v38, %v3609_v30  ;;  %v3630_v47 = vadd.f32 %v3629_v39, %v3628_v33  ;;  %9127 = vlog2.f32 %v4082_v41 }
 0x549   : > { %v3592_v31 = vadd.f32 %v3591_v42, %v3590_v19  ;;  %v3605_v48 = vrot.slane %v3604_v43, 1  ;;  %v3618_v49 = vadd.f32 %v3617_v44, %v3616_v34  ;;  %v3624_v50 = vrot.slane %v3623_v25, 2 }
 0x54a   : > { %v3599_v53 = vadd.f32 %v3598_v45, %v3597_v37  ;;  %v3612_v54 = vrot.slane %v3611_v46, 1  ;;  %v3631_v55 = vrot.slane %v3630_v47, 2 }
 0x54b   : > { %v3606_v56 = vadd.f32 %v3605_v48, %v3604_v43  ;;  %v3619_v57 = vrot.slane %v3618_v49, 1  ;;  %v3625_v58 = vadd.f32 %v3624_v50, %v3623_v25  ;;  %v4083_v59 = vmul.f32 %v9361_v36, %v3592_v31  ;;  %7045 = vmatmul.msk.f32.gmra.mxu0 %vm6186_vm13, %v5939_v28 }
 0x54c   : > { %v3613_v61 = vadd.f32 %v3612_v54, %v3611_v46  ;;  %v3632_v11 = vadd.f32 %v3631_v55, %v3630_v47  ;;  %v4084_v0 = vmul.f32 %v9361_v36, %v3599_v53  ;;  %v6002_v55 = vpop.trf.xlu2 }
 0x54d   : > { %v3620_v62 = vadd.f32 %v3619_v57, %v3618_v49  ;;  %v3626_v32 = vrot.slane %v3625_v58, 1  ;;  %v4085_v1 = vmul.f32 %v9361_v36, %v3606_v56  ;;  %9129 = vlog2.f32 %v4083_v59 }
 0x54e   : > { %v9128_v3 = vpop.eup %9127  ;;  %v3633_v4 = vrot.slane %v3632_v11, 1  ;;  %v4086_v6 = vmul.f32 %v9361_v36, %v3613_v61  ;;  %9131 = vlog2.f32 %v4084_v0 }
 0x54f   : > { %v3627_v7 = vadd.f32 %v3626_v32, %v3625_v58  ;;  %v4087_v8 = vmul.f32 %v9361_v36, %v3620_v62  ;;  %v4555_v15 = vmul.f32 0.6931472, %v9128_v3  ;;  %9133 = vlog2.f32 %v4085_v1  ;;  %v5971_v51 = vpop.trf.xlu1  ;;  %v6034_v1 = vpop.trf.xlu0 }
 0x550   : > { %v3634_v40 = vadd.f32 %v3633_v4, %v3632_v11  ;;  %9135 = vlog2.f32 %v4086_v6  ;;  %v6323_v4 = vld [vmem:[%s11341_s4 + $0x38] sm:$0xff]  ;;  %v6322_v6 = vld [vmem:[%s11341_s4 + $0x30] sm:$0xff] }
 0x551   : > { %v4088_v10 = vmul.f32 %v9361_v36, %v3627_v7  ;;  %9137 = vlog2.f32 %v4087_v8  ;;  %v4851_v63 = vmul.f32 %v9419_v5, %v4555_v15  ;;  %6385 = vmatpush.msra.mxu1 %v6323_v4  ;;  %7083 = vmatpush.msra.mxu2 %v6323_v4  ;;  %v6321_v8 = vld [vmem:[%s11341_s4 + $0x28] sm:$0xff]  ;;  %v6320_v15 = vld [vmem:[%s11341_s4 + $0x20] sm:$0xff] }
 0x552   : > { %v4089_v12 = vmul.f32 %v9361_v36, %v3634_v40  ;;  %v10966_v40 = vld [vmem:[%s11340_s3] ss:$0 sm:$0xff] }
 0x553   : > { %v9130_v13 = vpop.eup %9129  ;;  %9139 = vlog2.f32 %v4088_v10  ;;  %v5323_v21 = vmul.f32 1.442695, %v4851_v63  ;;  %7046 = vmatmul.msk.f32.gmra.mxu0 %vm6186_vm13, %v5970_v18  ;;  %6386 = vmatpush.msra.mxu1 %v6322_v6  ;;  %v6319_v10 = vld [vmem:[%s11341_s4 + $0x18] sm:$0xff] }
 0x554   : > { %v9132_v17 = vpop.eup %9131  ;;  %v4557_v20 = vmul.f32 0.6931472, %v9130_v13  ;;  %9141 = vlog2.f32 %v4089_v12  ;;  %v6003_v22 = vpop.trf.xlu2  ;;  %7084 = vmatpush.msra.mxu2 %v6322_v6  ;;  %v6318_v13 = vld [vmem:[%s11341_s4 + $0x10] sm:$0xff] }
 0x555   : > { %v9134_v24 = vpop.eup %9133  ;;  %v4559_v26 = vmul.f32 0.6931472, %v9132_v17  ;;  %9143 = vpow2.f32 %v5323_v21  ;;  %6387 = vmatpush.msra.mxu1 %v6321_v8 }
 0x556   : > { %v9136_v9 = vpop.eup %9135  ;;  %v4561_v27 = vmul.f32 0.6931472, %v9134_v24  ;;  %v4852_v14 = vmul.f32 %v9419_v5, %v4557_v20  ;;  %7085 = vmatpush.msra.mxu2 %v6321_v8  ;;  %v6317_v20 = vld [vmem:[%s11341_s4 + $0x8] sm:$0xff]  ;;  %v6316_v24 = vld [vmem:[%s11341_s4] sm:$0xff] }
 0x557   : > { %v9138_v29 = vpop.eup %9137  ;;  %v4563_v16 = vmul.f32 0.6931472, %v9136_v9  ;;  %v4853_v30 = vmul.f32 %v9419_v5, %v4559_v26  ;;  %v6066_v0 = vpop.trf.xlu1  ;;  %6388 = vmatpush.msra.mxu1 %v6320_v15 }
 0x558   : > { %v4565_v33 = vmul.f32 0.6931472, %v9138_v29  ;;  %v4854_v36 = vmul.f32 %v9419_v5, %v4561_v27  ;;  %v5325_v19 = vmul.f32 1.442695, %v4852_v14  ;;  %v6035_v3 = vpop.trf.xlu0  ;;  %7086 = vmatpush.msra.mxu2 %v6320_v15 }
 0x559   : > { %v9140_v23 = vpop.eup %9139  ;;  %v4855_v34 = vmul.f32 %v9419_v5, %v4563_v16  ;;  %v5327_v35 = vmul.f32 1.442695, %v4853_v30  ;;  %6389 = vmatpush.msra.mxu1 %v6319_v10 }
 0x55a   : > { %v9142_v37 = vpop.eup %9141  ;;  %v4567_v38 = vmul.f32 0.6931472, %v9140_v23  ;;  %v4856_v39 = vmul.f32 %v9419_v5, %v4565_v33  ;;  %9145 = vpow2.f32 %v5325_v19  ;;  %v5329_v41 = vmul.f32 1.442695, %v4854_v36  ;;  %7087 = vmatpush.msra.mxu2 %v6319_v10 }
 0x55b   : > { %v4569_v42 = vmul.f32 0.6931472, %v9142_v37  ;;  %9147 = vpow2.f32 %v5327_v35  ;;  %v5331_v43 = vmul.f32 1.442695, %v4855_v34  ;;  %v9144_v46 = vpop.eup %9143  ;;  %7047 = vmatmul.msk.f32.gmra.mxu0 %vm6186_vm13, %v5971_v51  ;;  %6390 = vmatpush.msra.mxu1 %v6318_v13 }
 0x55c   : > { %v4857_v44 = vmul.f32 %v9419_v5, %v4567_v38  ;;  %9149 = vpow2.f32 %v5329_v41  ;;  %v5333_v25 = vmul.f32 1.442695, %v4856_v39  ;;  %v6098_v32 = vpop.trf.xlu2  ;;  %7088 = vmatpush.msra.mxu2 %v6318_v13 }
 0x55d   : > { %v4858_v45 = vmul.f32 %v9419_v5, %v4569_v42  ;;  %9151 = vpow2.f32 %v5331_v43  ;;  %6391 = vmatpush.msra.mxu1 %v6317_v20 }
 0x55e   : > { %9153 = vpow2.f32 %v5333_v25  ;;  %v5335_v47 = vmul.f32 1.442695, %v4857_v44  ;;  %7089 = vmatpush.msra.mxu2 %v6317_v20 }
 0x55f   : > { %v5337_v31 = vmul.f32 1.442695, %v4858_v45  ;;  %v6067_v62 = vpop.trf.xlu1  ;;  %6392 = vmatpush.msra.mxu1 %v6316_v24 }
 0x560   : > { %v9146_v48 = vpop.eup %9145  ;;  %9155 = vpow2.f32 %v5335_v47  ;;  %7053 = vmatmul.msk.f32.vlgmr.msra.gmra.mxu3 %vm6186_vm13, %v6067_v62  ;;  %7090 = vmatpush.msra.mxu2 %v6316_v24 }
 0x561   : > { %v9148_v49 = vpop.eup %9147  ;;  %9157 = vpow2.f32 %v5337_v31  ;;  %v5855_v50 = vsel %vm5659_vm6, %v9146_v48, %v9144_v46 }
 0x562   : > { %v9150_v52 = vpop.eup %9149  ;;  %v5856_v53 = vsel %vm5661_vm7, %v9148_v49, %v5855_v50 }
 0x563   : > { %v9152_v54 = vpop.eup %9151  ;;  %v5857_v5 = vsel %vm5663_vm8, %v9150_v52, %v5856_v53  ;;  %7048 = vmatmul.msk.f32.gmra.mxu0 %vm6186_vm13, %v6002_v55 }
 0x564   : > { %v9154_v56 = vpop.eup %9153  ;;  %v5858_v57 = vsel %vm5665_vm9, %v9152_v54, %v5857_v5  ;;  %v6099_v2 = vpop.trf.xlu2 }
 0x565   : > { %v5859_v58 = vsel %vm5667_vm10, %v9154_v56, %v5858_v57 }
 0x566   : > { %v9156_v59 = vpop.eup %9155 }
 0x567   : > { %v9158_v60 = vpop.eup %9157  ;;  %v5860_v61 = vsel %vm5669_vm11, %v9156_v59, %v5859_v58  ;;  %v11012_v59 = vld [vmem:[%s11342_s5] ss:$0 sm:$0xff] }
 0x568   : > { %v5861_v11 = vsel %vm5671_vm12, %v9158_v60, %v5860_v61  ;;  %7054 = vmatmul.msk.f32.gmra.mxu3 %vm6186_vm13, %v6098_v32 }
 0x569   : > { %6117 = vxpose.xlu0.b32.end [4/4] (short) (narrow) %v5861_v11, 16 }
 0x56b   : > { %7049 = vmatmul.msk.f32.gmra.mxu0 %vm6186_vm13, %v6003_v22 }
 0x570   : > { %7055 = vmatmul.msk.f32.gmra.mxu3 %vm6186_vm13, %v6099_v2 }
 0x573   : > { %7050 = vmatmul.msk.f32.gmra.mxu0 %vm6186_vm13, %v6034_v1 }
 0x57b   : > { %7051 = vmatmul.msk.f32.gmra.mxu0 %vm6186_vm13, %v6035_v3 }
 0x583   : > { %7052 = vmatmul.msk.f32.gmra.mxu0 %vm6186_vm13, %v6066_v0 }
 0x5c0   : > { %v6252_v7 = vpop.f32.mrf.mxu0 }
 0x5c1   : > { %v6253_v12 = vadd.f32 %v10966_v40, %v6252_v7 }
 0x5c3   : > { %v6300_v21 = vmax.f32 %v6253_v12, 0.0 }
 0x5c5   : > { %7060 = vmatmul.msk.f32.vlgmr.msra.gmra.mxu1 %vm6328_vm14, %v6300_v21 }
 0x5c8   : > { %v6255_v17 = vpop.f32.mrf.mxu0 }
 0x5c9   : > { %v6256_v9 = vadd.f32 %v10966_v40, %v6255_v17 }
 0x5ca   : > { %v6162_v14 = vpop.trf.xlu1 }
 0x5cb   : > { %v6301_v28 = vmax.f32 %v6256_v9, 0.0 }
 0x5cd   : > { %7061 = vmatmul.msk.f32.gmra.mxu1 %vm6328_vm14, %v6301_v28 }
 0x5d0   : > { %v6258_v27 = vpop.f32.mrf.mxu0 }
 0x5d1   : > { %v6259_v29 = vadd.f32 %v10966_v40, %v6258_v27 }
 0x5d2   : > { %v6163_v18 = vpop.trf.xlu1 }
 0x5d3   : > { %v6302_v30 = vmax.f32 %v6259_v29, 0.0 }
 0x5d5   : > { %7062 = vmatmul.msk.f32.gmra.mxu1 %vm6328_vm14, %v6302_v30 }
 0x5d8   : > { %v6261_v16 = vpop.f32.mrf.mxu0 }
 0x5d9   : > { %v6262_v33 = vadd.f32 %v10966_v40, %v6261_v16 }
 0x5db   : > { %v6303_v19 = vmax.f32 %v6262_v33, 0.0 }
 0x5dd   : > { %7063 = vmatmul.msk.f32.gmra.mxu1 %vm6328_vm14, %v6303_v19 }
 0x5e0   : > { %v6264_v36 = vpop.f32.mrf.mxu0 }
 0x5e1   : > { %v6265_v23 = vadd.f32 %v10966_v40, %v6264_v36 }
 0x5e3   : > { %v6304_v35 = vmax.f32 %v6265_v23, 0.0  ;;  %v6279_v44 = vpop.f32.mrf.mxu3 }
 0x5e4   : > { %v6280_v48 = vadd.f32 %v10966_v40, %v6279_v44 }
 0x5e5   : > { %7064 = vmatmul.msk.f32.gmra.mxu1 %vm6328_vm14, %v6304_v35 }
 0x5e6   : > { %v6309_v50 = vmax.f32 %v6280_v48, 0.0 }
 0x5e8   : > { %v6267_v34 = vpop.f32.mrf.mxu0 }
 0x5e9   : > { %v6268_v37 = vadd.f32 %v10966_v40, %v6267_v34 }
 0x5eb   : > { %v6305_v39 = vmax.f32 %v6268_v37, 0.0  ;;  %v6282_v49 = vpop.f32.mrf.mxu3 }
 0x5ec   : > { %v6283_v51 = vadd.f32 %v10966_v40, %v6282_v49 }
 0x5ed   : > { %7065 = vmatmul.msk.f32.gmra.mxu1 %vm6328_vm14, %v6305_v39 }
 0x5ee   : > { %v6310_v52 = vmax.f32 %v6283_v51, 0.0 }
 0x5f0   : > { %v6270_v38 = vpop.f32.mrf.mxu0 }
 0x5f1   : > { %v6271_v41 = vadd.f32 %v10966_v40, %v6270_v38 }
 0x5f3   : > { %v6306_v43 = vmax.f32 %v6271_v41, 0.0  ;;  %v6285_v53 = vpop.f32.mrf.mxu3 }
 0x5f4   : > { %v6286_v54 = vadd.f32 %v10966_v40, %v6285_v53 }
 0x5f5   : > { %v6130_v63 = vpop.trf.xlu0  ;;  %7066 = vmatmul.msk.f32.gmra.mxu1 %vm6328_vm14, %v6306_v43 }
 0x5f6   : > { %7056 = vmatmul.msk.f32.gmra.mxu3 %vm6186_vm13, %v6130_v63  ;;  %v6311_v5 = vmax.f32 %v6286_v54, 0.0 }
 0x5f8   : > { %v6273_v42 = vpop.f32.mrf.mxu0 }
 0x5f9   : > { %v6274_v25 = vadd.f32 %v10966_v40, %v6273_v42 }
 0x5fb   : > { %v6307_v31 = vmax.f32 %v6274_v25, 0.0 }
 0x5fd   : > { %v6131_v26 = vpop.trf.xlu0  ;;  %7067 = vmatmul.msk.f32.gmra.mxu1 %vm6328_vm14, %v6307_v31 }
 0x5fe   : > { %7057 = vmatmul.msk.f32.gmra.mxu3 %vm6186_vm13, %v6131_v26 }
 0x600   : > { %v6276_v45 = vpop.f32.mrf.mxu0 }
 0x601   : > { %v6277_v46 = vadd.f32 %v10966_v40, %v6276_v45 }
 0x603   : > { %v6308_v47 = vmax.f32 %v6277_v46, 0.0 }
 0x605   : > { %7068 = vmatmul.msk.f32.vlgmr.msra.gmra.mxu2 %vm6328_vm14, %v6308_v47 }
 0x606   : > { %7058 = vmatmul.msk.f32.gmra.mxu3 %vm6186_vm13, %v6162_v14 }
 0x60d   : > { %7069 = vmatmul.msk.f32.gmra.mxu2 %vm6328_vm14, %v6309_v50 }
 0x60e   : > { %7059 = vmatmul.msk.f32.gmra.mxu3 %vm6186_vm13, %v6163_v18 }
 0x615   : > { %7070 = vmatmul.msk.f32.gmra.mxu2 %vm6328_vm14, %v6310_v52 }
 0x61d   : > { %7071 = vmatmul.msk.f32.gmra.mxu2 %vm6328_vm14, %v6311_v5 }
 0x642   : > { %v6394_v57 = vpop.f32.mrf.mxu1 }
 0x643   : > { %v11016_v60 = vadd.f32 %v11012_v59, %v6394_v57 }
 0x645   : > { %9159 = vtanh.f32 %v11016_v60 }
 0x64a   : > { %v6397_v0 = vpop.f32.mrf.mxu1 }
 0x64b   : > { %v11021_v62 = vadd.f32 %v11012_v59, %v6397_v0  ;;  %v9160_v1 = vpop.eup %9159 }
 0x64c   : > { %v6459_v7 = vsel %vm6458_vm15, %v9160_v1, -inf }
 0x64d   : > { %9161 = vtanh.f32 %v11021_v62 }
 0x652   : > { %v6400_v3 = vpop.f32.mrf.mxu1 }
 0x653   : > { %v9162_v4 = vpop.eup %9161  ;;  %v11030_v63 = vadd.f32 %v11012_v59, %v6400_v3 }
 0x654   : > { %v6460_v8 = vsel %vm6458_vm15, %v9162_v4, -inf }
 0x655   : > { %v6461_v15 = vmax.f32 %v6459_v7, %v6460_v8  ;;  %9163 = vtanh.f32 %v11030_v63 }
 0x657   : > { %v6462_v10 = vrot.slane %v6461_v15, 4 }
 0x659   : > { %v6463_v17 = vmax.f32 %v6461_v15, %v6462_v10 }
 0x65a   : > { %v6403_v20 = vpop.f32.mrf.mxu1 }
 0x65b   : > { %v6464_v24 = vrot.slane %v6463_v17, 2  ;;  %v11035_v26 = vadd.f32 %v11012_v59, %v6403_v20  ;;  %v9164_v14 = vpop.eup %9163 }
 0x65c   : > { %v6468_v30 = vsel %vm6458_vm15, %v9164_v14, -inf }
 0x65d   : > { %v6465_v9 = vmax.f32 %v6463_v17, %v6464_v24  ;;  %9165 = vtanh.f32 %v11035_v26 }
 0x65f   : > { %v6466_v27 = vrot.slane %v6465_v9, 1 }
 0x661   : > { %v6467_v28 = vmax.f32 %v6465_v9, %v6466_v27 }
 0x662   : > { %v6406_v29 = vpop.f32.mrf.mxu1 }
 0x663   : > { %v9166_v16 = vpop.eup %9165  ;;  %v6532_v19 = vsub.f32 %v9162_v4, %v6467_v28  ;;  %v11042_v34 = vadd.f32 %v11012_v59, %v6406_v29 }
 0x664   : > { %v6469_v18 = vsel %vm6458_vm15, %v9166_v16, -inf }
 0x665   : > { %v6470_v36 = vmax.f32 %v6468_v30, %v6469_v18  ;;  %v6549_v38 = vmul.f32 1.442695, %v6532_v19 }
 0x667   : > { %v6471_v23 = vrot.slane %v6470_v36, 4 }
 0x669   : > { %v6472_v35 = vmax.f32 %v6470_v36, %v6471_v23 }
 0x66a   : > { %v6409_v37 = vpop.f32.mrf.mxu1 }
 0x66b   : > { %v6473_v39 = vrot.slane %v6472_v35, 2  ;;  %v11046_v41 = vadd.f32 %v11012_v59, %v6409_v37 }
 0x66d   : > { %v6474_v43 = vmax.f32 %v6472_v35, %v6473_v39 }
 0x66f   : > { %v6475_v44 = vrot.slane %v6474_v43, 1 }
 0x671   : > { %v6476_v45 = vmax.f32 %v6474_v43, %v6475_v44 }
 0x672   : > { %v6412_v46 = vpop.f32.mrf.mxu1 }
 0x673   : > { %v6533_v31 = vsub.f32 %v9164_v14, %v6476_v45  ;;  %v6534_v48 = vsub.f32 %v9166_v16, %v6476_v45 }
 0x675   : > { %v6551_v52 = vmul.f32 1.442695, %v6533_v31  ;;  %v6553_v53 = vmul.f32 1.442695, %v6534_v48 }
 0x679   : > { %v6288_v55 = vpop.f32.mrf.mxu3 }
 0x67a   : > { %v6289_v56 = vadd.f32 %v10966_v40, %v6288_v55  ;;  %v11054_v55 = vadd.f32 %v11012_v59, %v6412_v46 }
 0x67c   : > { %v6312_v58 = vmax.f32 %v6289_v56, 0.0 }
 0x67e   : > { %7072 = vmatmul.msk.f32.gmra.mxu2 %vm6328_vm14, %v6312_v58 }
 0x681   : > { %v6291_v61 = vpop.f32.mrf.mxu3 }
 0x682   : > { %v6292_v11 = vadd.f32 %v10966_v40, %v6291_v61 }
 0x684   : > { %v6313_v22 = vmax.f32 %v6292_v11, 0.0  ;;  %v6415_v11 = vpop.f32.mrf.mxu1 }
 0x686   : > { %7073 = vmatmul.msk.f32.gmra.mxu2 %vm6328_vm14, %v6313_v22  ;;  %v11060_v22 = vadd.f32 %v11012_v59, %v6415_v11 }
 0x688   : > { %v6418_v4 = vpop.f32.mrf.mxu2 }
 0x689   : > { %v6294_v32 = vpop.f32.mrf.mxu3 }
 0x68a   : > { %v6295_v2 = vadd.f32 %v10966_v40, %v6294_v32 }
 0x68c   : > { %v6314_v6 = vmax.f32 %v6295_v2, 0.0 }
 0x68e   : > { %7074 = vmatmul.msk.f32.gmra.mxu2 %vm6328_vm14, %v6314_v6 }
 0x690   : > { %v6421_v19 = vpop.f32.mrf.mxu2 }
 0x691   : > { %v6297_v12 = vpop.f32.mrf.mxu3  ;;  %v11073_v35 = vadd.f32 %v11012_v59, %v6421_v19 }
 0x692   : > { %v6298_v13 = vadd.f32 %v10966_v40, %v6297_v12  ;;  %v6531_v40 = vsub.f32 %v9160_v1, %v6467_v28 }
 0x694   : > { %v6315_v21 = vmax.f32 %v6298_v13, 0.0  ;;  %v6547_v33 = vmul.f32 1.442695, %v6531_v40 }
 0x696   : > { %7075 = vmatmul.msk.f32.gmra.mxu2 %vm6328_vm14, %v6315_v21  ;;  %9167 = vpow2.f32 %v6547_v33  ;;  %v11067_v21 = vadd.f32 %v11012_v59, %v6418_v4 }
 0x697   : > { %9169 = vtanh.f32 %v11042_v34 }
 0x698   : > { %9171 = vtanh.f32 %v11046_v41 }
 0x699   : > { %9173 = vpow2.f32 %v6549_v38 }
 0x69a   : > { %9175 = vpow2.f32 %v6551_v52 }
 0x69b   : > { %9177 = vpow2.f32 %v6553_v53 }
 0x69c   : > { %v9168_v42 = vpop.eup %9167  ;;  %9179 = vtanh.f32 %v11054_v55 }
 0x69d   : > { %6595 = vrot.lane.b32.xlu2 %v9168_v42, %s9248_s12  ;;  %v9170_v25 = vpop.eup %9169  ;;  %v6732_v56 = vsel %vm6458_vm15, %v9168_v42, 0.0  ;;  %9181 = vtanh.f32 %v11060_v22 }
 0x69e   : > { %v9172_v47 = vpop.eup %9171  ;;  %v6477_v49 = vsel %vm6458_vm15, %v9170_v25, -inf  ;;  %9183 = vtanh.f32 %v11067_v21 }
 0x69f   : > { %v6478_v50 = vsel %vm6458_vm15, %v9172_v47, -inf  ;;  %v9174_v51 = vpop.eup %9173 }
 0x6a0   : > { %v6479_v54 = vmax.f32 %v6477_v49, %v6478_v50  ;;  %v6733_v57 = vsel %vm6458_vm15, %v9174_v51, 0.0  ;;  %v9176_v1 = vpop.eup %9175 }
 0x6a1   : > { %v6734_v61 = vadd.f32 %v6733_v57, %v6732_v56  ;;  %v9178_v6 = vpop.eup %9177  ;;  %6599 = vrot.lane.b32.xlu0 %v9176_v1, %s9248_s12  ;;  %v6741_v7 = vsel %vm6458_vm15, %v9176_v1, 0.0 }
 0x6a2   : > { %v6480_v5 = vrot.slane %v6479_v54, 4  ;;  %v6742_v10 = vsel %vm6458_vm15, %v9178_v6, 0.0  ;;  %v9180_v13 = vpop.eup %9179 }
 0x6a3   : > { %v6735_v32 = vrot.slane %v6734_v61, 4  ;;  %v6743_v12 = vadd.f32 %v6742_v10, %v6741_v7  ;;  %v9182_v9 = vpop.eup %9181  ;;  %v6486_v29 = vsel %vm6458_vm15, %v9180_v13, -inf }
 0x6a4   : > { %v6481_v58 = vmax.f32 %v6479_v54, %v6480_v5  ;;  %v6487_v16 = vsel %vm6458_vm15, %v9182_v9, -inf  ;;  %v9184_v44 = vpop.eup %9183 }
 0x6a5   : > { %6597 = vrot.lane.b32.xlu2 %v9174_v51, %s9248_s12  ;;  %v6736_v3 = vadd.f32 %v6735_v32, %v6734_v61  ;;  %v6744_v24 = vrot.slane %v6743_v12, 4  ;;  %v6488_v33 = vmax.f32 %v6486_v29, %v6487_v16  ;;  %v6495_v52 = vsel %vm6458_vm15, %v9184_v44, -inf }
 0x6a6   : > { %v6482_v0 = vrot.slane %v6481_v58, 2 }
 0x6a7   : > { %v6737_v15 = vrot.slane %v6736_v3, 2  ;;  %v6745_v40 = vadd.f32 %v6744_v24, %v6743_v12  ;;  %v6489_v37 = vrot.slane %v6488_v33, 4 }
 0x6a8   : > { %v6483_v2 = vmax.f32 %v6481_v58, %v6482_v0 }
 0x6a9   : > { %v6738_v20 = vadd.f32 %v6737_v15, %v6736_v3  ;;  %v6746_v23 = vrot.slane %v6745_v40, 2  ;;  %v6490_v39 = vmax.f32 %v6488_v33, %v6489_v37 }
 0x6aa   : > { %v6484_v8 = vrot.slane %v6483_v2, 1 }
 0x6ab   : > { %v6739_v28 = vrot.slane %v6738_v20, 1  ;;  %v6747_v38 = vadd.f32 %v6746_v23, %v6745_v40  ;;  %v6491_v43 = vrot.slane %v6490_v39, 2 }
 0x6ac   : > { %v6485_v17 = vmax.f32 %v6483_v2, %v6484_v8 }
 0x6ad   : > { %v6740_v36 = vadd.f32 %v6739_v28, %v6738_v20  ;;  %v6748_v42 = vrot.slane %v6747_v38, 1  ;;  %v6492_v46 = vmax.f32 %v6490_v39, %v6491_v43 }
 0x6ae   : > { %v6535_v27 = vsub.f32 %v9170_v25, %v6485_v17  ;;  %v6536_v14 = vsub.f32 %v9172_v47, %v6485_v17  ;;  %v6424_v47 = vpop.f32.mrf.mxu2 }
 0x6af   : > { %6812 = vrot.lane.b32.xlu1 %v6740_v36, %s9248_s12  ;;  %v6749_v25 = vadd.f32 %v6748_v42, %v6747_v38  ;;  %v6493_v50 = vrot.slane %v6492_v46, 1  ;;  %v11084_v61 = vadd.f32 %v11012_v59, %v6424_v47 }
 0x6b0   : > { %v6555_v30 = vmul.f32 1.442695, %v6535_v27  ;;  %v6557_v18 = vmul.f32 1.442695, %v6536_v14 }
 0x6b1   : > { %6814 = vrot.lane.b32.xlu2 %v6749_v25, %s9248_s12  ;;  %v6494_v56 = vmax.f32 %v6492_v46, %v6493_v50 }
 0x6b2   : > { %9185 = vpow2.f32 %v6555_v30 }
 0x6b3   : > { %9187 = vpow2.f32 %v6557_v18  ;;  %v6537_v1 = vsub.f32 %v9180_v13, %v6494_v56  ;;  %v6538_v4 = vsub.f32 %v9182_v9, %v6494_v56 }
 0x6b4   : > { %9189 = vtanh.f32 %v11073_v35 }
 0x6b5   : > { %9191 = vtanh.f32 %v11084_v61  ;;  %v6559_v15 = vmul.f32 1.442695, %v6537_v1  ;;  %v6561_v12 = vmul.f32 1.442695, %v6538_v4 }
 0x6b6   : > { %v6427_v32 = vpop.f32.mrf.mxu2 }
 0x6b7   : > { %6601 = vrot.lane.b32.xlu1 %v9178_v6, %s9248_s12  ;;  %v11088_v3 = vadd.f32 %v11012_v59, %v6427_v32 }
 0x6b8   : > { %v9186_v45 = vpop.eup %9185 }
 0x6b9   : > { %v9188_v31 = vpop.eup %9187  ;;  %v6750_v48 = vsel %vm6458_vm15, %v9186_v45, 0.0  ;;  %6603 = vrot.lane.b32.xlu2 %v9186_v45, %s9248_s12  ;;  %9193 = vtanh.f32 %v11088_v3 }
 0x6ba   : > { %v9190_v49 = vpop.eup %9189  ;;  %v6751_v51 = vsel %vm6458_vm15, %v9188_v31, 0.0  ;;  %9195 = vpow2.f32 %v6559_v15 }
 0x6bb   : > { %v6496_v53 = vsel %vm6458_vm15, %v9190_v49, -inf  ;;  %v6752_v54 = vadd.f32 %v6751_v51, %v6750_v48  ;;  %v9192_v13 = vpop.eup %9191  ;;  %9197 = vpow2.f32 %v6561_v12 }
 0x6bc   : > { %v6497_v5 = vmax.f32 %v6495_v52, %v6496_v53  ;;  %v6504_v28 = vsel %vm6458_vm15, %v9192_v13, -inf }
 0x6bd   : > { %v6753_v57 = vrot.slane %v6752_v54, 4 }
 0x6be   : > { %v6498_v58 = vrot.slane %v6497_v5, 4 }
 0x6bf   : > { %v6754_v11 = vadd.f32 %v6753_v57, %v6752_v54  ;;  %v9194_v9 = vpop.eup %9193 }
 0x6c0   : > { %v6499_v0 = vmax.f32 %v6497_v5, %v6498_v58  ;;  %v6505_v29 = vsel %vm6458_vm15, %v9194_v9, -inf  ;;  %v9196_v33 = vpop.eup %9195 }
 0x6c1   : > { %v6755_v2 = vrot.slane %v6754_v11, 2  ;;  %6605 = vrot.lane.b32.xlu2 %v9188_v31, %s9248_s12  ;;  %v6506_v30 = vmax.f32 %v6504_v28, %v6505_v29  ;;  %v9198_v36 = vpop.eup %9197  ;;  %v6759_v47 = vsel %vm6458_vm15, %v9196_v33, 0.0 }
 0x6c2   : > { %v6500_v6 = vrot.slane %v6499_v0, 2  ;;  %v6760_v31 = vsel %vm6458_vm15, %v9198_v36, 0.0 }
 0x6c3   : > { %v6756_v7 = vadd.f32 %v6755_v2, %v6754_v11  ;;  %v6507_v18 = vrot.slane %v6506_v30, 4  ;;  %v6761_v48 = vadd.f32 %v6760_v31, %v6759_v47 }
 0x6c4   : > { %v6501_v8 = vmax.f32 %v6499_v0, %v6500_v6 }
 0x6c5   : > { %v6757_v10 = vrot.slane %v6756_v7, 1  ;;  %v6508_v19 = vmax.f32 %v6506_v30, %v6507_v18 }
 0x6c6   : > { %v6502_v17 = vrot.slane %v6501_v8, 1 }
 0x6c7   : > { %v6758_v20 = vadd.f32 %v6757_v10, %v6756_v7  ;;  %v6509_v23 = vrot.slane %v6508_v19, 2 }
 0x6c8   : > { %v6503_v24 = vmax.f32 %v6501_v8, %v6502_v17 }
 0x6c9   : > { %6816 = vrot.lane.b32.xlu1 %v6758_v20, %s9248_s12  ;;  %6609 = vrot.lane.b32.xlu2 %v9198_v36, %s9248_s12  ;;  %v6510_v37 = vmax.f32 %v6508_v19, %v6509_v23 }
 0x6ca   : > { %v6539_v27 = vsub.f32 %v9184_v44, %v6503_v24  ;;  %v6540_v14 = vsub.f32 %v9190_v49, %v6503_v24  ;;  %v6762_v49 = vrot.slane %v6761_v48, 4 }
 0x6cb   : > { %v6511_v42 = vrot.slane %v6510_v37, 1 }
 0x6cc   : > { %v6563_v16 = vmul.f32 1.442695, %v6539_v27  ;;  %v6565_v40 = vmul.f32 1.442695, %v6540_v14  ;;  %v6763_v50 = vadd.f32 %v6762_v49, %v6761_v48 }
 0x6cd   : > { %v6512_v43 = vmax.f32 %v6510_v37, %v6511_v42 }
 0x6ce   : > { %9199 = vpow2.f32 %v6563_v16  ;;  %v6764_v52 = vrot.slane %v6763_v50, 2 }
 0x6cf   : > { %9201 = vpow2.f32 %v6565_v40  ;;  %v6541_v44 = vsub.f32 %v9192_v13, %v6512_v43  ;;  %v6542_v25 = vsub.f32 %v9194_v9, %v6512_v43 }
 0x6d0   : > { %v6765_v54 = vadd.f32 %v6764_v52, %v6763_v50 }
 0x6d1   : > { %6607 = vrot.lane.b32.xlu1 %v9196_v33, %s9248_s12  ;;  %v6567_v45 = vmul.f32 1.442695, %v6541_v44  ;;  %v6569_v46 = vmul.f32 1.442695, %v6542_v25 }
 0x6d2   : > { %v6766_v5 = vrot.slane %v6765_v54, 1 }
 0x6d3   : > { %9203 = vpow2.f32 %v6567_v45 }
 0x6d4   : > { %v9200_v38 = vpop.eup %9199  ;;  %9205 = vpow2.f32 %v6569_v46  ;;  %v6767_v56 = vadd.f32 %v6766_v5, %v6765_v54 }
 0x6d5   : > { %v9202_v39 = vpop.eup %9201  ;;  %6611 = vrot.lane.b32.xlu2 %v9200_v38, %s9248_s12  ;;  %v6768_v10 = vsel %vm6458_vm15, %v9200_v38, 0.0 }
 0x6d6   : > { %6818 = vrot.lane.b32.xlu0 %v6767_v56, %s9248_s12  ;;  %v6769_v12 = vsel %vm6458_vm15, %v9202_v39, 0.0 }
 0x6d7   : > { %v6770_v24 = vadd.f32 %v6769_v12, %v6768_v10 }
 0x6d9   : > { %6613 = vrot.lane.b32.xlu1 %v9202_v39, %s9248_s12  ;;  %v9204_v51 = vpop.eup %9203  ;;  %v6771_v16 = vrot.slane %v6770_v24, 4 }
 0x6da   : > { %v9206_v53 = vpop.eup %9205  ;;  %v6777_v20 = vsel %vm6458_vm15, %v9204_v51, 0.0 }
 0x6db   : > { %v6778_v9 = vsel %vm6458_vm15, %v9206_v53, 0.0  ;;  %v6772_v18 = vadd.f32 %v6771_v16, %v6770_v24 }
 0x6dc   : > { %v6779_v14 = vadd.f32 %v6778_v9, %v6777_v20 }
 0x6dd   : > { %6615 = vrot.lane.b32.xlu2 %v9204_v51, %s9248_s12  ;;  %v6773_v19 = vrot.slane %v6772_v18, 2 }
 0x6de   : > { %v6780_v40 = vrot.slane %v6779_v14, 4 }
 0x6df   : > { %v6774_v42 = vadd.f32 %v6773_v19, %v6772_v18 }
 0x6e0   : > { %v6781_v33 = vadd.f32 %v6780_v40, %v6779_v14 }
 0x6e1   : > { %6617 = vrot.lane.b32.xlu1 %v9206_v53, %s9248_s12  ;;  %v6775_v45 = vrot.slane %v6774_v42, 1 }
 0x6e2   : > { %v6782_v37 = vrot.slane %v6781_v33, 2 }
 0x6e3   : > { %v6776_v52 = vadd.f32 %v6775_v45, %v6774_v42 }
 0x6e4   : > { %v6783_v46 = vadd.f32 %v6782_v37, %v6781_v33 }
 0x6e5   : > { %6820 = vrot.lane.b32.xlu0 %v6776_v52, %s9248_s12 }
 0x6e6   : > { %v6784_v54 = vrot.slane %v6783_v46, 1 }
 0x6f7   : > { %v6596_v17 = vpop.permute.xlu2 %6595 }
 0x6f8   : > { %v6643_v48 = vmul.f32 %v6596_v17, %v11016_v60 }
 0x6fa   : > { %v6660_v56 = vsel %vm6659_vm0, %v6643_v48, 0.0 }
 0x6ff   : > { %v6598_v23 = vpop.permute.xlu2 %6597 }
 0x700   : > { %v6644_v43 = vmul.f32 %v6598_v23, %v11021_v62 }
 0x701   : > { %v6430_v57 = vpop.f32.mrf.mxu2 }
 0x702   : > { %v11106_v58 = vadd.f32 %v11012_v59, %v6430_v57  ;;  %v6661_v62 = vsel %vm6659_vm0, %v6644_v43, 0.0 }
 0x703   : > { %v6662_v57 = vadd.f32 %v6661_v62, %v6660_v56 }
 0x704   : > { %9207 = vtanh.f32 %v11106_v58 }
 0x709   : > { %v6433_v11 = vpop.f32.mrf.mxu2 }
 0x70a   : > { %v11110_v0 = vadd.f32 %v11012_v59, %v6433_v11  ;;  %v9208_v32 = vpop.eup %9207 }
 0x70b   : > { %v6513_v4 = vsel %vm6458_vm15, %v9208_v32, -inf }
 0x70c   : > { %9209 = vtanh.f32 %v11110_v0 }
 0x711   : > { %v6436_v1 = vpop.f32.mrf.mxu2 }
 0x712   : > { %v9210_v2 = vpop.eup %9209  ;;  %v11116_v15 = vadd.f32 %v11012_v59, %v6436_v1 }
 0x713   : > { %v6514_v6 = vsel %vm6458_vm15, %v9210_v2, -inf }
 0x714   : > { %v6515_v7 = vmax.f32 %v6513_v4, %v6514_v6  ;;  %9211 = vtanh.f32 %v11116_v15  ;;  %v6663_v4 = vrot.slane %v6662_v57, 4 }
 0x716   : > { %v6516_v8 = vrot.slane %v6515_v7, 4  ;;  %v6664_v17 = vadd.f32 %v6663_v4, %v6662_v57  ;;  %v11147_v57 = vpop.permute.xlu2 %6814 }
 0x717   : > { %vm6856_vm13 = vweird.f32 %v11147_v57 }
 0x718   : > { %v6517_v13 = vmax.f32 %v6515_v7, %v6516_v8  ;;  %v6665_v16 = vrot.slane %v6664_v17, 2 }
 0x719   : > { %v6439_v27 = vpop.f32.mrf.mxu2 }
 0x71a   : > { %v6518_v28 = vrot.slane %v6517_v13, 2  ;;  %v11124_v29 = vadd.f32 %v11012_v59, %v6439_v27  ;;  %v9212_v38 = vpop.eup %9211  ;;  %v6666_v33 = vadd.f32 %v6665_v16, %v6664_v17 }
 0x71b   : > { %v6522_v47 = vsel %vm6458_vm15, %v9212_v38, -inf }
 0x71c   : > { %v6519_v30 = vmax.f32 %v6517_v13, %v6518_v28  ;;  %9213 = vtanh.f32 %v11124_v29 }
 0x71e   : > { %v6520_v36 = vrot.slane %v6519_v30, 1 }
 0x720   : > { %v6521_v39 = vmax.f32 %v6519_v30, %v6520_v36 }
 0x721   : > { %v6813_v9 = vpop.permute.xlu1 %6812 }
 0x722   : > { %v9214_v44 = vpop.eup %9213  ;;  %v6543_v25 = vsub.f32 %v9208_v32, %v6521_v39  ;;  %v6544_v59 = vsub.f32 %v9210_v2, %v6521_v39  ;;  %v6785_v32 = vadd.f32 %v6784_v54, %v6783_v46  ;;  %v6847_v43 = vand.u32 2147483648, %v6813_v9 }
 0x723   : > { %v6523_v31 = vsel %vm6458_vm15, %v9214_v44, -inf  ;;  %vm6841_vm2 = vweird.f32 %v6813_v9 }
 0x724   : > { %v6571_v49 = vmul.f32 1.442695, %v6543_v25  ;;  %v6573_v50 = vmul.f32 1.442695, %v6544_v59  ;;  %v6524_v51 = vmax.f32 %v6522_v47, %v6523_v31  ;;  %6822 = vrot.lane.b32.xlu0 %v6785_v32, %s9248_s12  ;;  %v6845_v59 = vand.u32 2147483647, %v6813_v9 }
 0x725   : > { %v6848_v31 = vor.u32 1.1754944e-38, %v6847_v43 }
 0x726   : > { %9215 = vpow2.f32 %v6571_v49  ;;  %v6525_v53 = vrot.slane %v6524_v51, 4  ;;  %vm6846_vm4 = vcmp.eq.f32.partialorder %v6845_v59, 8.507059e+37 }
 0x727   : > { %9217 = vpow2.f32 %v6573_v50 }
 0x728   : > { %v6526_v5 = vmax.f32 %v6524_v51, %v6525_v53  ;;  %9219 = vrcp.f32 %v6813_v9 }
 0x729   : > { %v6602_v32 = vpop.permute.xlu1 %6601 }
 0x72a   : > { %v6527_v11 = vrot.slane %v6526_v5, 2 }
 0x72c   : > { %v9216_v60 = vpop.eup %9215  ;;  %v6528_v1 = vmax.f32 %v6526_v5, %v6527_v11  ;;  %v6604_v11 = vpop.permute.xlu2 %6603 }
 0x72d   : > { %v9218_v2 = vpop.eup %9217  ;;  %6619 = vrot.lane.b32.xlu2 %v9216_v60, %s9248_s12  ;;  %v6786_v6 = vsel %vm6458_vm15, %v9216_v60, 0.0 }
 0x72e   : > { %v6529_v7 = vrot.slane %v6528_v1, 1  ;;  %6621 = vrot.lane.b32.xlu1 %v9218_v2, %s9248_s12  ;;  %v6787_v8 = vsel %vm6458_vm15, %v9218_v2, 0.0  ;;  %v9220_v18 = vpop.eup %9219  ;;  %v6600_v2 = vpop.permute.xlu0 %6599 }
 0x72f   : > { %v6788_v10 = vadd.f32 %v6787_v8, %v6786_v6  ;;  %v6837_v19 = vmul.f32 %v9220_v18, %v6813_v9  ;;  %vm6842_vm1 = vweird.f32 %v9220_v18  ;;  %v6647_v8 = vmul.f32 %v6604_v11, %v11042_v34 }
 0x730   : > { %v6530_v12 = vmax.f32 %v6528_v1, %v6529_v7  ;;  %vm6843_vm3 = vmor %vm6841_vm2, %vm6842_vm1  ;;  %v6645_v9 = vmul.f32 %v6600_v2, %v11030_v63 }
 0x731   : > { %v6789_v20 = vrot.slane %v6788_v10, 4  ;;  %v6838_v39 = vsub.f32 1.0, %v6837_v19 }
 0x732   : > { %v6545_v13 = vsub.f32 %v9212_v38, %v6530_v12  ;;  %v6546_v24 = vsub.f32 %v9214_v44, %v6530_v12  ;;  %v6667_v38 = vrot.slane %v6666_v33, 1 }
 0x733   : > { %v6790_v27 = vadd.f32 %v6789_v20, %v6788_v10  ;;  %v6839_v25 = vmul.f32 %v9220_v18, %v6838_v39  ;;  %v6646_v20 = vmul.f32 %v6602_v32, %v11035_v26 }
 0x734   : > { %v6575_v14 = vmul.f32 1.442695, %v6545_v13  ;;  %v6577_v28 = vmul.f32 1.442695, %v6546_v24  ;;  %v6668_v49 = vadd.f32 %v6667_v38, %v6666_v33  ;;  %v6606_v60 = vpop.permute.xlu2 %6605  ;;  %v6678_v24 = vsel %vm6659_vm0, %v6647_v8, 0.0 }
 0x735   : > { %v6791_v40 = vrot.slane %v6790_v27, 2  ;;  %v6840_v47 = vadd.f32 %v9220_v18, %v6839_v25  ;;  %v6648_v7 = vmul.f32 %v6606_v60, %v11046_v41  ;;  %v6670_v41 = vsel %vm6659_vm0, %v6646_v20, 0.0 }
 0x736   : > { %9221 = vpow2.f32 %v6575_v14  ;;  %v6860_v60 = vand.u32 2147483647, %v11147_v57 }
 0x737   : > { %9223 = vpow2.f32 %v6577_v28  ;;  %v6792_v30 = vadd.f32 %v6791_v40, %v6790_v27  ;;  %v6844_v50 = vsel %vm6843_vm3, %v9220_v18, %v6840_v47  ;;  %v6679_v17 = vsel %vm6659_vm0, %v6648_v7, 0.0 }
 0x738   : > { %v6849_v51 = vsel %vm6846_vm4, %v6848_v31, %v6844_v50  ;;  %9225 = vrcp.f32 %v11147_v57  ;;  %v6680_v27 = vadd.f32 %v6679_v17, %v6678_v24  ;;  %v6669_v28 = vsel %vm6659_vm0, %v6645_v9, 0.0 }
 0x739   : > { %v6793_v36 = vrot.slane %v6792_v30, 1  ;;  %v11144_v53 = vmul.f32 %v6849_v51, %v6668_v49  ;;  %v6671_v40 = vadd.f32 %v6670_v41, %v6669_v28  ;;  %v6862_v49 = vand.u32 2147483648, %v11147_v57 }
 0x73a   : > { %v6681_v16 = vrot.slane %v6680_v27, 4  ;;  %vm6861_vm1 = vcmp.eq.f32.partialorder %v6860_v60, 8.507059e+37 }
 0x73b   : > { %v6794_v23 = vadd.f32 %v6793_v36, %v6792_v30  ;;  %v11149_v1 = vpop.permute.xlu1 %6816 }
 0x73c   : > { %v9222_v37 = vpop.eup %9221  ;;  %v6610_v4 = vpop.permute.xlu2 %6609  ;;  %9227 = vrcp.f32 %v11149_v1  ;;  %v6682_v19 = vadd.f32 %v6681_v16, %v6680_v27  ;;  %vm6871_vm3 = vweird.f32 %v11149_v1 }
 0x73d   : > { %v9224_v42 = vpop.eup %9223  ;;  %6824 = vrot.lane.b32.xlu0 %v6794_v23, %s9248_s12  ;;  %6623 = vrot.lane.b32.xlu2 %v9222_v37, %s9248_s12  ;;  %v6795_v44 = vsel %vm6458_vm15, %v9222_v37, 0.0  ;;  %v6672_v23 = vrot.slane %v6671_v40, 4  ;;  %v6650_v37 = vmul.f32 %v6610_v4, %v11060_v22 }
 0x73e   : > { %6625 = vrot.lane.b32.xlu1 %v9224_v42, %s9248_s12  ;;  %v6796_v45 = vsel %vm6458_vm15, %v9224_v42, 0.0  ;;  %v11160_v14 = vpop.eup %9225 }
 0x73f   : > { %v6797_v46 = vadd.f32 %v6796_v45, %v6795_v44  ;;  %v6852_v34 = vmul.f32 %v11160_v14, %v11147_v57  ;;  %v6673_v25 = vadd.f32 %v6672_v23, %v6671_v40  ;;  %v6688_v45 = vsel %vm6659_vm0, %v6650_v37, 0.0 }
 0x740   : > { %vm6857_vm5 = vweird.f32 %v11160_v14 }
 0x741   : > { %v6798_v48 = vrot.slane %v6797_v46, 4  ;;  %v6853_v36 = vsub.f32 1.0, %v6852_v34  ;;  %vm11204_vm14 = vmor %vm6856_vm13, %vm6857_vm5 }
 0x742   : > { %v11173_v42 = vpop.eup %9227 }
 0x743   : > { %v6799_v52 = vadd.f32 %v6798_v48, %v6797_v46  ;;  %v6608_v6 = vpop.permute.xlu1 %6607  ;;  %v6854_v44 = vmul.f32 %v11160_v14, %v6853_v36  ;;  %vm6872_vm2 = vweird.f32 %v11173_v42 }
 0x744   : > { %v6612_v10 = vpop.permute.xlu2 %6611  ;;  %v6649_v63 = vmul.f32 %v6608_v6, %v11054_v55  ;;  %v6683_v55 = vrot.slane %v6682_v19, 2  ;;  %v6863_v6 = vor.u32 1.1754944e-38, %v6862_v49  ;;  %vm11238_vm4 = vmor %vm6871_vm3, %vm6872_vm2 }
 0x745   : > { %v6800_v62 = vrot.slane %v6799_v52, 2  ;;  %v6651_v39 = vmul.f32 %v6612_v10, %v11067_v21  ;;  %v6867_v21 = vmul.f32 %v11173_v42, %v11149_v1 }
 0x746   : > { %v6687_v38 = vsel %vm6659_vm0, %v6649_v63, 0.0 }
 0x747   : > { %v6801_v54 = vadd.f32 %v6800_v62, %v6799_v52  ;;  %v6696_v22 = vsel %vm6659_vm0, %v6651_v39, 0.0  ;;  %v6689_v31 = vadd.f32 %v6688_v45, %v6687_v38  ;;  %v6674_v52 = vrot.slane %v6673_v25, 2 }
 0x748   : > { %v11154_v12 = vpop.permute.xlu0 %6818 }
 0x749   : > { %v6802_v5 = vrot.slane %v6801_v54, 1  ;;  %9229 = vrcp.f32 %v11154_v12  ;;  %v6690_v11 = vrot.slane %v6689_v31, 4  ;;  %v6675_v7 = vadd.f32 %v6674_v52, %v6673_v25 }
 0x74a   : > { %v6890_v52 = vand.u32 2147483647, %v11154_v12  ;;  %vm6886_vm13 = vweird.f32 %v11154_v12 }
 0x74b   : > { %v6803_v56 = vadd.f32 %v6802_v5, %v6801_v54  ;;  %v6614_v13 = vpop.permute.xlu1 %6613  ;;  %v6684_v54 = vadd.f32 %v6683_v55, %v6682_v19  ;;  %v6868_v5 = vsub.f32 1.0, %v6867_v21  ;;  %v6691_v41 = vadd.f32 %v6690_v11, %v6689_v31 }
 0x74c   : > { %v6616_v26 = vpop.permute.xlu2 %6615  ;;  %v6652_v33 = vmul.f32 %v6614_v13, %v11073_v35  ;;  %v6676_v63 = vrot.slane %v6675_v7, 1 }
 0x74d   : > { %6826 = vrot.lane.b32.xlu0 %v6803_v56, %s9248_s12  ;;  %v6653_v50 = vmul.f32 %v6616_v26, %v11084_v61  ;;  %v6685_v13 = vrot.slane %v6684_v54, 1  ;;  %v6869_v24 = vmul.f32 %v11173_v42, %v6868_v5 }
 0x74e   : > { %v6697_v43 = vsel %vm6659_vm0, %v6652_v33, 0.0 }
 0x74f   : > { %v6698_v48 = vadd.f32 %v6697_v43, %v6696_v22  ;;  %v11189_v51 = vpop.eup %9229  ;;  %v6705_v2 = vsel %vm6659_vm0, %v6653_v50, 0.0  ;;  %v6870_v19 = vadd.f32 %v11173_v42, %v6869_v24  ;;  %v11230_v37 = vadd.f32 %v6685_v13, %v6684_v54 }
 0x750   : > { %v6882_v4 = vmul.f32 %v11189_v51, %v11154_v12  ;;  %v6877_v43 = vand.u32 2147483648, %v11149_v1 }
 0x751   : > { %v6699_v32 = vrot.slane %v6698_v48, 4  ;;  %v6874_v31 = vsel %vm11238_vm4, %v11173_v42, %v6870_v19 }
 0x752   : > { %v6883_v40 = vsub.f32 1.0, %v6882_v4  ;;  %v6878_v11 = vor.u32 1.1754944e-38, %v6877_v43 }
 0x753   : > { %v6618_v18 = vpop.permute.xlu1 %6617  ;;  %v6700_v28 = vadd.f32 %v6699_v32, %v6698_v48  ;;  %v6875_v48 = vand.u32 2147483647, %v11149_v1 }
 0x754   : > { %v6654_v46 = vmul.f32 %v6618_v18, %v11088_v3  ;;  %v6855_v3 = vadd.f32 %v11160_v14, %v6854_v44  ;;  %v6884_v44 = vmul.f32 %v11189_v51, %v6883_v40 }
 0x755   : > { %v6701_v39 = vrot.slane %v6700_v28, 2  ;;  %vm6876_vm5 = vcmp.eq.f32.partialorder %v6875_v48, 8.507059e+37 }
 0x756   : > { %v6706_v56 = vsel %vm6659_vm0, %v6654_v46, 0.0  ;;  %v6859_v20 = vsel %vm11204_vm14, %v11160_v14, %v6855_v3  ;;  %v6885_v54 = vadd.f32 %v11189_v51, %v6884_v44 }
 0x757   : > { %v11167_v30 = vpop.permute.xlu0 %6820  ;;  %v6707_v8 = vadd.f32 %v6706_v56, %v6705_v2  ;;  %v6864_v14 = vsel %vm6861_vm1, %v6863_v6, %v6859_v20  ;;  %v11250_v3 = vadd.f32 %v6701_v39, %v6700_v28  ;;  %v6879_v2 = vsel %vm6876_vm5, %v6878_v11, %v6874_v31 }
 0x758   : > { %9231 = vrcp.f32 %v11167_v30  ;;  %vm11263_vm1 = vcmp.eq.f32.partialorder %v6890_v52, 8.507059e+37  ;;  %vm6901_vm4 = vweird.f32 %v11167_v30 }
 0x759   : > { %v6708_v36 = vrot.slane %v6707_v8, 4 }
 0x75b   : > { %v6709_v22 = vadd.f32 %v6708_v36, %v6707_v8 }
 0x75d   : > { %v6710_v42 = vrot.slane %v6709_v22, 2 }
 0x75e   : > { %v11211_v57 = vpop.eup %9231 }
 0x75f   : > { %v6897_v33 = vmul.f32 %v11211_v57, %v11167_v30  ;;  %vm6902_vm2 = vweird.f32 %v11211_v57  ;;  %v6711_v13 = vadd.f32 %v6710_v42, %v6709_v22  ;;  %v6880_v22 = vmul.f32 %v6879_v2, %v11230_v37 }
 0x760   : > { %vm11284_vm5 = vmor %vm6901_vm4, %vm6902_vm2 }
 0x761   : > { %v6898_v45 = vsub.f32 1.0, %v6897_v33  ;;  %v6966_v37 = vrot.slane %v6880_v22, 6 }
 0x763   : > { %v6899_v32 = vmul.f32 %v11211_v57, %v6898_v45 }
 0x765   : > { %v6900_v20 = vadd.f32 %v11211_v57, %v6899_v32 }
 0x787   : > { %v6620_v35 = vpop.permute.xlu2 %6619 }
 0x788   : > { %v6655_v61 = vmul.f32 %v6620_v35, %v11106_v58 }
 0x78a   : > { %v6714_v34 = vsel %vm6659_vm0, %v6655_v61, 0.0 }
 0x796   : > { %v11179_v59 = vpop.permute.xlu0 %6822 }
 0x797   : > { %9233 = vrcp.f32 %v11179_v59  ;;  %v6624_v10 = vpop.permute.xlu2 %6623  ;;  %v6920_v40 = vand.u32 2147483647, %v11179_v59 }
 0x798   : > { %v6657_v26 = vmul.f32 %v6624_v10, %v11116_v15  ;;  %v6692_v15 = vrot.slane %v6691_v41, 2 }
 0x79a   : > { %v6723_v55 = vsel %vm6659_vm0, %v6657_v26, 0.0  ;;  %v6693_v50 = vadd.f32 %v6692_v15, %v6691_v41  ;;  %v6907_v41 = vand.u32 2147483648, %v11167_v30 }
 0x79c   : > { %v6694_v4 = vrot.slane %v6693_v50, 1  ;;  %v6908_v19 = vor.u32 1.1754944e-38, %v6907_v41 }
 0x79d   : > { %v11218_v27 = vpop.eup %9233 }
 0x79e   : > { %v6912_v23 = vmul.f32 %v11218_v27, %v11179_v59  ;;  %vm6917_vm3 = vweird.f32 %v11218_v27 }
 0x7a0   : > { %v6622_v47 = vpop.permute.xlu1 %6621  ;;  %v6913_v49 = vsub.f32 1.0, %v6912_v23 }
 0x7a1   : > { %v6656_v62 = vmul.f32 %v6622_v47, %v11110_v0  ;;  %v6677_v47 = vadd.f32 %v6676_v63, %v6675_v7  ;;  %v6703_v7 = vrot.slane %v11250_v3, 1 }
 0x7a2   : > { %v6914_v60 = vmul.f32 %v11218_v27, %v6913_v49 }
 0x7a3   : > { %v6715_v58 = vsel %vm6659_vm0, %v6656_v62, 0.0  ;;  %v6892_v62 = vand.u32 2147483648, %v11154_v12  ;;  %v11255_v1 = vmul.f32 %v6864_v14, %v6677_v47  ;;  %v6904_v14 = vsel %vm11284_vm5, %v11211_v57, %v6900_v20 }
 0x7a4   : > { %v6716_v18 = vadd.f32 %v6715_v58, %v6714_v34  ;;  %v6915_v28 = vadd.f32 %v11218_v27, %v6914_v60  ;;  %v6922_v34 = vand.u32 2147483648, %v11179_v59 }
 0x7a5   : > { %v6893_v10 = vor.u32 1.1754944e-38, %v6892_v62  ;;  %v6964_v47 = vrot.slane %v11255_v1, 7 }
 0x7a6   : > { %v6717_v25 = vrot.slane %v6716_v18, 4  ;;  %v6923_v15 = vor.u32 1.1754944e-38, %v6922_v34 }
 0x7a7   : > { %v6965_v1 = vsel %vm5659_vm6, %v6964_v47, %v11144_v53 }
 0x7a8   : > { %v6718_v5 = vadd.f32 %v6717_v25, %v6716_v18  ;;  %v6967_v6 = vsel %vm5661_vm7, %v6966_v37, %v6965_v1 }
 0x7aa   : > { %v6719_v12 = vrot.slane %v6718_v5, 2 }
 0x7ac   : > { %v6720_v26 = vadd.f32 %v6719_v12, %v6718_v5 }
 0x7af   : > { %v11209_v17 = vpop.permute.xlu0 %6824 }
 0x7b0   : > { %9235 = vrcp.f32 %v11209_v17  ;;  %v6626_v9 = vpop.permute.xlu1 %6625  ;;  %v6937_v33 = vand.u32 2147483648, %v11209_v17  ;;  %vm6931_vm2 = vweird.f32 %v11209_v17  ;;  %v6935_v23 = vand.u32 2147483647, %v11209_v17 }
 0x7b1   : > { %v6658_v16 = vmul.f32 %v6626_v9, %v11124_v29 }
 0x7b3   : > { %v6724_v29 = vsel %vm6659_vm0, %v6658_v16, 0.0  ;;  %vm6887_vm0 = vweird.f32 %v11189_v51 }
 0x7b4   : > { %v6725_v46 = vadd.f32 %v6724_v29, %v6723_v55  ;;  %vm11259_vm14 = vmor %vm6886_vm13, %vm6887_vm0  ;;  %vm6916_vm0 = vweird.f32 %v11179_v59  ;;  %v6695_v29 = vadd.f32 %v6694_v4, %v6693_v50  ;;  %v6721_v55 = vrot.slane %v6720_v26, 1 }
 0x7b5   : > { %v6889_v8 = vsel %vm11259_vm14, %v11189_v51, %v6885_v54  ;;  %v6905_v51 = vand.u32 2147483647, %v11167_v30  ;;  %v6712_v30 = vrot.slane %v6711_v13, 1  ;;  %vm11294_vm14 = vmor %vm6916_vm0, %vm6917_vm3  ;;  %vm6921_vm0 = vcmp.eq.f32.partialorder %v6920_v40, 8.507059e+37 }
 0x7b6   : > { %v11233_v38 = vpop.eup %9235  ;;  %v6726_v61 = vrot.slane %v6725_v46, 4  ;;  %v6919_v59 = vsel %vm11294_vm14, %v11218_v27, %v6915_v28  ;;  %v6894_v57 = vsel %vm11263_vm1, %v6893_v10, %v6889_v8  ;;  %vm6936_vm1 = vcmp.eq.f32.partialorder %v6935_v23, 8.507059e+37 }
 0x7b7   : > { %v6927_v21 = vmul.f32 %v11233_v38, %v11209_v17  ;;  %vm6932_vm13 = vweird.f32 %v11233_v38  ;;  %vm6906_vm3 = vcmp.eq.f32.partialorder %v6905_v51, 8.507059e+37  ;;  %v6924_v25 = vsel %vm6921_vm0, %v6923_v15, %v6919_v59 }
 0x7b8   : > { %v6727_v24 = vadd.f32 %v6726_v61, %v6725_v46  ;;  %vm11306_vm4 = vmor %vm6931_vm2, %vm6932_vm13  ;;  %v6909_v44 = vsel %vm6906_vm3, %v6908_v19, %v6904_v14  ;;  %v6938_v17 = vor.u32 1.1754944e-38, %v6937_v33  ;;  %v6713_v46 = vadd.f32 %v6712_v30, %v6711_v13 }
 0x7b9   : > { %v6928_v56 = vsub.f32 1.0, %v6927_v21  ;;  %v6704_v21 = vadd.f32 %v6703_v7, %v11250_v3  ;;  %v6895_v31 = vmul.f32 %v6894_v57, %v6695_v29  ;;  %v6722_v52 = vadd.f32 %v6721_v55, %v6720_v26 }
 0x7ba   : > { %v6728_v36 = vrot.slane %v6727_v24, 2  ;;  %v6925_v62 = vmul.f32 %v6924_v25, %v6713_v46 }
 0x7bb   : > { %v6929_v58 = vmul.f32 %v11233_v38, %v6928_v56  ;;  %v6910_v50 = vmul.f32 %v6909_v44, %v6704_v21  ;;  %v6968_v3 = vrot.slane %v6895_v31, 5 }
 0x7bc   : > { %v6729_v35 = vadd.f32 %v6728_v36, %v6727_v24  ;;  %v6972_v4 = vrot.slane %v6925_v62, 3 }
 0x7bd   : > { %v6930_v18 = vadd.f32 %v11233_v38, %v6929_v58  ;;  %v6970_v42 = vrot.slane %v6910_v50, 4  ;;  %v6969_v10 = vsel %vm5663_vm8, %v6968_v3, %v6967_v6 }
 0x7be   : > { %v6730_v54 = vrot.slane %v6729_v35, 1 }
 0x7bf   : > { %v11274_v9 = vpop.permute.xlu0 %6826  ;;  %v6934_v27 = vsel %vm11306_vm4, %v11233_v38, %v6930_v18  ;;  %v6971_v12 = vsel %vm5665_vm9, %v6970_v42, %v6969_v10 }
 0x7c0   : > { %9237 = vrcp.f32 %v11274_v9  ;;  %v6939_v49 = vsel %vm6936_vm1, %v6938_v17, %v6934_v27  ;;  %v6952_v38 = vand.u32 2147483648, %v11274_v9  ;;  %v6950_v56 = vand.u32 2147483647, %v11274_v9 }
 0x7c1   : > { %v6940_v11 = vmul.f32 %v6939_v49, %v6722_v52  ;;  %vm6946_vm13 = vweird.f32 %v11274_v9  ;;  %v6731_v2 = vadd.f32 %v6730_v54, %v6729_v35  ;;  %v6973_v58 = vsel %vm5667_vm10, %v6972_v4, %v6971_v12 }
 0x7c2   : > { %v6953_v61 = vor.u32 1.1754944e-38, %v6952_v38  ;;  %vm6951_vm2 = vcmp.eq.f32.partialorder %v6950_v56, 8.507059e+37 }
 0x7c3   : > { %v6974_v7 = vrot.slane %v6940_v11, 2 }
 0x7c5   : > { %v6975_v53 = vsel %vm5669_vm11, %v6974_v7, %v6973_v58 }
 0x7c6   : > { %v9238_v43 = vpop.eup %9237 }
 0x7c7   : > { %v6942_v45 = vmul.f32 %v9238_v43, %v11274_v9  ;;  %vm6947_vm5 = vweird.f32 %v9238_v43 }
 0x7c8   : > { %vm6948_vm14 = vmor %vm6946_vm13, %vm6947_vm5 }
 0x7c9   : > { %v6943_v48 = vsub.f32 1.0, %v6942_v45 }
 0x7cb   : > { %v6944_v5 = vmul.f32 %v9238_v43, %v6943_v48 }
 0x7cd   : > { %v6945_v32 = vadd.f32 %v9238_v43, %v6944_v5 }
 0x7cf   : > { %v6949_v60 = vsel %vm6948_vm14, %v9238_v43, %v6945_v32 }
 0x7d0   : > { %v6954_v0 = vsel %vm6951_vm2, %v6953_v61, %v6949_v60 }
 0x7d1   : > { %v6955_v8 = vmul.f32 %v6954_v0, %v6731_v2 }
 0x7d3   : > { %v6976_v20 = vrot.slane %v6955_v8, 1 }
 0x7d5   : > { %v6977_v13 = vsel %vm5671_vm12, %v6976_v20, %v6975_v53 }
 0x7d6   : > { %6978 = vrot.lane.b32.xlu2 %v6977_v13, %s9249_s13 }
 0x830   : > { %v6979_v24 = vpop.permute.xlu2 %6978 }
 0x831   : > { %6981 = vst.msk [vmem:[%s255_s17] sm:$0xff] %vm6458_vm15, %v6979_v24 }
 0x832 PF: > { %s17_s23 = sadd.s32 1, %s9245_s23  }
 0x833   : > { %p14_p5 = scmp.ge.s32.totalorder %s17_s23, 4  }
 0x835   :  { %16 = sbr.rel (!%p14_p5) target bundleno = 2 (0x2), region = 74 }

</bundles_post_ra>
